<compile_context>
chip_gen: v7x
topology: tpu7x:2x2x1
jax: 0.10.0
libtpu: 0.0.40
codegen_flags: <defaults>
</compile_context>

<pallas_src>
import functools

import jax
import jax.numpy as jnp
from jax import lax
from jax.experimental import pallas as pl
from jax.experimental.pallas import tpu as pltpu

_BN_EPS = 1e-3
_VMEM_LIMIT = 48 * 1024 * 1024   # explicit cap; leaves headroom on v7x's 64 MiB VMEM
_BAND_ALIGN = 128                # lane-aligned band stride of the kw-folded activation


def _round_up(x, m):
    return (x + m - 1) // m * m


def _pick_batch_tile(n, h, w):
    """Smallest divisor of n whose batch block gives MXU M = bt*h*w >= 256."""
    for bt in range(1, n + 1):
        if n % bt == 0 and bt * h * w >= 256:
            return bt
    return n


def _compiler_params():
    return pltpu.CompilerParams(
        dimension_semantics=("parallel",),
        vmem_limit_bytes=_VMEM_LIMIT)


# -----------------------------------------------------------------------------
# In-kernel helpers (traced inside kernel bodies).
# -----------------------------------------------------------------------------
def _fill_banded(xcat_ref, x_val, *, kw, pad):
    """Pack x (bt,H,W,Cin) into the kw-banded zero-padded activation scratch.

    xcat[b, pad+r, c, j*band + ci] = x[b, r, c + j - pad, ci]  (zero outside the image)
    Band offsets j*band are 128-aligned, so every store hits aligned lane columns.
    The scratch is re-zeroed every step (cheap; megacore-safe under any core split).
    """
    bt, h, w, cin = x_val.shape
    band = _round_up(cin, _BAND_ALIGN)
    xcat_ref[...] = jnp.zeros(xcat_ref.shape, xcat_ref.dtype)
    for j in range(kw):
        d0 = max(0, pad - j)            # destination column start
        s0 = max(0, j - pad)            # source column start
        wj = w - abs(j - pad)           # valid width for this column shift
        xcat_ref[:, pl.ds(pad, h), pl.ds(d0, wj), pl.ds(j * band, cin)] = (
            x_val[:, :, s0:s0 + wj, :])


def _conv_banded(xcat_ref, w_ref, b_ref, *, h, kh):
    """kh-tap conv from the banded scratch: kh dots with K = kw*band (BN folded).

    Returns relu(acc + bias) as (bt*h, W, C_out) float32.
    """
    bt = xcat_ref.shape[0]
    w_out = xcat_ref.shape[2]
    k = xcat_ref.shape[3]
    acc = None
    for i in range(kh):
        lhs = xcat_ref[:, pl.ds(i, h), :, :].reshape(bt * h, w_out, k)
        part = lax.dot_general(lhs, w_ref[i],
                               dimension_numbers=(((2,), (0,)), ((), ())),
                               preferred_element_type=jnp.float32)
        acc = part if acc is None else acc + part
    return jnp.maximum(acc + b_ref[...], 0.0)


# -----------------------------------------------------------------------------
# Kernel 1: fused pointwise stage — reads x once for all four branch heads.
#   [branch1x1 | branch5x5_1 | branch3x3dbl_1 | branch_pool-1x1] in ONE matmul,
#   then 3x3 avg-pool (count_include_pad) on the pool columns, bias+ReLU after pool.
# -----------------------------------------------------------------------------
def _pointwise_kernel(x_ref, w_ref, bh_ref, bp_ref,
                      b1_ref, t5_ref, t3_ref, pool_ref, pbuf_ref):
    bt, h, w, cin = x_ref.shape
    n1 = b1_ref.shape[-1]
    n5 = t5_ref.shape[-1]
    n3 = t3_ref.shape[-1]
    pf = pool_ref.shape[-1]
    nh = n1 + n5 + n3

    x = x_ref[...].reshape(bt * h, w, cin)
    y = lax.dot_general(x, w_ref[...],
                        dimension_numbers=(((2,), (0,)), ((), ())),
                        preferred_element_type=jnp.float32)          # (bt*h, w, nh+pf)

    # ReLU'd 1x1 heads (three separate outputs -> no wrapper channel slicing).
    heads = jnp.maximum(y[:, :, :nh] + bh_ref[...], 0.0)
    b1_ref[...] = heads[:, :, :n1].reshape(bt, h, w, n1).astype(b1_ref.dtype)
    t5_ref[...] = heads[:, :, n1:n1 + n5].reshape(bt, h, w, n5).astype(t5_ref.dtype)
    t3_ref[...] = heads[:, :, n1 + n5:nh].reshape(bt, h, w, n3).astype(t3_ref.dtype)

    # branch_pool: bias-free 1x1 already done above; pool now, then bias + ReLU.
    yp = y[:, :, nh:].reshape(bt, h, w, pf)
    pbuf_ref[...] = jnp.zeros(pbuf_ref.shape, pbuf_ref.dtype)        # zero pad border
    for b in range(bt):
        pbuf_ref[pl.ds(1, h), pl.ds(1, w), :] = yp[b]
        acc = jnp.zeros((h, w, pf), jnp.float32)
        for i in range(3):
            for j in range(3):
                acc = acc + pbuf_ref[pl.ds(i, h), pl.ds(j, w), :]
        pooled = acc * (1.0 / 9.0) + bp_ref[...]
        pool_ref[b] = jnp.maximum(pooled, 0.0).astype(pool_ref.dtype)


def _pointwise_stage(x, w_all, b_heads, b_pool, *, n1, n5, n3, bt):
    n, h, w, cin = x.shape
    pf = b_pool.shape[0]
    ctot = w_all.shape[1]
    nh = n1 + n5 + n3
    return pl.pallas_call(
        _pointwise_kernel,
        out_shape=(jax.ShapeDtypeStruct((n, h, w, n1), jnp.bfloat16),
                   jax.ShapeDtypeStruct((n, h, w, n5), jnp.bfloat16),
                   jax.ShapeDtypeStruct((n, h, w, n3), jnp.bfloat16),
                   jax.ShapeDtypeStruct((n, h, w, pf), jnp.bfloat16)),
        grid_spec=pltpu.PrefetchScalarGridSpec(
            num_scalar_prefetch=0,
            grid=(n // bt,),
            in_specs=[
                pl.BlockSpec((bt, h, w, cin), lambda b: (b, 0, 0, 0)),
                pl.BlockSpec((cin, ctot), lambda b: (0, 0)),
                pl.BlockSpec((1, nh), lambda b: (0, 0)),
                pl.BlockSpec((1, pf), lambda b: (0, 0)),
            ],
            out_specs=[
                pl.BlockSpec((bt, h, w, n1), lambda b: (b, 0, 0, 0)),
                pl.BlockSpec((bt, h, w, n5), lambda b: (b, 0, 0, 0)),
                pl.BlockSpec((bt, h, w, n3), lambda b: (b, 0, 0, 0)),
                pl.BlockSpec((bt, h, w, pf), lambda b: (b, 0, 0, 0)),
            ],
            scratch_shapes=[pltpu.VMEM((h + 2, w + 2, pf), jnp.float32)],
        ),
        compiler_params=_compiler_params(),
    )(x, w_all, b_heads.reshape(1, nh), b_pool.reshape(1, pf))


# -----------------------------------------------------------------------------
# Kernel 2: KxK conv (BN folded) with in-kernel padding and kw-folded contraction.
# -----------------------------------------------------------------------------
def _conv_kxk_kernel(x_ref, w_ref, b_ref, o_ref, xcat_ref, *, kh, kw, pad):
    bt, h, w, _ = x_ref.shape
    _fill_banded(xcat_ref, x_ref[...], kw=kw, pad=pad)
    y = _conv_banded(xcat_ref, w_ref, b_ref, h=h, kh=kh)
    o_ref[...] = y.reshape(bt, h, w, -1).astype(o_ref.dtype)


def _conv_kxk(x, w_banded, bias, *, kh, kw, pad, bt):
    n, h, w, cin = x.shape
    k = w_banded.shape[1]
    cout = w_banded.shape[2]
    kernel = functools.partial(_conv_kxk_kernel, kh=kh, kw=kw, pad=pad)
    return pl.pallas_call(
        kernel,
        out_shape=jax.ShapeDtypeStruct((n, h, w, cout), jnp.bfloat16),
        grid_spec=pltpu.PrefetchScalarGridSpec(
            num_scalar_prefetch=0,
            grid=(n // bt,),
            in_specs=[
                pl.BlockSpec((bt, h, w, cin), lambda b: (b, 0, 0, 0)),
                pl.BlockSpec((kh, k, cout), lambda b: (0, 0, 0)),
                pl.BlockSpec((1, cout), lambda b: (0, 0)),
            ],
            out_specs=pl.BlockSpec((bt, h, w, cout), lambda b: (b, 0, 0, 0)),
            scratch_shapes=[pltpu.VMEM((bt, h + 2 * pad, w, k), jnp.bfloat16)],
        ),
        compiler_params=_compiler_params(),
    )(x, w_banded, bias.reshape(1, cout))


# -----------------------------------------------------------------------------
# Kernel 3: fused branch3x3dbl — two 3x3 convs, intermediate stays in VMEM.
# -----------------------------------------------------------------------------
def _double_3x3_kernel(x_ref, w2_ref, b2_ref, w3_ref, b3_ref, o_ref,
                       xcat2_ref, xcat3_ref, *, pad):
    bt, h, w, _ = x_ref.shape
    _fill_banded(xcat2_ref, x_ref[...], kw=3, pad=pad)
    mid = _conv_banded(xcat2_ref, w2_ref, b2_ref, h=h, kh=3)         # (bt*h, w, 96) f32
    mid = mid.astype(x_ref.dtype).reshape(bt, h, w, -1)              # bf16, never hits HBM
    _fill_banded(xcat3_ref, mid, kw=3, pad=pad)
    y = _conv_banded(xcat3_ref, w3_ref, b3_ref, h=h, kh=3)
    o_ref[...] = y.reshape(bt, h, w, -1).astype(o_ref.dtype)


def _double_conv3x3(x, w2_banded, b2, w3_banded, b3, *, pad, bt):
    n, h, w, cin = x.shape
    k2, cmid = w2_banded.shape[1], w2_banded.shape[2]
    k3, cout = w3_banded.shape[1], w3_banded.shape[2]
    kernel = functools.partial(_double_3x3_kernel, pad=pad)
    return pl.pallas_call(
        kernel,
        out_shape=jax.ShapeDtypeStruct((n, h, w, cout), jnp.bfloat16),
        grid_spec=pltpu.PrefetchScalarGridSpec(
            num_scalar_prefetch=0,
            grid=(n // bt,),
            in_specs=[
                pl.BlockSpec((bt, h, w, cin), lambda b: (b, 0, 0, 0)),
                pl.BlockSpec((3, k2, cmid), lambda b: (0, 0, 0)),
                pl.BlockSpec((1, cmid), lambda b: (0, 0)),
                pl.BlockSpec((3, k3, cout), lambda b: (0, 0, 0)),
                pl.BlockSpec((1, cout), lambda b: (0, 0)),
            ],
            out_specs=pl.BlockSpec((bt, h, w, cout), lambda b: (b, 0, 0, 0)),
            scratch_shapes=[pltpu.VMEM((bt, h + 2 * pad, w, k2), jnp.bfloat16),
                            pltpu.VMEM((bt, h + 2 * pad, w, k3), jnp.bfloat16)],
        ),
        compiler_params=_compiler_params(),
    )(x, w2_banded, b2.reshape(1, cmid), w3_banded, b3.reshape(1, cout))


# -----------------------------------------------------------------------------
# BN folding / weight layout helpers (plain JAX glue on small weight tensors).
# -----------------------------------------------------------------------------
def _fold_bn(w_oihw, gamma, beta, mean, var):
    scale = gamma / jnp.sqrt(var + _BN_EPS)
    w = w_oihw.astype(jnp.float32) * scale[:, None, None, None]
    b = (beta - mean * scale).astype(jnp.float32)
    return w, b


def _as_1x1_matrix(w_folded):
    # (C_out, C_in, 1, 1) -> (C_in, C_out) bf16
    return jnp.transpose(w_folded[:, :, 0, 0], (1, 0)).astype(jnp.bfloat16)


def _as_banded(w_folded):
    # (C_out, C_in, KH, KW) -> (KH, KW*band, C_out) bf16 with zero band tails,
    # matching the 128-aligned kw-banded activation layout.
    cout, cin, kh, kw = w_folded.shape
    band = _round_up(cin, _BAND_ALIGN)
    w_hwio = jnp.transpose(w_folded, (2, 3, 1, 0))                   # (kh, kw, cin, cout)
    w_pad = jnp.zeros((kh, kw, band, cout), jnp.float32)
    w_pad = w_pad.at[:, :, :cin, :].set(w_hwio)
    return w_pad.reshape(kh, kw * band, cout).astype(jnp.bfloat16)


# -----------------------------------------------------------------------------
# InceptionA forward (NCHW in / NCHW out, inference-mode BN, bf16 compute).
# -----------------------------------------------------------------------------
def inception_a_forward(x_nchw, params):
    x = jnp.transpose(x_nchw, (0, 2, 3, 1)).astype(jnp.bfloat16)     # NHWC, once
    n, h, w, _ = x.shape
    bt = _pick_batch_tile(n, h, w)

    w1, b1 = _fold_bn(*params["branch1x1"])
    w51, b51 = _fold_bn(*params["branch5x5_1"])
    w52, b52 = _fold_bn(*params["branch5x5_2"])
    w31, b31 = _fold_bn(*params["branch3x3dbl_1"])
    w32, b32 = _fold_bn(*params["branch3x3dbl_2"])
    w33, b33 = _fold_bn(*params["branch3x3dbl_3"])
    wp, bp = _fold_bn(*params["branch_pool"])

    n1, n5, n3 = w1.shape[0], w51.shape[0], w31.shape[0]
    # Fused heads: [branch1x1 | branch5x5_1 | branch3x3dbl_1 | branch_pool 1x1].
    w_all = jnp.concatenate([_as_1x1_matrix(w1), _as_1x1_matrix(w51),
                             _as_1x1_matrix(w31), _as_1x1_matrix(wp)], axis=1)
    b_heads = jnp.concatenate([b1, b51, b31], axis=0)

    branch1x1, t5, t3, branch_pool = _pointwise_stage(
        x, w_all, b_heads, bp, n1=n1, n5=n5, n3=n3, bt=bt)

    branch5x5 = _conv_kxk(t5, _as_banded(w52), b52, kh=5, kw=5, pad=2, bt=bt)
    branch3x3dbl = _double_conv3x3(t3, _as_banded(w32), b32,
                                   _as_banded(w33), b33, pad=1, bt=bt)

    out = jnp.concatenate([branch1x1, branch5x5, branch3x3dbl, branch_pool], axis=-1)
    # TODO(synk): a consumer that accepts NHWC could skip this transpose (one HBM pass).
    return jnp.transpose(out, (0, 3, 1, 2)).astype(jnp.float32)      # NCHW, once


# -----------------------------------------------------------------------------
# Pure-JAX reference mirroring the same bf16/f32 arithmetic chain (torch ordering).
# -----------------------------------------------------------------------------
def _ref_basic_conv(x_nhwc_bf16, layer, *, padding):
    w_oihw, gamma, beta, mean, var = layer
    wf, bias = _fold_bn(w_oihw, gamma, beta, mean, var)
    w_hwio = jnp.transpose(wf, (2, 3, 1, 0)).astype(jnp.bfloat16)
    y = lax.conv_general_dilated(
        x_nhwc_bf16, w_hwio, window_strides=(1, 1),
        padding=((padding, padding), (padding, padding)),
        dimension_numbers=("NHWC", "HWIO", "NHWC"),
        preferred_element_type=jnp.float32)
    y = jnp.maximum(y + bias[None, None, None, :], 0.0)
    return y.astype(jnp.bfloat16)


def _ref_avg_pool3(x_nhwc_bf16):
    xp = jnp.pad(x_nhwc_bf16, ((0, 0), (1, 1), (1, 1), (0, 0))).astype(jnp.float32)
    s = lax.reduce_window(xp, 0.0, lax.add, (1, 3, 3, 1), (1, 1, 1, 1), "VALID")
    return (s * (1.0 / 9.0)).astype(jnp.bfloat16)


def _ref_inception_a(x_nchw, params):
    x = jnp.transpose(x_nchw, (0, 2, 3, 1)).astype(jnp.bfloat16)
    b1 = _ref_basic_conv(x, params["branch1x1"], padding=0)
    b5 = _ref_basic_conv(x, params["branch5x5_1"], padding=0)
    b5 = _ref_basic_conv(b5, params["branch5x5_2"], padding=2)
    b3 = _ref_basic_conv(x, params["branch3x3dbl_1"], padding=0)
    b3 = _ref_basic_conv(b3, params["branch3x3dbl_2"], padding=1)
    b3 = _ref_basic_conv(b3, params["branch3x3dbl_3"], padding=1)
    bp = _ref_basic_conv(_ref_avg_pool3(x), params["branch_pool"], padding=0)
    out = jnp.concatenate([b1, b5, b3, bp], axis=-1)
    return jnp.transpose(out, (0, 3, 1, 2)).astype(jnp.float32)


# -----------------------------------------------------------------------------
# Deterministic parameter construction and self-test.
# -----------------------------------------------------------------------------
def _make_bn_stats(c):
    gamma = jnp.linspace(0.5, 1.5, c, dtype=jnp.float32)
    beta = jnp.linspace(-0.1, 0.1, c, dtype=jnp.float32)
    mean = jnp.linspace(-0.2, 0.2, c, dtype=jnp.float32)
    var = jnp.linspace(0.5, 1.5, c, dtype=jnp.float32)
    return gamma, beta, mean, var


def make_inception_a_params(key, in_channels, pool_features):
    shapes = {
        "branch1x1": (64, in_channels, 1, 1),
        "branch5x5_1": (48, in_channels, 1, 1),
        "branch5x5_2": (64, 48, 5, 5),
        "branch3x3dbl_1": (64, in_channels, 1, 1),
        "branch3x3dbl_2": (96, 64, 3, 3),
        "branch3x3dbl_3": (96, 96, 3, 3),
        "branch_pool": (pool_features, in_channels, 1, 1),
    }
    params = {}
    for i, (name, shp) in enumerate(sorted(shapes.items())):
        k = jax.random.fold_in(key, i)
        w = 0.1 * jax.random.normal(k, shp, jnp.float32)
        params[name] = (w,) + _make_bn_stats(shp[0])
    return params


if __name__ == "__main__":
    key = jax.random.PRNGKey(0)
    # Small shapes: internal branch widths (64/48/96) are fixed by the module.
    N, C_IN, H, W = 2, 16, 8, 8
    POOL_FEATURES = 16

    params = make_inception_a_params(key, C_IN, POOL_FEATURES)
    x = jax.random.normal(jax.random.fold_in(key, 1000), (N, C_IN, H, W), jnp.float32)

    fwd = jax.jit(inception_a_forward)
    out = jax.block_until_ready(fwd(x, params))

    ref = _ref_inception_a(x, params)
    assert out.shape == (N, 64 + 64 + 96 + POOL_FEATURES, H, W), out.shape
    max_err = jnp.max(jnp.abs(out - ref))
    assert jnp.allclose(out, ref, atol=5e-2, rtol=5e-2), f"mismatch vs reference: {max_err}"

    print("KERNEL_OK")
</pallas_src>

<mosaic_0001>
module attributes {stable_mosaic.version = 11 : i64} {
  func.func @_pointwise_kernel(%arg0: i32, %arg1: memref<2x8x8x16xbf16, #tpu.memory_space<vmem>>, %arg2: memref<16x192xbf16, #tpu.memory_space<vmem>>, %arg3: memref<1x176xf32, #tpu.memory_space<vmem>>, %arg4: memref<1x16xf32, #tpu.memory_space<vmem>>, %arg5: memref<2x8x8x64xbf16, #tpu.memory_space<vmem>>, %arg6: memref<2x8x8x48xbf16, #tpu.memory_space<vmem>>, %arg7: memref<2x8x8x64xbf16, #tpu.memory_space<vmem>>, %arg8: memref<2x8x8x16xbf16, #tpu.memory_space<vmem>>, %arg9: memref<10x10x16xf32, #tpu.memory_space<vmem>>) attributes {dimension_semantics = [#tpu.dimension_semantics<parallel>], iteration_bounds = array<i64: 1>, scalar_prefetch = 0 : i64, scratch_operands = 1 : i64, tpu.core_type = #tpu.core_type<tc>, window_params = [{transform_indices = @transform_0, window_bounds = array<i64: 2, 8, 8, 16>}, {pipeline_mode = #tpu.pipeline_mode<synchronous>, transform_indices = @transform_1, window_bounds = array<i64: 16, 192>}, {pipeline_mode = #tpu.pipeline_mode<synchronous>, transform_indices = @transform_2, window_bounds = array<i64: 1, 176>}, {pipeline_mode = #tpu.pipeline_mode<synchronous>, transform_indices = @transform_3, window_bounds = array<i64: 1, 16>}, {transform_indices = @transform_4, window_bounds = array<i64: 2, 8, 8, 64>}, {transform_indices = @transform_5, window_bounds = array<i64: 2, 8, 8, 48>}, {transform_indices = @transform_6, window_bounds = array<i64: 2, 8, 8, 64>}, {transform_indices = @transform_7, window_bounds = array<i64: 2, 8, 8, 16>}]} {
    %c0 = arith.constant 0 : index
    %c0_0 = arith.constant 0 : index
    %c0_1 = arith.constant 0 : index
    %c0_2 = arith.constant 0 : index
    %0 = vector.load %arg1[%c0, %c0_0, %c0_1, %c0_2] : memref<2x8x8x16xbf16, #tpu.memory_space<vmem>>, vector<2x8x8x16xbf16>
    %1 = vector.shape_cast %0 : vector<2x8x8x16xbf16> to vector<16x8x16xbf16>
    %c0_3 = arith.constant 0 : index
    %c0_4 = arith.constant 0 : index
    %2 = vector.load %arg2[%c0_3, %c0_4] : memref<16x192xbf16, #tpu.memory_space<vmem>>, vector<16x192xbf16>
    %cst = arith.constant dense<0.000000e+00> : vector<16x8x192xf32>
    %3 = tpu.matmul %1, %2, %cst {dimension_numbers = #tpu.dot_dimension_numbers<[2], [0], [0, 1], [1], [0, 0, 0, 1, 1, 1], [], []>} : vector<16x8x16xbf16>, vector<16x192xbf16>, vector<16x8x192xf32> -> vector<16x8x192xf32>
    %4 = vector.extract_strided_slice %3 {offsets = [0, 0, 0], sizes = [16, 8, 176], strides = [1, 1, 1]} : vector<16x8x192xf32> to vector<16x8x176xf32>
    %c0_5 = arith.constant 0 : index
    %c0_6 = arith.constant 0 : index
    %5 = vector.load %arg3[%c0_5, %c0_6] : memref<1x176xf32, #tpu.memory_space<vmem>>, vector<1x176xf32>
    %6 = vector.shape_cast %5 : vector<1x176xf32> to vector<1x1x176xf32>
    %7 = vector.broadcast %6 : vector<1x1x176xf32> to vector<16x8x176xf32>
    %8 = arith.addf %4, %7 : vector<16x8x176xf32>
    %cst_7 = arith.constant 0.000000e+00 : f32
    %9 = vector.broadcast %cst_7 : f32 to vector<16x8x176xf32>
    %10 = arith.maximumf %8, %9 : vector<16x8x176xf32>
    %11 = vector.extract_strided_slice %10 {offsets = [0, 0, 0], sizes = [16, 8, 64], strides = [1, 1, 1]} : vector<16x8x176xf32> to vector<16x8x64xf32>
    %12 = vector.shape_cast %11 : vector<16x8x64xf32> to vector<2x8x8x64xf32>
    %13 = arith.truncf %12 : vector<2x8x8x64xf32> to vector<2x8x8x64xbf16>
    %c0_8 = arith.constant 0 : index
    %c0_9 = arith.constant 0 : index
    %c0_10 = arith.constant 0 : index
    %c0_11 = arith.constant 0 : index
    %14 = vector.load %arg5[%c0_8, %c0_9, %c0_10, %c0_11] : memref<2x8x8x64xbf16, #tpu.memory_space<vmem>>, vector<2x8x8x64xbf16>
    tpu.vector_store %arg5[%c0_8, %c0_9, %c0_10, %c0_11], %13 {strides = array<i32>} : memref<2x8x8x64xbf16, #tpu.memory_space<vmem>>, vector<2x8x8x64xbf16>,
    %15 = vector.extract_strided_slice %10 {offsets = [0, 0, 64], sizes = [16, 8, 48], strides = [1, 1, 1]} : vector<16x8x176xf32> to vector<16x8x48xf32>
    %16 = vector.shape_cast %15 : vector<16x8x48xf32> to vector<2x8x8x48xf32>
    %17 = arith.truncf %16 : vector<2x8x8x48xf32> to vector<2x8x8x48xbf16>
    %c0_12 = arith.constant 0 : index
    %c0_13 = arith.constant 0 : index
    %c0_14 = arith.constant 0 : index
    %c0_15 = arith.constant 0 : index
    %18 = vector.load %arg6[%c0_12, %c0_13, %c0_14, %c0_15] : memref<2x8x8x48xbf16, #tpu.memory_space<vmem>>, vector<2x8x8x48xbf16>
    tpu.vector_store %arg6[%c0_12, %c0_13, %c0_14, %c0_15], %17 {strides = array<i32>} : memref<2x8x8x48xbf16, #tpu.memory_space<vmem>>, vector<2x8x8x48xbf16>,
    %19 = vector.extract_strided_slice %10 {offsets = [0, 0, 112], sizes = [16, 8, 64], strides = [1, 1, 1]} : vector<16x8x176xf32> to vector<16x8x64xf32>
    %20 = vector.shape_cast %19 : vector<16x8x64xf32> to vector<2x8x8x64xf32>
    %21 = arith.truncf %20 : vector<2x8x8x64xf32> to vector<2x8x8x64xbf16>
    %c0_16 = arith.constant 0 : index
    %c0_17 = arith.constant 0 : index
    %c0_18 = arith.constant 0 : index
    %c0_19 = arith.constant 0 : index
    %22 = vector.load %arg7[%c0_16, %c0_17, %c0_18, %c0_19] : memref<2x8x8x64xbf16, #tpu.memory_space<vmem>>, vector<2x8x8x64xbf16>
    tpu.vector_store %arg7[%c0_16, %c0_17, %c0_18, %c0_19], %21 {strides = array<i32>} : memref<2x8x8x64xbf16, #tpu.memory_space<vmem>>, vector<2x8x8x64xbf16>,
    %23 = vector.extract_strided_slice %3 {offsets = [0, 0, 176], sizes = [16, 8, 16], strides = [1, 1, 1]} : vector<16x8x192xf32> to vector<16x8x16xf32>
    %24 = vector.shape_cast %23 : vector<16x8x16xf32> to vector<2x8x8x16xf32>
    %cst_20 = arith.constant 0.000000e+00 : f32
    %25 = vector.broadcast %cst_20 : f32 to vector<10x10x16xf32>
    %c0_21 = arith.constant 0 : index
    %c0_22 = arith.constant 0 : index
    %c0_23 = arith.constant 0 : index
    %26 = vector.load %arg9[%c0_21, %c0_22, %c0_23] : memref<10x10x16xf32, #tpu.memory_space<vmem>>, vector<10x10x16xf32>
    tpu.vector_store %arg9[%c0_21, %c0_22, %c0_23], %25 {strides = array<i32>} : memref<10x10x16xf32, #tpu.memory_space<vmem>>, vector<10x10x16xf32>,
    %27 = vector.extract_strided_slice %24 {offsets = [0, 0, 0, 0], sizes = [1, 8, 8, 16], strides = [1, 1, 1, 1]} : vector<2x8x8x16xf32> to vector<1x8x8x16xf32>
    %28 = vector.shape_cast %27 : vector<1x8x8x16xf32> to vector<8x8x16xf32>
    %c1 = arith.constant 1 : index
    %c1_24 = arith.constant 1 : index
    %c0_25 = arith.constant 0 : index
    %29 = vector.load %arg9[%c1, %c1_24, %c0_25] : memref<10x10x16xf32, #tpu.memory_space<vmem>>, vector<8x8x16xf32>
    tpu.vector_store %arg9[%c1, %c1_24, %c0_25], %28 {strides = array<i32>} : memref<10x10x16xf32, #tpu.memory_space<vmem>>, vector<8x8x16xf32>,
    %cst_26 = arith.constant 0.000000e+00 : f32
    %30 = vector.broadcast %cst_26 : f32 to vector<8x8x16xf32>
    %c0_27 = arith.constant 0 : index
    %c0_28 = arith.constant 0 : index
    %c0_29 = arith.constant 0 : index
    %31 = vector.load %arg9[%c0_27, %c0_28, %c0_29] : memref<10x10x16xf32, #tpu.memory_space<vmem>>, vector<8x8x16xf32>
    %32 = arith.addf %30, %31 : vector<8x8x16xf32>
    %c0_30 = arith.constant 0 : index
    %c1_31 = arith.constant 1 : index
    %c0_32 = arith.constant 0 : index
    %33 = vector.load %arg9[%c0_30, %c1_31, %c0_32] : memref<10x10x16xf32, #tpu.memory_space<vmem>>, vector<8x8x16xf32>
    %34 = arith.addf %32, %33 : vector<8x8x16xf32>
    %c0_33 = arith.constant 0 : index
    %c2 = arith.constant 2 : index
    %c0_34 = arith.constant 0 : index
    %35 = vector.load %arg9[%c0_33, %c2, %c0_34] : memref<10x10x16xf32, #tpu.memory_space<vmem>>, vector<8x8x16xf32>
    %36 = arith.addf %34, %35 : vector<8x8x16xf32>
    %c1_35 = arith.constant 1 : index
    %c0_36 = arith.constant 0 : index
    %c0_37 = arith.constant 0 : index
    %37 = vector.load %arg9[%c1_35, %c0_36, %c0_37] : memref<10x10x16xf32, #tpu.memory_space<vmem>>, vector<8x8x16xf32>
    %38 = arith.addf %36, %37 : vector<8x8x16xf32>
    %c1_38 = arith.constant 1 : index
    %c1_39 = arith.constant 1 : index
    %c0_40 = arith.constant 0 : index
    %39 = vector.load %arg9[%c1_38, %c1_39, %c0_40] : memref<10x10x16xf32, #tpu.memory_space<vmem>>, vector<8x8x16xf32>
    %40 = arith.addf %38, %39 : vector<8x8x16xf32>
    %c1_41 = arith.constant 1 : index
    %c2_42 = arith.constant 2 : index
    %c0_43 = arith.constant 0 : index
    %41 = vector.load %arg9[%c1_41, %c2_42, %c0_43] : memref<10x10x16xf32, #tpu.memory_space<vmem>>, vector<8x8x16xf32>
    %42 = arith.addf %40, %41 : vector<8x8x16xf32>
    %c2_44 = arith.constant 2 : index
    %c0_45 = arith.constant 0 : index
    %c0_46 = arith.constant 0 : index
    %43 = vector.load %arg9[%c2_44, %c0_45, %c0_46] : memref<10x10x16xf32, #tpu.memory_space<vmem>>, vector<8x8x16xf32>
    %44 = arith.addf %42, %43 : vector<8x8x16xf32>
    %c2_47 = arith.constant 2 : index
    %c1_48 = arith.constant 1 : index
    %c0_49 = arith.constant 0 : index
    %45 = vector.load %arg9[%c2_47, %c1_48, %c0_49] : memref<10x10x16xf32, #tpu.memory_space<vmem>>, vector<8x8x16xf32>
    %46 = arith.addf %44, %45 : vector<8x8x16xf32>
    %c2_50 = arith.constant 2 : index
    %c2_51 = arith.constant 2 : index
    %c0_52 = arith.constant 0 : index
    %47 = vector.load %arg9[%c2_50, %c2_51, %c0_52] : memref<10x10x16xf32, #tpu.memory_space<vmem>>, vector<8x8x16xf32>
    %48 = arith.addf %46, %47 : vector<8x8x16xf32>
    %cst_53 = arith.constant 0.111111112 : f32
    %49 = vector.broadcast %cst_53 : f32 to vector<8x8x16xf32>
    %50 = arith.mulf %48, %49 : vector<8x8x16xf32>
    %c0_54 = arith.constant 0 : index
    %c0_55 = arith.constant 0 : index
    %51 = vector.load %arg4[%c0_54, %c0_55] : memref<1x16xf32, #tpu.memory_space<vmem>>, vector<1x16xf32>
    %52 = vector.shape_cast %51 : vector<1x16xf32> to vector<1x1x16xf32>
    %53 = vector.broadcast %52 : vector<1x1x16xf32> to vector<8x8x16xf32>
    %54 = arith.addf %50, %53 : vector<8x8x16xf32>
    %cst_56 = arith.constant 0.000000e+00 : f32
    %55 = vector.broadcast %cst_56 : f32 to vector<8x8x16xf32>
    %56 = arith.maximumf %54, %55 : vector<8x8x16xf32>
    %57 = arith.truncf %56 : vector<8x8x16xf32> to vector<8x8x16xbf16>
    %c0_57 = arith.constant 0 : index
    %c0_58 = arith.constant 0 : index
    %c0_59 = arith.constant 0 : index
    %c0_60 = arith.constant 0 : index
    %58 = vector.load %arg8[%c0_57, %c0_58, %c0_59, %c0_60] : memref<2x8x8x16xbf16, #tpu.memory_space<vmem>>, vector<1x8x8x16xbf16>
    %59 = vector.shape_cast %58 : vector<1x8x8x16xbf16> to vector<8x8x16xbf16>
    %60 = vector.shape_cast %57 : vector<8x8x16xbf16> to vector<1x8x8x16xbf16>
    tpu.vector_store %arg8[%c0_57, %c0_58, %c0_59, %c0_60], %60 {strides = array<i32>} : memref<2x8x8x16xbf16, #tpu.memory_space<vmem>>, vector<1x8x8x16xbf16>,
    %61 = vector.extract_strided_slice %24 {offsets = [1, 0, 0, 0], sizes = [1, 8, 8, 16], strides = [1, 1, 1, 1]} : vector<2x8x8x16xf32> to vector<1x8x8x16xf32>
    %62 = vector.shape_cast %61 : vector<1x8x8x16xf32> to vector<8x8x16xf32>
    %c1_61 = arith.constant 1 : index
    %c1_62 = arith.constant 1 : index
    %c0_63 = arith.constant 0 : index
    %63 = vector.load %arg9[%c1_61, %c1_62, %c0_63] : memref<10x10x16xf32, #tpu.memory_space<vmem>>, vector<8x8x16xf32>
    tpu.vector_store %arg9[%c1_61, %c1_62, %c0_63], %62 {strides = array<i32>} : memref<10x10x16xf32, #tpu.memory_space<vmem>>, vector<8x8x16xf32>,
    %cst_64 = arith.constant 0.000000e+00 : f32
    %64 = vector.broadcast %cst_64 : f32 to vector<8x8x16xf32>
    %c0_65 = arith.constant 0 : index
    %c0_66 = arith.constant 0 : index
    %c0_67 = arith.constant 0 : index
    %65 = vector.load %arg9[%c0_65, %c0_66, %c0_67] : memref<10x10x16xf32, #tpu.memory_space<vmem>>, vector<8x8x16xf32>
    %66 = arith.addf %64, %65 : vector<8x8x16xf32>
    %c0_68 = arith.constant 0 : index
    %c1_69 = arith.constant 1 : index
    %c0_70 = arith.constant 0 : index
    %67 = vector.load %arg9[%c0_68, %c1_69, %c0_70] : memref<10x10x16xf32, #tpu.memory_space<vmem>>, vector<8x8x16xf32>
    %68 = arith.addf %66, %67 : vector<8x8x16xf32>
    %c0_71 = arith.constant 0 : index
    %c2_72 = arith.constant 2 : index
    %c0_73 = arith.constant 0 : index
    %69 = vector.load %arg9[%c0_71, %c2_72, %c0_73] : memref<10x10x16xf32, #tpu.memory_space<vmem>>, vector<8x8x16xf32>
    %70 = arith.addf %68, %69 : vector<8x8x16xf32>
    %c1_74 = arith.constant 1 : index
    %c0_75 = arith.constant 0 : index
    %c0_76 = arith.constant 0 : index
    %71 = vector.load %arg9[%c1_74, %c0_75, %c0_76] : memref<10x10x16xf32, #tpu.memory_space<vmem>>, vector<8x8x16xf32>
    %72 = arith.addf %70, %71 : vector<8x8x16xf32>
    %c1_77 = arith.constant 1 : index
    %c1_78 = arith.constant 1 : index
    %c0_79 = arith.constant 0 : index
    %73 = vector.load %arg9[%c1_77, %c1_78, %c0_79] : memref<10x10x16xf32, #tpu.memory_space<vmem>>, vector<8x8x16xf32>
    %74 = arith.addf %72, %73 : vector<8x8x16xf32>
    %c1_80 = arith.constant 1 : index
    %c2_81 = arith.constant 2 : index
    %c0_82 = arith.constant 0 : index
    %75 = vector.load %arg9[%c1_80, %c2_81, %c0_82] : memref<10x10x16xf32, #tpu.memory_space<vmem>>, vector<8x8x16xf32>
    %76 = arith.addf %74, %75 : vector<8x8x16xf32>
    %c2_83 = arith.constant 2 : index
    %c0_84 = arith.constant 0 : index
    %c0_85 = arith.constant 0 : index
    %77 = vector.load %arg9[%c2_83, %c0_84, %c0_85] : memref<10x10x16xf32, #tpu.memory_space<vmem>>, vector<8x8x16xf32>
    %78 = arith.addf %76, %77 : vector<8x8x16xf32>
    %c2_86 = arith.constant 2 : index
    %c1_87 = arith.constant 1 : index
    %c0_88 = arith.constant 0 : index
    %79 = vector.load %arg9[%c2_86, %c1_87, %c0_88] : memref<10x10x16xf32, #tpu.memory_space<vmem>>, vector<8x8x16xf32>
    %80 = arith.addf %78, %79 : vector<8x8x16xf32>
    %c2_89 = arith.constant 2 : index
    %c2_90 = arith.constant 2 : index
    %c0_91 = arith.constant 0 : index
    %81 = vector.load %arg9[%c2_89, %c2_90, %c0_91] : memref<10x10x16xf32, #tpu.memory_space<vmem>>, vector<8x8x16xf32>
    %82 = arith.addf %80, %81 : vector<8x8x16xf32>
    %cst_92 = arith.constant 0.111111112 : f32
    %83 = vector.broadcast %cst_92 : f32 to vector<8x8x16xf32>
    %84 = arith.mulf %82, %83 : vector<8x8x16xf32>
    %c0_93 = arith.constant 0 : index
    %c0_94 = arith.constant 0 : index
    %85 = vector.load %arg4[%c0_93, %c0_94] : memref<1x16xf32, #tpu.memory_space<vmem>>, vector<1x16xf32>
    %86 = vector.shape_cast %85 : vector<1x16xf32> to vector<1x1x16xf32>
    %87 = vector.broadcast %86 : vector<1x1x16xf32> to vector<8x8x16xf32>
    %88 = arith.addf %84, %87 : vector<8x8x16xf32>
    %cst_95 = arith.constant 0.000000e+00 : f32
    %89 = vector.broadcast %cst_95 : f32 to vector<8x8x16xf32>
    %90 = arith.maximumf %88, %89 : vector<8x8x16xf32>
    %91 = arith.truncf %90 : vector<8x8x16xf32> to vector<8x8x16xbf16>
    %c1_96 = arith.constant 1 : index
    %c0_97 = arith.constant 0 : index
    %c0_98 = arith.constant 0 : index
    %c0_99 = arith.constant 0 : index
    %92 = vector.load %arg8[%c1_96, %c0_97, %c0_98, %c0_99] : memref<2x8x8x16xbf16, #tpu.memory_space<vmem>>, vector<1x8x8x16xbf16>
    %93 = vector.shape_cast %92 : vector<1x8x8x16xbf16> to vector<8x8x16xbf16>
    %94 = vector.shape_cast %91 : vector<8x8x16xbf16> to vector<1x8x8x16xbf16>
    tpu.vector_store %arg8[%c1_96, %c0_97, %c0_98, %c0_99], %94 {strides = array<i32>} : memref<2x8x8x16xbf16, #tpu.memory_space<vmem>>, vector<1x8x8x16xbf16>,
    return
  }
  func.func @transform_0(%arg0: i32) -> (i32, i32, i32, i32) {
    %c0_i32 = arith.constant 0 : i32
    %c0_i32_0 = arith.constant 0 : i32
    %c0_i32_1 = arith.constant 0 : i32
    %c0_i32_2 = arith.constant 0 : i32
    return %arg0, %c0_i32, %c0_i32_0, %c0_i32_1 : i32, i32, i32, i32
  }
  func.func @transform_1(%arg0: i32) -> (i32, i32) {
    %c0_i32 = arith.constant 0 : i32
    %c0_i32_0 = arith.constant 0 : i32
    %c0_i32_1 = arith.constant 0 : i32
    return %c0_i32, %c0_i32_0 : i32, i32
  }
  func.func @transform_2(%arg0: i32) -> (i32, i32) {
    %c0_i32 = arith.constant 0 : i32
    %c0_i32_0 = arith.constant 0 : i32
    %c0_i32_1 = arith.constant 0 : i32
    return %c0_i32, %c0_i32_0 : i32, i32
  }
  func.func @transform_3(%arg0: i32) -> (i32, i32) {
    %c0_i32 = arith.constant 0 : i32
    %c0_i32_0 = arith.constant 0 : i32
    %c0_i32_1 = arith.constant 0 : i32
    return %c0_i32, %c0_i32_0 : i32, i32
  }
  func.func @transform_4(%arg0: i32) -> (i32, i32, i32, i32) {
    %c0_i32 = arith.constant 0 : i32
    %c0_i32_0 = arith.constant 0 : i32
    %c0_i32_1 = arith.constant 0 : i32
    %c0_i32_2 = arith.constant 0 : i32
    return %arg0, %c0_i32, %c0_i32_0, %c0_i32_1 : i32, i32, i32, i32
  }
  func.func @transform_5(%arg0: i32) -> (i32, i32, i32, i32) {
    %c0_i32 = arith.constant 0 : i32
    %c0_i32_0 = arith.constant 0 : i32
    %c0_i32_1 = arith.constant 0 : i32
    %c0_i32_2 = arith.constant 0 : i32
    return %arg0, %c0_i32, %c0_i32_0, %c0_i32_1 : i32, i32, i32, i32
  }
  func.func @transform_6(%arg0: i32) -> (i32, i32, i32, i32) {
    %c0_i32 = arith.constant 0 : i32
    %c0_i32_0 = arith.constant 0 : i32
    %c0_i32_1 = arith.constant 0 : i32
    %c0_i32_2 = arith.constant 0 : i32
    return %arg0, %c0_i32, %c0_i32_0, %c0_i32_1 : i32, i32, i32, i32
  }
  func.func @transform_7(%arg0: i32) -> (i32, i32, i32, i32) {
    %c0_i32 = arith.constant 0 : i32
    %c0_i32_0 = arith.constant 0 : i32
    %c0_i32_1 = arith.constant 0 : i32
    %c0_i32_2 = arith.constant 0 : i32
    return %arg0, %c0_i32, %c0_i32_0, %c0_i32_1 : i32, i32, i32, i32
  }
}

module attributes {stable_mosaic.version = 11 : i64} {
  func.func @_double_3x3_kernel(%arg0: i32, %arg1: memref<2x8x8x64xbf16, #tpu.memory_space<vmem>>, %arg2: memref<3x384x96xbf16, #tpu.memory_space<vmem>>, %arg3: memref<1x96xf32, #tpu.memory_space<vmem>>, %arg4: memref<3x384x96xbf16, #tpu.memory_space<vmem>>, %arg5: memref<1x96xf32, #tpu.memory_space<vmem>>, %arg6: memref<2x8x8x96xbf16, #tpu.memory_space<vmem>>, %arg7: memref<2x10x8x384xbf16, #tpu.memory_space<vmem>>, %arg8: memref<2x10x8x384xbf16, #tpu.memory_space<vmem>>) attributes {dimension_semantics = [#tpu.dimension_semantics<parallel>], iteration_bounds = array<i64: 1>, scalar_prefetch = 0 : i64, scratch_operands = 2 : i64, tpu.core_type = #tpu.core_type<tc>, window_params = [{transform_indices = @transform_0, window_bounds = array<i64: 2, 8, 8, 64>}, {pipeline_mode = #tpu.pipeline_mode<synchronous>, transform_indices = @transform_1, window_bounds = array<i64: 3, 384, 96>}, {pipeline_mode = #tpu.pipeline_mode<synchronous>, transform_indices = @transform_2, window_bounds = array<i64: 1, 96>}, {pipeline_mode = #tpu.pipeline_mode<synchronous>, transform_indices = @transform_3, window_bounds = array<i64: 3, 384, 96>}, {pipeline_mode = #tpu.pipeline_mode<synchronous>, transform_indices = @transform_4, window_bounds = array<i64: 1, 96>}, {transform_indices = @transform_5, window_bounds = array<i64: 2, 8, 8, 96>}]} {
    %c0 = arith.constant 0 : index
    %c0_0 = arith.constant 0 : index
    %c0_1 = arith.constant 0 : index
    %c0_2 = arith.constant 0 : index
    %0 = vector.load %arg1[%c0, %c0_0, %c0_1, %c0_2] : memref<2x8x8x64xbf16, #tpu.memory_space<vmem>>, vector<2x8x8x64xbf16>
    %cst = arith.constant 0.000000e+00 : bf16
    %1 = vector.broadcast %cst : bf16 to vector<2x10x8x384xbf16>
    %c0_3 = arith.constant 0 : index
    %c0_4 = arith.constant 0 : index
    %c0_5 = arith.constant 0 : index
    %c0_6 = arith.constant 0 : index
    %2 = vector.load %arg7[%c0_3, %c0_4, %c0_5, %c0_6] : memref<2x10x8x384xbf16, #tpu.memory_space<vmem>>, vector<2x10x8x384xbf16>
    tpu.vector_store %arg7[%c0_3, %c0_4, %c0_5, %c0_6], %1 {strides = array<i32>} : memref<2x10x8x384xbf16, #tpu.memory_space<vmem>>, vector<2x10x8x384xbf16>,
    %3 = vector.extract_strided_slice %0 {offsets = [0, 0, 0, 0], sizes = [2, 8, 7, 64], strides = [1, 1, 1, 1]} : vector<2x8x8x64xbf16> to vector<2x8x7x64xbf16>
    %c0_7 = arith.constant 0 : index
    %c1 = arith.constant 1 : index
    %c1_8 = arith.constant 1 : index
    %c0_9 = arith.constant 0 : index
    %4 = vector.load %arg7[%c0_7, %c1, %c1_8, %c0_9] : memref<2x10x8x384xbf16, #tpu.memory_space<vmem>>, vector<2x8x7x64xbf16>
    tpu.vector_store %arg7[%c0_7, %c1, %c1_8, %c0_9], %3 {strides = array<i32>} : memref<2x10x8x384xbf16, #tpu.memory_space<vmem>>, vector<2x8x7x64xbf16>,
    %c0_10 = arith.constant 0 : index
    %c1_11 = arith.constant 1 : index
    %c0_12 = arith.constant 0 : index
    %c128 = arith.constant 128 : index
    %5 = vector.load %arg7[%c0_10, %c1_11, %c0_12, %c128] : memref<2x10x8x384xbf16, #tpu.memory_space<vmem>>, vector<2x8x8x64xbf16>
    tpu.vector_store %arg7[%c0_10, %c1_11, %c0_12, %c128], %0 {strides = array<i32>} : memref<2x10x8x384xbf16, #tpu.memory_space<vmem>>, vector<2x8x8x64xbf16>,
    %6 = vector.extract_strided_slice %0 {offsets = [0, 0, 1, 0], sizes = [2, 8, 7, 64], strides = [1, 1, 1, 1]} : vector<2x8x8x64xbf16> to vector<2x8x7x64xbf16>
    %c0_13 = arith.constant 0 : index
    %c1_14 = arith.constant 1 : index
    %c0_15 = arith.constant 0 : index
    %c256 = arith.constant 256 : index
    %7 = vector.load %arg7[%c0_13, %c1_14, %c0_15, %c256] : memref<2x10x8x384xbf16, #tpu.memory_space<vmem>>, vector<2x8x7x64xbf16>
    tpu.vector_store %arg7[%c0_13, %c1_14, %c0_15, %c256], %6 {strides = array<i32>} : memref<2x10x8x384xbf16, #tpu.memory_space<vmem>>, vector<2x8x7x64xbf16>,
    %c0_16 = arith.constant 0 : index
    %c0_17 = arith.constant 0 : index
    %c0_18 = arith.constant 0 : index
    %c0_19 = arith.constant 0 : index
    %8 = vector.load %arg7[%c0_16, %c0_17, %c0_18, %c0_19] : memref<2x10x8x384xbf16, #tpu.memory_space<vmem>>, vector<2x8x8x384xbf16>
    %9 = vector.shape_cast %8 : vector<2x8x8x384xbf16> to vector<16x8x384xbf16>
    %c0_20 = arith.constant 0 : index
    %c0_21 = arith.constant 0 : index
    %c0_22 = arith.constant 0 : index
    %10 = vector.load %arg2[%c0_20, %c0_21, %c0_22] : memref<3x384x96xbf16, #tpu.memory_space<vmem>>, vector<1x384x96xbf16>
    %11 = vector.shape_cast %10 : vector<1x384x96xbf16> to vector<384x96xbf16>
    %cst_23 = arith.constant dense<0.000000e+00> : vector<16x8x96xf32>
    %12 = tpu.matmul %9, %11, %cst_23 {dimension_numbers = #tpu.dot_dimension_numbers<[2], [0], [0, 1], [1], [0, 0, 0, 1, 1, 1], [], []>} : vector<16x8x384xbf16>, vector<384x96xbf16>, vector<16x8x96xf32> -> vector<16x8x96xf32>
    %c0_24 = arith.constant 0 : index
    %c1_25 = arith.constant 1 : index
    %c0_26 = arith.constant 0 : index
    %c0_27 = arith.constant 0 : index
    %13 = vector.load %arg7[%c0_24, %c1_25, %c0_26, %c0_27] : memref<2x10x8x384xbf16, #tpu.memory_space<vmem>>, vector<2x8x8x384xbf16>
    %14 = vector.shape_cast %13 : vector<2x8x8x384xbf16> to vector<16x8x384xbf16>
    %c1_28 = arith.constant 1 : index
    %c0_29 = arith.constant 0 : index
    %c0_30 = arith.constant 0 : index
    %15 = vector.load %arg2[%c1_28, %c0_29, %c0_30] : memref<3x384x96xbf16, #tpu.memory_space<vmem>>, vector<1x384x96xbf16>
    %16 = vector.shape_cast %15 : vector<1x384x96xbf16> to vector<384x96xbf16>
    %cst_31 = arith.constant dense<0.000000e+00> : vector<16x8x96xf32>
    %17 = tpu.matmul %14, %16, %cst_31 {dimension_numbers = #tpu.dot_dimension_numbers<[2], [0], [0, 1], [1], [0, 0, 0, 1, 1, 1], [], []>} : vector<16x8x384xbf16>, vector<384x96xbf16>, vector<16x8x96xf32> -> vector<16x8x96xf32>
    %18 = arith.addf %12, %17 : vector<16x8x96xf32>
    %c0_32 = arith.constant 0 : index
    %c2 = arith.constant 2 : index
    %c0_33 = arith.constant 0 : index
    %c0_34 = arith.constant 0 : index
    %19 = vector.load %arg7[%c0_32, %c2, %c0_33, %c0_34] : memref<2x10x8x384xbf16, #tpu.memory_space<vmem>>, vector<2x8x8x384xbf16>
    %20 = vector.shape_cast %19 : vector<2x8x8x384xbf16> to vector<16x8x384xbf16>
    %c2_35 = arith.constant 2 : index
    %c0_36 = arith.constant 0 : index
    %c0_37 = arith.constant 0 : index
    %21 = vector.load %arg2[%c2_35, %c0_36, %c0_37] : memref<3x384x96xbf16, #tpu.memory_space<vmem>>, vector<1x384x96xbf16>
    %22 = vector.shape_cast %21 : vector<1x384x96xbf16> to vector<384x96xbf16>
    %cst_38 = arith.constant dense<0.000000e+00> : vector<16x8x96xf32>
    %23 = tpu.matmul %20, %22, %cst_38 {dimension_numbers = #tpu.dot_dimension_numbers<[2], [0], [0, 1], [1], [0, 0, 0, 1, 1, 1], [], []>} : vector<16x8x384xbf16>, vector<384x96xbf16>, vector<16x8x96xf32> -> vector<16x8x96xf32>
    %24 = arith.addf %18, %23 : vector<16x8x96xf32>
    %c0_39 = arith.constant 0 : index
    %c0_40 = arith.constant 0 : index
    %25 = vector.load %arg3[%c0_39, %c0_40] : memref<1x96xf32, #tpu.memory_space<vmem>>, vector<1x96xf32>
    %26 = vector.shape_cast %25 : vector<1x96xf32> to vector<1x1x96xf32>
    %27 = vector.broadcast %26 : vector<1x1x96xf32> to vector<16x8x96xf32>
    %28 = arith.addf %24, %27 : vector<16x8x96xf32>
    %cst_41 = arith.constant 0.000000e+00 : f32
    %29 = vector.broadcast %cst_41 : f32 to vector<16x8x96xf32>
    %30 = arith.maximumf %28, %29 : vector<16x8x96xf32>
    %31 = arith.truncf %30 : vector<16x8x96xf32> to vector<16x8x96xbf16>
    %32 = vector.shape_cast %31 : vector<16x8x96xbf16> to vector<2x8x8x96xbf16>
    %cst_42 = arith.constant 0.000000e+00 : bf16
    %33 = vector.broadcast %cst_42 : bf16 to vector<2x10x8x384xbf16>
    %c0_43 = arith.constant 0 : index
    %c0_44 = arith.constant 0 : index
    %c0_45 = arith.constant 0 : index
    %c0_46 = arith.constant 0 : index
    %34 = vector.load %arg8[%c0_43, %c0_44, %c0_45, %c0_46] : memref<2x10x8x384xbf16, #tpu.memory_space<vmem>>, vector<2x10x8x384xbf16>
    tpu.vector_store %arg8[%c0_43, %c0_44, %c0_45, %c0_46], %33 {strides = array<i32>} : memref<2x10x8x384xbf16, #tpu.memory_space<vmem>>, vector<2x10x8x384xbf16>,
    %35 = vector.extract_strided_slice %32 {offsets = [0, 0, 0, 0], sizes = [2, 8, 7, 96], strides = [1, 1, 1, 1]} : vector<2x8x8x96xbf16> to vector<2x8x7x96xbf16>
    %c0_47 = arith.constant 0 : index
    %c1_48 = arith.constant 1 : index
    %c1_49 = arith.constant 1 : index
    %c0_50 = arith.constant 0 : index
    %36 = vector.load %arg8[%c0_47, %c1_48, %c1_49, %c0_50] : memref<2x10x8x384xbf16, #tpu.memory_space<vmem>>, vector<2x8x7x96xbf16>
    tpu.vector_store %arg8[%c0_47, %c1_48, %c1_49, %c0_50], %35 {strides = array<i32>} : memref<2x10x8x384xbf16, #tpu.memory_space<vmem>>, vector<2x8x7x96xbf16>,
    %c0_51 = arith.constant 0 : index
    %c1_52 = arith.constant 1 : index
    %c0_53 = arith.constant 0 : index
    %c128_54 = arith.constant 128 : index
    %37 = vector.load %arg8[%c0_51, %c1_52, %c0_53, %c128_54] : memref<2x10x8x384xbf16, #tpu.memory_space<vmem>>, vector<2x8x8x96xbf16>
    tpu.vector_store %arg8[%c0_51, %c1_52, %c0_53, %c128_54], %32 {strides = array<i32>} : memref<2x10x8x384xbf16, #tpu.memory_space<vmem>>, vector<2x8x8x96xbf16>,
    %38 = vector.extract_strided_slice %32 {offsets = [0, 0, 1, 0], sizes = [2, 8, 7, 96], strides = [1, 1, 1, 1]} : vector<2x8x8x96xbf16> to vector<2x8x7x96xbf16>
    %c0_55 = arith.constant 0 : index
    %c1_56 = arith.constant 1 : index
    %c0_57 = arith.constant 0 : index
    %c256_58 = arith.constant 256 : index
    %39 = vector.load %arg8[%c0_55, %c1_56, %c0_57, %c256_58] : memref<2x10x8x384xbf16, #tpu.memory_space<vmem>>, vector<2x8x7x96xbf16>
    tpu.vector_store %arg8[%c0_55, %c1_56, %c0_57, %c256_58], %38 {strides = array<i32>} : memref<2x10x8x384xbf16, #tpu.memory_space<vmem>>, vector<2x8x7x96xbf16>,
    %c0_59 = arith.constant 0 : index
    %c0_60 = arith.constant 0 : index
    %c0_61 = arith.constant 0 : index
    %c0_62 = arith.constant 0 : index
    %40 = vector.load %arg8[%c0_59, %c0_60, %c0_61, %c0_62] : memref<2x10x8x384xbf16, #tpu.memory_space<vmem>>, vector<2x8x8x384xbf16>
    %41 = vector.shape_cast %40 : vector<2x8x8x384xbf16> to vector<16x8x384xbf16>
    %c0_63 = arith.constant 0 : index
    %c0_64 = arith.constant 0 : index
    %c0_65 = arith.constant 0 : index
    %42 = vector.load %arg4[%c0_63, %c0_64, %c0_65] : memref<3x384x96xbf16, #tpu.memory_space<vmem>>, vector<1x384x96xbf16>
    %43 = vector.shape_cast %42 : vector<1x384x96xbf16> to vector<384x96xbf16>
    %cst_66 = arith.constant dense<0.000000e+00> : vector<16x8x96xf32>
    %44 = tpu.matmul %41, %43, %cst_66 {dimension_numbers = #tpu.dot_dimension_numbers<[2], [0], [0, 1], [1], [0, 0, 0, 1, 1, 1], [], []>} : vector<16x8x384xbf16>, vector<384x96xbf16>, vector<16x8x96xf32> -> vector<16x8x96xf32>
    %c0_67 = arith.constant 0 : index
    %c1_68 = arith.constant 1 : index
    %c0_69 = arith.constant 0 : index
    %c0_70 = arith.constant 0 : index
    %45 = vector.load %arg8[%c0_67, %c1_68, %c0_69, %c0_70] : memref<2x10x8x384xbf16, #tpu.memory_space<vmem>>, vector<2x8x8x384xbf16>
    %46 = vector.shape_cast %45 : vector<2x8x8x384xbf16> to vector<16x8x384xbf16>
    %c1_71 = arith.constant 1 : index
    %c0_72 = arith.constant 0 : index
    %c0_73 = arith.constant 0 : index
    %47 = vector.load %arg4[%c1_71, %c0_72, %c0_73] : memref<3x384x96xbf16, #tpu.memory_space<vmem>>, vector<1x384x96xbf16>
    %48 = vector.shape_cast %47 : vector<1x384x96xbf16> to vector<384x96xbf16>
    %cst_74 = arith.constant dense<0.000000e+00> : vector<16x8x96xf32>
    %49 = tpu.matmul %46, %48, %cst_74 {dimension_numbers = #tpu.dot_dimension_numbers<[2], [0], [0, 1], [1], [0, 0, 0, 1, 1, 1], [], []>} : vector<16x8x384xbf16>, vector<384x96xbf16>, vector<16x8x96xf32> -> vector<16x8x96xf32>
    %50 = arith.addf %44, %49 : vector<16x8x96xf32>
    %c0_75 = arith.constant 0 : index
    %c2_76 = arith.constant 2 : index
    %c0_77 = arith.constant 0 : index
    %c0_78 = arith.constant 0 : index
    %51 = vector.load %arg8[%c0_75, %c2_76, %c0_77, %c0_78] : memref<2x10x8x384xbf16, #tpu.memory_space<vmem>>, vector<2x8x8x384xbf16>
    %52 = vector.shape_cast %51 : vector<2x8x8x384xbf16> to vector<16x8x384xbf16>
    %c2_79 = arith.constant 2 : index
    %c0_80 = arith.constant 0 : index
    %c0_81 = arith.constant 0 : index
    %53 = vector.load %arg4[%c2_79, %c0_80, %c0_81] : memref<3x384x96xbf16, #tpu.memory_space<vmem>>, vector<1x384x96xbf16>
    %54 = vector.shape_cast %53 : vector<1x384x96xbf16> to vector<384x96xbf16>
    %cst_82 = arith.constant dense<0.000000e+00> : vector<16x8x96xf32>
    %55 = tpu.matmul %52, %54, %cst_82 {dimension_numbers = #tpu.dot_dimension_numbers<[2], [0], [0, 1], [1], [0, 0, 0, 1, 1, 1], [], []>} : vector<16x8x384xbf16>, vector<384x96xbf16>, vector<16x8x96xf32> -> vector<16x8x96xf32>
    %56 = arith.addf %50, %55 : vector<16x8x96xf32>
    %c0_83 = arith.constant 0 : index
    %c0_84 = arith.constant 0 : index
    %57 = vector.load %arg5[%c0_83, %c0_84] : memref<1x96xf32, #tpu.memory_space<vmem>>, vector<1x96xf32>
    %58 = vector.shape_cast %57 : vector<1x96xf32> to vector<1x1x96xf32>
    %59 = vector.broadcast %58 : vector<1x1x96xf32> to vector<16x8x96xf32>
    %60 = arith.addf %56, %59 : vector<16x8x96xf32>
    %cst_85 = arith.constant 0.000000e+00 : f32
    %61 = vector.broadcast %cst_85 : f32 to vector<16x8x96xf32>
    %62 = arith.maximumf %60, %61 : vector<16x8x96xf32>
    %63 = vector.shape_cast %62 : vector<16x8x96xf32> to vector<2x8x8x96xf32>
    %64 = arith.truncf %63 : vector<2x8x8x96xf32> to vector<2x8x8x96xbf16>
    %c0_86 = arith.constant 0 : index
    %c0_87 = arith.constant 0 : index
    %c0_88 = arith.constant 0 : index
    %c0_89 = arith.constant 0 : index
    %65 = vector.load %arg6[%c0_86, %c0_87, %c0_88, %c0_89] : memref<2x8x8x96xbf16, #tpu.memory_space<vmem>>, vector<2x8x8x96xbf16>
    tpu.vector_store %arg6[%c0_86, %c0_87, %c0_88, %c0_89], %64 {strides = array<i32>} : memref<2x8x8x96xbf16, #tpu.memory_space<vmem>>, vector<2x8x8x96xbf16>,
    return
  }
  func.func @transform_0(%arg0: i32) -> (i32, i32, i32, i32) {
    %c0_i32 = arith.constant 0 : i32
    %c0_i32_0 = arith.constant 0 : i32
    %c0_i32_1 = arith.constant 0 : i32
    %c0_i32_2 = arith.constant 0 : i32
    return %arg0, %c0_i32, %c0_i32_0, %c0_i32_1 : i32, i32, i32, i32
  }
  func.func @transform_1(%arg0: i32) -> (i32, i32, i32) {
    %c0_i32 = arith.constant 0 : i32
    %c0_i32_0 = arith.constant 0 : i32
    %c0_i32_1 = arith.constant 0 : i32
    %c0_i32_2 = arith.constant 0 : i32
    return %c0_i32, %c0_i32_0, %c0_i32_1 : i32, i32, i32
  }
  func.func @transform_2(%arg0: i32) -> (i32, i32) {
    %c0_i32 = arith.constant 0 : i32
    %c0_i32_0 = arith.constant 0 : i32
    %c0_i32_1 = arith.constant 0 : i32
    return %c0_i32, %c0_i32_0 : i32, i32
  }
  func.func @transform_3(%arg0: i32) -> (i32, i32, i32) {
    %c0_i32 = arith.constant 0 : i32
    %c0_i32_0 = arith.constant 0 : i32
    %c0_i32_1 = arith.constant 0 : i32
    %c0_i32_2 = arith.constant 0 : i32
    return %c0_i32, %c0_i32_0, %c0_i32_1 : i32, i32, i32
  }
  func.func @transform_4(%arg0: i32) -> (i32, i32) {
    %c0_i32 = arith.constant 0 : i32
    %c0_i32_0 = arith.constant 0 : i32
    %c0_i32_1 = arith.constant 0 : i32
    return %c0_i32, %c0_i32_0 : i32, i32
  }
  func.func @transform_5(%arg0: i32) -> (i32, i32, i32, i32) {
    %c0_i32 = arith.constant 0 : i32
    %c0_i32_0 = arith.constant 0 : i32
    %c0_i32_1 = arith.constant 0 : i32
    %c0_i32_2 = arith.constant 0 : i32
    return %arg0, %c0_i32, %c0_i32_0, %c0_i32_1 : i32, i32, i32, i32
  }
}

module attributes {stable_mosaic.version = 11 : i64} {
  func.func @_conv_kxk_kernel(%arg0: i32, %arg1: memref<2x8x8x48xbf16, #tpu.memory_space<vmem>>, %arg2: memref<5x640x64xbf16, #tpu.memory_space<vmem>>, %arg3: memref<1x64xf32, #tpu.memory_space<vmem>>, %arg4: memref<2x8x8x64xbf16, #tpu.memory_space<vmem>>, %arg5: memref<2x12x8x640xbf16, #tpu.memory_space<vmem>>) attributes {dimension_semantics = [#tpu.dimension_semantics<parallel>], iteration_bounds = array<i64: 1>, scalar_prefetch = 0 : i64, scratch_operands = 1 : i64, tpu.core_type = #tpu.core_type<tc>, window_params = [{transform_indices = @transform_0, window_bounds = array<i64: 2, 8, 8, 48>}, {pipeline_mode = #tpu.pipeline_mode<synchronous>, transform_indices = @transform_1, window_bounds = array<i64: 5, 640, 64>}, {pipeline_mode = #tpu.pipeline_mode<synchronous>, transform_indices = @transform_2, window_bounds = array<i64: 1, 64>}, {transform_indices = @transform_3, window_bounds = array<i64: 2, 8, 8, 64>}]} {
    %c0 = arith.constant 0 : index
    %c0_0 = arith.constant 0 : index
    %c0_1 = arith.constant 0 : index
    %c0_2 = arith.constant 0 : index
    %0 = vector.load %arg1[%c0, %c0_0, %c0_1, %c0_2] : memref<2x8x8x48xbf16, #tpu.memory_space<vmem>>, vector<2x8x8x48xbf16>
    %cst = arith.constant 0.000000e+00 : bf16
    %1 = vector.broadcast %cst : bf16 to vector<2x12x8x640xbf16>
    %c0_3 = arith.constant 0 : index
    %c0_4 = arith.constant 0 : index
    %c0_5 = arith.constant 0 : index
    %c0_6 = arith.constant 0 : index
    %2 = vector.load %arg5[%c0_3, %c0_4, %c0_5, %c0_6] : memref<2x12x8x640xbf16, #tpu.memory_space<vmem>>, vector<2x12x8x640xbf16>
    tpu.vector_store %arg5[%c0_3, %c0_4, %c0_5, %c0_6], %1 {strides = array<i32>} : memref<2x12x8x640xbf16, #tpu.memory_space<vmem>>, vector<2x12x8x640xbf16>,
    %3 = vector.extract_strided_slice %0 {offsets = [0, 0, 0, 0], sizes = [2, 8, 6, 48], strides = [1, 1, 1, 1]} : vector<2x8x8x48xbf16> to vector<2x8x6x48xbf16>
    %c0_7 = arith.constant 0 : index
    %c2 = arith.constant 2 : index
    %c2_8 = arith.constant 2 : index
    %c0_9 = arith.constant 0 : index
    %4 = vector.load %arg5[%c0_7, %c2, %c2_8, %c0_9] : memref<2x12x8x640xbf16, #tpu.memory_space<vmem>>, vector<2x8x6x48xbf16>
    tpu.vector_store %arg5[%c0_7, %c2, %c2_8, %c0_9], %3 {strides = array<i32>} : memref<2x12x8x640xbf16, #tpu.memory_space<vmem>>, vector<2x8x6x48xbf16>,
    %5 = vector.extract_strided_slice %0 {offsets = [0, 0, 0, 0], sizes = [2, 8, 7, 48], strides = [1, 1, 1, 1]} : vector<2x8x8x48xbf16> to vector<2x8x7x48xbf16>
    %c0_10 = arith.constant 0 : index
    %c2_11 = arith.constant 2 : index
    %c1 = arith.constant 1 : index
    %c128 = arith.constant 128 : index
    %6 = vector.load %arg5[%c0_10, %c2_11, %c1, %c128] : memref<2x12x8x640xbf16, #tpu.memory_space<vmem>>, vector<2x8x7x48xbf16>
    tpu.vector_store %arg5[%c0_10, %c2_11, %c1, %c128], %5 {strides = array<i32>} : memref<2x12x8x640xbf16, #tpu.memory_space<vmem>>, vector<2x8x7x48xbf16>,
    %c0_12 = arith.constant 0 : index
    %c2_13 = arith.constant 2 : index
    %c0_14 = arith.constant 0 : index
    %c256 = arith.constant 256 : index
    %7 = vector.load %arg5[%c0_12, %c2_13, %c0_14, %c256] : memref<2x12x8x640xbf16, #tpu.memory_space<vmem>>, vector<2x8x8x48xbf16>
    tpu.vector_store %arg5[%c0_12, %c2_13, %c0_14, %c256], %0 {strides = array<i32>} : memref<2x12x8x640xbf16, #tpu.memory_space<vmem>>, vector<2x8x8x48xbf16>,
    %8 = vector.extract_strided_slice %0 {offsets = [0, 0, 1, 0], sizes = [2, 8, 7, 48], strides = [1, 1, 1, 1]} : vector<2x8x8x48xbf16> to vector<2x8x7x48xbf16>
    %c0_15 = arith.constant 0 : index
    %c2_16 = arith.constant 2 : index
    %c0_17 = arith.constant 0 : index
    %c384 = arith.constant 384 : index
    %9 = vector.load %arg5[%c0_15, %c2_16, %c0_17, %c384] : memref<2x12x8x640xbf16, #tpu.memory_space<vmem>>, vector<2x8x7x48xbf16>
    tpu.vector_store %arg5[%c0_15, %c2_16, %c0_17, %c384], %8 {strides = array<i32>} : memref<2x12x8x640xbf16, #tpu.memory_space<vmem>>, vector<2x8x7x48xbf16>,
    %10 = vector.extract_strided_slice %0 {offsets = [0, 0, 2, 0], sizes = [2, 8, 6, 48], strides = [1, 1, 1, 1]} : vector<2x8x8x48xbf16> to vector<2x8x6x48xbf16>
    %c0_18 = arith.constant 0 : index
    %c2_19 = arith.constant 2 : index
    %c0_20 = arith.constant 0 : index
    %c512 = arith.constant 512 : index
    %11 = vector.load %arg5[%c0_18, %c2_19, %c0_20, %c512] : memref<2x12x8x640xbf16, #tpu.memory_space<vmem>>, vector<2x8x6x48xbf16>
    tpu.vector_store %arg5[%c0_18, %c2_19, %c0_20, %c512], %10 {strides = array<i32>} : memref<2x12x8x640xbf16, #tpu.memory_space<vmem>>, vector<2x8x6x48xbf16>,
    %c0_21 = arith.constant 0 : index
    %c0_22 = arith.constant 0 : index
    %c0_23 = arith.constant 0 : index
    %c0_24 = arith.constant 0 : index
    %12 = vector.load %arg5[%c0_21, %c0_22, %c0_23, %c0_24] : memref<2x12x8x640xbf16, #tpu.memory_space<vmem>>, vector<2x8x8x640xbf16>
    %13 = vector.shape_cast %12 : vector<2x8x8x640xbf16> to vector<16x8x640xbf16>
    %c0_25 = arith.constant 0 : index
    %c0_26 = arith.constant 0 : index
    %c0_27 = arith.constant 0 : index
    %14 = vector.load %arg2[%c0_25, %c0_26, %c0_27] : memref<5x640x64xbf16, #tpu.memory_space<vmem>>, vector<1x640x64xbf16>
    %15 = vector.shape_cast %14 : vector<1x640x64xbf16> to vector<640x64xbf16>
    %cst_28 = arith.constant dense<0.000000e+00> : vector<16x8x64xf32>
    %16 = tpu.matmul %13, %15, %cst_28 {dimension_numbers = #tpu.dot_dimension_numbers<[2], [0], [0, 1], [1], [0, 0, 0, 1, 1, 1], [], []>} : vector<16x8x640xbf16>, vector<640x64xbf16>, vector<16x8x64xf32> -> vector<16x8x64xf32>
    %c0_29 = arith.constant 0 : index
    %c1_30 = arith.constant 1 : index
    %c0_31 = arith.constant 0 : index
    %c0_32 = arith.constant 0 : index
    %17 = vector.load %arg5[%c0_29, %c1_30, %c0_31, %c0_32] : memref<2x12x8x640xbf16, #tpu.memory_space<vmem>>, vector<2x8x8x640xbf16>
    %18 = vector.shape_cast %17 : vector<2x8x8x640xbf16> to vector<16x8x640xbf16>
    %c1_33 = arith.constant 1 : index
    %c0_34 = arith.constant 0 : index
    %c0_35 = arith.constant 0 : index
    %19 = vector.load %arg2[%c1_33, %c0_34, %c0_35] : memref<5x640x64xbf16, #tpu.memory_space<vmem>>, vector<1x640x64xbf16>
    %20 = vector.shape_cast %19 : vector<1x640x64xbf16> to vector<640x64xbf16>
    %cst_36 = arith.constant dense<0.000000e+00> : vector<16x8x64xf32>
    %21 = tpu.matmul %18, %20, %cst_36 {dimension_numbers = #tpu.dot_dimension_numbers<[2], [0], [0, 1], [1], [0, 0, 0, 1, 1, 1], [], []>} : vector<16x8x640xbf16>, vector<640x64xbf16>, vector<16x8x64xf32> -> vector<16x8x64xf32>
    %22 = arith.addf %16, %21 : vector<16x8x64xf32>
    %c0_37 = arith.constant 0 : index
    %c2_38 = arith.constant 2 : index
    %c0_39 = arith.constant 0 : index
    %c0_40 = arith.constant 0 : index
    %23 = vector.load %arg5[%c0_37, %c2_38, %c0_39, %c0_40] : memref<2x12x8x640xbf16, #tpu.memory_space<vmem>>, vector<2x8x8x640xbf16>
    %24 = vector.shape_cast %23 : vector<2x8x8x640xbf16> to vector<16x8x640xbf16>
    %c2_41 = arith.constant 2 : index
    %c0_42 = arith.constant 0 : index
    %c0_43 = arith.constant 0 : index
    %25 = vector.load %arg2[%c2_41, %c0_42, %c0_43] : memref<5x640x64xbf16, #tpu.memory_space<vmem>>, vector<1x640x64xbf16>
    %26 = vector.shape_cast %25 : vector<1x640x64xbf16> to vector<640x64xbf16>
    %cst_44 = arith.constant dense<0.000000e+00> : vector<16x8x64xf32>
    %27 = tpu.matmul %24, %26, %cst_44 {dimension_numbers = #tpu.dot_dimension_numbers<[2], [0], [0, 1], [1], [0, 0, 0, 1, 1, 1], [], []>} : vector<16x8x640xbf16>, vector<640x64xbf16>, vector<16x8x64xf32> -> vector<16x8x64xf32>
    %28 = arith.addf %22, %27 : vector<16x8x64xf32>
    %c0_45 = arith.constant 0 : index
    %c3 = arith.constant 3 : index
    %c0_46 = arith.constant 0 : index
    %c0_47 = arith.constant 0 : index
    %29 = vector.load %arg5[%c0_45, %c3, %c0_46, %c0_47] : memref<2x12x8x640xbf16, #tpu.memory_space<vmem>>, vector<2x8x8x640xbf16>
    %30 = vector.shape_cast %29 : vector<2x8x8x640xbf16> to vector<16x8x640xbf16>
    %c3_48 = arith.constant 3 : index
    %c0_49 = arith.constant 0 : index
    %c0_50 = arith.constant 0 : index
    %31 = vector.load %arg2[%c3_48, %c0_49, %c0_50] : memref<5x640x64xbf16, #tpu.memory_space<vmem>>, vector<1x640x64xbf16>
    %32 = vector.shape_cast %31 : vector<1x640x64xbf16> to vector<640x64xbf16>
    %cst_51 = arith.constant dense<0.000000e+00> : vector<16x8x64xf32>
    %33 = tpu.matmul %30, %32, %cst_51 {dimension_numbers = #tpu.dot_dimension_numbers<[2], [0], [0, 1], [1], [0, 0, 0, 1, 1, 1], [], []>} : vector<16x8x640xbf16>, vector<640x64xbf16>, vector<16x8x64xf32> -> vector<16x8x64xf32>
    %34 = arith.addf %28, %33 : vector<16x8x64xf32>
    %c0_52 = arith.constant 0 : index
    %c4 = arith.constant 4 : index
    %c0_53 = arith.constant 0 : index
    %c0_54 = arith.constant 0 : index
    %35 = vector.load %arg5[%c0_52, %c4, %c0_53, %c0_54] : memref<2x12x8x640xbf16, #tpu.memory_space<vmem>>, vector<2x8x8x640xbf16>
    %36 = vector.shape_cast %35 : vector<2x8x8x640xbf16> to vector<16x8x640xbf16>
    %c4_55 = arith.constant 4 : index
    %c0_56 = arith.constant 0 : index
    %c0_57 = arith.constant 0 : index
    %37 = vector.load %arg2[%c4_55, %c0_56, %c0_57] : memref<5x640x64xbf16, #tpu.memory_space<vmem>>, vector<1x640x64xbf16>
    %38 = vector.shape_cast %37 : vector<1x640x64xbf16> to vector<640x64xbf16>
    %cst_58 = arith.constant dense<0.000000e+00> : vector<16x8x64xf32>
    %39 = tpu.matmul %36, %38, %cst_58 {dimension_numbers = #tpu.dot_dimension_numbers<[2], [0], [0, 1], [1], [0, 0, 0, 1, 1, 1], [], []>} : vector<16x8x640xbf16>, vector<640x64xbf16>, vector<16x8x64xf32> -> vector<16x8x64xf32>
    %40 = arith.addf %34, %39 : vector<16x8x64xf32>
    %c0_59 = arith.constant 0 : index
    %c0_60 = arith.constant 0 : index
    %41 = vector.load %arg3[%c0_59, %c0_60] : memref<1x64xf32, #tpu.memory_space<vmem>>, vector<1x64xf32>
    %42 = vector.shape_cast %41 : vector<1x64xf32> to vector<1x1x64xf32>
    %43 = vector.broadcast %42 : vector<1x1x64xf32> to vector<16x8x64xf32>
    %44 = arith.addf %40, %43 : vector<16x8x64xf32>
    %cst_61 = arith.constant 0.000000e+00 : f32
    %45 = vector.broadcast %cst_61 : f32 to vector<16x8x64xf32>
    %46 = arith.maximumf %44, %45 : vector<16x8x64xf32>
    %47 = vector.shape_cast %46 : vector<16x8x64xf32> to vector<2x8x8x64xf32>
    %48 = arith.truncf %47 : vector<2x8x8x64xf32> to vector<2x8x8x64xbf16>
    %c0_62 = arith.constant 0 : index
    %c0_63 = arith.constant 0 : index
    %c0_64 = arith.constant 0 : index
    %c0_65 = arith.constant 0 : index
    %49 = vector.load %arg4[%c0_62, %c0_63, %c0_64, %c0_65] : memref<2x8x8x64xbf16, #tpu.memory_space<vmem>>, vector<2x8x8x64xbf16>
    tpu.vector_store %arg4[%c0_62, %c0_63, %c0_64, %c0_65], %48 {strides = array<i32>} : memref<2x8x8x64xbf16, #tpu.memory_space<vmem>>, vector<2x8x8x64xbf16>,
    return
  }
  func.func @transform_0(%arg0: i32) -> (i32, i32, i32, i32) {
    %c0_i32 = arith.constant 0 : i32
    %c0_i32_0 = arith.constant 0 : i32
    %c0_i32_1 = arith.constant 0 : i32
    %c0_i32_2 = arith.constant 0 : i32
    return %arg0, %c0_i32, %c0_i32_0, %c0_i32_1 : i32, i32, i32, i32
  }
  func.func @transform_1(%arg0: i32) -> (i32, i32, i32) {
    %c0_i32 = arith.constant 0 : i32
    %c0_i32_0 = arith.constant 0 : i32
    %c0_i32_1 = arith.constant 0 : i32
    %c0_i32_2 = arith.constant 0 : i32
    return %c0_i32, %c0_i32_0, %c0_i32_1 : i32, i32, i32
  }
  func.func @transform_2(%arg0: i32) -> (i32, i32) {
    %c0_i32 = arith.constant 0 : i32
    %c0_i32_0 = arith.constant 0 : i32
    %c0_i32_1 = arith.constant 0 : i32
    return %c0_i32, %c0_i32_0 : i32, i32
  }
  func.func @transform_3(%arg0: i32) -> (i32, i32, i32, i32) {
    %c0_i32 = arith.constant 0 : i32
    %c0_i32_0 = arith.constant 0 : i32
    %c0_i32_1 = arith.constant 0 : i32
    %c0_i32_2 = arith.constant 0 : i32
    return %arg0, %c0_i32, %c0_i32_0, %c0_i32_1 : i32, i32, i32, i32
  }
}

</mosaic_0001>

<bundles_post_ra>
// kernel: inception_a_forward.3
= control target key start
LH: loop header
LB: loop body
LE: loop exit
PB: predicated region body
PF: predicated region fallthrough
CT: control target
= control target key end

     0   :  { %v1224_v1 = vmov 0   ;;  %vm90_vm0 = vcmask 130048   ;;  %vm612_vm1 = vcmask 123904   ;;  %v1225_v11 = vmov 0.0   ;;  %s1227_s29 = smov 64   ;;  %s1228_s12 = smov 16   ;;  %s1805_s1 = inlined_call_operand.vmem [shape: bf16[16,192], index: 1, kind: input, shape index: {}]   ;;  %s1806_s0 = inlined_call_operand.vmem [shape: bf16[2,8,8,16], index: 0, kind: input, shape index: {}]   ;;  %s1807_s2 = inlined_call_operand.vmem [shape: f32[1,176], index: 2, kind: input, shape index: {}]   ;;  %s1808_s4 = inlined_call_operand.vmem [shape: bf16[2,8,8,64], index: 4, kind: output, shape index: {0}]   ;;  %s1809_s5 = inlined_call_operand.vmem [shape: bf16[2,8,8,48], index: 5, kind: output, shape index: {1}]   ;;  %s1810_s6 = inlined_call_operand.vmem [shape: bf16[2,8,8,64], index: 6, kind: output, shape index: {2}]   ;;  %s1811_s3 = inlined_call_operand.vmem [shape: f32[1,16], index: 3, kind: input, shape index: {}]   ;;  %s1812_s7 = inlined_call_operand.vmem [shape: bf16[2,8,8,16], index: 7, kind: output, shape index: {3}]  }
   0x1   :  { %v1213_v0 = vld [vmem:[%s1805_s1 + $0x4] ss:$8 sps:$4 sm:$0xff]   ;;  %147 = vmatprep.mubr.bf16.mxu0 %v1224_v1  ;;  %187 = vmatprep.mubr.bf16.mxu1 %v1224_v1  ;;  %v1215_v2 = vld [vmem:[%s1805_s1] ss:$8 sps:$4 sm:$0xff]   ;;  %v1220_v7 = vld [vmem:[%s1806_s0 + $0x10] sm:$0xff]   ;;  %611 = vst.msk [vmem:[#allocation2] sm:$0xff] %vm90_vm0, %v1225_v11  ;;  %v230_v12 = vlaneseq }
   0x2   :  { %115 = vmatprep.subr.bf16.mxu0 %v1213_v0  ;;  %1206 = vmatprep.subr.bf16.mxu1 %v1213_v0  ;;  %v1216_v3 = vld [vmem:[%s1806_s0] sm:$0xff]   ;;  %v1218_v5 = vld [vmem:[%s1806_s0 + $0x8] sm:$0xff]   ;;  %v1221_v8 = vld [vmem:[%s1806_s0 + $0x30] sm:$0xff]   ;;  %613 = vst.msk [vmem:[#allocation2 + $0x8] sm:$0x3] %vm612_vm1, %v1225_v11  ;;  %vm320_vm2 = vcmask 519168  }
   0x3   :  { %116 = vmatpush1.bf16.msra.mxu0 %v1215_v2  ;;  %1207 = vmatpush1.bf16.msra.mxu1 %v1215_v2  ;;  %v1217_v4 = vld [vmem:[%s1806_s0 + $0x20] sm:$0xff]   ;;  %v1219_v6 = vld [vmem:[%s1806_s0 + $0x28] sm:$0xff]   ;;  %v1222_v9 = vld [vmem:[%s1806_s0 + $0x18] sm:$0xff]   ;;  %614 = vst.msk [vmem:[#allocation2 + $0x10] sm:$0xff] %vm90_vm0, %v1225_v11  ;;  %v231_v13 = vshrl.u32 %v230_v12, 7  ;;  %vm433_vm3 = vcmask 388096  }
   0x4   :  { %v1223_v10 = vld [vmem:[%s1806_s0 + $0x38] sm:$0xff]   ;;  %615 = vst.msk [vmem:[#allocation2 + $0x18] sm:$0x3] %vm612_vm1, %v1225_v11  ;;  %631 = vst.msk [vmem:[#allocation2 + $0x98] sm:$0x3] %vm612_vm1, %v1225_v11  ;;  %vm857_vm4 = vcmask 125952  }
   0x5   :  { %616 = vst.msk [vmem:[#allocation2 + $0x20] sm:$0xff] %vm90_vm0, %v1225_v11  ;;  %618 = vst.msk [vmem:[#allocation2 + $0x30] sm:$0xff] %vm90_vm0, %v1225_v11  ;;  %v232_v14 = vsub.s32 0, %v231_v13  ;;  %v228_v15 = vld [vmem:[%s1807_s2] sm:$0x3]  ;;  %v236_v16 = vsub.s32 1, %v231_v13 }
   0x6   :  { %1124 = vmatmul.mubr.msk.bf16.vlgmr.msra.gmra.mrb[0].mxu0 %vm90_vm0, %v1216_v3  ;;  %1128 = vmatmul.mubr.msk.bf16.vlgmr.msra.gmra.mrb[0].mxu1 %vm90_vm0, %v1217_v4  ;;  %617 = vst.msk [vmem:[#allocation2 + $0x28] sm:$0x3] %vm612_vm1, %v1225_v11  ;;  %619 = vst.msk [vmem:[#allocation2 + $0x38] sm:$0x3] %vm612_vm1, %v1225_v11  ;;  %s1226_s2 = smov 80  }
   0x7   :  { %157 = vmatprep.mubr.bf16.mxu0 %v1224_v1  ;;  %197 = vmatprep.mubr.bf16.mxu1 %v1224_v1  ;;  %620 = vst.msk [vmem:[#allocation2 + $0x40] sm:$0xff] %vm90_vm0, %v1225_v11  ;;  %622 = vst.msk [vmem:[#allocation2 + $0x50] sm:$0xff] %vm90_vm0, %v1225_v11  ;;  %v1330_v17 = vrot.slane %v228_v15, %v232_v14  ;;  %v1332_v18 = vrot.slane %v228_v15, %v236_v16 }
   0x8   :  { %621 = vst.msk [vmem:[#allocation2 + $0x48] sm:$0x3] %vm612_vm1, %v1225_v11  ;;  %623 = vst.msk [vmem:[#allocation2 + $0x58] sm:$0x3] %vm612_vm1, %v1225_v11 }
   0x9   :  { %624 = vst.msk [vmem:[#allocation2 + $0x60] sm:$0xff] %vm90_vm0, %v1225_v11  ;;  %626 = vst.msk [vmem:[#allocation2 + $0x70] sm:$0xff] %vm90_vm0, %v1225_v11 }
   0xa   :  { %625 = vst.msk [vmem:[#allocation2 + $0x68] sm:$0x3] %vm612_vm1, %v1225_v11  ;;  %627 = vst.msk [vmem:[#allocation2 + $0x78] sm:$0x3] %vm612_vm1, %v1225_v11 }
   0xb   :  { %628 = vst.msk [vmem:[#allocation2 + $0x80] sm:$0xff] %vm90_vm0, %v1225_v11  ;;  %630 = vst.msk [vmem:[#allocation2 + $0x90] sm:$0xff] %vm90_vm0, %v1225_v11 }
   0xc   :  { %629 = vst.msk [vmem:[#allocation2 + $0x88] sm:$0x3] %vm612_vm1, %v1225_v11 }
   0xe   :  { %1125 = vmatmul.mubr.msk.bf16.gmra.mrb[4].mxu0 %vm90_vm0, %v1218_v5  ;;  %1129 = vmatmul.mubr.msk.bf16.gmra.mrb[4].mxu1 %vm90_vm0, %v1219_v6 }
   0xf   :  { %167 = vmatprep.mubr.bf16.mxu0 %v1224_v1  ;;  %207 = vmatprep.mubr.bf16.mxu1 %v1224_v1 }
  0x16   :  { %1126 = vmatmul.mubr.msk.bf16.gmra.mrb[8].mxu0 %vm90_vm0, %v1220_v7  ;;  %1130 = vmatmul.mubr.msk.bf16.gmra.mrb[8].mxu1 %vm90_vm0, %v1221_v8 }
  0x17   :  { %177 = vmatprep.mubr.bf16.mxu0 %v1224_v1  ;;  %217 = vmatprep.mubr.bf16.mxu1 %v1224_v1 }
  0x1e   :  { %1127 = vmatmul.mubr.msk.bf16.gmra.mrb[12].mxu0 %vm90_vm0, %v1222_v9  ;;  %1131 = vmatmul.mubr.msk.bf16.gmra.mrb[12].mxu1 %vm90_vm0, %v1223_v10 }
  0xd9   :  { %v149_v19 = vpop.f32.mrb[0].mxu0  ;;  %v189_v20 = vpop.f32.mrb[0].mxu1 }
  0xda   :  { %v240_v21 = vadd.f32 %v1330_v17, %v149_v19  ;;  %v256_v22 = vadd.f32 %v1330_v17, %v189_v20  ;;  %v151_v23 = vpop.f32.mrb[1].mxu0  ;;  %v191_v24 = vpop.f32.mrb[1].mxu1 }
  0xdb   :  { %v241_v25 = vadd.f32 %v1332_v18, %v151_v23  ;;  %v257_v26 = vadd.f32 %v1332_v18, %v191_v24  ;;  %v193_v27 = vpop.f32.mrb[2].mxu1  ;;  %640 = vrot.lane.b32.xlu0 %v151_v23, %s1226_s2  ;;  %v153_v28 = vpop.f32.mrb[2].mxu0 }
  0xdc   :  { %v272_v29 = vmax.f32 %v240_v21, 0.0  ;;  %v288_v30 = vmax.f32 %v256_v22, 0.0  ;;  %v258_v31 = vadd.f32 %v1330_v17, %v193_v27  ;;  %v242_v32 = vadd.f32 %v1330_v17, %v153_v28  ;;  %v155_v33 = vpop.f32.mrb[3].mxu0  ;;  %v195_v34 = vpop.f32.mrb[3].mxu1 }
  0xdd   :  { %v273_v35 = vmax.f32 %v241_v25, 0.0  ;;  %v289_v36 = vmax.f32 %v257_v26, 0.0  ;;  %v243_v37 = vadd.f32 %v1332_v18, %v155_v33  ;;  %v259_v38 = vadd.f32 %v1332_v18, %v195_v34  ;;  %876 = vrot.lane.b32.xlu1 %v195_v34, %s1226_s2 }
  0xde   :  { %v304_v39 = vpack.c.bf16 %v272_v29, %v272_v29  ;;  %v1344_v40 = vpack.c.bf16 %v288_v30, %v288_v30  ;;  %v290_v41 = vmax.f32 %v258_v31, 0.0  ;;  %v274_v42 = vmax.f32 %v242_v32, 0.0 }
  0xdf   :  { %v275_v43 = vmax.f32 %v243_v37, 0.0  ;;  %v291_v44 = vmax.f32 %v259_v38, 0.0  ;;  %874 = vrot.lane.b32.xlu0 %v191_v24, %s1226_s2  ;;  %v1190_v45 = vpack.c.bf16 %v273_v35, %v272_v29  ;;  %v1347_v46 = vpack.c.bf16 %v289_v36, %v288_v30 }
  0xe0   :  { %321 = vst.msk [vmem:[%s1808_s4] sm:$0xf] %vm320_vm2, %v304_v39  ;;  %329 = vst.msk [vmem:[%s1808_s4 + $0x20] sm:$0xf] %vm320_vm2, %v1344_v40  ;;  %v1358_v47 = vpack.c.bf16 %v290_v41, %v290_v41  ;;  %v305_v48 = vpack.c.bf16 %v274_v42, %v274_v42 }
  0xe1   :  { %v159_v49 = vpop.f32.mrb[4].mxu0  ;;  %v1191_v50 = vpack.c.bf16 %v275_v43, %v274_v42  ;;  %v1360_v51 = vpack.c.bf16 %v291_v44, %v290_v41  ;;  %v199_v52 = vpop.f32.mrb[4].mxu1 }
  0xe2   :  { %330 = vst.msk [vmem:[%s1808_s4 + $0x24] sm:$0xf] %vm320_vm2, %v1358_v47  ;;  %322 = vst.msk [vmem:[%s1808_s4 + $0x4] sm:$0xf] %vm320_vm2, %v305_v48  ;;  %v244_v53 = vadd.f32 %v1330_v17, %v159_v49  ;;  %387 = vrot.lane.b32.xlu1 %v305_v48, %s1227_s29  ;;  %v161_v54 = vpop.f32.mrb[5].mxu0  ;;  %v260_v55 = vadd.f32 %v1330_v17, %v199_v52  ;;  %v1374_v56 = vpop.f32.mrb[5].mxu1 }
  0xe3   :  { %v245_v57 = vadd.f32 %v1332_v18, %v161_v54  ;;  %642 = vrot.lane.b32.xlu0 %v155_v33, %s1226_s2  ;;  %v163_v58 = vpop.f32.mrb[6].mxu0  ;;  %v261_v59 = vadd.f32 %v1332_v18, %v1374_v56  ;;  %v203_v60 = vpop.f32.mrb[6].mxu1 }
  0xe4   :  { %v276_v61 = vmax.f32 %v244_v53, 0.0  ;;  %v246_v62 = vadd.f32 %v1330_v17, %v163_v58  ;;  %v1381_v63 = vpop.f32.mrb[7].mxu0  ;;  %v292_v0 = vmax.f32 %v260_v55, 0.0  ;;  %v262_v1 = vadd.f32 %v1330_v17, %v203_v60  ;;  %v1384_v2 = vpop.f32.mrb[7].mxu1 }
  0xe5   :  { %v277_v3 = vmax.f32 %v245_v57, 0.0  ;;  %v247_v4 = vadd.f32 %v1332_v18, %v1381_v63  ;;  %v293_v5 = vmax.f32 %v261_v59, 0.0  ;;  %v263_v6 = vadd.f32 %v1332_v18, %v1384_v2 }
  0xe6   :  { %v1390_v7 = vpack.c.bf16 %v276_v61, %v276_v61  ;;  %v278_v8 = vmax.f32 %v246_v62, 0.0  ;;  %644 = vrot.lane.b32.xlu1 %v161_v54, %s1226_s2  ;;  %v1393_v9 = vpack.c.bf16 %v292_v0, %v292_v0  ;;  %v294_v10 = vmax.f32 %v262_v1, 0.0 }
  0xe7   :  { %v279_v11 = vmax.f32 %v247_v4, 0.0  ;;  %385 = vrot.lane.b32.xlu0 %v304_v39, %s1227_s29  ;;  %v295_v12 = vmax.f32 %v263_v6, 0.0  ;;  %v1396_v13 = vpack.c.bf16 %v277_v3, %v276_v61  ;;  %v1398_v14 = vpack.c.bf16 %v293_v5, %v292_v0 }
  0xe8   :  { %323 = vst.msk [vmem:[%s1808_s4 + $0x8] sm:$0xf] %vm320_vm2, %v1390_v7  ;;  %v1405_v15 = vpack.c.bf16 %v278_v8, %v278_v8  ;;  %331 = vst.msk [vmem:[%s1808_s4 + $0x28] sm:$0xf] %vm320_vm2, %v1393_v9  ;;  %v1412_v16 = vpack.c.bf16 %v294_v10, %v294_v10 }
  0xe9   :  { %v1414_v19 = vpack.c.bf16 %v279_v11, %v278_v8  ;;  %v169_v20 = vpop.f32.mrb[8].mxu0  ;;  %v1416_v21 = vpack.c.bf16 %v295_v12, %v294_v10  ;;  %v209_v22 = vpop.f32.mrb[8].mxu1 }
  0xea   :  { %324 = vst.msk [vmem:[%s1808_s4 + $0xc] sm:$0xf] %vm320_vm2, %v1405_v15  ;;  %516 = vrot.lane.b32.xlu1 %v1191_v50, %s1228_s12  ;;  %332 = vst.msk [vmem:[%s1808_s4 + $0x2c] sm:$0xf] %vm320_vm2, %v1412_v16  ;;  %v248_v23 = vadd.f32 %v1330_v17, %v169_v20  ;;  %v1430_v24 = vpop.f32.mrb[9].mxu0  ;;  %v264_v25 = vadd.f32 %v1330_v17, %v209_v22  ;;  %v1433_v26 = vpop.f32.mrb[9].mxu1 }
  0xeb   :  { %514 = vrot.lane.b32.xlu0 %v1190_v45, %s1228_s12  ;;  %v249_v27 = vadd.f32 %v1332_v18, %v1430_v24  ;;  %v173_v28 = vpop.f32.mrb[10].mxu0  ;;  %v265_v29 = vadd.f32 %v1332_v18, %v1433_v26  ;;  %v213_v30 = vpop.f32.mrb[10].mxu1 }
  0xec   :  { %v280_v31 = vmax.f32 %v248_v23, 0.0  ;;  %v250_v32 = vadd.f32 %v1330_v17, %v173_v28  ;;  %v1441_v33 = vpop.f32.mrb[11].mxu0  ;;  %v296_v34 = vmax.f32 %v264_v25, 0.0  ;;  %v266_v35 = vadd.f32 %v1330_v17, %v213_v30  ;;  %v1444_v36 = vpop.f32.mrb[11].mxu1 }
  0xed   :  { %v281_v37 = vmax.f32 %v249_v27, 0.0  ;;  %v251_v38 = vadd.f32 %v1332_v18, %v1441_v33  ;;  %v297_v39 = vmax.f32 %v265_v29, 0.0  ;;  %v267_v41 = vadd.f32 %v1332_v18, %v1444_v36 }
  0xee   :  { %532 = vrot.lane.b32.xlu1 %v1360_v51, %s1228_s12  ;;  %v1452_v42 = vpack.c.bf16 %v280_v31, %v280_v31  ;;  %v282_v43 = vmax.f32 %v250_v32, 0.0  ;;  %v1454_v44 = vpack.c.bf16 %v296_v34, %v296_v34  ;;  %v298_v45 = vmax.f32 %v266_v35, 0.0 }
  0xef   :  { %530 = vrot.lane.b32.xlu0 %v1347_v46, %s1228_s12  ;;  %v283_v48 = vmax.f32 %v251_v38, 0.0  ;;  %v299_v49 = vmax.f32 %v267_v41, 0.0  ;;  %v1194_v50 = vpack.c.bf16 %v281_v37, %v280_v31  ;;  %v1202_v52 = vpack.c.bf16 %v297_v39, %v296_v34 }
  0xf0   :  { %325 = vst.msk [vmem:[%s1808_s4 + $0x10] sm:$0xf] %vm320_vm2, %v1452_v42  ;;  %v309_v51 = vpack.c.bf16 %v282_v43, %v282_v43  ;;  %333 = vst.msk [vmem:[%s1808_s4 + $0x30] sm:$0xf] %vm320_vm2, %v1454_v44  ;;  %v1468_v53 = vpack.c.bf16 %v298_v45, %v298_v45 }
  0xf1   :  { %v179_v46 = vpop.f32.mrb[12].mxu0  ;;  %v1195_v54 = vpack.c.bf16 %v283_v48, %v282_v43  ;;  %v1203_v55 = vpack.c.bf16 %v299_v49, %v298_v45  ;;  %v219_v57 = vpop.f32.mrb[12].mxu1 }
  0xf2   :  { %646 = vrot.lane.b32.xlu1 %v1381_v63, %s1226_s2  ;;  %326 = vst.msk [vmem:[%s1808_s4 + $0x14] sm:$0xf] %vm320_vm2, %v309_v51  ;;  %334 = vst.msk [vmem:[%s1808_s4 + $0x34] sm:$0xf] %vm320_vm2, %v1468_v53  ;;  %v252_v58 = vadd.f32 %v1330_v17, %v179_v46  ;;  %v181_v59 = vpop.f32.mrb[13].mxu0  ;;  %v268_v60 = vadd.f32 %v1330_v17, %v219_v57  ;;  %v221_v61 = vpop.f32.mrb[13].mxu1 }
  0xf3   :  { %878 = vrot.lane.b32.xlu0 %v1374_v56, %s1226_s2  ;;  %v253_v62 = vadd.f32 %v1332_v18, %v181_v59  ;;  %v183_v63 = vpop.f32.mrb[14].mxu0  ;;  %v269_v0 = vadd.f32 %v1332_v18, %v221_v61  ;;  %v223_v1 = vpop.f32.mrb[14].mxu1 }
  0xf4   :  { %v284_v3 = vmax.f32 %v252_v58, 0.0  ;;  %v254_v4 = vadd.f32 %v1330_v17, %v183_v63  ;;  %v185_v5 = vpop.f32.mrb[15].mxu0  ;;  %v300_v6 = vmax.f32 %v268_v60, 0.0  ;;  %v270_v8 = vadd.f32 %v1330_v17, %v223_v1  ;;  %v225_v10 = vpop.f32.mrb[15].mxu1 }
  0xf5   :  { %v285_v11 = vmax.f32 %v253_v62, 0.0  ;;  %v255_v12 = vadd.f32 %v1332_v18, %v185_v5  ;;  %v301_v20 = vmax.f32 %v269_v0, 0.0  ;;  %v271_v56 = vadd.f32 %v1332_v18, %v225_v10 }
  0xf6   :  { %880 = vrot.lane.b32.xlu1 %v1384_v2, %s1226_s2  ;;  %v310_v22 = vpack.c.bf16 %v284_v3, %v284_v3  ;;  %v286_v23 = vmax.f32 %v254_v4, 0.0  ;;  %v318_v25 = vpack.c.bf16 %v300_v6, %v300_v6  ;;  %v302_v27 = vmax.f32 %v270_v8, 0.0 }
  0xf7   :  { %518 = vrot.lane.b32.xlu0 %v1396_v13, %s1228_s12  ;;  %v287_v28 = vmax.f32 %v255_v12, 0.0  ;;  %v303_v29 = vmax.f32 %v271_v56, 0.0  ;;  %v1196_v17 = vpack.c.bf16 %v285_v11, %v284_v3  ;;  %v1204_v30 = vpack.c.bf16 %v301_v20, %v300_v6  ;;  %v705_v13 = vld [vmem:[#allocation2 + $0x2] sm:$0xff]  ;;  %v1586_v11 = vld [vmem:[%s1811_s3] ss:$0 sm:$0xff] }
  0xf8   :  { %327 = vst.msk [vmem:[%s1808_s4 + $0x18] sm:$0xf] %vm320_vm2, %v310_v22  ;;  %v311_v18 = vpack.c.bf16 %v286_v23, %v286_v23  ;;  %335 = vst.msk [vmem:[%s1808_s4 + $0x38] sm:$0xf] %vm320_vm2, %v318_v25  ;;  %v319_v2 = vpack.c.bf16 %v302_v27, %v302_v27 }
  0xf9   :  { %v1197_v31 = vpack.c.bf16 %v287_v28, %v286_v23  ;;  %v1205_v32 = vpack.c.bf16 %v303_v29, %v302_v27 }
  0xfa   :  { %520 = vrot.lane.b32.xlu1 %v1414_v19, %s1228_s12  ;;  %328 = vst.msk [vmem:[%s1808_s4 + $0x1c] sm:$0xf] %vm320_vm2, %v311_v18  ;;  %336 = vst.msk [vmem:[%s1808_s4 + $0x3c] sm:$0xf] %vm320_vm2, %v319_v2 }
  0xfb   :  { %534 = vrot.lane.b32.xlu0 %v1398_v14, %s1228_s12 }
  0xfe   :  { %536 = vrot.lane.b32.xlu1 %v1416_v21, %s1228_s12 }
  0xff   :  { %648 = vrot.lane.b32.xlu0 %v1430_v24, %s1226_s2 }
 0x102   :  { %650 = vrot.lane.b32.xlu1 %v1441_v33, %s1226_s2 }
 0x103   :  { %882 = vrot.lane.b32.xlu0 %v1433_v26, %s1226_s2 }
 0x106   :  { %884 = vrot.lane.b32.xlu1 %v1444_v36, %s1226_s2 }
 0x107   :  { %522 = vrot.lane.b32.xlu0 %v1194_v50, %s1228_s12 }
 0x10a   :  { %391 = vrot.lane.b32.xlu1 %v1405_v15, %s1227_s29 }
 0x10b   :  { %538 = vrot.lane.b32.xlu0 %v1202_v52, %s1228_s12 }
 0x10e   :  { %524 = vrot.lane.b32.xlu1 %v1195_v54, %s1228_s12 }
 0x10f   :  { %652 = vrot.lane.b32.xlu0 %v181_v59, %s1226_s2 }
 0x112   :  { %540 = vrot.lane.b32.xlu1 %v1203_v55, %s1228_s12 }
 0x113   :  { %389 = vrot.lane.b32.xlu0 %v1390_v7, %s1227_s29 }
 0x116   :  { %654 = vrot.lane.b32.xlu1 %v185_v5, %s1226_s2 }
 0x117   :  { %886 = vrot.lane.b32.xlu0 %v221_v61, %s1226_s2 }
 0x11a   :  { %395 = vrot.lane.b32.xlu1 %v309_v51, %s1227_s29 }
 0x11b   :  { %393 = vrot.lane.b32.xlu0 %v1452_v42, %s1227_s29 }
 0x11e   :  { %888 = vrot.lane.b32.xlu1 %v225_v10, %s1226_s2 }
 0x11f   :  { %401 = vrot.lane.b32.xlu0 %v1344_v40, %s1227_s29  ;;  %v673_v40 = vld [vmem:[#allocation2] sm:$0xff] }
 0x122   :  { %403 = vrot.lane.b32.xlu1 %v1358_v47, %s1227_s29  ;;  %v689_v47 = vld [vmem:[#allocation2 + $0x1] sm:$0xff] }
 0x123   :  { %405 = vrot.lane.b32.xlu0 %v1393_v9, %s1227_s29  ;;  %v697_v9 = vadd.f32 %v689_v47, %v673_v40 }
 0x126   :  { %407 = vrot.lane.b32.xlu1 %v1412_v16, %s1227_s29  ;;  %v713_v16 = vadd.f32 %v705_v13, %v697_v9 }
 0x127   :  { %409 = vrot.lane.b32.xlu0 %v1454_v44, %s1227_s29 }
 0x12a   :  { %411 = vrot.lane.b32.xlu1 %v1468_v53, %s1227_s29 }
 0x12b   :  { %397 = vrot.lane.b32.xlu0 %v310_v22, %s1227_s29 }
 0x12e   :  { %399 = vrot.lane.b32.xlu1 %v311_v18, %s1227_s29 }
 0x12f   :  { %526 = vrot.lane.b32.xlu0 %v1196_v17, %s1228_s12 }
 0x132   :  { %528 = vrot.lane.b32.xlu1 %v1197_v31, %s1228_s12 }
 0x133   :  { %542 = vrot.lane.b32.xlu0 %v1204_v30, %s1228_s12 }
 0x136   :  { %544 = vrot.lane.b32.xlu1 %v1205_v32, %s1228_s12 }
 0x137   :  { %413 = vrot.lane.b32.xlu0 %v318_v25, %s1227_s29 }
 0x13a   :  { %415 = vrot.lane.b32.xlu1 %v319_v2, %s1227_s29 }
 0x14d   :  { %v641_v7 = vpop.permute.xlu0 %640 }
 0x14e   :  { %665 = vst.msk [vmem:[#allocation2 + $0x11] sm:$0xff] %vm90_vm0, %v641_v7 }
 0x14f   :  { %v877_v14 = vpop.permute.xlu1 %876 }
 0x151   :  { %v875_v15 = vpop.permute.xlu0 %874 }
 0x154   :  { %v388_v19 = vpop.permute.xlu1 %387 }
 0x155   :  { %v674_v21 = vld [vmem:[#allocation2 + $0x10] sm:$0xff]  ;;  %435 = vst.msk [vmem:[%s1809_s5 + $0x4] sm:$0xf] %vm433_vm3, %v388_v19  ;;  %v643_v33 = vpop.permute.xlu0 %642 }
 0x156   :  { %v690_v24 = vld [vmem:[#allocation2 + $0x11] sm:$0xff]  ;;  %v729_v34 = vadd.f32 %v713_v16, %v674_v21  ;;  %666 = vst.msk [vmem:[#allocation2 + $0x21] sm:$0xff] %vm90_vm0, %v643_v33 }
 0x157   :  { %v706_v26 = vld [vmem:[#allocation2 + $0x12] sm:$0xff]  ;;  %v698_v36 = vadd.f32 %v690_v24, %v674_v21 }
 0x158   :  { %898 = vst.msk [vmem:[#allocation2 + $0x11] sm:$0xff] %vm90_vm0, %v875_v15  ;;  %v645_v35 = vpop.permute.xlu1 %644  ;;  %v745_v37 = vadd.f32 %v729_v34, %v690_v24 }
 0x159   :  { %667 = vst.msk [vmem:[#allocation2 + $0x31] sm:$0xff] %vm90_vm0, %v645_v35  ;;  %v386_v38 = vpop.permute.xlu0 %385  ;;  %v714_v41 = vadd.f32 %v706_v26, %v698_v36 }
 0x15a   :  { %434 = vst.msk [vmem:[%s1809_s5] sm:$0xf] %vm433_vm3, %v386_v38  ;;  %v761_v42 = vadd.f32 %v745_v37, %v706_v26 }
 0x15c   :  { %v517_v39 = vpop.permute.xlu1 %516 }
 0x15d   :  { %v547_v45 = vrot.slane %v517_v39, 4  ;;  %v515_v48 = vpop.permute.xlu0 %514  ;;  %v675_v50 = vld [vmem:[#allocation2 + $0x20] sm:$0xff] }
 0x15e   :  { %v691_v52 = vld [vmem:[#allocation2 + $0x21] sm:$0xff]  ;;  %v546_v53 = vrot.slane %v515_v48, 4  ;;  %v730_v54 = vadd.f32 %v714_v41, %v675_v50  ;;  %v778_v55 = vadd.f32 %v761_v42, %v675_v50 }
 0x15f   :  { %v907_v43 = vld [vmem:[#allocation2 + $0x10] sm:$0xff]  ;;  %v707_v51 = vld [vmem:[#allocation2 + $0x22] sm:$0xff]  ;;  %v699_v46 = vadd.f32 %v691_v52, %v675_v50  ;;  %v564_v57 = vsel %vm90_vm0, %v517_v39, %v547_v45 }
 0x160   :  { %v923_v44 = vld [vmem:[#allocation2 + $0x11] sm:$0xff]  ;;  %v962_v49 = vadd.f32 %v907_v43, %v713_v16  ;;  %899 = vst.msk [vmem:[#allocation2 + $0x21] sm:$0xff] %vm90_vm0, %v877_v14  ;;  %v563_v60 = vsel %vm90_vm0, %v515_v48, %v546_v53  ;;  %v533_v61 = vpop.permute.xlu1 %532  ;;  %v746_v0 = vadd.f32 %v730_v54, %v691_v52  ;;  %v794_v1 = vadd.f32 %v778_v55, %v691_v52 }
 0x161   :  { %v931_v58 = vadd.f32 %v923_v44, %v907_v43  ;;  %v676_v59 = vld [vmem:[#allocation2 + $0x30] sm:$0xff]  ;;  %596 = vst.msk [vmem:[%s1810_s6 + $0x4] sm:$0xf] %vm320_vm2, %v564_v57  ;;  %v715_v63 = vadd.f32 %v707_v51, %v699_v46  ;;  %595 = vst.msk [vmem:[%s1810_s6] sm:$0xf] %vm320_vm2, %v563_v60  ;;  %v531_v3 = vpop.permute.xlu0 %530  ;;  %v555_v4 = vrot.slane %v533_v61, 4 }
 0x162   :  { %v978_v62 = vadd.f32 %v962_v49, %v923_v44  ;;  %v554_v5 = vrot.slane %v531_v3, 4  ;;  %v762_v6 = vadd.f32 %v746_v0, %v707_v51  ;;  %v810_v8 = vadd.f32 %v794_v1, %v707_v51  ;;  %v939_v12 = vld [vmem:[#allocation2 + $0x12] sm:$0xff] }
 0x163   :  { %v731_v10 = vadd.f32 %v715_v63, %v676_v59  ;;  %v572_v20 = vsel %vm90_vm0, %v533_v61, %v555_v4  ;;  %v947_v23 = vadd.f32 %v939_v12, %v931_v58  ;;  %v692_v28 = vld [vmem:[#allocation2 + $0x31] sm:$0xff] }
 0x164   :  { %v571_v56 = vsel %vm90_vm0, %v531_v3, %v554_v5  ;;  %v647_v22 = vpop.permute.xlu1 %646  ;;  %v994_v25 = vadd.f32 %v978_v62, %v939_v12  ;;  %v818_v27 = vmul.f32 0.11111111, %v810_v8  ;;  %v708_v29 = vld [vmem:[#allocation2 + $0x32] sm:$0xff]  ;;  %v779_v17 = vadd.f32 %v762_v6, %v676_v59  ;;  %604 = vst.msk [vmem:[%s1810_s6 + $0x24] sm:$0xf] %vm320_vm2, %v572_v20 }
 0x165   :  { %603 = vst.msk [vmem:[%s1810_s6 + $0x20] sm:$0xf] %vm320_vm2, %v571_v56  ;;  %v879_v30 = vpop.permute.xlu0 %878  ;;  %v747_v47 = vadd.f32 %v731_v10, %v692_v28  ;;  %v700_v24 = vadd.f32 %v692_v28, %v676_v59 }
 0x166   :  { %668 = vst.msk [vmem:[#allocation2 + $0x41] sm:$0xff] %vm90_vm0, %v647_v22  ;;  %900 = vst.msk [vmem:[#allocation2 + $0x31] sm:$0xff] %vm90_vm0, %v879_v30  ;;  %v833_v31 = vadd.f32 %v1586_v11, %v818_v27  ;;  %v795_v9 = vadd.f32 %v779_v17, %v692_v28 }
 0x167   :  { %v908_v18 = vld [vmem:[#allocation2 + $0x20] sm:$0xff]  ;;  %v763_v36 = vadd.f32 %v747_v47, %v708_v29  ;;  %v716_v51 = vadd.f32 %v708_v29, %v700_v24 }
 0x168   :  { %v924_v2 = vld [vmem:[#allocation2 + $0x21] sm:$0xff]  ;;  %v963_v32 = vadd.f32 %v947_v23, %v908_v18  ;;  %v1010_v40 = vadd.f32 %v994_v25, %v908_v18  ;;  %v881_v13 = vpop.permute.xlu1 %880  ;;  %v841_v14 = vmax.f32 %v833_v31, 0.0  ;;  %v811_v26 = vadd.f32 %v795_v9, %v708_v29 }
 0x169   :  { %v932_v7 = vadd.f32 %v924_v2, %v908_v18  ;;  %v519_v19 = vpop.permute.xlu0 %518  ;;  %v940_v21 = vld [vmem:[#allocation2 + $0x22] sm:$0xff] }
 0x16a   :  { %v979_v15 = vadd.f32 %v963_v32, %v924_v2  ;;  %v1026_v16 = vadd.f32 %v1010_v40, %v924_v2  ;;  %v548_v33 = vrot.slane %v519_v19, 4  ;;  %v849_v34 = vpack.c.bf16 %v841_v14, %v841_v14 }
 0x16b   :  { %v948_v37 = vadd.f32 %v940_v21, %v932_v7  ;;  %v819_v39 = vmul.f32 0.11111111, %v811_v26 }
 0x16c   :  { %v1042_v35 = vadd.f32 %v1026_v16, %v940_v21  ;;  %v995_v38 = vadd.f32 %v979_v15, %v940_v21  ;;  %v565_v44 = vsel %vm90_vm0, %v519_v19, %v548_v33  ;;  %v521_v45 = vpop.permute.xlu1 %520  ;;  %858 = vst.msk [vmem:[%s1812_s7] sm:$0xf] %vm857_vm4, %v849_v34 }
 0x16d   :  { %v677_v41 = vld [vmem:[#allocation2 + $0x40] sm:$0xff]  ;;  %v909_v50 = vld [vmem:[#allocation2 + $0x30] sm:$0xff]  ;;  %597 = vst.msk [vmem:[%s1810_s6 + $0x8] sm:$0xf] %vm320_vm2, %v565_v44  ;;  %v535_v52 = vpop.permute.xlu0 %534  ;;  %v834_v53 = vadd.f32 %v1586_v11, %v819_v39  ;;  %v549_v5 = vrot.slane %v521_v45, 4 }
 0x16e   :  { %v693_v42 = vld [vmem:[#allocation2 + $0x41] sm:$0xff]  ;;  %v1050_v48 = vmul.f32 0.11111111, %v1042_v35  ;;  %v780_v49 = vadd.f32 %v763_v36, %v677_v41  ;;  %v925_v46 = vld [vmem:[#allocation2 + $0x31] sm:$0xff]  ;;  %v964_v54 = vadd.f32 %v948_v37, %v909_v50  ;;  %v1011_v55 = vadd.f32 %v995_v38, %v909_v50 }
 0x16f   :  { %v709_v43 = vld [vmem:[#allocation2 + $0x42] sm:$0xff]  ;;  %v842_v59 = vmax.f32 %v834_v53, 0.0  ;;  %v732_v60 = vadd.f32 %v716_v51, %v677_v41  ;;  %v933_v3 = vadd.f32 %v925_v46, %v909_v50  ;;  %v941_v4 = vld [vmem:[#allocation2 + $0x32] sm:$0xff]  ;;  %v556_v20 = vrot.slane %v535_v52, 4 }
 0x170   :  { %901 = vst.msk [vmem:[#allocation2 + $0x41] sm:$0xff] %vm90_vm0, %v881_v13  ;;  %v1065_v57 = vadd.f32 %v1586_v11, %v1050_v48  ;;  %v796_v58 = vadd.f32 %v780_v49, %v693_v42  ;;  %v980_v61 = vadd.f32 %v964_v54, %v925_v46  ;;  %v1027_v62 = vadd.f32 %v1011_v55, %v925_v46  ;;  %v537_v63 = vpop.permute.xlu1 %536 }
 0x171   :  { %v649_v6 = vpop.permute.xlu0 %648  ;;  %v850_v8 = vpack.c.bf16 %v842_v59, %v842_v59  ;;  %v566_v23 = vsel %vm90_vm0, %v521_v45, %v549_v5  ;;  %v557_v25 = vrot.slane %v537_v63, 4  ;;  %v701_v27 = vadd.f32 %v693_v42, %v677_v41 }
 0x172   :  { %v1073_v0 = vmax.f32 %v1065_v57, 0.0  ;;  %v812_v1 = vadd.f32 %v796_v58, %v709_v43  ;;  %v996_v10 = vadd.f32 %v980_v61, %v941_v4  ;;  %v1043_v12 = vadd.f32 %v1027_v62, %v941_v4  ;;  %669 = vst.msk [vmem:[#allocation2 + $0x51] sm:$0xff] %vm90_vm0, %v649_v6 }
 0x173   :  { %859 = vst.msk [vmem:[%s1812_s7 + $0x4] sm:$0xf] %vm857_vm4, %v850_v8  ;;  %v748_v28 = vadd.f32 %v732_v60, %v693_v42  ;;  %v573_v30 = vsel %vm90_vm0, %v535_v52, %v556_v20  ;;  %v574_v7 = vsel %vm90_vm0, %v537_v63, %v557_v25  ;;  %v949_v13 = vadd.f32 %v941_v4, %v933_v3 }
 0x174   :  { %v1081_v56 = vpack.c.bf16 %v1073_v0, %v1073_v0  ;;  %v820_v22 = vmul.f32 0.11111111, %v812_v1  ;;  %v1051_v29 = vmul.f32 0.11111111, %v1043_v12  ;;  %598 = vst.msk [vmem:[%s1810_s6 + $0xc] sm:$0xf] %vm320_vm2, %v566_v23  ;;  %v651_v18 = vpop.permute.xlu1 %650  ;;  %v717_v15 = vadd.f32 %v709_v43, %v701_v27 }
 0x175   :  { %605 = vst.msk [vmem:[%s1810_s6 + $0x28] sm:$0xf] %vm320_vm2, %v573_v30  ;;  %v883_v32 = vpop.permute.xlu0 %882  ;;  %606 = vst.msk [vmem:[%s1810_s6 + $0x2c] sm:$0xf] %vm320_vm2, %v574_v7  ;;  %v764_v16 = vadd.f32 %v748_v28, %v709_v43 }
 0x176   :  { %1166 = vst.msk [vmem:[%s1812_s7 + $0x20] sm:$0xf] %vm857_vm4, %v1081_v56  ;;  %v835_v2 = vadd.f32 %v1586_v11, %v820_v22  ;;  %v1066_v40 = vadd.f32 %v1586_v11, %v1051_v29 }
 0x177   :  { %v910_v17 = vld [vmem:[#allocation2 + $0x40] sm:$0xff]  ;;  %670 = vst.msk [vmem:[#allocation2 + $0x61] sm:$0xff] %vm90_vm0, %v651_v18 }
 0x178   :  { %v1012_v31 = vadd.f32 %v996_v10, %v910_v17  ;;  %v926_v47 = vld [vmem:[#allocation2 + $0x41] sm:$0xff]  ;;  %v843_v9 = vmax.f32 %v835_v2, 0.0  ;;  %v1074_v19 = vmax.f32 %v1066_v40, 0.0  ;;  %v885_v24 = vpop.permute.xlu1 %884  ;;  %v965_v33 = vadd.f32 %v949_v13, %v910_v17 }
 0x179   :  { %v942_v21 = vld [vmem:[#allocation2 + $0x42] sm:$0xff]  ;;  %v678_v35 = vld [vmem:[#allocation2 + $0x50] sm:$0xff]  ;;  %v523_v38 = vpop.permute.xlu0 %522  ;;  %v934_v48 = vadd.f32 %v926_v47, %v910_v17 }
 0x17a   :  { %v1028_v14 = vadd.f32 %v1012_v31, %v926_v47  ;;  %v851_v26 = vpack.c.bf16 %v843_v9, %v843_v9  ;;  %v694_v36 = vld [vmem:[#allocation2 + $0x51] sm:$0xff]  ;;  %v1082_v39 = vpack.c.bf16 %v1074_v19, %v1074_v19  ;;  %v733_v42 = vadd.f32 %v717_v15, %v678_v35 }
 0x17b   :  { %v710_v37 = vld [vmem:[#allocation2 + $0x52] sm:$0xff]  ;;  %v702_v41 = vadd.f32 %v694_v36, %v678_v35  ;;  %v781_v44 = vadd.f32 %v764_v16, %v678_v35  ;;  %v550_v45 = vrot.slane %v523_v38, 4  ;;  %v981_v54 = vadd.f32 %v965_v33, %v926_v47 }
 0x17c   :  { %v1044_v34 = vadd.f32 %v1028_v14, %v942_v21  ;;  %902 = vst.msk [vmem:[#allocation2 + $0x51] sm:$0xff] %vm90_vm0, %v883_v32  ;;  %v749_v49 = vadd.f32 %v733_v42, %v694_v36  ;;  %v392_v46 = vpop.permute.xlu1 %391  ;;  %v950_v0 = vadd.f32 %v942_v21, %v934_v48 }
 0x17d   :  { %860 = vst.msk [vmem:[%s1812_s7 + $0x8] sm:$0xf] %vm857_vm4, %v851_v26  ;;  %1167 = vst.msk [vmem:[%s1812_s7 + $0x24] sm:$0xf] %vm857_vm4, %v1082_v39  ;;  %v797_v50 = vadd.f32 %v781_v44, %v694_v36  ;;  %v718_v57 = vadd.f32 %v710_v37, %v702_v41  ;;  %v567_v58 = vsel %vm90_vm0, %v523_v38, %v550_v45  ;;  %v539_v59 = vpop.permute.xlu0 %538 }
 0x17e   :  { %v1052_v43 = vmul.f32 0.11111111, %v1044_v34  ;;  %v679_v52 = vld [vmem:[#allocation2 + $0x60] sm:$0xff]  ;;  %437 = vst.msk [vmem:[%s1809_s5 + $0xc] sm:$0xf] %vm433_vm3, %v392_v46  ;;  %v765_v60 = vadd.f32 %v749_v49, %v710_v37  ;;  %v558_v62 = vrot.slane %v539_v59, 4  ;;  %v997_v6 = vadd.f32 %v981_v54, %v942_v21 }
 0x17f   :  { %v695_v51 = vld [vmem:[#allocation2 + $0x61] sm:$0xff]  ;;  %v813_v61 = vadd.f32 %v797_v50, %v710_v37  ;;  %599 = vst.msk [vmem:[%s1810_s6 + $0x10] sm:$0xf] %vm320_vm2, %v567_v58  ;;  %v734_v10 = vadd.f32 %v718_v57, %v679_v52 }
 0x180   :  { %v711_v53 = vld [vmem:[#allocation2 + $0x62] sm:$0xff]  ;;  %v1067_v55 = vadd.f32 %v1586_v11, %v1052_v43  ;;  %v782_v3 = vadd.f32 %v765_v60, %v679_v52  ;;  %v575_v4 = vsel %vm90_vm0, %v539_v59, %v558_v62  ;;  %v525_v5 = vpop.permute.xlu1 %524  ;;  %v703_v2 = vadd.f32 %v695_v51, %v679_v52 }
 0x181   :  { %903 = vst.msk [vmem:[#allocation2 + $0x61] sm:$0xff] %vm90_vm0, %v885_v24  ;;  %v821_v1 = vmul.f32 0.11111111, %v813_v61  ;;  %v551_v56 = vrot.slane %v525_v5, 4  ;;  %v653_v22 = vpop.permute.xlu0 %652  ;;  %v750_v47 = vadd.f32 %v734_v10, %v695_v51 }
 0x182   :  { %v1075_v63 = vmax.f32 %v1067_v55, 0.0  ;;  %607 = vst.msk [vmem:[%s1810_s6 + $0x30] sm:$0xf] %vm320_vm2, %v575_v4  ;;  %v798_v25 = vadd.f32 %v782_v3, %v695_v51  ;;  %v719_v33 = vadd.f32 %v711_v53, %v703_v2 }
 0x183   :  { %v911_v12 = vld [vmem:[#allocation2 + $0x50] sm:$0xff]  ;;  %v836_v23 = vadd.f32 %v1586_v11, %v821_v1  ;;  %671 = vst.msk [vmem:[#allocation2 + $0x71] sm:$0xff] %vm90_vm0, %v653_v22  ;;  %v568_v30 = vsel %vm90_vm0, %v525_v5, %v551_v56  ;;  %v766_v38 = vadd.f32 %v750_v47, %v711_v53 }
 0x184   :  { %v1083_v8 = vpack.c.bf16 %v1075_v63, %v1075_v63  ;;  %v927_v20 = vld [vmem:[#allocation2 + $0x51] sm:$0xff]  ;;  %v966_v29 = vadd.f32 %v950_v0, %v911_v12  ;;  %v1013_v17 = vadd.f32 %v997_v6, %v911_v12  ;;  %v814_v31 = vadd.f32 %v798_v25, %v711_v53  ;;  %600 = vst.msk [vmem:[%s1810_s6 + $0x14] sm:$0xf] %vm320_vm2, %v568_v30  ;;  %v541_v40 = vpop.permute.xlu1 %540 }
 0x185   :  { %v935_v27 = vadd.f32 %v927_v20, %v911_v12  ;;  %v943_v28 = vld [vmem:[#allocation2 + $0x52] sm:$0xff]  ;;  %v844_v18 = vmax.f32 %v836_v23, 0.0  ;;  %v559_v14 = vrot.slane %v541_v40, 4  ;;  %v390_v15 = vpop.permute.xlu0 %389 }
 0x186   :  { %1168 = vst.msk [vmem:[%s1812_s7 + $0x28] sm:$0xf] %vm857_vm4, %v1083_v8  ;;  %v982_v7 = vadd.f32 %v966_v29, %v927_v20  ;;  %v1029_v9 = vadd.f32 %v1013_v17, %v927_v20  ;;  %v822_v19 = vmul.f32 0.11111111, %v814_v31 }
 0x187   :  { %v951_v32 = vadd.f32 %v943_v28, %v935_v27  ;;  %v852_v16 = vpack.c.bf16 %v844_v18, %v844_v18  ;;  %436 = vst.msk [vmem:[%s1809_s5 + $0x8] sm:$0xf] %vm433_vm3, %v390_v15  ;;  %v576_v26 = vsel %vm90_vm0, %v541_v40, %v559_v14 }
 0x188   :  { %v959_v13 = vld [vmem:[#allocation2 + $0x60] sm:$0xff]  ;;  %v998_v21 = vadd.f32 %v982_v7, %v943_v28  ;;  %v1045_v24 = vadd.f32 %v1029_v9, %v943_v28  ;;  %v837_v34 = vadd.f32 %v1586_v11, %v822_v19  ;;  %608 = vst.msk [vmem:[%s1810_s6 + $0x34] sm:$0xf] %vm320_vm2, %v576_v26  ;;  %v655_v37 = vpop.permute.xlu1 %654  ;;  %v777_v7 = vld [vmem:[#allocation2 + $0x90] sm:$0xff] }
 0x189   :  { %861 = vst.msk [vmem:[%s1812_s7 + $0xc] sm:$0xf] %vm857_vm4, %v852_v16  ;;  %v967_v35 = vadd.f32 %v959_v13, %v951_v32  ;;  %v975_v36 = vld [vmem:[#allocation2 + $0x61] sm:$0xff]  ;;  %v887_v45 = vpop.permute.xlu0 %886 }
 0x18a   :  { %v1053_v39 = vmul.f32 0.11111111, %v1045_v24  ;;  %v1014_v41 = vadd.f32 %v998_v21, %v959_v13  ;;  %v680_v42 = vld [vmem:[#allocation2 + $0x70] sm:$0xff]  ;;  %672 = vst.msk [vmem:[#allocation2 + $0x81] sm:$0xff] %vm90_vm0, %v655_v37  ;;  %v845_v48 = vmax.f32 %v837_v34, 0.0  ;;  %v991_v53 = vld [vmem:[#allocation2 + $0x62] sm:$0xff]  ;;  %v936_v59 = vadd.f32 %v975_v36, %v959_v13 }
 0x18b   :  { %v696_v44 = vld [vmem:[#allocation2 + $0x71] sm:$0xff]  ;;  %v735_v49 = vadd.f32 %v719_v33, %v680_v42  ;;  %v783_v46 = vadd.f32 %v766_v38, %v680_v42  ;;  %v983_v55 = vadd.f32 %v975_v36, %v967_v35 }
 0x18c   :  { %v712_v43 = vld [vmem:[#allocation2 + $0x72] sm:$0xff]  ;;  %v1068_v50 = vadd.f32 %v1586_v11, %v1053_v39  ;;  %v1030_v52 = vadd.f32 %v1014_v41, %v975_v36  ;;  %v704_v51 = vadd.f32 %v696_v44, %v680_v42  ;;  %v853_v54 = vpack.c.bf16 %v845_v48, %v845_v48  ;;  %v396_v58 = vpop.permute.xlu1 %395 }
 0x18d   :  { %904 = vst.msk [vmem:[#allocation2 + $0x71] sm:$0xff] %vm90_vm0, %v887_v45  ;;  %v751_v57 = vadd.f32 %v735_v49, %v696_v44  ;;  %v799_v62 = vadd.f32 %v783_v46, %v696_v44  ;;  %v394_v63 = vpop.permute.xlu0 %393  ;;  %v999_v6 = vadd.f32 %v991_v53, %v983_v55  ;;  %v952_v20 = vadd.f32 %v991_v53, %v936_v59  ;;  %v793_v33 = vld [vmem:[#allocation2 + $0x91] sm:$0xff] }
 0x18e   :  { %v1076_v60 = vmax.f32 %v1068_v50, 0.0  ;;  %v1046_v61 = vadd.f32 %v1030_v52, %v991_v53  ;;  %439 = vst.msk [vmem:[%s1809_s5 + $0x14] sm:$0xf] %vm433_vm3, %v396_v58  ;;  %438 = vst.msk [vmem:[%s1809_s5 + $0x10] sm:$0xf] %vm433_vm3, %v394_v63  ;;  %v720_v4 = vadd.f32 %v712_v43, %v704_v51  ;;  %v809_v41 = vld [vmem:[#allocation2 + $0x92] sm:$0xff] }
 0x18f   :  { %862 = vst.msk [vmem:[%s1812_s7 + $0x10] sm:$0xf] %vm857_vm4, %v853_v54  ;;  %v767_v0 = vadd.f32 %v751_v57, %v712_v43  ;;  %v815_v5 = vadd.f32 %v799_v62, %v712_v43 }
 0x190   :  { %v1084_v1 = vpack.c.bf16 %v1076_v60, %v1076_v60  ;;  %v1054_v3 = vmul.f32 0.11111111, %v1046_v61  ;;  %v889_v56 = vpop.permute.xlu1 %888 }
 0x191   :  { %v728_v8 = vld [vmem:[#allocation2 + $0x80] sm:$0xff]  ;;  %v823_v23 = vmul.f32 0.11111111, %v815_v5  ;;  %v402_v17 = vpop.permute.xlu0 %401 }
 0x192   :  { %v744_v10 = vld [vmem:[#allocation2 + $0x81] sm:$0xff]  ;;  %1169 = vst.msk [vmem:[%s1812_s7 + $0x2c] sm:$0xf] %vm857_vm4, %v1084_v1  ;;  %v1069_v22 = vadd.f32 %v1586_v11, %v1054_v3  ;;  %v736_v25 = vadd.f32 %v728_v8, %v720_v4  ;;  %v784_v27 = vadd.f32 %v767_v0, %v728_v8 }
 0x193   :  { %v760_v12 = vld [vmem:[#allocation2 + $0x82] sm:$0xff]  ;;  %442 = vst.msk [vmem:[%s1809_s5 + $0x20] sm:$0xf] %vm433_vm3, %v402_v17  ;;  %v838_v32 = vadd.f32 %v1586_v11, %v823_v23 }
 0x194   :  { %v1007_v28 = vld [vmem:[#allocation2 + $0x70] sm:$0xff]  ;;  %905 = vst.msk [vmem:[#allocation2 + $0x81] sm:$0xff] %vm90_vm0, %v889_v56  ;;  %v1077_v31 = vmax.f32 %v1069_v22, 0.0  ;;  %v752_v40 = vadd.f32 %v744_v10, %v736_v25  ;;  %v800_v47 = vadd.f32 %v784_v27, %v744_v10  ;;  %v404_v15 = vpop.permute.xlu1 %403 }
 0x195   :  { %v1023_v29 = vld [vmem:[#allocation2 + $0x71] sm:$0xff]  ;;  %v1015_v30 = vadd.f32 %v1007_v28, %v999_v6  ;;  %v968_v2 = vadd.f32 %v1007_v28, %v952_v20  ;;  %v846_v19 = vmax.f32 %v838_v32, 0.0  ;;  %443 = vst.msk [vmem:[%s1809_s5 + $0x24] sm:$0xf] %vm433_vm3, %v404_v15  ;;  %v406_v26 = vpop.permute.xlu0 %405 }
 0x196   :  { %v937_v18 = vadd.f32 %v1023_v29, %v1007_v28  ;;  %v1039_v13 = vld [vmem:[#allocation2 + $0x72] sm:$0xff]  ;;  %v1085_v16 = vpack.c.bf16 %v1077_v31, %v1077_v31  ;;  %v768_v21 = vadd.f32 %v760_v12, %v752_v40  ;;  %v816_v24 = vadd.f32 %v800_v47, %v760_v12  ;;  %444 = vst.msk [vmem:[%s1809_s5 + $0x28] sm:$0xf] %vm433_vm3, %v406_v26 }
 0x197   :  { %v1031_v9 = vadd.f32 %v1023_v29, %v1015_v30  ;;  %v984_v14 = vadd.f32 %v1023_v29, %v968_v2  ;;  %v854_v36 = vpack.c.bf16 %v846_v19, %v846_v19 }
 0x198   :  { %1170 = vst.msk [vmem:[%s1812_s7 + $0x30] sm:$0xf] %vm857_vm4, %v1085_v16  ;;  %v785_v37 = vadd.f32 %v777_v7, %v768_v21  ;;  %v824_v38 = vmul.f32 0.11111111, %v816_v24  ;;  %v953_v39 = vadd.f32 %v1039_v13, %v937_v18  ;;  %v408_v43 = vpop.permute.xlu1 %407 }
 0x199   :  { %v1047_v34 = vadd.f32 %v1039_v13, %v1031_v9  ;;  %v1000_v35 = vadd.f32 %v1039_v13, %v984_v14  ;;  %863 = vst.msk [vmem:[%s1812_s7 + $0x14] sm:$0xf] %vm857_vm4, %v854_v36  ;;  %v410_v52 = vpop.permute.xlu0 %409 }
 0x19a   :  { %v801_v45 = vadd.f32 %v793_v33, %v785_v37  ;;  %v839_v48 = vadd.f32 %v1586_v11, %v824_v38  ;;  %445 = vst.msk [vmem:[%s1809_s5 + $0x2c] sm:$0xf] %vm433_vm3, %v408_v43  ;;  %446 = vst.msk [vmem:[%s1809_s5 + $0x30] sm:$0xf] %vm433_vm3, %v410_v52 }
 0x19b   :  { %v1055_v42 = vmul.f32 0.11111111, %v1047_v34  ;;  %v961_v44 = vld [vmem:[#allocation2 + $0x80] sm:$0xff] }
 0x19c   :  { %v969_v49 = vadd.f32 %v961_v44, %v953_v39  ;;  %v1016_v50 = vadd.f32 %v1000_v35, %v961_v44  ;;  %v977_v46 = vld [vmem:[#allocation2 + $0x81] sm:$0xff]  ;;  %v817_v54 = vadd.f32 %v809_v41, %v801_v45  ;;  %v847_v55 = vmax.f32 %v839_v48, 0.0  ;;  %v412_v60 = vpop.permute.xlu1 %411 }
 0x19d   :  { %v1070_v51 = vadd.f32 %v1586_v11, %v1055_v42  ;;  %v993_v59 = vld [vmem:[#allocation2 + $0x82] sm:$0xff]  ;;  %447 = vst.msk [vmem:[%s1809_s5 + $0x34] sm:$0xf] %vm433_vm3, %v412_v60  ;;  %v398_v1 = vpop.permute.xlu0 %397 }
 0x19e   :  { %v985_v53 = vadd.f32 %v977_v46, %v969_v49  ;;  %v1032_v57 = vadd.f32 %v1016_v50, %v977_v46  ;;  %v825_v61 = vmul.f32 0.11111111, %v817_v54  ;;  %v855_v62 = vpack.c.bf16 %v847_v55, %v847_v55  ;;  %440 = vst.msk [vmem:[%s1809_s5 + $0x18] sm:$0xf] %vm433_vm3, %v398_v1 }
 0x19f   :  { %v1078_v58 = vmax.f32 %v1070_v51, 0.0 }
 0x1a0   :  { %v1001_v63 = vadd.f32 %v993_v59, %v985_v53  ;;  %v1048_v0 = vadd.f32 %v1032_v57, %v993_v59  ;;  %v840_v4 = vadd.f32 %v1586_v11, %v825_v61  ;;  %864 = vst.msk [vmem:[%s1812_s7 + $0x18] sm:$0xf] %vm857_vm4, %v855_v62  ;;  %v400_v8 = vpop.permute.xlu1 %399 }
 0x1a1   :  { %v1086_v3 = vpack.c.bf16 %v1078_v58, %v1078_v58  ;;  %441 = vst.msk [vmem:[%s1809_s5 + $0x1c] sm:$0xf] %vm433_vm3, %v400_v8  ;;  %v527_v56 = vpop.permute.xlu0 %526 }
 0x1a2   :  { %v1017_v5 = vadd.f32 %v1001_v63, %v777_v7  ;;  %v1056_v6 = vmul.f32 0.11111111, %v1048_v0  ;;  %v848_v10 = vmax.f32 %v840_v4, 0.0  ;;  %v552_v22 = vrot.slane %v527_v56, 4 }
 0x1a3   :  { %1171 = vst.msk [vmem:[%s1812_s7 + $0x34] sm:$0xf] %vm857_vm4, %v1086_v3 }
 0x1a4   :  { %v1033_v12 = vadd.f32 %v1017_v5, %v793_v33  ;;  %v1071_v20 = vadd.f32 %v1586_v11, %v1056_v6  ;;  %v856_v23 = vpack.c.bf16 %v848_v10, %v848_v10  ;;  %v569_v28 = vsel %vm90_vm0, %v527_v56, %v552_v22  ;;  %v529_v29 = vpop.permute.xlu1 %528 }
 0x1a5   :  { %601 = vst.msk [vmem:[%s1810_s6 + $0x18] sm:$0xf] %vm320_vm2, %v569_v28  ;;  %v553_v18 = vrot.slane %v529_v29, 4  ;;  %v543_v2 = vpop.permute.xlu0 %542 }
 0x1a6   :  { %v1049_v25 = vadd.f32 %v1033_v12, %v809_v41  ;;  %v1079_v27 = vmax.f32 %v1071_v20, 0.0  ;;  %865 = vst.msk [vmem:[%s1812_s7 + $0x1c] sm:$0xf] %vm857_vm4, %v856_v23  ;;  %v560_v31 = vrot.slane %v543_v2, 4 }
 0x1a7   :  { %v570_v40 = vsel %vm90_vm0, %v529_v29, %v553_v18 }
 0x1a8   :  { %v1057_v17 = vmul.f32 0.11111111, %v1049_v25  ;;  %v1087_v30 = vpack.c.bf16 %v1079_v27, %v1079_v27  ;;  %602 = vst.msk [vmem:[%s1810_s6 + $0x1c] sm:$0xf] %vm320_vm2, %v570_v40  ;;  %v577_v47 = vsel %vm90_vm0, %v543_v2, %v560_v31  ;;  %v545_v7 = vpop.permute.xlu1 %544 }
 0x1a9   :  { %609 = vst.msk [vmem:[%s1810_s6 + $0x38] sm:$0xf] %vm320_vm2, %v577_v47  ;;  %v414_v13 = vpop.permute.xlu0 %413 }
 0x1aa   :  { %v1072_v32 = vadd.f32 %v1586_v11, %v1057_v17  ;;  %1172 = vst.msk [vmem:[%s1812_s7 + $0x38] sm:$0xf] %vm857_vm4, %v1087_v30  ;;  %v561_v11 = vrot.slane %v545_v7, 4 }
 0x1ab   :  { %448 = vst.msk [vmem:[%s1809_s5 + $0x38] sm:$0xf] %vm433_vm3, %v414_v13 }
 0x1ac   :  { %v1080_v9 = vmax.f32 %v1072_v32, 0.0  ;;  %v578_v15 = vsel %vm90_vm0, %v545_v7, %v561_v11  ;;  %v416_v16 = vpop.permute.xlu1 %415 }
 0x1ad   :  { %610 = vst.msk [vmem:[%s1810_s6 + $0x3c] sm:$0xf] %vm320_vm2, %v578_v15 }
 0x1ae   :  { %v1088_v14 = vpack.c.bf16 %v1080_v9, %v1080_v9  ;;  %449 = vst.msk [vmem:[%s1809_s5 + $0x3c] sm:$0xf] %vm433_vm3, %v416_v16 }
 0x1b0   :  { %1173 = vst.msk [vmem:[%s1812_s7 + $0x3c] sm:$0xf] %vm857_vm4, %v1088_v14 }

// kernel: inception_a_forward.5
= control target key start
LH: loop header
LB: loop body
LE: loop exit
PB: predicated region body
PF: predicated region fallthrough
CT: control target
= control target key end

     0   :  { %v5843_v1 = vmov 0   ;;  %vm206_vm0 = vcmask 519168   ;;  %vm207_vm1 = vsmask.f32 7938  ;;  %vm354_vm3 = vsmask.f32 3328  ;;  %s7398_s1 = inlined_call_operand.vmem [shape: bf16[3,384,96], index: 1, kind: input, shape index: {}]   ;;  %s7399_s0 = inlined_call_operand.vmem [shape: bf16[2,8,8,64], index: 0, kind: input, shape index: {}]   ;;  %s7400_s3 = inlined_call_operand.vmem [shape: bf16[3,384,96], index: 3, kind: input, shape index: {}]   ;;  %s7401_s2 = inlined_call_operand.vmem [shape: f32[1,96], index: 2, kind: input, shape index: {}]   ;;  %s7402_s4 = inlined_call_operand.vmem [shape: f32[1,96], index: 4, kind: input, shape index: {}]   ;;  %s7403_s5 = inlined_call_operand.vmem [shape: bf16[2,8,8,96], index: 5, kind: output, shape index: {}]  }
   0x1   :  { %v5877_v0 = vld [vmem:[%s7398_s1 + $0x100] sm:$0xff]   ;;  %39 = vst [vmem:[#allocation2 + $0xc] sm:$0xff] %v5843_v1  ;;  %41 = vst [vmem:[#allocation2 + $0x18] sm:$0xff] %v5843_v1  ;;  %v5612_v5 = vld [vmem:[%s7398_s1 + $0x108] sm:$0xff]   ;;  %vm2333_vm5 = vcmask 781312  }
   0x2   :  { %37 = vst [vmem:[#allocation2] sm:$0xff] %v5843_v1  ;;  %38 = vst [vmem:[#allocation2 + $0x8] sm:$0xf] %v5843_v1  ;;  %v5609_v2 = vld [vmem:[%s7398_s1 + $0xc0] sm:$0xff]   ;;  %4775 = vmatprep.subr.bf16.mxu0 %v5877_v0  ;;  %v5613_v6 = vld [vmem:[%s7398_s1 + $0xc8] sm:$0xff]  }
   0x3   :  { %40 = vst [vmem:[#allocation2 + $0x14] sm:$0xf] %v5843_v1  ;;  %42 = vst [vmem:[#allocation2 + $0x20] sm:$0xf] %v5843_v1  ;;  %v5610_v3 = vld [vmem:[%s7398_s1 + $0x40] sm:$0xff]   ;;  %4776 = vmatpush3.bf16.msra.mxu0 %v5609_v2  ;;  %v5614_v7 = vld [vmem:[%s7398_s1 + $0x48] sm:$0xff]  }
   0x4   :  { %43 = vst [vmem:[#allocation2 + $0x24] sm:$0xff] %v5843_v1  ;;  %44 = vst [vmem:[#allocation2 + $0x2c] sm:$0xf] %v5843_v1  ;;  %v5611_v4 = vld [vmem:[%s7398_s1] sm:$0xff]   ;;  %4855 = vmatprep.subr.bf16.mxu1 %v5610_v3  ;;  %4777 = vmatprep.subr.bf16.mxu0 %v5612_v5  ;;  %v5615_v8 = vld [vmem:[%s7398_s1 + $0x8] sm:$0xff]  }
   0x5   :  { %45 = vst [vmem:[#allocation2 + $0x30] sm:$0xff] %v5843_v1  ;;  %46 = vst [vmem:[#allocation2 + $0x38] sm:$0xf] %v5843_v1  ;;  %4856 = vmatpush3.bf16.msra.mxu1 %v5611_v4  ;;  %v5616_v9 = vld [vmem:[%s7398_s1 + $0x110] sm:$0xff]   ;;  %v5620_v13 = vld [vmem:[%s7398_s1 + $0x118] sm:$0xff]  }
   0x6   :  { %47 = vst [vmem:[#allocation2 + $0x3c] sm:$0xff] %v5843_v1  ;;  %48 = vst [vmem:[#allocation2 + $0x44] sm:$0xf] %v5843_v1  ;;  %4857 = vmatprep.subr.bf16.mxu1 %v5614_v7  ;;  %v5617_v10 = vld [vmem:[%s7398_s1 + $0xd0] sm:$0xff]   ;;  %v5621_v14 = vld [vmem:[%s7398_s1 + $0xd8] sm:$0xff]  }
   0x7   :  { %49 = vst [vmem:[#allocation2 + $0x48] sm:$0xff] %v5843_v1  ;;  %50 = vst [vmem:[#allocation2 + $0x50] sm:$0xf] %v5843_v1  ;;  %4778 = vmatpush3.bf16.msra.mxu0 %v5613_v6  ;;  %v5618_v11 = vld [vmem:[%s7398_s1 + $0x50] sm:$0xff]   ;;  %v5622_v15 = vld [vmem:[%s7398_s1 + $0x58] sm:$0xff]  }
   0x8   :  { %51 = vst [vmem:[#allocation2 + $0x54] sm:$0xff] %v5843_v1  ;;  %52 = vst [vmem:[#allocation2 + $0x5c] sm:$0xf] %v5843_v1  ;;  %4779 = vmatprep.subr.bf16.mxu0 %v5616_v9  ;;  %v5619_v12 = vld [vmem:[%s7398_s1 + $0x10] sm:$0xff]   ;;  %v5623_v16 = vld [vmem:[%s7398_s1 + $0x18] sm:$0xff]  }
   0x9   :  { %53 = vst [vmem:[#allocation2 + $0x60] sm:$0xff] %v5843_v1  ;;  %54 = vst [vmem:[#allocation2 + $0x68] sm:$0xf] %v5843_v1  ;;  %4858 = vmatpush3.bf16.msra.mxu1 %v5615_v8  ;;  %v5624_v17 = vld [vmem:[%s7398_s1 + $0x120] sm:$0xff]   ;;  %v5628_v21 = vld [vmem:[%s7398_s1 + $0x128] sm:$0xff]  }
   0xa   :  { %56 = vst [vmem:[#allocation2 + $0x74] sm:$0xf] %v5843_v1  ;;  %58 = vst [vmem:[#allocation2 + $0x80] sm:$0xf] %v5843_v1  ;;  %4859 = vmatprep.subr.bf16.mxu1 %v5618_v11  ;;  %v5625_v18 = vld [vmem:[%s7398_s1 + $0xe0] sm:$0xff]   ;;  %v5629_v22 = vld [vmem:[%s7398_s1 + $0xe8] sm:$0xff]  }
   0xb   :  { %59 = vst [vmem:[#allocation2 + $0x84] sm:$0xff] %v5843_v1  ;;  %60 = vst [vmem:[#allocation2 + $0x8c] sm:$0xf] %v5843_v1  ;;  %4780 = vmatpush3.bf16.msra.mxu0 %v5617_v10  ;;  %v5626_v19 = vld [vmem:[%s7398_s1 + $0x60] sm:$0xff]   ;;  %v5630_v23 = vld [vmem:[%s7398_s1 + $0x68] sm:$0xff]  }
   0xc   :  { %61 = vst [vmem:[#allocation2 + $0x90] sm:$0xff] %v5843_v1  ;;  %62 = vst [vmem:[#allocation2 + $0x98] sm:$0xf] %v5843_v1  ;;  %4781 = vmatprep.subr.bf16.mxu0 %v5620_v13  ;;  %v5627_v20 = vld [vmem:[%s7398_s1 + $0x20] sm:$0xff]   ;;  %v5631_v24 = vld [vmem:[%s7398_s1 + $0x28] sm:$0xff]  }
   0xd   :  { %63 = vst [vmem:[#allocation2 + $0x9c] sm:$0xff] %v5843_v1  ;;  %64 = vst [vmem:[#allocation2 + $0xa4] sm:$0xf] %v5843_v1  ;;  %4860 = vmatpush3.bf16.msra.mxu1 %v5619_v12  ;;  %v5632_v25 = vld [vmem:[%s7398_s1 + $0x130] sm:$0xff]   ;;  %v5636_v29 = vld [vmem:[%s7398_s1 + $0x138] sm:$0xff]  }
   0xe   :  { %65 = vst [vmem:[#allocation2 + $0xa8] sm:$0xff] %v5843_v1  ;;  %66 = vst [vmem:[#allocation2 + $0xb0] sm:$0xf] %v5843_v1  ;;  %4861 = vmatprep.subr.bf16.mxu1 %v5622_v15  ;;  %v5633_v26 = vld [vmem:[%s7398_s1 + $0xf0] sm:$0xff]   ;;  %v5637_v30 = vld [vmem:[%s7398_s1 + $0xf8] sm:$0xff]  }
   0xf   :  { %67 = vst [vmem:[#allocation2 + $0xb4] sm:$0xff] %v5843_v1  ;;  %68 = vst [vmem:[#allocation2 + $0xbc] sm:$0xf] %v5843_v1  ;;  %4782 = vmatpush3.bf16.msra.mxu0 %v5621_v14  ;;  %v5634_v27 = vld [vmem:[%s7398_s1 + $0x70] sm:$0xff]   ;;  %v5638_v31 = vld [vmem:[%s7398_s1 + $0x78] sm:$0xff]  }
  0x10   :  { %69 = vst [vmem:[#allocation2 + $0xc0] sm:$0xff] %v5843_v1  ;;  %70 = vst [vmem:[#allocation2 + $0xc8] sm:$0xf] %v5843_v1  ;;  %4783 = vmatprep.subr.bf16.mxu0 %v5624_v17  ;;  %v5635_v28 = vld [vmem:[%s7398_s1 + $0x30] sm:$0xff]   ;;  %v5639_v32 = vld [vmem:[%s7398_s1 + $0x38] sm:$0xff]  }
  0x11   :  { %71 = vst [vmem:[#allocation2 + $0xcc] sm:$0xff] %v5843_v1  ;;  %72 = vst [vmem:[#allocation2 + $0xd4] sm:$0xf] %v5843_v1  ;;  %4862 = vmatpush3.bf16.msra.mxu1 %v5623_v16  ;;  %v21_v33 = vld [vmem:[%s7399_s0] sm:$0xf] }
  0x12   :  { %73 = vst [vmem:[#allocation2 + $0xd8] sm:$0xff] %v5843_v1  ;;  %74 = vst [vmem:[#allocation2 + $0xe0] sm:$0xf] %v5843_v1  ;;  %4863 = vmatprep.subr.bf16.mxu1 %v5626_v19  ;;  %v22_v34 = vld [vmem:[%s7399_s0 + $0x4] sm:$0xf]  ;;  %v78_v35 = vshrl.u32 %v21_v33, 16 }
  0x13   :  { %76 = vst [vmem:[#allocation2 + $0xec] sm:$0xf] %v5843_v1  ;;  %2117 = vst [vmem:[#allocation3 + $0x8] sm:$0xf] %v5843_v1  ;;  %4784 = vmatpush3.bf16.msra.mxu0 %v5625_v18  ;;  %v81_v36 = vshll.u32 %v21_v33, 16  ;;  %v85_v37 = vshrl.u32 %v22_v34, 16 }
  0x14   :  { %2118 = vst [vmem:[#allocation3 + $0xc] sm:$0xff] %v5843_v1  ;;  %2119 = vst [vmem:[#allocation3 + $0x14] sm:$0xf] %v5843_v1  ;;  %4785 = vmatprep.subr.bf16.mxu0 %v5628_v21  ;;  %v88_v38 = vshll.u32 %v22_v34, 16  ;;  %v209_v39 = vld [vmem:[#allocation2 + $0xc] sm:$0xf] }
  0x15   :  { %2120 = vst [vmem:[#allocation3 + $0x18] sm:$0xff] %v5843_v1  ;;  %2121 = vst [vmem:[#allocation3 + $0x20] sm:$0xf] %v5843_v1  ;;  %4864 = vmatpush3.bf16.msra.mxu1 %v5627_v20  ;;  %v80_v40 = vrot.slane %v78_v35, 7  ;;  %v87_v41 = vrot.slane %v85_v37, 7  ;;  %v6057_v43 = vld [vmem:[%s7398_s1 + $0x140] sm:$0xff]  }
  0x16   :  { %2122 = vst [vmem:[#allocation3 + $0x24] sm:$0xff] %v5843_v1  ;;  %2123 = vst [vmem:[#allocation3 + $0x2c] sm:$0xf] %v5843_v1  ;;  %4865 = vmatprep.subr.bf16.mxu1 %v5630_v23  ;;  %v212_v42 = vld [vmem:[#allocation2 + $0x18] sm:$0xf]  ;;  %v274_v45 = vrot.slane %v78_v35, 4 }
  0x17   :  { %2124 = vst [vmem:[#allocation3 + $0x30] sm:$0xff] %v5843_v1  ;;  %2125 = vst [vmem:[#allocation3 + $0x38] sm:$0xf] %v5843_v1  ;;  %4786 = vmatpush3.bf16.msra.mxu0 %v5629_v22  ;;  %v23_v46 = vld [vmem:[%s7399_s0 + $0x8] sm:$0xf]  ;;  %v83_v48 = vor.u32 %v81_v36, %v80_v40  ;;  %v90_v49 = vor.u32 %v88_v38, %v87_v41  ;;  %v275_v50 = vrot.slane %v81_v36, 5 }
  0x18   :  { %2126 = vst [vmem:[#allocation3 + $0x3c] sm:$0xff] %v5843_v1  ;;  %2127 = vst [vmem:[#allocation3 + $0x44] sm:$0xf] %v5843_v1  ;;  %4787 = vmatprep.subr.bf16.mxu0 %v5632_v25  ;;  %v6071_v47 = vld [vmem:[%s7399_s0 + $0xc] sm:$0xf]  ;;  %v92_v51 = vshrl.u32 %v23_v46, 16 }
  0x19   :  { %2128 = vst [vmem:[#allocation3 + $0x48] sm:$0xff] %v5843_v1  ;;  %2129 = vst [vmem:[#allocation3 + $0x50] sm:$0xf] %v5843_v1  ;;  %4866 = vmatpush3.bf16.msra.mxu1 %v5631_v24  ;;  %v95_v52 = vshll.u32 %v23_v46, 16  ;;  %v99_v53 = vshrl.u32 %v6071_v47, 16  ;;  %v102_v54 = vshll.u32 %v6071_v47, 16  ;;  %v276_v63 = vor.u32 %v275_v50, %v274_v45 }
  0x1a   :  { %2130 = vst [vmem:[#allocation3 + $0x54] sm:$0xff] %v5843_v1  ;;  %2131 = vst [vmem:[#allocation3 + $0x5c] sm:$0xf] %v5843_v1  ;;  %4867 = vmatprep.subr.bf16.mxu1 %v5634_v27  ;;  %v94_v57 = vrot.slane %v92_v51, 7  ;;  %v6086_v58 = vld [vmem:[%s7399_s0 + $0x10] sm:$0xf] }
  0x1b   :  { %2132 = vst [vmem:[#allocation3 + $0x60] sm:$0xff] %v5843_v1  ;;  %2133 = vst [vmem:[#allocation3 + $0x68] sm:$0xf] %v5843_v1  ;;  %4788 = vmatpush3.bf16.msra.mxu0 %v5633_v26  ;;  %v278_v59 = vrot.slane %v85_v37, 4  ;;  %v101_v60 = vrot.slane %v99_v53, 7  ;;  %v279_v0 = vrot.slane %v88_v38, 5 }
  0x1c   :  { %2135 = vst [vmem:[#allocation3 + $0x74] sm:$0xf] %v5843_v1  ;;  %2137 = vst [vmem:[#allocation3 + $0x80] sm:$0xf] %v5843_v1  ;;  %4789 = vmatprep.subr.bf16.mxu0 %v5636_v29  ;;  %v215_v61 = vld [vmem:[#allocation2 + $0x24] sm:$0xf]  ;;  %v97_v2 = vor.u32 %v95_v52, %v94_v57 }
  0x1d   :  { %2138 = vst [vmem:[#allocation3 + $0x84] sm:$0xff] %v5843_v1  ;;  %2139 = vst [vmem:[#allocation3 + $0x8c] sm:$0xf] %v5843_v1  ;;  %4868 = vmatpush3.bf16.msra.mxu1 %v5635_v28  ;;  %v6093_v62 = vld [vmem:[%s7399_s0 + $0x14] sm:$0xf]  ;;  %v106_v4 = vshrl.u32 %v6086_v58, 16  ;;  %v104_v5 = vor.u32 %v102_v54, %v101_v60  ;;  %v280_v18 = vor.u32 %v279_v0, %v278_v59 }
  0x1e   :  { %2140 = vst [vmem:[#allocation3 + $0x90] sm:$0xff] %v5843_v1  ;;  %2141 = vst [vmem:[#allocation3 + $0x98] sm:$0xf] %v5843_v1  ;;  %4869 = vmatprep.subr.bf16.mxu1 %v5638_v31  ;;  %v218_v3 = vld [vmem:[#allocation2 + $0x30] sm:$0xf]  ;;  %v109_v6 = vshll.u32 %v6086_v58, 16 }
  0x1f   :  { %2142 = vst [vmem:[#allocation3 + $0x9c] sm:$0xff] %v5843_v1  ;;  %2143 = vst [vmem:[#allocation3 + $0xa4] sm:$0xf] %v5843_v1  ;;  %4790 = vmatpush3.bf16.msra.mxu0 %v5637_v30  ;;  %v113_v7 = vshrl.u32 %v6093_v62, 16  ;;  %v108_v9 = vrot.slane %v106_v4, 7  ;;  %v116_v10 = vshll.u32 %v6093_v62, 16 }
  0x20   :  { %2144 = vst [vmem:[#allocation3 + $0xa8] sm:$0xff] %v5843_v1  ;;  %2145 = vst [vmem:[#allocation3 + $0xb0] sm:$0xf] %v5843_v1  ;;  %5255 = vmatprep.subr.bf16.mxu0 %v6057_v43  ;;  %v6112_v11 = vld [vmem:[%s7399_s0 + $0x18] sm:$0xf]  ;;  %v5655_v16 = vld [vmem:[%s7398_s1 + $0x80] sm:$0xff]  }
  0x21   :  { %2146 = vst [vmem:[#allocation3 + $0xb4] sm:$0xff] %v5843_v1  ;;  %2147 = vst [vmem:[#allocation3 + $0xbc] sm:$0xf] %v5843_v1  ;;  %4870 = vmatpush3.bf16.msra.mxu1 %v5639_v32  ;;  %v115_v13 = vrot.slane %v113_v7, 7  ;;  %v221_v14 = vld [vmem:[#allocation2 + $0x3c] sm:$0xf]  ;;  %v111_v20 = vor.u32 %v109_v6, %v108_v9 }
  0x22   :  { %2148 = vst [vmem:[#allocation3 + $0xc0] sm:$0xff] %v5843_v1  ;;  %2149 = vst [vmem:[#allocation3 + $0xc8] sm:$0xf] %v5843_v1  ;;  %v6121_v15 = vld [vmem:[%s7399_s0 + $0x1c] sm:$0xf]  ;;  %v6128_v17 = vrot.slane %v276_v63, 4  ;;  %5287 = vmatprep.subr.bf16.mxu1 %v5655_v16 }
  0x23   :  { %2150 = vst [vmem:[#allocation3 + $0xcc] sm:$0xff] %v5843_v1  ;;  %2151 = vst [vmem:[#allocation3 + $0xd4] sm:$0xf] %v5843_v1  ;;  %v282_v19 = vrot.slane %v92_v51, 4  ;;  %v283_v21 = vrot.slane %v95_v52, 5  ;;  %v118_v22 = vor.u32 %v116_v10, %v115_v13  ;;  %v120_v24 = vshrl.u32 %v6112_v11, 16 }
  0x24   :  { %2152 = vst [vmem:[#allocation3 + $0xd8] sm:$0xff] %v5843_v1  ;;  %2153 = vst [vmem:[#allocation3 + $0xe0] sm:$0xf] %v5843_v1  ;;  %v224_v23 = vld [vmem:[#allocation2 + $0x48] sm:$0xf]  ;;  %v123_v25 = vshll.u32 %v6112_v11, 16 }
  0x25   :  { %2155 = vst [vmem:[#allocation3 + $0xec] sm:$0xf] %v5843_v1  ;;  %258 = vst.msk [vmem:[#allocation2 + $0x10] sm:$0xf] %vm206_vm0, %v21_v33  ;;  %v127_v29 = vshrl.u32 %v6121_v15, 16  ;;  %v130_v30 = vshll.u32 %v6121_v15, 16 }
  0x26   :  { %259 = vst.msk [vmem:[#allocation2 + $0x1c] sm:$0xf] %vm206_vm0, %v22_v34  ;;  %vm6061_vm2 = vmand %vm206_vm0, %vm207_vm1  ;;  %v6151_v35 = vld [vmem:[%s7399_s0 + $0x20] sm:$0xf]  ;;  %v6156_v36 = vld [vmem:[%s7399_s0 + $0x24] sm:$0xf] }
  0x27   :  { %260 = vst.msk [vmem:[#allocation2 + $0x28] sm:$0xf] %vm206_vm0, %v23_v46  ;;  %261 = vst.msk [vmem:[#allocation2 + $0x34] sm:$0xf] %vm206_vm0, %v6071_v47  ;;  %v210_v55 = vsel %vm6061_vm2, %v83_v48, %v209_v39  ;;  %v213_v56 = vsel %vm6061_vm2, %v90_v49, %v212_v42  ;;  %v216_v8 = vsel %vm6061_vm2, %v97_v2, %v215_v61  ;;  %v6158_v37 = vrot.slane %v280_v18, 4  ;;  %v5645_v38 = vld [vmem:[%s7398_s1 + $0x148] sm:$0xff]  }
  0x28   :  { %211 = vst [vmem:[#allocation2 + $0xc] sm:$0xf] %v210_v55  ;;  %214 = vst [vmem:[#allocation2 + $0x18] sm:$0xf] %v213_v56  ;;  %v219_v12 = vsel %vm6061_vm2, %v104_v5, %v218_v3  ;;  %v222_v28 = vsel %vm6061_vm2, %v111_v20, %v221_v14  ;;  %v225_v39 = vsel %vm6061_vm2, %v118_v22, %v224_v23  ;;  %v122_v40 = vrot.slane %v120_v24, 7  ;;  %v5656_v49 = vld [vmem:[%s7398_s1 + $0x88] sm:$0xff]  }
  0x29   :  { %262 = vst.msk [vmem:[#allocation2 + $0x40] sm:$0xf] %vm206_vm0, %v6086_v58  ;;  %263 = vst.msk [vmem:[#allocation2 + $0x4c] sm:$0xf] %vm206_vm0, %v6093_v62  ;;  %v129_v41 = vrot.slane %v127_v29, 7  ;;  %v284_v42 = vor.u32 %v283_v21, %v282_v19  ;;  %v134_v48 = vshrl.u32 %v6151_v35, 16 }
  0x2a   :  { %217 = vst [vmem:[#allocation2 + $0x24] sm:$0xf] %v216_v8  ;;  %264 = vst.msk [vmem:[#allocation2 + $0x58] sm:$0xf] %vm206_vm0, %v6112_v11  ;;  %v227_v45 = vld [vmem:[#allocation2 + $0x54] sm:$0xf]  ;;  %v125_v52 = vor.u32 %v123_v25, %v122_v40 }
  0x2b   :  { %220 = vst [vmem:[#allocation2 + $0x30] sm:$0xf] %v219_v12  ;;  %265 = vst.msk [vmem:[#allocation2 + $0x64] sm:$0xf] %vm206_vm0, %v6121_v15  ;;  %v230_v46 = vld [vmem:[#allocation2 + $0x60] sm:$0xf]  ;;  %v132_v55 = vor.u32 %v130_v30, %v129_v41 }
  0x2c   :  { %223 = vst [vmem:[#allocation2 + $0x3c] sm:$0xf] %v222_v28  ;;  %266 = vst.msk [vmem:[#allocation2 + $0x88] sm:$0xf] %vm206_vm0, %v6151_v35  ;;  %v6180_v51 = vld [vmem:[%s7398_s1 + $0x150] sm:$0xff]   ;;  %v137_v56 = vshll.u32 %v6151_v35, 16 }
  0x2d   :  { %267 = vst.msk [vmem:[#allocation2 + $0x94] sm:$0xf] %vm206_vm0, %v6156_v36  ;;  %226 = vst [vmem:[#allocation2 + $0x48] sm:$0xf] %v225_v39  ;;  %v141_v57 = vshrl.u32 %v6156_v36, 16  ;;  %v6191_v60 = vrot.slane %v99_v53, 4  ;;  %v231_v53 = vsel %vm6061_vm2, %v132_v55, %v230_v46 }
  0x2e   :  { %v233_v59 = vld [vmem:[#allocation2 + $0x84] sm:$0xf]  ;;  %v136_v0 = vrot.slane %v134_v48, 7  ;;  %v144_v2 = vshll.u32 %v6156_v36, 16  ;;  %v6204_v5 = vrot.slane %v284_v42, 4  ;;  %v6208_v8 = vrot.slane %v102_v54, 5  ;;  %vm6399_vm4 = vmand %vm206_vm0, %vm354_vm3 }
  0x2f   :  { %v484_v26 = vld [vmem:[#allocation2 + $0xc] sm:$0xff]  ;;  %v6138_v27 = vld [vmem:[#allocation2 + $0x18] sm:$0xff]  ;;  %232 = vst [vmem:[#allocation2 + $0x60] sm:$0xf] %v231_v53  ;;  %v143_v12 = vrot.slane %v141_v57, 7  ;;  %v6221_v54 = vrot.slane %v106_v4, 4  ;;  %vm6820_vm6 = vmand %vm2333_vm5, %vm207_vm1 }
  0x30   :  { %v4309_v31 = vcombine.low %v484_v26, %v6138_v27  ;;  %v4310_v32 = vcombine.high %v484_v26, %v6138_v27  ;;  %v4357_v33 = vcombine.low %v5843_v1, %v484_v26  ;;  %v4358_v34 = vcombine.high %v5843_v1, %v484_v26  ;;  %v5660_v13 = vld [vmem:[%s7398_s1 + $0x90] sm:$0xff]   ;;  %v6228_v19 = vld [vmem:[%s7399_s0 + $0x28] sm:$0xf]  ;;  %v5651_v4 = vld [vmem:[%s7398_s1 + $0x158] sm:$0xff]  }
  0x31   :  { %v488_v50 = vld [vmem:[#allocation2 + $0x24] sm:$0xff]  ;;  %v139_v9 = vor.u32 %v137_v56, %v136_v0  ;;  %v236_v18 = vld [vmem:[#allocation2 + $0x90] sm:$0xf]  ;;  %v6232_v20 = vrot.slane %v109_v6, 5  ;;  %v146_v22 = vor.u32 %v144_v2, %v143_v12  ;;  %v6246_v26 = vld [vmem:[%s7399_s0 + $0x2c] sm:$0xf] }
  0x32   :  { %869 = vmatprep.mubr.bf16.mxu0 %v4310_v32  ;;  %1335 = vmatprep.mubr.bf16.mxu1 %v4358_v34  ;;  %v6193_v61 = vld [vmem:[#allocation2 + $0x30] sm:$0xff]  ;;  %v4361_v63 = vcombine.high %v6138_v27, %v488_v50  ;;  %v4360_v47 = vcombine.low %v6138_v27, %v488_v50  ;;  %268 = vst.msk [vmem:[#allocation2 + $0xa0] sm:$0xf] %vm206_vm0, %v6228_v19  ;;  %v148_v6 = vshrl.u32 %v6228_v19, 16  ;;  %v151_v27 = vshll.u32 %v6228_v19, 16  ;;  %v5661_v32 = vld [vmem:[%s7398_s1 + $0x98] sm:$0xff]   ;;  %vm6831_vm7 = vmand %vm2333_vm5, %vm354_vm3 }
  0x33   :  { %870 = vmatmul.mubr.bf16.vlgmr.msra.gmra.mrb[0].mxu0 %v4309_v31  ;;  %1336 = vmatmul.mubr.bf16.vlgmr.msra.gmra.mrb[0].mxu1 %v4357_v33  ;;  %v4313_v3 = vcombine.high %v488_v50, %v6193_v61  ;;  %v4312_v14 = vcombine.low %v488_v50, %v6193_v61  ;;  %v234_v23 = vsel %vm6061_vm2, %v139_v9, %v233_v59  ;;  %v155_v28 = vshrl.u32 %v6246_v26, 16  ;;  %v239_v40 = vld [vmem:[#allocation2 + $0x9c] sm:$0xf]  ;;  %v242_v41 = vld [vmem:[#allocation2 + $0xa8] sm:$0xf]  ;;  %v5654_v59 = vld [vmem:[%s7398_s1 + $0x160] sm:$0xff]  }
  0x34   :  { %5256 = vmatpush3.bf16.msra.mxu0 %v6057_v43  ;;  %5288 = vmatpush3.bf16.msra.mxu1 %v5655_v16  ;;  %v228_v43 = vsel %vm6061_vm2, %v125_v52, %v227_v45  ;;  %v6223_v16 = vld [vmem:[#allocation2 + $0x3c] sm:$0xff]  ;;  %v6250_v58 = vld [vmem:[#allocation2 + $0x48] sm:$0xff]  ;;  %235 = vst [vmem:[#allocation2 + $0x84] sm:$0xf] %v234_v23  ;;  %v158_v31 = vshll.u32 %v6246_v26, 16  ;;  %v237_v34 = vsel %vm6061_vm2, %v146_v22, %v236_v18  ;;  %v6272_v42 = vrot.slane %v113_v7, 4 }
  0x35   :  { %5257 = vmatprep.subr.bf16.mxu0 %v5645_v38  ;;  %1343 = vmatprep.mubr.bf16.mxu1 %v4361_v63  ;;  %229 = vst [vmem:[#allocation2 + $0x54] sm:$0xf] %v228_v43  ;;  %v4364_v21 = vcombine.high %v6193_v61, %v6223_v16  ;;  %269 = vst.msk [vmem:[#allocation2 + $0xac] sm:$0xf] %vm206_vm0, %v6246_v26  ;;  %v4316_v33 = vcombine.high %v6223_v16, %v6250_v58  ;;  %v157_v39 = vrot.slane %v155_v28, 7  ;;  %v5659_v53 = vld [vmem:[%s7398_s1 + $0x168] sm:$0xff]  }
  0x36   :  { %5289 = vmatprep.subr.bf16.mxu1 %v5656_v49  ;;  %877 = vmatprep.mubr.bf16.mxu0 %v4313_v3  ;;  %238 = vst [vmem:[#allocation2 + $0x90] sm:$0xf] %v237_v34  ;;  %v6276_v45 = vrot.slane %v116_v10, 5  ;;  %v6290_v7 = vld [vmem:[%s7399_s0 + $0x30] sm:$0xf]  ;;  %v4315_v62 = vcombine.low %v6223_v16, %v6250_v58  ;;  %v4363_v10 = vcombine.low %v6193_v61, %v6223_v16  ;;  %v6302_v55 = vrot.slane %v123_v25, 5 }
  0x37   :  { %v160_v52 = vor.u32 %v158_v31, %v157_v39  ;;  %v6310_v63 = vld [vmem:[%s7399_s0 + $0x34] sm:$0xf]  ;;  %270 = vst.msk [vmem:[#allocation2 + $0xb8] sm:$0xf] %vm206_vm0, %v6290_v7  ;;  %v162_v61 = vshrl.u32 %v6290_v7, 16  ;;  %v165_v0 = vshll.u32 %v6290_v7, 16 }
  0x38   :  { %5258 = vmatpush3.bf16.msra.mxu0 %v5645_v38  ;;  %5290 = vmatpush3.bf16.msra.mxu1 %v5656_v49  ;;  %v150_v38 = vrot.slane %v148_v6, 7  ;;  %v6281_v49 = vld [vmem:[#allocation2 + $0x60] sm:$0xff]  ;;  %271 = vst.msk [vmem:[#allocation2 + $0xc4] sm:$0xf] %vm206_vm0, %v6310_v63  ;;  %v169_v9 = vshrl.u32 %v6310_v63, 16  ;;  %v172_v12 = vshll.u32 %v6310_v63, 16 }
  0x39   :  { %5259 = vmatprep.subr.bf16.mxu0 %v6180_v51  ;;  %5291 = vmatprep.subr.bf16.mxu1 %v5660_v13  ;;  %v243_v25 = vsel %vm6061_vm2, %v160_v52, %v242_v41  ;;  %v245_v18 = vld [vmem:[#allocation2 + $0xb4] sm:$0xf]  ;;  %v5666_v22 = vld [vmem:[%s7398_s1 + $0xa8] sm:$0xff]   ;;  %v6352_v23 = vld [vmem:[%s7399_s0 + $0x38] sm:$0xf]  ;;  %v315_v35 = vrot.slane %v151_v27, 5 }
  0x3a   :  { %v153_v50 = vor.u32 %v151_v27, %v150_v38  ;;  %244 = vst [vmem:[#allocation2 + $0xa8] sm:$0xf] %v243_v25  ;;  %v176_v34 = vshrl.u32 %v6352_v23, 16  ;;  %272 = vst.msk [vmem:[#allocation2 + $0xd0] sm:$0xf] %vm206_vm0, %v6352_v23  ;;  %v5664_v41 = vld [vmem:[%s7398_s1 + $0x170] sm:$0xff]  }
  0x3b   :  { %878 = vmatmul.mubr.bf16.gmra.mrb[4].mxu0 %v4312_v14  ;;  %1344 = vmatmul.mubr.bf16.gmra.mrb[4].mxu1 %v4360_v47  ;;  %v164_v14 = vrot.slane %v162_v61, 7  ;;  %v171_v47 = vrot.slane %v169_v9, 7  ;;  %v254_v25 = vld [vmem:[#allocation2 + $0xd8] sm:$0xf]  ;;  %v6446_v44 = vld [vmem:[%s7398_s1 + $0x200] sm:$0xff]   ;;  %v319_v36 = vrot.slane %v158_v31, 5 }
  0x3c   :  { %885 = vmatprep.mubr.bf16.mxu0 %v4316_v33  ;;  %1351 = vmatprep.mubr.bf16.mxu1 %v4364_v21  ;;  %v6279_v46 = vld [vmem:[#allocation2 + $0x54] sm:$0xff]  ;;  %v240_v11 = vsel %vm6061_vm2, %v153_v50, %v239_v40  ;;  %v248_v21 = vld [vmem:[#allocation2 + $0xc0] sm:$0xf]  ;;  %v292_v33 = vor.u32 %v6232_v20, %v6221_v54  ;;  %v6373_v54 = vld [vmem:[#allocation2 + $0x84] sm:$0xff]  ;;  %v179_v20 = vshll.u32 %v6352_v23, 16  ;;  %v178_v50 = vrot.slane %v176_v34, 7 }
  0x3d   :  { %5260 = vmatpush3.bf16.msra.mxu0 %v6180_v51  ;;  %5292 = vmatpush3.bf16.msra.mxu1 %v5660_v13  ;;  %v6298_v51 = vrot.slane %v120_v24, 4  ;;  %v5665_v24 = vld [vmem:[%s7398_s1 + $0xa0] sm:$0xff]   ;;  %v4319_v3 = vcombine.high %v6279_v46, %v6281_v49  ;;  %v4367_v43 = vcombine.high %v6250_v58, %v6279_v46  ;;  %241 = vst [vmem:[#allocation2 + $0x9c] sm:$0xf] %v240_v11  ;;  %v6336_v13 = vrot.slane %v127_v29, 4  ;;  %v6375_v15 = vld [vmem:[#allocation2 + $0x90] sm:$0xff] }
  0x3e   :  { %5261 = vmatprep.subr.bf16.mxu0 %v5651_v4  ;;  %5293 = vmatprep.subr.bf16.mxu1 %v5661_v32  ;;  %v288_v29 = vor.u32 %v6208_v8, %v6191_v60  ;;  %v6363_v60 = vrot.slane %v130_v30, 5  ;;  %v174_v8 = vor.u32 %v172_v12, %v171_v47  ;;  %v251_v11 = vld [vmem:[#allocation2 + $0xcc] sm:$0xf]  ;;  %v4370_v47 = vcombine.high %v5843_v1, %v6373_v54  ;;  %v356_v1 = vld [vmem:[#allocation2 + $0x14] sm:$0xf] }
  0x3f   :  { %v323_v26 = vrot.slane %v165_v0, 5 }
  0x40   :  { %v249_v40 = vsel %vm6061_vm2, %v174_v8, %v248_v21  ;;  %v296_v21 = vor.u32 %v6276_v45, %v6272_v42  ;;  %v300_v8 = vor.u32 %v6302_v55, %v6298_v51  ;;  %v362_v45 = vld [vmem:[#allocation2 + $0x2c] sm:$0xf] }
  0x41   :  { %5262 = vmatpush3.bf16.msra.mxu0 %v5651_v4  ;;  %5294 = vmatpush3.bf16.msra.mxu1 %v5661_v32  ;;  %v167_v4 = vor.u32 %v165_v0, %v164_v14  ;;  %v6357_v32 = vld [vmem:[%s7399_s0 + $0x3c] sm:$0xf]  ;;  %250 = vst [vmem:[#allocation2 + $0xc0] sm:$0xf] %v249_v40  ;;  %v4322_v14 = vcombine.high %v6373_v54, %v6375_v15 }
  0x42   :  { %5263 = vmatprep.subr.bf16.mxu0 %v5654_v59  ;;  %5295 = vmatprep.subr.bf16.mxu1 %v5665_v24  ;;  %v183_v38 = vshrl.u32 %v6357_v32, 16  ;;  %273 = vst.msk [vmem:[#allocation2 + $0xdc] sm:$0xf] %vm206_vm0, %v6357_v32  ;;  %v186_v39 = vshll.u32 %v6357_v32, 16  ;;  %v386_v32 = vld [vmem:[#allocation2 + $0xa4] sm:$0xf] }
  0x43   :  { %886 = vmatmul.mubr.bf16.gmra.mrb[8].mxu0 %v4315_v62  ;;  %1352 = vmatmul.mubr.bf16.gmra.mrb[8].mxu1 %v4363_v10  ;;  %v246_v30 = vsel %vm6061_vm2, %v167_v4, %v245_v18  ;;  %v5670_v62 = vld [vmem:[%s7398_s1 + $0xb0] sm:$0xff]   ;;  %v289_v10 = vrot.slane %v288_v29, 4  ;;  %v5671_v18 = vld [vmem:[%s7398_s1 + $0xb8] sm:$0xff]   ;;  %v181_v29 = vor.u32 %v179_v20, %v178_v50  ;;  %v301_v50 = vrot.slane %v300_v8, 4 }
  0x44   :  { %893 = vmatprep.mubr.bf16.mxu0 %v4319_v3  ;;  %1359 = vmatprep.mubr.bf16.mxu1 %v4367_v43  ;;  %247 = vst [vmem:[#allocation2 + $0xb4] sm:$0xf] %v246_v30  ;;  %v185_v52 = vrot.slane %v183_v38, 7  ;;  %v293_v43 = vrot.slane %v292_v33, 4  ;;  %v359_v33 = vld [vmem:[#allocation2 + $0x20] sm:$0xf]  ;;  %v357_v30 = vsel %vm6399_vm4, %v6128_v17, %v356_v1  ;;  %v363_v17 = vsel %vm6399_vm4, %v6204_v5, %v362_v45 }
  0x45   :  { %5264 = vmatpush3.bf16.msra.mxu0 %v5654_v59  ;;  %5296 = vmatpush3.bf16.msra.mxu1 %v5665_v24  ;;  %v4318_v59 = vcombine.low %v6279_v46, %v6281_v49  ;;  %v4366_v24 = vcombine.low %v6250_v58, %v6279_v46  ;;  %v5669_v58 = vld [vmem:[%s7398_s1 + $0x178] sm:$0xff]   ;;  %v360_v42 = vsel %vm6399_vm4, %v6158_v37, %v359_v33  ;;  %v297_v5 = vrot.slane %v296_v21, 4  ;;  %v5681_v3 = vld [vmem:[%s7398_s1 + $0x208] sm:$0xff]  }
  0x46   :  { %5265 = vmatprep.subr.bf16.mxu0 %v5659_v53  ;;  %5297 = vmatprep.subr.bf16.mxu1 %v5666_v22  ;;  %v188_v4 = vor.u32 %v186_v39, %v185_v52  ;;  %v6429_v40 = vld [vmem:[#allocation2 + $0x9c] sm:$0xff]  ;;  %v252_v51 = vsel %vm6061_vm2, %v181_v29, %v251_v11  ;;  %358 = vst [vmem:[#allocation2 + $0x14] sm:$0xf] %v357_v30  ;;  %361 = vst [vmem:[#allocation2 + $0x20] sm:$0xf] %v360_v42  ;;  %v311_v1 = vrot.slane %v144_v2, 5 }
  0x47   :  { %253 = vst [vmem:[#allocation2 + $0xcc] sm:$0xf] %v252_v51  ;;  %364 = vst [vmem:[#allocation2 + $0x2c] sm:$0xf] %v363_v17  ;;  %v374_v21 = vld [vmem:[#allocation2 + $0x5c] sm:$0xf] }
  0x48   :  { %v255_v55 = vsel %vm6061_vm2, %v188_v4, %v254_v25  ;;  %v371_v25 = vld [vmem:[#allocation2 + $0x50] sm:$0xf]  ;;  %v377_v29 = vld [vmem:[#allocation2 + $0x68] sm:$0xf]  ;;  %v310_v4 = vrot.slane %v141_v57, 4  ;;  %v314_v33 = vrot.slane %v148_v6, 4  ;;  %v6492_v6 = vcombine.low %v6375_v15, %v6429_v40 }
  0x49   :  { %5266 = vmatpush3.bf16.msra.mxu0 %v5659_v53  ;;  %5298 = vmatpush3.bf16.msra.mxu1 %v5666_v22  ;;  %v365_v53 = vld [vmem:[#allocation2 + $0x38] sm:$0xf]  ;;  %v304_v22 = vor.u32 %v6363_v60, %v6336_v13  ;;  %256 = vst [vmem:[#allocation2 + $0xd8] sm:$0xf] %v255_v55  ;;  %v5675_v13 = vld [vmem:[%s7398_s1 + $0x1c0] sm:$0xff]   ;;  %v6448_v60 = vld [vmem:[#allocation2 + $0xa8] sm:$0xff] }
  0x4a   :  { %5267 = vmatprep.subr.bf16.mxu0 %v5664_v41  ;;  %5299 = vmatprep.subr.bf16.mxu1 %v5670_v62  ;;  %v366_v37 = vsel %vm6399_vm4, %v289_v10, %v365_v53  ;;  %v4321_v10 = vcombine.low %v6373_v54, %v6375_v15  ;;  %v4325_v11 = vcombine.high %v6429_v40, %v6448_v60  ;;  %v318_v57 = vrot.slane %v155_v28, 4  ;;  %v380_v17 = vld [vmem:[#allocation2 + $0x8c] sm:$0xf] }
  0x4b   :  { %894 = vmatmul.mubr.bf16.gmra.mrb[12].mxu0 %v4318_v59  ;;  %1360 = vmatmul.mubr.bf16.gmra.mrb[12].mxu1 %v4366_v24  ;;  %367 = vst [vmem:[#allocation2 + $0x38] sm:$0xf] %v366_v37  ;;  %v305_v52 = vrot.slane %v304_v22, 4  ;;  %v6452_v59 = vld [vmem:[#allocation2] sm:$0xff]  ;;  %v4324_v2 = vcombine.low %v6429_v40, %v6448_v60  ;;  %v322_v30 = vrot.slane %v162_v61, 4  ;;  %v312_v42 = vor.u32 %v311_v1, %v310_v4 }
  0x4c   :  { %901 = vmatprep.mubr.bf16.mxu0 %v4322_v14  ;;  %1367 = vmatprep.mubr.bf16.mxu1 %v4370_v47  ;;  %v4369_v24 = vcombine.low %v6452_v59, %v6373_v54  ;;  %v372_v47 = vsel %vm6399_vm4, %v297_v5, %v371_v25  ;;  %v375_v54 = vsel %vm6399_vm4, %v301_v50, %v374_v21  ;;  %v326_v28 = vrot.slane %v169_v9, 4  ;;  %v383_v37 = vld [vmem:[#allocation2 + $0x98] sm:$0xf]  ;;  %v398_v4 = vld [vmem:[#allocation2 + $0xd4] sm:$0xf] }
  0x4d   :  { %5268 = vmatpush3.bf16.msra.mxu0 %v5664_v41  ;;  %5300 = vmatpush3.bf16.msra.mxu1 %v5670_v62  ;;  %v6460_v41 = vcombine.high %v6375_v15, %v6429_v40  ;;  %v368_v62 = vld [vmem:[#allocation2 + $0x44] sm:$0xf]  ;;  %373 = vst [vmem:[#allocation2 + $0x50] sm:$0xf] %v372_v47  ;;  %376 = vst [vmem:[#allocation2 + $0x5c] sm:$0xf] %v375_v54  ;;  %v316_v31 = vor.u32 %v315_v35, %v314_v33 }
  0x4e   :  { %5269 = vmatprep.subr.bf16.mxu0 %v5669_v58  ;;  %5301 = vmatprep.subr.bf16.mxu1 %v5671_v18  ;;  %v369_v14 = vsel %vm6399_vm4, %v293_v43, %v368_v62  ;;  %v307_v43 = vrot.slane %v137_v56, 5  ;;  %v510_v56 = vld [vmem:[#allocation2 + $0xc0] sm:$0xff]  ;;  %v327_v15 = vrot.slane %v172_v12, 5  ;;  %v330_v45 = vrot.slane %v176_v34, 4  ;;  %v512_v0 = vld [vmem:[#allocation2 + $0xcc] sm:$0xff] }
  0x4f   :  { %370 = vst [vmem:[#allocation2 + $0x44] sm:$0xf] %v369_v14  ;;  %v320_v53 = vor.u32 %v319_v36, %v318_v57  ;;  %v331_v61 = vrot.slane %v179_v20, 5  ;;  %v334_v7 = vrot.slane %v183_v38, 4  ;;  %v335_v63 = vrot.slane %v186_v39, 5  ;;  %v5677_v57 = vld [vmem:[%s7398_s1 + $0x180] sm:$0xff]  }
  0x50   :  { %v313_v12 = vrot.slane %v312_v42, 4  ;;  %v6515_v34 = vld [vmem:[#allocation2 + $0xd8] sm:$0xff]  ;;  %v317_v22 = vrot.slane %v316_v31, 4  ;;  %v324_v20 = vor.u32 %v323_v26, %v322_v30  ;;  %v6521_v55 = vcombine.high %v510_v56, %v512_v0  ;;  %v5672_v47 = vld [vmem:[#allocation2 + $0x14] ss:$12 sps:$4 sm:$0xff]  }
  0x51   :  { %5270 = vmatpush3.bf16.msra.mxu0 %v5669_v58  ;;  %5302 = vmatpush3.bf16.msra.mxu1 %v5671_v18  ;;  %v378_v58 = vsel %vm6399_vm4, %v305_v52, %v377_v29  ;;  %v306_v18 = vrot.slane %v134_v48, 4  ;;  %v508_v48 = vld [vmem:[#allocation2 + $0xb4] sm:$0xff]  ;;  %v321_v40 = vrot.slane %v320_v53, 4  ;;  %v4331_v38 = vcombine.high %v512_v0, %v6515_v34  ;;  %v389_v52 = vld [vmem:[#allocation2 + $0xb0] sm:$0xf] }
  0x52   :  { %4935 = vmatprep.subr.bf16.mxu0 %v5675_v13  ;;  %5319 = vmatprep.subr.bf16.mxu1 %v6446_v44  ;;  %379 = vst [vmem:[#allocation2 + $0x68] sm:$0xf] %v378_v58  ;;  %v4328_v19 = vcombine.high %v508_v48, %v510_v56  ;;  %v6497_v27 = vcombine.high %v6448_v60, %v508_v48  ;;  %v5674_v54 = vld [vmem:[#allocation2 + $0x8] ss:$12 sps:$4 sm:$0xff]   ;;  %v392_v58 = vld [vmem:[#allocation2 + $0xbc] sm:$0xf] }
  0x53   :  { %902 = vmatmul.mubr.bf16.gmra.mrb[16].mxu0 %v4321_v10  ;;  %1368 = vmatmul.mubr.bf16.gmra.mrb[16].mxu1 %v4369_v24  ;;  %v308_v8 = vor.u32 %v307_v43, %v306_v18  ;;  %v4327_v51 = vcombine.low %v508_v48, %v510_v56  ;;  %v6518_v23 = vcombine.low %v6448_v60, %v508_v48  ;;  %v395_v43 = vld [vmem:[#allocation2 + $0xc8] sm:$0xf]  ;;  %v401_v1 = vld [vmem:[#allocation2 + $0xe0] sm:$0xf]  ;;  %v5685_v42 = vld [vmem:[%s7398_s1 + $0x1d0] sm:$0xff]  }
  0x54   :  { %909 = vmatprep.mubr.bf16.mxu0 %v4325_v11  ;;  %1375 = vmatprep.mubr.bf16.mxu1 %v6460_v41  ;;  %v328_v39 = vor.u32 %v327_v15, %v326_v28  ;;  %v332_v13 = vor.u32 %v331_v61, %v330_v45  ;;  %v384_v50 = vsel %vm6399_vm4, %v313_v12, %v383_v37  ;;  %v325_v11 = vrot.slane %v324_v20, 4  ;;  %v5676_v36 = vld [vmem:[#allocation2 + $0x20] ss:$12 sps:$4 sm:$0xff]   ;;  %v5688_v26 = vld [vmem:[%s7398_s1 + $0x210] sm:$0xff]   ;;  %v5691_v45 = vld [vmem:[%s7398_s1 + $0x218] sm:$0xff]  }
  0x55   :  { %v309_v9 = vrot.slane %v308_v8, 4  ;;  %v387_v60 = vsel %vm6399_vm4, %v317_v22, %v386_v32  ;;  %v336_v10 = vor.u32 %v335_v63, %v334_v7  ;;  %385 = vst [vmem:[#allocation2 + $0x98] sm:$0xf] %v384_v50  ;;  %v390_v24 = vsel %vm6399_vm4, %v321_v40, %v389_v52  ;;  %v5687_v31 = vld [vmem:[%s7398_s1 + $0x190] sm:$0xff]   ;;  %v5690_v7 = vld [vmem:[%s7398_s1 + $0x198] sm:$0xff]   ;;  %v5695_v63 = vld [vmem:[%s7398_s1 + $0x1e0] sm:$0xff]  }
  0x56   :  { %388 = vst [vmem:[#allocation2 + $0xa4] sm:$0xf] %v387_v60  ;;  %391 = vst [vmem:[#allocation2 + $0xb0] sm:$0xf] %v390_v24  ;;  %v329_v62 = vrot.slane %v328_v39, 4  ;;  %v333_v25 = vrot.slane %v332_v13, 4  ;;  %v4330_v21 = vcombine.low %v512_v0, %v6515_v34  ;;  %v6534_v29 = vcombine.low %v510_v56, %v512_v0 }
  0x57   :  { %v381_v5 = vsel %vm6399_vm4, %v309_v9, %v380_v17  ;;  %v337_v14 = vrot.slane %v336_v10, 4  ;;  %v393_v18 = vsel %vm6399_vm4, %v325_v11, %v392_v58  ;;  %v5673_v56 = vld [vmem:[#allocation2 + $0x2c] ss:$12 sps:$4 sm:$0xff]   ;;  %v5682_v8 = vld [vmem:[#allocation2 + $0x44] ss:$12 sps:$4 sm:$0xff]  }
  0x58   :  { %382 = vst [vmem:[#allocation2 + $0x8c] sm:$0xf] %v381_v5  ;;  %394 = vst [vmem:[#allocation2 + $0xbc] sm:$0xf] %v393_v18  ;;  %v396_v33 = vsel %vm6399_vm4, %v329_v62, %v395_v43  ;;  %v399_v48 = vsel %vm6399_vm4, %v333_v25, %v398_v4  ;;  %v5684_v30 = vld [vmem:[#allocation2 + $0x38] ss:$12 sps:$4 sm:$0xff]  }
  0x59   :  { %v402_v35 = vsel %vm6399_vm4, %v337_v14, %v401_v1  ;;  %397 = vst [vmem:[#allocation2 + $0xc8] sm:$0xf] %v396_v33  ;;  %400 = vst [vmem:[#allocation2 + $0xd4] sm:$0xf] %v399_v48  ;;  %v5683_v28 = vld [vmem:[#allocation2 + $0x5c] ss:$12 sps:$4 sm:$0xff]   ;;  %v4463_v33 = vcombine.high %v6281_v49, %v6452_v59 }
  0x5a   :  { %403 = vst [vmem:[#allocation2 + $0xe0] sm:$0xf] %v402_v35  ;;  %v5686_v15 = vld [vmem:[#allocation2 + $0x50] ss:$12 sps:$4 sm:$0xff]   ;;  %v5698_v0 = vld [vmem:[%s7398_s1 + $0x220] sm:$0xff]   ;;  %v5699_v40 = vld [vmem:[%s7398_s1 + $0x1e8] sm:$0xff]  }
  0x5b   :  { %910 = vmatmul.mubr.bf16.gmra.mrb[20].mxu0 %v4324_v2  ;;  %1376 = vmatmul.mubr.bf16.gmra.mrb[20].mxu1 %v6492_v6  ;;  %v5679_v2 = vld [vmem:[%s7398_s1 + $0x1c8] sm:$0xff]   ;;  %v5697_v12 = vld [vmem:[%s7398_s1 + $0x1a0] sm:$0xff]   ;;  %v5705_v37 = vld [vmem:[%s7398_s1 + $0x1f0] sm:$0xff]  }
  0x5c   :  { %917 = vmatprep.mubr.bf16.mxu0 %v4328_v19  ;;  %1383 = vmatprep.mubr.bf16.mxu1 %v6497_v27  ;;  %v5680_v19 = vld [vmem:[%s7398_s1 + $0x188] sm:$0xff]   ;;  %v5708_v32 = vld [vmem:[%s7398_s1 + $0x230] sm:$0xff]   ;;  %v5709_v50 = vld [vmem:[%s7398_s1 + $0x1f8] sm:$0xff]  }
  0x5d   :  { %v5693_v9 = vld [vmem:[#allocation2 + $0xa4] ss:$12 sps:$4 sm:$0xff]   ;;  %v5700_v17 = vld [vmem:[%s7398_s1 + $0x1a8] sm:$0xff]   ;;  %v5711_v60 = vld [vmem:[%s7398_s1 + $0x238] sm:$0xff]  }
  0x5e   :  { %v5696_v22 = vld [vmem:[#allocation2 + $0x98] ss:$12 sps:$4 sm:$0xff]   ;;  %v5707_v5 = vld [vmem:[%s7398_s1 + $0x1b0] sm:$0xff]   ;;  %v5714_v52 = vld [vmem:[#allocation2 + $0x1c] ss:$12 sps:$4 sm:$0xff]  }
  0x5f   :  { %v5692_v53 = vld [vmem:[#allocation2 + $0x8c] ss:$12 sps:$4 sm:$0xff]   ;;  %v1502_v11 = vld [vmem:[#allocation2 + $0x30] sm:$0xff] }
  0x60   :  { %v5694_v61 = vld [vmem:[#allocation2 + $0x80] ss:$12 sps:$4 sm:$0xff]   ;;  %v5702_v20 = vld [vmem:[#allocation2 + $0xbc] ss:$12 sps:$4 sm:$0xff]   ;;  %v5712_v62 = vld [vmem:[#allocation2 + $0x18] ss:$12 sps:$4 sm:$0xff]   ;;  %v4457_v14 = vcombine.high %v1502_v11, %v6223_v16 }
  0x61   :  { %v5703_v39 = vld [vmem:[#allocation2 + $0xd4] ss:$12 sps:$4 sm:$0xff]   ;;  %v5710_v24 = vld [vmem:[%s7398_s1 + $0x1b8] sm:$0xff]  }
  0x62   :  { %v5706_v13 = vld [vmem:[#allocation2 + $0xc8] ss:$12 sps:$4 sm:$0xff]   ;;  %v5715_v10 = vld [vmem:[#allocation2 + $0x20] ss:$12 sps:$4 sm:$0xff]   ;;  %v5716_v25 = vld [vmem:[#allocation2 + $0x38] ss:$12 sps:$4 sm:$0xff]  }
  0x63   :  { %918 = vmatmul.mubr.bf16.gmra.mrb[24].mxu0 %v4327_v51  ;;  %1384 = vmatmul.mubr.bf16.gmra.mrb[24].mxu1 %v6518_v23  ;;  %v5701_v51 = vld [vmem:[%s7398_s1 + $0x228] sm:$0xff]   ;;  %v5719_v43 = vld [vmem:[#allocation2 + $0x98] ss:$12 sps:$4 sm:$0xff]   ;;  %v5720_v1 = vld [vmem:[#allocation2 + $0xb0] ss:$12 sps:$4 sm:$0xff]  }
  0x64   :  { %925 = vmatprep.mubr.bf16.mxu0 %v4331_v38  ;;  %1391 = vmatprep.mubr.bf16.mxu1 %v6521_v55  ;;  %v5704_v38 = vld [vmem:[#allocation2 + $0xb0] ss:$12 sps:$4 sm:$0xff]   ;;  %v5718_v58 = vld [vmem:[#allocation2 + $0x68] ss:$12 sps:$4 sm:$0xff]   ;;  %v5722_v35 = vld [vmem:[#allocation2 + $0xe0] ss:$12 sps:$4 sm:$0xff]  }
  0x65   :  { %v5721_v48 = vld [vmem:[#allocation2 + $0xc8] ss:$12 sps:$4 sm:$0xff]  }
  0x6b   :  { %926 = vmatmul.mubr.bf16.gmra.mrb[28].mxu0 %v4330_v21  ;;  %1392 = vmatmul.mubr.bf16.gmra.mrb[28].mxu1 %v6534_v29  ;;  %v1506_v21 = vld [vmem:[#allocation2 + $0x48] sm:$0xff] }
  0x6c   :  { %5271 = vmatprep.mubr.bf16.mxu0 %v5672_v47  ;;  %5303 = vmatprep.mubr.bf16.mxu1 %v5674_v54  ;;  %v5717_v47 = vld [vmem:[#allocation2 + $0x50] ss:$12 sps:$4 sm:$0xff]   ;;  %v4456_v54 = vcombine.low %v1502_v11, %v6223_v16  ;;  %v4460_v18 = vcombine.high %v1506_v21, %v6279_v46  ;;  %v4459_v4 = vcombine.low %v1506_v21, %v6279_v46 }
  0x6d   :  { %v4462_v16 = vcombine.low %v6281_v49, %v6452_v59  ;;  %v4475_v46 = vcombine.high %v6515_v34, %v6452_v59  ;;  %v4474_v49 = vcombine.low %v6515_v34, %v6452_v59  ;;  %v5727_v59 = vld [vmem:[%s7400_s3 + $0x110] sm:$0xff]   ;;  %v5729_v34 = vld [vmem:[%s7400_s3 + $0x140] sm:$0xff]  }
  0x73   :  { %5272 = vmatmul.mubr.bf16.vlgmr.msra.gmra.mrb[32].mxu0 %v5673_v56  ;;  %5304 = vmatmul.mubr.bf16.vlgmr.msra.gmra.mrb[32].mxu1 %v5676_v36  ;;  %v5732_v56 = vld [vmem:[%s7400_s3 + $0x148] sm:$0xff]   ;;  %v5733_v36 = vld [vmem:[%s7400_s3 + $0x120] sm:$0xff]  }
  0x74   :  { %4936 = vmatpush3.bf16.msra.mxu0 %v5677_v57  ;;  %5320 = vmatpush3.bf16.msra.mxu1 %v6446_v44  ;;  %v5689_v44 = vld [vmem:[%s7398_s1 + $0x1d8] sm:$0xff]  }
  0x75   :  { %4937 = vmatprep.subr.bf16.mxu0 %v5679_v2  ;;  %5321 = vmatprep.subr.bf16.mxu1 %v5681_v3  ;;  %v5731_v57 = vld [vmem:[%s7400_s3 + $0xd8] sm:$0xff]   ;;  %v5734_v2 = vld [vmem:[%s7400_s3 + $0xe0] sm:$0xff]  }
  0x76   :  { %5275 = vmatprep.mubr.bf16.mxu0 %v5682_v8  ;;  %5307 = vmatprep.mubr.bf16.mxu1 %v5684_v30  ;;  %v5736_v8 = vld [vmem:[%s7400_s3 + $0x128] sm:$0xff]   ;;  %v5738_v30 = vld [vmem:[%s7400_s3 + $0x158] sm:$0xff]  }
  0x78   :  { %4938 = vmatpush3.bf16.msra.mxu0 %v5680_v19  ;;  %5322 = vmatpush3.bf16.msra.mxu1 %v5681_v3  ;;  %v5735_v3 = vld [vmem:[%s7400_s3 + $0x150] sm:$0xff]   ;;  %v5737_v19 = vld [vmem:[%s7400_s3 + $0xe8] sm:$0xff]  }
  0x79   :  { %4939 = vmatprep.subr.bf16.mxu0 %v5685_v42  ;;  %5323 = vmatprep.subr.bf16.mxu1 %v5688_v26  ;;  %v5739_v42 = vld [vmem:[%s7400_s3 + $0x130] sm:$0xff]  }
  0x7b   :  { %5276 = vmatmul.mubr.bf16.gmra.mrb[36].mxu0 %v5683_v28  ;;  %5308 = vmatmul.mubr.bf16.gmra.mrb[36].mxu1 %v5686_v15  ;;  %v5740_v28 = vld [vmem:[%s7400_s3 + $0xf0] sm:$0xff]  }
  0x7c   :  { %4940 = vmatpush3.bf16.msra.mxu0 %v5687_v31  ;;  %5324 = vmatpush3.bf16.msra.mxu1 %v5688_v26  ;;  %v5741_v26 = vld [vmem:[%s7400_s3 + $0x160] sm:$0xff]  }
  0x7d   :  { %4941 = vmatprep.subr.bf16.mxu0 %v5689_v44  ;;  %5325 = vmatprep.subr.bf16.mxu1 %v5691_v45  ;;  %v5742_v44 = vld [vmem:[%s7400_s3 + $0x138] sm:$0xff]  }
  0x7e   :  { %5279 = vmatprep.mubr.bf16.mxu0 %v5692_v53  ;;  %5311 = vmatprep.mubr.bf16.mxu1 %v5694_v61 }
  0x80   :  { %4942 = vmatpush3.bf16.msra.mxu0 %v5690_v7  ;;  %5326 = vmatpush3.bf16.msra.mxu1 %v5691_v45  ;;  %v5744_v45 = vld [vmem:[%s7400_s3 + $0x168] sm:$0xff]   ;;  %v5743_v7 = vld [vmem:[%s7400_s3 + $0xf8] sm:$0xff]  }
  0x81   :  { %4943 = vmatprep.subr.bf16.mxu0 %v5695_v63  ;;  %5327 = vmatprep.subr.bf16.mxu1 %v5698_v0 }
  0x83   :  { %5280 = vmatmul.mubr.bf16.gmra.mrb[40].mxu0 %v5693_v9  ;;  %5312 = vmatmul.mubr.bf16.gmra.mrb[40].mxu1 %v5696_v22 }
  0x84   :  { %4944 = vmatpush3.bf16.msra.mxu0 %v5697_v12  ;;  %5328 = vmatpush3.bf16.msra.mxu1 %v5698_v0 }
  0x85   :  { %4945 = vmatprep.subr.bf16.mxu0 %v5699_v40  ;;  %5329 = vmatprep.subr.bf16.mxu1 %v5701_v51 }
  0x86   :  { %5283 = vmatprep.mubr.bf16.mxu0 %v5702_v20  ;;  %5315 = vmatprep.mubr.bf16.mxu1 %v5704_v38  ;;  %v5747_v38 = vld [vmem:[%s7400_s3 + $0x170] sm:$0xff]  }
  0x88   :  { %4946 = vmatpush3.bf16.msra.mxu0 %v5700_v17  ;;  %5330 = vmatpush3.bf16.msra.mxu1 %v5701_v51 }
  0x89   :  { %4947 = vmatprep.subr.bf16.mxu0 %v5705_v37  ;;  %5331 = vmatprep.subr.bf16.mxu1 %v5708_v32 }
  0x8b   :  { %5284 = vmatmul.mubr.bf16.gmra.mrb[44].mxu0 %v5703_v39  ;;  %5316 = vmatmul.mubr.bf16.gmra.mrb[44].mxu1 %v5706_v13 }
  0x8c   :  { %4948 = vmatpush3.bf16.msra.mxu0 %v5707_v5  ;;  %5332 = vmatpush3.bf16.msra.mxu1 %v5708_v32 }
  0x8d   :  { %4949 = vmatprep.subr.bf16.mxu0 %v5709_v50  ;;  %5333 = vmatprep.subr.bf16.mxu1 %v5711_v60 }
  0x8e   :  { %1883 = vmatprep.mubr.bf16.mxu0 %v5714_v52  ;;  %5335 = vmatprep.mubr.bf16.mxu1 %v5715_v10  ;;  %v5749_v52 = vld [vmem:[%s7400_s3 + $0x178] sm:$0xff]  }
  0x90   :  { %4950 = vmatpush3.bf16.msra.mxu0 %v5710_v24  ;;  %5334 = vmatpush3.bf16.msra.mxu1 %v5711_v60 }
  0x91   :  { %5351 = vmatprep.subr.bf16.mxu1 %v5729_v34 }
  0x93   :  { %1884 = vmatmul.mubr.bf16.vlgmr.msra.gmra.mrb[48].mxu0 %v5712_v62  ;;  %5336 = vmatmul.mubr.bf16.vlgmr.msra.gmra.mrb[32].mxu1 %v5716_v25 }
  0x94   :  { %1891 = vmatprep.mubr.bf16.mxu0 %v4457_v14  ;;  %5339 = vmatprep.mubr.bf16.mxu1 %v5717_v47 }
  0x95   :  { %5352 = vmatpush3.bf16.msra.mxu1 %v5729_v34 }
  0x96   :  { %5353 = vmatprep.subr.bf16.mxu1 %v5732_v56 }
  0x99   :  { %5354 = vmatpush3.bf16.msra.mxu1 %v5732_v56 }
  0x9a   :  { %5355 = vmatprep.subr.bf16.mxu1 %v5735_v3 }
  0x9b   :  { %1892 = vmatmul.mubr.bf16.gmra.mrb[52].mxu0 %v4456_v54  ;;  %5340 = vmatmul.mubr.bf16.gmra.mrb[36].mxu1 %v5718_v58 }
  0x9c   :  { %1899 = vmatprep.mubr.bf16.mxu0 %v4460_v18  ;;  %5343 = vmatprep.mubr.bf16.mxu1 %v5719_v43 }
  0x9d   :  { %5356 = vmatpush3.bf16.msra.mxu1 %v5735_v3 }
  0x9e   :  { %5357 = vmatprep.subr.bf16.mxu1 %v5738_v30 }
  0xa1   :  { %5358 = vmatpush3.bf16.msra.mxu1 %v5738_v30 }
  0xa2   :  { %5359 = vmatprep.subr.bf16.mxu1 %v5741_v26 }
  0xa3   :  { %1900 = vmatmul.mubr.bf16.gmra.mrb[56].mxu0 %v4459_v4  ;;  %5344 = vmatmul.mubr.bf16.gmra.mrb[40].mxu1 %v5720_v1 }
  0xa4   :  { %1907 = vmatprep.mubr.bf16.mxu0 %v4463_v33  ;;  %5347 = vmatprep.mubr.bf16.mxu1 %v5721_v48 }
  0xa5   :  { %5360 = vmatpush3.bf16.msra.mxu1 %v5741_v26 }
  0xa6   :  { %5361 = vmatprep.subr.bf16.mxu1 %v5744_v45 }
  0xa9   :  { %5362 = vmatpush3.bf16.msra.mxu1 %v5744_v45 }
  0xaa   :  { %5363 = vmatprep.subr.bf16.mxu1 %v5747_v38 }
  0xab   :  { %1908 = vmatmul.mubr.bf16.gmra.mrb[60].mxu0 %v4462_v16  ;;  %5348 = vmatmul.mubr.bf16.gmra.mrb[44].mxu1 %v5722_v35 }
  0xac   :  { %1915 = vmatprep.mubr.bf16.mxu0 %v6460_v41  ;;  %v5723_v41 = vld [vmem:[%s7400_s3 + $0x100] sm:$0xff]  }
  0xad   :  { %5015 = vmatprep.subr.bf16.mxu0 %v5723_v41  ;;  %5364 = vmatpush3.bf16.msra.mxu1 %v5747_v38 }
  0xae   :  { %5365 = vmatprep.subr.bf16.mxu1 %v5749_v52 }
  0xb1   :  { %5366 = vmatpush3.bf16.msra.mxu1 %v5749_v52 }
  0xb3   :  { %1916 = vmatmul.mubr.bf16.gmra.mrb[64].mxu0 %v6492_v6  ;;  %v5724_v6 = vld [vmem:[%s7400_s3 + $0xc0] sm:$0xff]  }
  0xb4   :  { %1923 = vmatprep.mubr.bf16.mxu0 %v6497_v27  ;;  %5016 = vmatpush3.bf16.msra.mxu0 %v5724_v6  ;;  %v5725_v27 = vld [vmem:[%s7400_s3 + $0x108] sm:$0xff]  }
  0xb5   :  { %5017 = vmatprep.subr.bf16.mxu0 %v5725_v27 }
  0xbb   :  { %1924 = vmatmul.mubr.bf16.gmra.mrb[68].mxu0 %v6518_v23  ;;  %v5726_v23 = vld [vmem:[%s7400_s3 + $0xc8] sm:$0xff]  }
  0xbc   :  { %1931 = vmatprep.mubr.bf16.mxu0 %v6521_v55  ;;  %5018 = vmatpush3.bf16.msra.mxu0 %v5726_v23  ;;  %v5728_v55 = vld [vmem:[%s7400_s3 + $0xd0] sm:$0xff]  }
  0xbd   :  { %5019 = vmatprep.subr.bf16.mxu0 %v5727_v59 }
  0xc0   :  { %5020 = vmatpush3.bf16.msra.mxu0 %v5728_v55 }
  0xc3   :  { %1932 = vmatmul.mubr.bf16.gmra.mrb[72].mxu0 %v6534_v29  ;;  %v5730_v29 = vld [vmem:[%s7400_s3 + $0x118] sm:$0xff]  }
  0xc4   :  { %1939 = vmatprep.mubr.bf16.mxu0 %v4475_v46  ;;  %5021 = vmatprep.subr.bf16.mxu0 %v5730_v29 }
  0xc5   :  { %5022 = vmatpush3.bf16.msra.mxu0 %v5731_v57 }
  0xc6   :  { %5023 = vmatprep.subr.bf16.mxu0 %v5733_v36 }
  0xc9   :  { %5024 = vmatpush3.bf16.msra.mxu0 %v5734_v2 }
  0xca   :  { %5025 = vmatprep.subr.bf16.mxu0 %v5736_v8 }
  0xcb   :  { %1940 = vmatmul.mubr.bf16.gmra.mrb[76].mxu0 %v4474_v49 }
  0xcd   :  { %5026 = vmatpush3.bf16.msra.mxu0 %v5737_v19 }
  0xce   :  { %5027 = vmatprep.subr.bf16.mxu0 %v5739_v42 }
  0xd1   :  { %5028 = vmatpush3.bf16.msra.mxu0 %v5740_v28 }
  0xd2   :  { %5029 = vmatprep.subr.bf16.mxu0 %v5742_v44 }
  0xd5   :  { %5030 = vmatpush3.bf16.msra.mxu0 %v5743_v7  ;;  %v6748_v7 = vld [vmem:[%s7400_s3 + $0x80] sm:$0xff]  }
  0xd6   :  { %5383 = vmatprep.subr.bf16.mxu1 %v6748_v7 }
 0x106   :  { %v4791_v31 = vpop.f32.mrb[0].mxu0  ;;  %v4871_v15 = vpop.f32.mrb[0].mxu1 }
 0x107   :  { %v4792_v53 = vpop.f32.mrb[1].mxu0  ;;  %v4872_v61 = vpop.f32.mrb[1].mxu1 }
 0x108   :  { %v6696_v63 = vadd.f32 %v4792_v53, %v4791_v31  ;;  %v4794_v0 = vpop.f32.mrb[2].mxu0  ;;  %v6698_v9 = vadd.f32 %v4872_v61, %v4871_v15  ;;  %v4874_v12 = vpop.f32.mrb[2].mxu1  ;;  %v5761_v61 = vld [vmem:[%s7400_s3 + $0x40] sm:$0xff]  }
 0x109   :  { %v4795_v22 = vpop.f32.mrb[3].mxu0  ;;  %v4875_v40 = vpop.f32.mrb[3].mxu1  ;;  %5095 = vmatprep.subr.bf16.mxu0 %v5761_v61 }
 0x10a   :  { %v6700_v51 = vadd.f32 %v4795_v22, %v4794_v0  ;;  %v6702_v20 = vadd.f32 %v4875_v40, %v4874_v12 }
 0x10e   :  { %v4797_v17 = vpop.f32.mrb[4].mxu0  ;;  %v4877_v37 = vpop.f32.mrb[4].mxu1 }
 0x10f   :  { %v4798_v32 = vpop.f32.mrb[5].mxu0  ;;  %v4878_v39 = vpop.f32.mrb[5].mxu1 }
 0x110   :  { %v6707_v13 = vadd.f32 %v4798_v32, %v4797_v17  ;;  %v4800_v5 = vpop.f32.mrb[6].mxu0  ;;  %v6709_v50 = vadd.f32 %v4878_v39, %v4877_v37  ;;  %v4880_v60 = vpop.f32.mrb[6].mxu1 }
 0x111   :  { %v4801_v10 = vpop.f32.mrb[7].mxu0  ;;  %v4881_v24 = vpop.f32.mrb[7].mxu1 }
 0x112   :  { %v6714_v11 = vadd.f32 %v4801_v10, %v4800_v5  ;;  %v6716_v62 = vadd.f32 %v4881_v24, %v4880_v60 }
 0x116   :  { %v4803_v25 = vpop.f32.mrb[8].mxu0  ;;  %v4883_v14 = vpop.f32.mrb[8].mxu1 }
 0x117   :  { %v4804_v47 = vpop.f32.mrb[9].mxu0  ;;  %v4884_v21 = vpop.f32.mrb[9].mxu1 }
 0x118   :  { %v6718_v54 = vadd.f32 %v4804_v47, %v4803_v25  ;;  %v4806_v58 = vpop.f32.mrb[10].mxu0  ;;  %v6720_v18 = vadd.f32 %v4884_v21, %v4883_v14  ;;  %v4886_v43 = vpop.f32.mrb[10].mxu1 }
 0x119   :  { %v4807_v4 = vpop.f32.mrb[11].mxu0  ;;  %v4887_v1 = vpop.f32.mrb[11].mxu1 }
 0x11a   :  { %v6722_v33 = vadd.f32 %v4807_v4, %v4806_v58  ;;  %v6724_v48 = vadd.f32 %v4887_v1, %v4886_v43 }
 0x11e   :  { %v4809_v16 = vpop.f32.mrb[12].mxu0  ;;  %v4889_v35 = vpop.f32.mrb[12].mxu1 }
 0x11f   :  { %v4810_v46 = vpop.f32.mrb[13].mxu0  ;;  %v4890_v49 = vpop.f32.mrb[13].mxu1 }
 0x120   :  { %v6726_v41 = vadd.f32 %v4810_v46, %v4809_v16  ;;  %v4812_v6 = vpop.f32.mrb[14].mxu0  ;;  %v6728_v27 = vadd.f32 %v4890_v49, %v4889_v35  ;;  %v4892_v23 = vpop.f32.mrb[14].mxu1 }
 0x121   :  { %v4813_v59 = vpop.f32.mrb[15].mxu0  ;;  %v4893_v34 = vpop.f32.mrb[15].mxu1 }
 0x122   :  { %v6730_v55 = vadd.f32 %v4813_v59, %v4812_v6  ;;  %v6732_v29 = vadd.f32 %v4893_v34, %v4892_v23 }
 0x126   :  { %v4815_v56 = vpop.f32.mrb[16].mxu0  ;;  %v4895_v57 = vpop.f32.mrb[16].mxu1 }
 0x127   :  { %v4816_v36 = vpop.f32.mrb[17].mxu0  ;;  %v4896_v2 = vpop.f32.mrb[17].mxu1 }
 0x128   :  { %v6734_v3 = vadd.f32 %v4816_v36, %v4815_v56  ;;  %v4818_v8 = vpop.f32.mrb[18].mxu0  ;;  %v6736_v30 = vadd.f32 %v4896_v2, %v4895_v57  ;;  %v4898_v19 = vpop.f32.mrb[18].mxu1 }
 0x129   :  { %v4819_v42 = vpop.f32.mrb[19].mxu0  ;;  %v4899_v26 = vpop.f32.mrb[19].mxu1 }
 0x12a   :  { %v6738_v28 = vadd.f32 %v4819_v42, %v4818_v8  ;;  %v6740_v31 = vadd.f32 %v4899_v26, %v4898_v19 }
 0x12e   :  { %v4821_v15 = vpop.f32.mrb[20].mxu0  ;;  %v4901_v44 = vpop.f32.mrb[20].mxu1 }
 0x12f   :  { %v4822_v45 = vpop.f32.mrb[21].mxu0  ;;  %v4902_v53 = vpop.f32.mrb[21].mxu1 }
 0x130   :  { %v4823_v0 = vadd.f32 %v4822_v45, %v4821_v15  ;;  %v4824_v12 = vpop.f32.mrb[22].mxu0  ;;  %v4903_v22 = vadd.f32 %v4902_v53, %v4901_v44  ;;  %v4904_v40 = vpop.f32.mrb[22].mxu1 }
 0x131   :  { %v4825_v38 = vpop.f32.mrb[23].mxu0  ;;  %v4905_v17 = vpop.f32.mrb[23].mxu1 }
 0x132   :  { %v4826_v37 = vadd.f32 %v4825_v38, %v4824_v12  ;;  %v4906_v32 = vadd.f32 %v4905_v17, %v4904_v40 }
 0x136   :  { %v4827_v39 = vpop.f32.mrb[24].mxu0  ;;  %v4907_v5 = vpop.f32.mrb[24].mxu1 }
 0x137   :  { %v4828_v60 = vpop.f32.mrb[25].mxu0  ;;  %v4908_v52 = vpop.f32.mrb[25].mxu1 }
 0x138   :  { %v4829_v10 = vadd.f32 %v4828_v60, %v4827_v39  ;;  %v4830_v24 = vpop.f32.mrb[26].mxu0  ;;  %v4909_v25 = vadd.f32 %v4908_v52, %v4907_v5  ;;  %v4910_v14 = vpop.f32.mrb[26].mxu1 }
 0x139   :  { %v4831_v47 = vpop.f32.mrb[27].mxu0  ;;  %v4911_v21 = vpop.f32.mrb[27].mxu1 }
 0x13a   :  { %v4832_v58 = vadd.f32 %v4831_v47, %v4830_v24  ;;  %v4912_v43 = vadd.f32 %v4911_v21, %v4910_v14 }
 0x13e   :  { %v4833_v4 = vpop.f32.mrb[28].mxu0  ;;  %v4913_v1 = vpop.f32.mrb[28].mxu1 }
 0x13f   :  { %v4834_v16 = vpop.f32.mrb[29].mxu0  ;;  %v4914_v35 = vpop.f32.mrb[29].mxu1 }
 0x140   :  { %v4835_v46 = vadd.f32 %v4834_v16, %v4833_v4  ;;  %v4836_v49 = vpop.f32.mrb[30].mxu0  ;;  %v4915_v6 = vadd.f32 %v4914_v35, %v4913_v1  ;;  %v4916_v23 = vpop.f32.mrb[30].mxu1 }
 0x141   :  { %v4837_v59 = vpop.f32.mrb[31].mxu0  ;;  %v4917_v34 = vpop.f32.mrb[31].mxu1 }
 0x142   :  { %v4838_v56 = vadd.f32 %v4837_v59, %v4836_v49  ;;  %v4918_v57 = vadd.f32 %v4917_v34, %v4916_v23 }
 0x146   :  { %v5273_v36 = vpop.f32.mrb[32].mxu0 }
 0x147   :  { %v977_v2 = vadd.f32 %v5273_v36, %v6707_v13  ;;  %v968_v8 = vpop.f32.mrb[33].mxu0 }
 0x148   :  { %v969_v19 = vadd.f32 %v6696_v63, %v968_v8  ;;  %v5274_v42 = vpop.f32.mrb[34].mxu0 }
 0x149   :  { %v6754_v26 = vadd.f32 %v6709_v50, %v977_v2  ;;  %v980_v15 = vadd.f32 %v5274_v42, %v6714_v11  ;;  %v971_v44 = vpop.f32.mrb[35].mxu0 }
 0x14a   :  { %v1338_v45 = vadd.f32 %v6698_v9, %v969_v19  ;;  %v972_v53 = vadd.f32 %v6700_v51, %v971_v44 }
 0x14b   :  { %v6760_v61 = vadd.f32 %v6716_v62, %v980_v15 }
 0x14c   :  { %v1341_v12 = vadd.f32 %v6702_v20, %v972_v53 }
 0x14e   :  { %v5277_v13 = vpop.f32.mrb[36].mxu0 }
 0x14f   :  { %v993_v40 = vadd.f32 %v5277_v13, %v6726_v41  ;;  %v984_v63 = vpop.f32.mrb[37].mxu0 }
 0x150   :  { %v985_v38 = vadd.f32 %v6718_v54, %v984_v63  ;;  %v5278_v50 = vpop.f32.mrb[38].mxu0 }
 0x151   :  { %v6766_v17 = vadd.f32 %v6728_v27, %v993_v40  ;;  %v996_v11 = vadd.f32 %v5278_v50, %v6730_v55  ;;  %v987_v9 = vpop.f32.mrb[39].mxu0 }
 0x152   :  { %v6770_v51 = vadd.f32 %v6720_v18, %v985_v38  ;;  %v988_v62 = vadd.f32 %v6722_v33, %v987_v9 }
 0x153   :  { %v6774_v20 = vadd.f32 %v6732_v29, %v996_v11 }
 0x154   :  { %v6777_v41 = vadd.f32 %v6724_v48, %v988_v62 }
 0x156   :  { %v5281_v39 = vpop.f32.mrb[40].mxu0 }
 0x157   :  { %v1009_v54 = vadd.f32 %v5281_v39, %v4823_v0  ;;  %v1000_v5 = vpop.f32.mrb[41].mxu0 }
 0x158   :  { %v1001_v27 = vadd.f32 %v6734_v3, %v1000_v5  ;;  %v5282_v60 = vpop.f32.mrb[42].mxu0 }
 0x159   :  { %v6780_v52 = vadd.f32 %v4903_v22, %v1009_v54  ;;  %v1012_v55 = vadd.f32 %v5282_v60, %v4826_v37  ;;  %v1003_v24 = vpop.f32.mrb[43].mxu0 }
 0x15a   :  { %v6783_v18 = vadd.f32 %v6736_v30, %v1001_v27  ;;  %v1004_v33 = vadd.f32 %v6738_v28, %v1003_v24 }
 0x15b   :  { %v6786_v29 = vadd.f32 %v4906_v32, %v1012_v55 }
 0x15c   :  { %v6789_v48 = vadd.f32 %v6740_v31, %v1004_v33 }
 0x15e   :  { %v5285_v14 = vpop.f32.mrb[44].mxu0 }
 0x15f   :  { %v1025_v0 = vadd.f32 %v5285_v14, %v4835_v46  ;;  %v1016_v47 = vpop.f32.mrb[45].mxu0 }
 0x160   :  { %v1017_v21 = vadd.f32 %v4829_v10, %v1016_v47  ;;  %v5286_v3 = vpop.f32.mrb[46].mxu0 }
 0x161   :  { %v6791_v4 = vadd.f32 %v4915_v6, %v1025_v0  ;;  %v1028_v22 = vadd.f32 %v5286_v3, %v4838_v56  ;;  %v1019_v37 = vpop.f32.mrb[47].mxu0  ;;  %v2335_v0 = vld [vmem:[#allocation3 + $0xc] sm:$0xf] }
 0x162   :  { %v6793_v1 = vadd.f32 %v4909_v25, %v1017_v21  ;;  %v1020_v30 = vadd.f32 %v4832_v58, %v1019_v37  ;;  %v6802_v25 = vld [vmem:[%s7401_s2] ss:$0 sm:$0xff] }
 0x163   :  { %v6795_v16 = vadd.f32 %v4918_v57, %v1028_v22 }
 0x164   :  { %v6797_v28 = vadd.f32 %v4912_v43, %v1020_v30 }
 0x166   :  { %v4951_v32 = vpop.f32.mrb[48].mxu0  ;;  %v5337_v35 = vpop.f32.mrb[32].mxu1 }
 0x167   :  { %v4952_v31 = vpop.f32.mrb[49].mxu0  ;;  %v1982_v49 = vpop.f32.mrb[33].mxu1 }
 0x168   :  { %v4953_v23 = vadd.f32 %v4952_v31, %v4951_v32  ;;  %v4954_v46 = vpop.f32.mrb[50].mxu0  ;;  %v5338_v59 = vpop.f32.mrb[34].mxu1  ;;  %v2481_v32 = vld [vmem:[#allocation3 + $0x14] sm:$0xf] }
 0x169   :  { %v4955_v10 = vpop.f32.mrb[51].mxu0  ;;  %v1985_v34 = vpop.f32.mrb[35].mxu1 }
 0x16a   :  { %v5453_v6 = vadd.f32 %v4953_v23, %v1338_v45  ;;  %v4956_v36 = vadd.f32 %v4955_v10, %v4954_v46  ;;  %v2338_v10 = vld [vmem:[#allocation3 + $0x18] sm:$0xf] }
 0x16c   :  { %v5454_v58 = vadd.f32 %v5453_v6, %v1982_v49  ;;  %v5461_v56 = vadd.f32 %v4956_v36, %v1341_v12 }
 0x16e   :  { %v2068_v43 = vadd.f32 %v5454_v58, %v6802_v25  ;;  %v5462_v57 = vadd.f32 %v5461_v56, %v1985_v34  ;;  %v4957_v2 = vpop.f32.mrb[52].mxu0  ;;  %v6805_v8 = vpop.f32.mrb[36].mxu1 }
 0x16f   :  { %v4958_v19 = vpop.f32.mrb[53].mxu0  ;;  %v6807_v42 = vpop.f32.mrb[37].mxu1 }
 0x170   :  { %v2084_v15 = vmax.f32 %v2068_v43, 0.0  ;;  %v2069_v44 = vadd.f32 %v5462_v57, %v6802_v25  ;;  %v4959_v45 = vadd.f32 %v4958_v19, %v4957_v2  ;;  %v4960_v53 = vpop.f32.mrb[54].mxu0  ;;  %v6810_v13 = vpop.f32.mrb[38].mxu1 }
 0x171   :  { %v4961_v40 = vpop.f32.mrb[55].mxu0  ;;  %v2001_v63 = vpop.f32.mrb[39].mxu1 }
 0x172   :  { %v2100_v12 = vpack.c.bf16 %v2084_v15, %v2084_v15  ;;  %v2085_v38 = vmax.f32 %v2069_v44, 0.0  ;;  %v5449_v50 = vadd.f32 %v4959_v45, %v6754_v26  ;;  %v4962_v11 = vadd.f32 %v4961_v40, %v4960_v53 }
 0x174   :  { %v2205_v9 = vshrl.u32 %v2100_v12, 16  ;;  %v2208_v62 = vshll.u32 %v2100_v12, 16  ;;  %2384 = vst.msk [vmem:[#allocation3 + $0x10] sm:$0xf] %vm2333_vm5, %v2100_v12  ;;  %v2101_v39 = vpack.c.bf16 %v2085_v38, %v2085_v38  ;;  %v5450_v54 = vadd.f32 %v5449_v50, %v5337_v35  ;;  %v2484_v38 = vld [vmem:[#allocation3 + $0x20] sm:$0xf] }
 0x175   :  { %v5457_v5 = vadd.f32 %v4962_v11, %v6760_v61 }
 0x176   :  { %v2207_v27 = vrot.slane %v2205_v9, 7  ;;  %v2400_v60 = vrot.slane %v2205_v9, 4  ;;  %v2401_v55 = vrot.slane %v2208_v62, 5  ;;  %v2212_v24 = vshrl.u32 %v2101_v39, 16  ;;  %2385 = vst.msk [vmem:[#allocation3 + $0x1c] sm:$0xf] %vm2333_vm5, %v2101_v39 }
 0x177   :  { %v4963_v33 = vpop.f32.mrb[56].mxu0  ;;  %v6816_v14 = vpop.f32.mrb[40].mxu1  ;;  %v2215_v47 = vshll.u32 %v2101_v39, 16  ;;  %v2070_v21 = vadd.f32 %v5450_v54, %v6802_v25  ;;  %v5458_v61 = vadd.f32 %v5457_v5, %v5338_v59 }
 0x178   :  { %v4964_v3 = vpop.f32.mrb[57].mxu0  ;;  %v6825_v22 = vpop.f32.mrb[41].mxu1  ;;  %v2210_v37 = vor.u32 %v2208_v62, %v2207_v27  ;;  %v2402_v30 = vor.u32 %v2401_v55, %v2400_v60  ;;  %v2214_v35 = vrot.slane %v2212_v24, 7  ;;  %v2404_v31 = vrot.slane %v2212_v24, 4 }
 0x179   :  { %v4966_v49 = vpop.f32.mrb[58].mxu0  ;;  %v6827_v23 = vpop.f32.mrb[42].mxu1  ;;  %v2405_v34 = vrot.slane %v2215_v47, 5  ;;  %v2086_v59 = vmax.f32 %v2070_v21, 0.0  ;;  %v2071_v6 = vadd.f32 %v5458_v61, %v6802_v25  ;;  %v4965_v36 = vadd.f32 %v4964_v3, %v4963_v33 }
 0x17a   :  { %v4967_v58 = vpop.f32.mrb[59].mxu0  ;;  %v6836_v56 = vpop.f32.mrb[43].mxu1  ;;  %v2336_v43 = vsel %vm6820_vm6, %v2210_v37, %v2335_v0  ;;  %v2403_v57 = vrot.slane %v2402_v30, 4  ;;  %v2217_v2 = vor.u32 %v2215_v47, %v2214_v35  ;;  %v2341_v47 = vld [vmem:[#allocation3 + $0x24] sm:$0xf] }
 0x17b   :  { %v4968_v19 = vadd.f32 %v4967_v58, %v4966_v49  ;;  %2337 = vst [vmem:[#allocation3 + $0xc] sm:$0xf] %v2336_v43  ;;  %v2406_v15 = vor.u32 %v2405_v34, %v2404_v31  ;;  %v2102_v44 = vpack.c.bf16 %v2086_v59, %v2086_v59  ;;  %v2087_v45 = vmax.f32 %v2071_v6, 0.0 }
 0x17c   :  { %v5469_v53 = vadd.f32 %v4965_v36, %v6770_v51  ;;  %v2482_v40 = vsel %vm6831_vm7, %v2403_v57, %v2481_v32  ;;  %v2339_v12 = vsel %vm6820_vm6, %v2217_v2, %v2338_v10  ;;  %v2487_v10 = vld [vmem:[#allocation3 + $0x2c] sm:$0xf]  ;;  %v2344_v57 = vld [vmem:[#allocation3 + $0x30] sm:$0xf] }
 0x17d   :  { %v5477_v50 = vadd.f32 %v4968_v19, %v6777_v41  ;;  %2483 = vst [vmem:[#allocation3 + $0x14] sm:$0xf] %v2482_v40  ;;  %2340 = vst [vmem:[#allocation3 + $0x18] sm:$0xf] %v2339_v12  ;;  %v2407_v11 = vrot.slane %v2406_v15, 4  ;;  %v2219_v9 = vshrl.u32 %v2102_v44, 16  ;;  %v2103_v39 = vpack.c.bf16 %v2087_v45, %v2087_v45 }
 0x17e   :  { %v2222_v62 = vshll.u32 %v2102_v44, 16  ;;  %2386 = vst.msk [vmem:[#allocation3 + $0x28] sm:$0xf] %vm2333_vm5, %v2102_v44  ;;  %v5470_v54 = vadd.f32 %v5469_v53, %v6807_v42  ;;  %v4969_v5 = vpop.f32.mrb[60].mxu0  ;;  %v6848_v27 = vpop.f32.mrb[44].mxu1 }
 0x17f   :  { %v5478_v51 = vadd.f32 %v5477_v50, %v2001_v63  ;;  %v2485_v60 = vsel %vm6831_vm7, %v2407_v11, %v2484_v38  ;;  %v2221_v55 = vrot.slane %v2219_v9, 7  ;;  %v2408_v24 = vrot.slane %v2219_v9, 4  ;;  %2387 = vst.msk [vmem:[#allocation3 + $0x34] sm:$0xf] %vm2333_vm5, %v2103_v39  ;;  %v4970_v33 = vpop.f32.mrb[61].mxu0  ;;  %v6853_v0 = vpop.f32.mrb[45].mxu1 }
 0x180   :  { %v2409_v41 = vrot.slane %v2222_v62, 5  ;;  %2486 = vst [vmem:[#allocation3 + $0x20] sm:$0xf] %v2485_v60  ;;  %v2226_v21 = vshrl.u32 %v2103_v39, 16  ;;  %v2229_v61 = vshll.u32 %v2103_v39, 16  ;;  %v2072_v42 = vadd.f32 %v5470_v54, %v6802_v25  ;;  %v4972_v3 = vpop.f32.mrb[62].mxu0 }
 0x181   :  { %v2073_v63 = vadd.f32 %v5478_v51, %v6802_v25  ;;  %v6857_v37 = vpop.f32.mrb[46].mxu1  ;;  %v2224_v30 = vor.u32 %v2222_v62, %v2221_v55  ;;  %v4971_v35 = vadd.f32 %v4970_v33, %v4969_v5  ;;  %v4973_v31 = vpop.f32.mrb[63].mxu0  ;;  %v2490_v50 = vld [vmem:[#allocation3 + $0x38] sm:$0xf]  ;;  %v2347_v60 = vld [vmem:[#allocation3 + $0x3c] sm:$0xf] }
 0x182   :  { %v2410_v32 = vor.u32 %v2409_v41, %v2408_v24  ;;  %v6859_v49 = vpop.f32.mrb[47].mxu1  ;;  %v2228_v34 = vrot.slane %v2226_v21, 7  ;;  %v2412_v59 = vrot.slane %v2226_v21, 4  ;;  %v2413_v6 = vrot.slane %v2229_v61, 5  ;;  %v6864_v15 = vld [vmem:[#allocation3 + $0xc] sm:$0xff] }
 0x183   :  { %v2088_v36 = vmax.f32 %v2072_v42, 0.0  ;;  %v2342_v58 = vsel %vm6820_vm6, %v2224_v30, %v2341_v47  ;;  %v2089_v2 = vmax.f32 %v2073_v63, 0.0  ;;  %v5465_v19 = vadd.f32 %v4971_v35, %v6766_v17 }
 0x184   :  { %v2411_v43 = vrot.slane %v2410_v32, 4  ;;  %2343 = vst [vmem:[#allocation3 + $0x24] sm:$0xf] %v2342_v58  ;;  %v2231_v44 = vor.u32 %v2229_v61, %v2228_v34  ;;  %v2414_v45 = vor.u32 %v2413_v6, %v2412_v59  ;;  %v4974_v40 = vadd.f32 %v4973_v31, %v4972_v3  ;;  %v6866_v12 = vld [vmem:[#allocation3 + $0x18] sm:$0xff]  ;;  %v2350_v6 = vld [vmem:[#allocation3 + $0x48] sm:$0xf] }
 0x185   :  { %v2104_v53 = vpack.c.bf16 %v2088_v36, %v2088_v36  ;;  %v2105_v11 = vpack.c.bf16 %v2089_v2, %v2089_v2  ;;  %v5466_v9 = vadd.f32 %v5465_v19, %v6805_v8  ;;  %v4566_v62 = vcombine.low %v6864_v15, %v6866_v12  ;;  %v2493_v58 = vld [vmem:[#allocation3 + $0x44] sm:$0xf] }
 0x186   :  { %v2488_v38 = vsel %vm6831_vm7, %v2411_v43, %v2487_v10  ;;  %v2345_v17 = vsel %vm6820_vm6, %v2231_v44, %v2344_v57  ;;  %v2415_v39 = vrot.slane %v2414_v45, 4  ;;  %v4975_v5 = vpop.f32.mrb[64].mxu0  ;;  %v5473_v41 = vadd.f32 %v4974_v40, %v6774_v20  ;;  %v5763_v44 = vld [vmem:[%s7400_s3] sm:$0xff]  }
 0x187   :  { %2489 = vst [vmem:[#allocation3 + $0x2c] sm:$0xf] %v2488_v38  ;;  %v2233_v54 = vshrl.u32 %v2104_v53, 16  ;;  %v2236_v51 = vshll.u32 %v2104_v53, 16  ;;  %2388 = vst.msk [vmem:[#allocation3 + $0x40] sm:$0xf] %vm2333_vm5, %v2104_v53  ;;  %v2074_v8 = vadd.f32 %v5466_v9, %v6802_v25  ;;  %v4567_v19 = vcombine.high %v6864_v15, %v6866_v12 }
 0x188   :  { %2346 = vst [vmem:[#allocation3 + $0x30] sm:$0xf] %v2345_v17  ;;  %v2240_v55 = vshrl.u32 %v2105_v11, 16  ;;  %v2243_v24 = vshll.u32 %v2105_v11, 16  ;;  %2389 = vst.msk [vmem:[#allocation3 + $0x4c] sm:$0xf] %vm2333_vm5, %v2105_v11  ;;  %v2491_v47 = vsel %vm6831_vm7, %v2415_v39, %v2490_v50  ;;  %v5474_v20 = vadd.f32 %v5473_v41, %v6810_v13 }
 0x189   :  { %v4976_v33 = vpop.f32.mrb[65].mxu0  ;;  %v2235_v21 = vrot.slane %v2233_v54, 7  ;;  %v2416_v61 = vrot.slane %v2233_v54, 4  ;;  %v2417_v42 = vrot.slane %v2236_v51, 5  ;;  %v5748_v3 = vld [vmem:[#allocation3 + $0x14] ss:$12 sps:$4 sm:$0xff]   ;;  %2994 = vmatprep.mubr.bf16.mxu0 %v4567_v19 }
 0x18a   :  { %v4978_v63 = vpop.f32.mrb[66].mxu0  ;;  %2492 = vst [vmem:[#allocation3 + $0x38] sm:$0xf] %v2491_v47  ;;  %v2242_v30 = vrot.slane %v2240_v55, 7  ;;  %v2420_v32 = vrot.slane %v2240_v55, 4  ;;  %v2421_v35 = vrot.slane %v2243_v24, 5  ;;  %v4977_v36 = vadd.f32 %v4976_v33, %v4975_v5  ;;  %5367 = vmatprep.mubr.bf16.mxu1 %v5748_v3  ;;  %2995 = vmatmul.mubr.bf16.vlgmr.msra.gmra.mrb[80].mxu0 %v4566_v62 }
 0x18b   :  { %v2090_v31 = vmax.f32 %v2074_v8, 0.0  ;;  %v4979_v10 = vpop.f32.mrb[67].mxu0  ;;  %v2238_v34 = vor.u32 %v2236_v51, %v2235_v21  ;;  %v2418_v59 = vor.u32 %v2417_v42, %v2416_v61  ;;  %v2496_v40 = vld [vmem:[#allocation3 + $0x50] sm:$0xf]  ;;  %v2075_v13 = vadd.f32 %v5474_v20, %v6802_v25  ;;  %v5765_v50 = vld [vmem:[%s7400_s3 + $0x48] sm:$0xff]   ;;  %5096 = vmatpush3.bf16.msra.mxu0 %v5763_v44  ;;  %v5770_v20 = vld [vmem:[%s7400_s3 + $0x50] sm:$0xff]  }
 0x18c   :  { %v2245_v43 = vor.u32 %v2243_v24, %v2242_v30  ;;  %v2422_v57 = vor.u32 %v2421_v35, %v2420_v32  ;;  %v5485_v38 = vadd.f32 %v4977_v36, %v6783_v18  ;;  %v2353_v51 = vld [vmem:[#allocation3 + $0x54] sm:$0xf]  ;;  %v5766_v61 = vld [vmem:[%s7400_s3 + $0x8] sm:$0xff]   ;;  %v6914_v30 = vld [vmem:[#allocation3 + $0x24] sm:$0xff]  ;;  %5097 = vmatprep.subr.bf16.mxu0 %v5765_v50 }
 0x18d   :  { %v2106_v2 = vpack.c.bf16 %v2090_v31, %v2090_v31  ;;  %v2348_v45 = vsel %vm6820_vm6, %v2238_v34, %v2347_v60  ;;  %v2419_v53 = vrot.slane %v2418_v59, 4  ;;  %v2091_v18 = vmax.f32 %v2075_v13, 0.0  ;;  %v2356_v44 = vld [vmem:[#allocation3 + $0x60] sm:$0xf] }
 0x18e   :  { %2349 = vst [vmem:[#allocation3 + $0x3c] sm:$0xf] %v2348_v45  ;;  %v2351_v11 = vsel %vm6820_vm6, %v2245_v43, %v2350_v6  ;;  %v2423_v9 = vrot.slane %v2422_v57, 4  ;;  %v5486_v5 = vadd.f32 %v5485_v38, %v6825_v22  ;;  %v4980_v60 = vadd.f32 %v4979_v10, %v4978_v63  ;;  %v4981_v55 = vpop.f32.mrb[68].mxu0  ;;  %v6910_v22 = vld [vmem:[%s7400_s3 + $0x88] sm:$0xff]  }
 0x18f   :  { %v2247_v17 = vshrl.u32 %v2106_v2, 16  ;;  %v2250_v39 = vshll.u32 %v2106_v2, 16  ;;  %2390 = vst.msk [vmem:[#allocation3 + $0x58] sm:$0xf] %vm2333_vm5, %v2106_v2  ;;  %v2494_v54 = vsel %vm6831_vm7, %v2419_v53, %v2493_v58  ;;  %2352 = vst [vmem:[#allocation3 + $0x48] sm:$0xf] %v2351_v11  ;;  %v2107_v62 = vpack.c.bf16 %v2091_v18, %v2091_v18  ;;  %5098 = vmatpush3.bf16.msra.mxu0 %v5766_v61 }
 0x190   :  { %v6900_v24 = vld [vmem:[#allocation3 + $0x30] sm:$0xff]  ;;  %2495 = vst [vmem:[#allocation3 + $0x44] sm:$0xf] %v2494_v54  ;;  %v2497_v8 = vsel %vm6831_vm7, %v2423_v9, %v2496_v40  ;;  %v4982_v21 = vpop.f32.mrb[69].mxu0  ;;  %v2076_v42 = vadd.f32 %v5486_v5, %v6802_v25  ;;  %v5493_v63 = vadd.f32 %v4980_v60, %v6789_v48  ;;  %v2499_v48 = vld [vmem:[#allocation3 + $0x5c] sm:$0xf]  ;;  %5099 = vmatprep.subr.bf16.mxu0 %v5770_v20 }
 0x191   :  { %v2249_v41 = vrot.slane %v2247_v17, 7  ;;  %v2424_v33 = vrot.slane %v2247_v17, 4  ;;  %v2425_v47 = vrot.slane %v2250_v39, 5  ;;  %2498 = vst [vmem:[#allocation3 + $0x50] sm:$0xf] %v2497_v8  ;;  %v4983_v3 = vadd.f32 %v4982_v21, %v4981_v55  ;;  %v4984_v32 = vpop.f32.mrb[70].mxu0 }
 0x192   :  { %v5752_v35 = vld [vmem:[#allocation3 + $0x2c] ss:$12 sps:$4 sm:$0xff]   ;;  %v4570_v34 = vcombine.high %v6914_v30, %v6900_v24  ;;  %v4569_v59 = vcombine.low %v6914_v30, %v6900_v24  ;;  %v4985_v6 = vpop.f32.mrb[71].mxu0  ;;  %v2254_v36 = vshrl.u32 %v2107_v62, 16  ;;  %v2257_v58 = vshll.u32 %v2107_v62, 16 }
 0x193   :  { %v2252_v31 = vor.u32 %v2250_v39, %v2249_v41  ;;  %v2426_v10 = vor.u32 %v2425_v47, %v2424_v33  ;;  %2391 = vst.msk [vmem:[#allocation3 + $0x64] sm:$0xf] %vm2333_vm5, %v2107_v62  ;;  %v2092_v43 = vmax.f32 %v2076_v42, 0.0  ;;  %v5494_v57 = vadd.f32 %v5493_v63, %v6836_v56  ;;  %5368 = vmatmul.mubr.bf16.vlgmr.msra.gmra.mrb[48].mxu1 %v5752_v35  ;;  %v5772_v56 = vld [vmem:[%s7400_s3 + $0x10] sm:$0xff]  }
 0x194   :  { %v5481_v45 = vadd.f32 %v4983_v3, %v6780_v52  ;;  %3002 = vmatprep.mubr.bf16.mxu0 %v4570_v34  ;;  %v4986_v53 = vadd.f32 %v4985_v6, %v4984_v32  ;;  %5384 = vmatpush3.bf16.msra.mxu1 %v6748_v7  ;;  %v2256_v40 = vrot.slane %v2254_v36, 7  ;;  %v2428_v13 = vrot.slane %v2254_v36, 4  ;;  %v5773_v52 = vld [vmem:[%s7400_s3 + $0x90] sm:$0xff]   ;;  %v2502_v7 = vld [vmem:[#allocation3 + $0x68] sm:$0xf] }
 0x195   :  { %v2354_v2 = vsel %vm6820_vm6, %v2252_v31, %v2353_v51  ;;  %v2427_v19 = vrot.slane %v2426_v10, 4  ;;  %v2429_v38 = vrot.slane %v2257_v58, 5  ;;  %v2108_v50 = vpack.c.bf16 %v2092_v43, %v2092_v43  ;;  %5385 = vmatprep.subr.bf16.mxu1 %v6910_v22  ;;  %v5774_v51 = vld [vmem:[%s7400_s3 + $0x58] sm:$0xff]   ;;  %3003 = vmatmul.mubr.bf16.gmra.mrb[84].mxu0 %v4569_v59  ;;  %v6947_v41 = vld [vmem:[#allocation3 + $0x3c] sm:$0xff]  ;;  %v2359_v10 = vld [vmem:[#allocation3 + $0x84] sm:$0xf] }
 0x196   :  { %2355 = vst [vmem:[#allocation3 + $0x54] sm:$0xf] %v2354_v2  ;;  %v2077_v9 = vadd.f32 %v5494_v57, %v6802_v25  ;;  %v5482_v17 = vadd.f32 %v5481_v45, %v6816_v14  ;;  %v5489_v39 = vadd.f32 %v4986_v53, %v6786_v29  ;;  %v6941_v54 = vld [vmem:[#allocation3 + $0x48] sm:$0xff]  ;;  %v2259_v18 = vor.u32 %v2257_v58, %v2256_v40  ;;  %v4987_v8 = vpop.f32.mrb[72].mxu0  ;;  %v2362_v40 = vld [vmem:[#allocation3 + $0x90] sm:$0xf] }
 0x197   :  { %v2500_v11 = vsel %vm6831_vm7, %v2427_v19, %v2499_v48  ;;  %v2430_v5 = vor.u32 %v2429_v38, %v2428_v13  ;;  %v2261_v60 = vshrl.u32 %v2108_v50, 16  ;;  %v2264_v55 = vshll.u32 %v2108_v50, 16  ;;  %2392 = vst.msk [vmem:[#allocation3 + $0x88] sm:$0xf] %vm2333_vm5, %v2108_v50  ;;  %v5775_v29 = vld [vmem:[%s7400_s3 + $0x18] sm:$0xff]   ;;  %v4988_v61 = vpop.f32.mrb[73].mxu0  ;;  %5100 = vmatpush3.bf16.msra.mxu0 %v5772_v56 }
 0x198   :  { %2501 = vst [vmem:[#allocation3 + $0x5c] sm:$0xf] %v2500_v11  ;;  %v6955_v14 = vld [vmem:[%s7400_s3 + $0x98] sm:$0xff]   ;;  %v2093_v33 = vmax.f32 %v2077_v9, 0.0  ;;  %v2078_v47 = vadd.f32 %v5482_v17, %v6802_v25  ;;  %v5490_v21 = vadd.f32 %v5489_v39, %v6827_v23  ;;  %v4573_v62 = vcombine.high %v6947_v41, %v6941_v54  ;;  %v5755_v42 = vld [vmem:[#allocation3 + $0x44] ss:$12 sps:$4 sm:$0xff]   ;;  %5386 = vmatpush3.bf16.msra.mxu1 %v6910_v22 }
 0x199   :  { %v2357_v63 = vsel %vm6820_vm6, %v2259_v18, %v2356_v44  ;;  %v2431_v3 = vrot.slane %v2430_v5, 4  ;;  %v2263_v32 = vrot.slane %v2261_v60, 7  ;;  %v2432_v35 = vrot.slane %v2261_v60, 4  ;;  %v4990_v31 = vpop.f32.mrb[74].mxu0  ;;  %5387 = vmatprep.subr.bf16.mxu1 %v5773_v52  ;;  %5371 = vmatprep.mubr.bf16.mxu1 %v5755_v42  ;;  %v5779_v22 = vld [vmem:[%s7400_s3 + $0x60] sm:$0xff]  }
 0x19a   :  { %2358 = vst [vmem:[#allocation3 + $0x60] sm:$0xf] %v2357_v63  ;;  %v2433_v34 = vrot.slane %v2264_v55, 5  ;;  %v2109_v23 = vpack.c.bf16 %v2093_v33, %v2093_v33  ;;  %v2094_v59 = vmax.f32 %v2078_v47, 0.0  ;;  %v2079_v6 = vadd.f32 %v5490_v21, %v6802_v25  ;;  %3010 = vmatprep.mubr.bf16.mxu0 %v4573_v62  ;;  %v4991_v20 = vpop.f32.mrb[75].mxu0  ;;  %5101 = vmatprep.subr.bf16.mxu0 %v5774_v51  ;;  %v5781_v56 = vld [vmem:[%s7400_s3 + $0x20] sm:$0xff]  }
 0x19b   :  { %v2503_v48 = vsel %vm6831_vm7, %v2431_v3, %v2502_v7  ;;  %v2266_v36 = vor.u32 %v2264_v55, %v2263_v32  ;;  %v4989_v58 = vadd.f32 %v4988_v61, %v4987_v8  ;;  %v4572_v43 = vcombine.low %v6947_v41, %v6941_v54  ;;  %v2505_v2 = vld [vmem:[#allocation3 + $0x8c] sm:$0xf]  ;;  %5102 = vmatpush3.bf16.msra.mxu0 %v5775_v29  ;;  %v5782_v11 = vld [vmem:[%s7400_s3 + $0xa0] sm:$0xff]   ;;  %v2508_v39 = vld [vmem:[#allocation3 + $0x98] sm:$0xf] }
 0x19c   :  { %2504 = vst [vmem:[#allocation3 + $0x68] sm:$0xf] %v2503_v48  ;;  %v2434_v57 = vor.u32 %v2433_v34, %v2432_v35  ;;  %v2268_v19 = vshrl.u32 %v2109_v23, 16  ;;  %v2271_v44 = vshll.u32 %v2109_v23, 16  ;;  %2393 = vst.msk [vmem:[#allocation3 + $0x94] sm:$0xf] %vm2333_vm5, %v2109_v23  ;;  %v2110_v45 = vpack.c.bf16 %v2094_v59, %v2094_v59  ;;  %5388 = vmatpush3.bf16.msra.mxu1 %v5773_v52 }
 0x19d   :  { %v2360_v53 = vsel %vm6820_vm6, %v2266_v36, %v2359_v10  ;;  %v2095_v13 = vmax.f32 %v2079_v6, 0.0  ;;  %v5501_v38 = vadd.f32 %v4989_v58, %v6793_v1  ;;  %v4992_v50 = vadd.f32 %v4991_v20, %v4990_v31  ;;  %5389 = vmatprep.subr.bf16.mxu1 %v6955_v14  ;;  %v5783_v52 = vld [vmem:[%s7400_s3 + $0x68] sm:$0xff]   ;;  %5103 = vmatprep.subr.bf16.mxu0 %v5779_v22  ;;  %v2511_v31 = vld [vmem:[#allocation3 + $0xa4] sm:$0xf] }
 0x19e   :  { %2361 = vst [vmem:[#allocation3 + $0x84] sm:$0xf] %v2360_v53  ;;  %v2435_v7 = vrot.slane %v2434_v57, 4  ;;  %v2270_v9 = vrot.slane %v2268_v19, 7  ;;  %v2436_v1 = vrot.slane %v2268_v19, 4  ;;  %v2437_v17 = vrot.slane %v2271_v44, 5  ;;  %3011 = vmatmul.mubr.bf16.gmra.mrb[88].mxu0 %v4572_v43 }
 0x19f   :  { %2394 = vst.msk [vmem:[#allocation3 + $0xa0] sm:$0xf] %vm2333_vm5, %v2110_v45  ;;  %v2275_v51 = vshrl.u32 %v2110_v45, 16  ;;  %v2278_v18 = vshll.u32 %v2110_v45, 16  ;;  %v2111_v5 = vpack.c.bf16 %v2095_v13, %v2095_v13  ;;  %v5502_v60 = vadd.f32 %v5501_v38, %v6853_v0  ;;  %v4993_v55 = vpop.f32.mrb[76].mxu0  ;;  %5104 = vmatpush3.bf16.msra.mxu0 %v5781_v56  ;;  %v5784_v32 = vld [vmem:[%s7400_s3 + $0x28] sm:$0xff]  }
 0x1a0   :  { %v2506_v8 = vsel %vm6831_vm7, %v2435_v7, %v2505_v2  ;;  %v2273_v29 = vor.u32 %v2271_v44, %v2270_v9  ;;  %v2438_v33 = vor.u32 %v2437_v17, %v2436_v1  ;;  %v2365_v47 = vld [vmem:[#allocation3 + $0x9c] sm:$0xf]  ;;  %v5509_v21 = vadd.f32 %v4992_v50, %v6797_v28  ;;  %v4994_v61 = vpop.f32.mrb[77].mxu0  ;;  %5390 = vmatpush3.bf16.msra.mxu1 %v6955_v14  ;;  %v5788_v6 = vld [vmem:[%s7400_s3 + $0x70] sm:$0xff]   ;;  %v2368_v57 = vld [vmem:[#allocation3 + $0xa8] sm:$0xf] }
 0x1a1   :  { %2507 = vst [vmem:[#allocation3 + $0x8c] sm:$0xf] %v2506_v8  ;;  %v2277_v62 = vrot.slane %v2275_v51, 7  ;;  %v2440_v42 = vrot.slane %v2275_v51, 4  ;;  %v2441_v63 = vrot.slane %v2278_v18, 5  ;;  %v2282_v3 = vshrl.u32 %v2111_v5, 16  ;;  %5391 = vmatprep.subr.bf16.mxu1 %v5782_v11  ;;  %5105 = vmatprep.subr.bf16.mxu0 %v5783_v52 }
 0x1a2   :  { %2395 = vst.msk [vmem:[#allocation3 + $0xac] sm:$0xf] %vm2333_vm5, %v2111_v5  ;;  %v4996_v0 = vpop.f32.mrb[78].mxu0  ;;  %v2363_v28 = vsel %vm6820_vm6, %v2273_v29, %v2362_v40  ;;  %v2439_v35 = vrot.slane %v2438_v33, 4  ;;  %v2285_v14 = vshll.u32 %v2111_v5, 16  ;;  %v2080_v10 = vadd.f32 %v5502_v60, %v6802_v25  ;;  %v6999_v34 = vld [vmem:[#allocation3 + $0x60] sm:$0xff] }
 0x1a3   :  { %v4997_v23 = vpop.f32.mrb[79].mxu0  ;;  %v5785_v59 = vld [vmem:[%s7400_s3 + $0xa8] sm:$0xff]   ;;  %2364 = vst [vmem:[#allocation3 + $0x90] sm:$0xf] %v2363_v28  ;;  %v2280_v20 = vor.u32 %v2278_v18, %v2277_v62  ;;  %v2442_v22 = vor.u32 %v2441_v63, %v2440_v42  ;;  %v2284_v48 = vrot.slane %v2282_v3, 7  ;;  %v2444_v36 = vrot.slane %v2282_v3, 4  ;;  %5106 = vmatpush3.bf16.msra.mxu0 %v5784_v32 }
 0x1a4   :  { %v5758_v58 = vld [vmem:[#allocation3 + $0x5c] ss:$12 sps:$4 sm:$0xff]   ;;  %v2509_v43 = vsel %vm6831_vm7, %v2439_v35, %v2508_v39  ;;  %v2445_v2 = vrot.slane %v2285_v14, 5  ;;  %v2096_v19 = vmax.f32 %v2080_v10, 0.0  ;;  %v5510_v44 = vadd.f32 %v5509_v21, %v6859_v49  ;;  %5392 = vmatpush3.bf16.msra.mxu1 %v5782_v11  ;;  %v7012_v38 = vld [vmem:[#allocation3 + $0x54] sm:$0xff]  ;;  %v5790_v11 = vld [vmem:[%s7400_s3 + $0x30] sm:$0xff]   ;;  %5107 = vmatprep.subr.bf16.mxu0 %v5788_v6 }
 0x1a5   :  { %2510 = vst [vmem:[#allocation3 + $0x98] sm:$0xf] %v2509_v43  ;;  %v2366_v45 = vsel %vm6820_vm6, %v2280_v20, %v2365_v47  ;;  %v2443_v53 = vrot.slane %v2442_v22, 4  ;;  %v2287_v40 = vor.u32 %v2285_v14, %v2284_v48  ;;  %v4995_v13 = vadd.f32 %v4994_v61, %v4993_v55  ;;  %5372 = vmatmul.mubr.bf16.gmra.mrb[52].mxu1 %v5758_v58  ;;  %v5791_v7 = vld [vmem:[%s7400_s3 + $0xb0] sm:$0xff]   ;;  %v2514_v17 = vld [vmem:[#allocation3 + $0xb0] sm:$0xf] }
 0x1a6   :  { %2367 = vst [vmem:[#allocation3 + $0x9c] sm:$0xf] %v2366_v45  ;;  %v2446_v50 = vor.u32 %v2445_v2, %v2444_v36  ;;  %v2112_v56 = vpack.c.bf16 %v2096_v19, %v2096_v19  ;;  %v2081_v52 = vadd.f32 %v5510_v44, %v6802_v25  ;;  %v4576_v49 = vcombine.high %v7012_v38, %v6999_v34  ;;  %v5793_v18 = vld [vmem:[%s7400_s3 + $0x78] sm:$0xff]   ;;  %v2371_v3 = vld [vmem:[#allocation3 + $0xb4] sm:$0xf] }
 0x1a7   :  { %5393 = vmatprep.subr.bf16.mxu1 %v5785_v59  ;;  %v2512_v9 = vsel %vm6831_vm7, %v2443_v53, %v2511_v31  ;;  %v2369_v1 = vsel %vm6820_vm6, %v2287_v40, %v2368_v57  ;;  %v5497_v39 = vadd.f32 %v4995_v13, %v6791_v4  ;;  %v4575_v51 = vcombine.low %v7012_v38, %v6999_v34  ;;  %v5795_v33 = vld [vmem:[%s7400_s3 + $0xb8] sm:$0xff]   ;;  %v2374_v13 = vld [vmem:[#allocation3 + $0xc0] sm:$0xf] }
 0x1a8   :  { %2513 = vst [vmem:[#allocation3 + $0xa4] sm:$0xf] %v2512_v9  ;;  %2370 = vst [vmem:[#allocation3 + $0xa8] sm:$0xf] %v2369_v1  ;;  %v2447_v5 = vrot.slane %v2446_v50, 4  ;;  %v2289_v60 = vshrl.u32 %v2112_v56, 16  ;;  %3018 = vmatprep.mubr.bf16.mxu0 %v4576_v49  ;;  %5394 = vmatpush3.bf16.msra.mxu1 %v5785_v59  ;;  %v4998_v29 = vadd.f32 %v4997_v23, %v4996_v0 }
 0x1a9   :  { %v2292_v55 = vshll.u32 %v2112_v56, 16  ;;  %2396 = vst.msk [vmem:[#allocation3 + $0xb8] sm:$0xf] %vm2333_vm5, %v2112_v56  ;;  %v2097_v8 = vmax.f32 %v2081_v52, 0.0  ;;  %v5498_v4 = vadd.f32 %v5497_v39, %v6848_v27  ;;  %3019 = vmatmul.mubr.bf16.gmra.mrb[92].mxu0 %v4575_v51  ;;  %v7040_v42 = vld [vmem:[#allocation3 + $0x84] sm:$0xff]  ;;  %5395 = vmatprep.subr.bf16.mxu1 %v5791_v7  ;;  %v7062_v57 = vcombine.low %v6866_v12, %v6914_v30 }
 0x1aa   :  { %v2515_v47 = vsel %vm6831_vm7, %v2447_v5, %v2514_v17  ;;  %v2291_v21 = vrot.slane %v2289_v60, 7  ;;  %v2448_v61 = vrot.slane %v2289_v60, 4  ;;  %v7042_v63 = vld [vmem:[#allocation3 + $0x90] sm:$0xff]  ;;  %5108 = vmatpush3.bf16.msra.mxu0 %v5790_v11  ;;  %v5794_v27 = vld [vmem:[%s7400_s3 + $0x38] sm:$0xff]   ;;  %v2517_v0 = vld [vmem:[#allocation3 + $0xbc] sm:$0xf]  ;;  %v5505_v35 = vadd.f32 %v4998_v29, %v6795_v16 }
 0x1ab   :  { %v2449_v62 = vrot.slane %v2292_v55, 5  ;;  %2516 = vst [vmem:[#allocation3 + $0xb0] sm:$0xf] %v2515_v47  ;;  %v2113_v32 = vpack.c.bf16 %v2097_v8, %v2097_v8  ;;  %v2082_v28 = vadd.f32 %v5498_v4, %v6802_v25  ;;  %v4579_v31 = vcombine.high %v7040_v42, %v7042_v63  ;;  %5109 = vmatprep.subr.bf16.mxu0 %v5793_v18  ;;  %v5797_v16 = vld [vmem:[%s7400_s3 + $0x1c0] sm:$0xff]   ;;  %v2520_v11 = vld [vmem:[#allocation3 + $0xc8] sm:$0xf] }
 0x1ac   :  { %v2294_v14 = vor.u32 %v2292_v55, %v2291_v21  ;;  %v4578_v23 = vcombine.low %v7040_v42, %v7042_v63  ;;  %v5762_v59 = vld [vmem:[#allocation3 + $0x8c] ss:$12 sps:$4 sm:$0xff]   ;;  %5396 = vmatpush3.bf16.msra.mxu1 %v5791_v7  ;;  %v5506_v48 = vadd.f32 %v5505_v35, %v6857_v37  ;;  %v7066_v37 = vcombine.high %v6900_v24, %v6947_v41 }
 0x1ad   :  { %v2450_v10 = vor.u32 %v2449_v62, %v2448_v61  ;;  %v2296_v6 = vshrl.u32 %v2113_v32, 16  ;;  %v2299_v20 = vshll.u32 %v2113_v32, 16  ;;  %2397 = vst.msk [vmem:[#allocation3 + $0xc4] sm:$0xf] %vm2333_vm5, %v2113_v32  ;;  %v2098_v22 = vmax.f32 %v2082_v28, 0.0  ;;  %3026 = vmatprep.mubr.bf16.mxu0 %v4579_v31  ;;  %5397 = vmatprep.subr.bf16.mxu1 %v5795_v33  ;;  %v2629_v43 = vld [vmem:[#allocation3 + $0x9c] sm:$0xff] }
 0x1ae   :  { %v2372_v36 = vsel %vm6820_vm6, %v2294_v14, %v2371_v3  ;;  %5375 = vmatprep.mubr.bf16.mxu1 %v5762_v59  ;;  %5110 = vmatpush3.bf16.msra.mxu0 %v5794_v27  ;;  %v2083_v50 = vadd.f32 %v5506_v48, %v6802_v25  ;;  %v7077_v39 = vcombine.low %v6900_v24, %v6947_v41  ;;  %v2377_v55 = vld [vmem:[#allocation3 + $0xcc] sm:$0xf]  ;;  %v2380_v14 = vld [vmem:[#allocation3 + $0xd8] sm:$0xf] }
 0x1af   :  { %v2451_v58 = vrot.slane %v2450_v10, 4  ;;  %2373 = vst [vmem:[#allocation3 + $0xb4] sm:$0xf] %v2372_v36  ;;  %v2298_v2 = vrot.slane %v2296_v6, 7  ;;  %v2452_v19 = vrot.slane %v2296_v6, 4  ;;  %v2453_v44 = vrot.slane %v2299_v20, 5 }
 0x1b0   :  { %v2114_v45 = vpack.c.bf16 %v2098_v22, %v2098_v22  ;;  %v7068_v53 = vld [vmem:[#allocation3 + $0xa8] sm:$0xff]  ;;  %5398 = vmatpush3.bf16.msra.mxu1 %v5795_v33  ;;  %v2099_v1 = vmax.f32 %v2083_v50, 0.0  ;;  %v7081_v25 = vcombine.low %v6941_v54, %v7012_v38  ;;  %v7089_v33 = vcombine.high %v7042_v63, %v2629_v43  ;;  %v2526_v6 = vld [vmem:[#allocation3 + $0xe0] sm:$0xf] }
 0x1b1   :  { %v2518_v40 = vsel %vm6831_vm7, %v2451_v58, %v2517_v0  ;;  %v4582_v56 = vcombine.high %v2629_v43, %v7068_v53  ;;  %v2301_v52 = vor.u32 %v2299_v20, %v2298_v2  ;;  %v2454_v49 = vor.u32 %v2453_v44, %v2452_v19  ;;  %3027 = vmatmul.mubr.bf16.gmra.mrb[96].mxu0 %v4578_v23  ;;  %v2523_v0 = vld [vmem:[#allocation3 + $0xd4] sm:$0xf] }
 0x1b2   :  { %2519 = vst [vmem:[#allocation3 + $0xbc] sm:$0xf] %v2518_v40  ;;  %v2303_v7 = vshrl.u32 %v2114_v45, 16  ;;  %v2306_v9 = vshll.u32 %v2114_v45, 16  ;;  %2398 = vst.msk [vmem:[#allocation3 + $0xd0] sm:$0xf] %vm2333_vm5, %v2114_v45  ;;  %5175 = vmatprep.subr.bf16.mxu1 %v5797_v16  ;;  %v2115_v4 = vpack.c.bf16 %v2099_v1, %v2099_v1  ;;  %v4581_v29 = vcombine.low %v2629_v43, %v7068_v53 }
 0x1b3   :  { %3034 = vmatprep.mubr.bf16.mxu0 %v4582_v56  ;;  %v5771_v17 = vld [vmem:[#allocation3 + $0xa4] ss:$12 sps:$4 sm:$0xff]   ;;  %v2375_v51 = vsel %vm6820_vm6, %v2301_v52, %v2374_v13  ;;  %v2455_v18 = vrot.slane %v2454_v49, 4  ;;  %v7092_v47 = vcombine.low %v7042_v63, %v2629_v43  ;;  %v5792_v40 = vld [vmem:[#allocation3 + $0x8] ss:$12 sps:$4 sm:$0xff]   ;;  %v5801_v1 = vld [vmem:[%s7400_s3 + $0x188] sm:$0xff]  }
 0x1b4   :  { %v2305_v5 = vrot.slane %v2303_v7, 7  ;;  %v2456_v60 = vrot.slane %v2303_v7, 4  ;;  %2376 = vst [vmem:[#allocation3 + $0xc0] sm:$0xf] %v2375_v51  ;;  %v2457_v8 = vrot.slane %v2306_v9, 5  ;;  %5376 = vmatmul.mubr.bf16.gmra.mrb[56].mxu1 %v5771_v17  ;;  %v2310_v61 = vshrl.u32 %v2115_v4, 16 }
 0x1b5   :  { %v2521_v24 = vsel %vm6831_vm7, %v2455_v18, %v2520_v11  ;;  %v2313_v62 = vshll.u32 %v2115_v4, 16  ;;  %2399 = vst.msk [vmem:[#allocation3 + $0xdc] sm:$0xf] %vm2333_vm5, %v2115_v4  ;;  %v7127_v13 = vld [vmem:[#allocation2] sm:$0xff]  ;;  %v5796_v56 = vld [vmem:[#allocation3 + $0x20] ss:$12 sps:$4 sm:$0xff]  }
 0x1b6   :  { %v2308_v41 = vor.u32 %v2306_v9, %v2305_v5  ;;  %2522 = vst [vmem:[#allocation3 + $0xc8] sm:$0xf] %v2521_v24  ;;  %v2458_v21 = vor.u32 %v2457_v8, %v2456_v60  ;;  %v7095_v27 = vld [vmem:[#allocation3 + $0xb4] sm:$0xff]  ;;  %v2312_v63 = vrot.slane %v2310_v61, 7  ;;  %v2460_v35 = vrot.slane %v2310_v61, 4  ;;  %v5806_v51 = vld [vmem:[%s7400_s3 + $0x1d8] sm:$0xff]  }
 0x1b7   :  { %v7101_v32 = vcombine.low %v7068_v53, %v7095_v27  ;;  %v2461_v31 = vrot.slane %v2313_v62, 5  ;;  %v4615_v50 = vcombine.high %v7127_v13, %v6864_v15  ;;  %v5799_v52 = vld [vmem:[%s7400_s3 + $0x180] sm:$0xff]   ;;  %v4614_v49 = vcombine.low %v7127_v13, %v6864_v15  ;;  %v5798_v11 = vld [vmem:[#allocation3 + $0x38] ss:$12 sps:$4 sm:$0xff]   ;;  %v5807_v18 = vld [vmem:[%s7400_s3 + $0x198] sm:$0xff]  }
 0x1b8   :  { %v2378_v3 = vsel %vm6820_vm6, %v2308_v41, %v2377_v55  ;;  %v2459_v28 = vrot.slane %v2458_v21, 4  ;;  %v2315_v23 = vor.u32 %v2313_v62, %v2312_v63  ;;  %v5800_v7 = vld [vmem:[%s7400_s3 + $0x1c8] sm:$0xff]   ;;  %v4618_v9 = vcombine.high %v6866_v12, %v6914_v30  ;;  %v5803_v15 = vld [vmem:[%s7400_s3 + $0x1d0] sm:$0xff]   ;;  %v5809_v5 = vld [vmem:[%s7400_s3 + $0x1e0] sm:$0xff]  }
 0x1b9   :  { %2379 = vst [vmem:[#allocation3 + $0xcc] sm:$0xf] %v2378_v3  ;;  %3035 = vmatmul.mubr.bf16.gmra.mrb[100].mxu0 %v4581_v29  ;;  %v2462_v59 = vor.u32 %v2461_v31, %v2460_v35  ;;  %v5802_v17 = vld [vmem:[#allocation3 + $0x50] ss:$12 sps:$4 sm:$0xff]   ;;  %v5805_v12 = vld [vmem:[%s7400_s3 + $0x190] sm:$0xff]   ;;  %v4624_v29 = vcombine.high %v6941_v54, %v7012_v38  ;;  %v5817_v38 = vld [vmem:[%s7400_s3 + $0x1f8] sm:$0xff]   ;;  %v4627_v61 = vcombine.high %v7127_v13, %v7040_v42 }
 0x1ba   :  { %v2524_v10 = vsel %vm6831_vm7, %v2459_v28, %v2523_v0  ;;  %v2381_v22 = vsel %vm6820_vm6, %v2315_v23, %v2380_v14  ;;  %v5804_v30 = vld [vmem:[#allocation3 + $0x80] ss:$12 sps:$4 sm:$0xff]   ;;  %v5808_v60 = vld [vmem:[#allocation3 + $0x98] ss:$12 sps:$4 sm:$0xff]   ;;  %v5811_v55 = vld [vmem:[%s7400_s3 + $0x1a0] sm:$0xff]   ;;  %v4626_v0 = vcombine.low %v7127_v13, %v7040_v42  ;;  %v4633_v42 = vcombine.high %v7068_v53, %v7095_v27 }
 0x1bb   :  { %2525 = vst [vmem:[#allocation3 + $0xd4] sm:$0xf] %v2524_v10  ;;  %v7105_v20 = vld [vmem:[#allocation3 + $0xc0] sm:$0xff]  ;;  %v2463_v48 = vrot.slane %v2462_v59, 4  ;;  %2382 = vst [vmem:[#allocation3 + $0xd8] sm:$0xf] %v2381_v22  ;;  %v4720_v53 = vcombine.high %v6999_v34, %v7127_v13  ;;  %v4719_v31 = vcombine.low %v6999_v34, %v7127_v13 }
 0x1bc   :  { %v4585_v16 = vcombine.high %v7095_v27, %v7105_v20  ;;  %v4584_v36 = vcombine.low %v7095_v27, %v7105_v20  ;;  %v5810_v8 = vld [vmem:[#allocation3 + $0xb0] ss:$12 sps:$4 sm:$0xff]   ;;  %v5815_v41 = vld [vmem:[%s7400_s3 + $0x1f0] sm:$0xff]   ;;  %v5818_v62 = vld [vmem:[%s7400_s3 + $0x1b8] sm:$0xff]  }
 0x1bd   :  { %v5780_v58 = vld [vmem:[#allocation3 + $0xbc] ss:$12 sps:$4 sm:$0xff]   ;;  %v2527_v43 = vsel %vm6831_vm7, %v2463_v48, %v2526_v6  ;;  %v5816_v54 = vld [vmem:[%s7400_s3 + $0x1b0] sm:$0xff]   ;;  %v5820_v3 = vld [vmem:[%s7400_s3 + $0x200] sm:$0xff]  }
 0x1be   :  { %3042 = vmatprep.mubr.bf16.mxu0 %v4585_v16  ;;  %2528 = vst [vmem:[#allocation3 + $0xe0] sm:$0xf] %v2527_v43  ;;  %5379 = vmatprep.mubr.bf16.mxu1 %v5780_v58  ;;  %v5812_v4 = vld [vmem:[%s7400_s3 + $0x1e8] sm:$0xff]   ;;  %v5826_v63 = vld [vmem:[%s7400_s3 + $0x210] sm:$0xff]   ;;  %v5828_v35 = vld [vmem:[%s7400_s3 + $0x218] sm:$0xff]  }
 0x1bf   :  { %v5813_v24 = vld [vmem:[%s7400_s3 + $0x1a8] sm:$0xff]   ;;  %v5831_v27 = vld [vmem:[%s7400_s3 + $0x230] sm:$0xff]   ;;  %v5832_v14 = vld [vmem:[%s7400_s3 + $0x238] sm:$0xff]  }
 0x1c0   :  { %v7115_v2 = vld [vmem:[#allocation3 + $0xcc] sm:$0xff]  ;;  %v5823_v28 = vld [vmem:[%s7400_s3 + $0x208] sm:$0xff]  }
 0x1c1   :  { %v7119_v26 = vcombine.low %v7105_v20, %v7115_v2  ;;  %3043 = vmatmul.mubr.bf16.gmra.mrb[104].mxu0 %v4584_v36  ;;  %v5833_v10 = vld [vmem:[#allocation3 + $0x20] ss:$12 sps:$4 sm:$0xff]   ;;  %v5835_v23 = vld [vmem:[#allocation3 + $0x50] ss:$12 sps:$4 sm:$0xff]   ;;  %v5837_v59 = vld [vmem:[#allocation3 + $0x98] ss:$12 sps:$4 sm:$0xff]  }
 0x1c2   :  { %v7121_v19 = vld [vmem:[#allocation3 + $0xd8] sm:$0xff]  ;;  %v5814_v21 = vld [vmem:[#allocation3 + $0xc8] ss:$12 sps:$4 sm:$0xff]  }
 0x1c3   :  { %v4588_v44 = vcombine.high %v7115_v2, %v7121_v19  ;;  %v4587_v45 = vcombine.low %v7115_v2, %v7121_v19  ;;  %v4732_v34 = vcombine.high %v7121_v19, %v7127_v13  ;;  %v5839_v6 = vld [vmem:[#allocation3 + $0xc8] ss:$12 sps:$4 sm:$0xff]  }
 0x1c5   :  { %v5789_v46 = vld [vmem:[#allocation3 + $0xd4] ss:$12 sps:$4 sm:$0xff]   ;;  %3050 = vmatprep.mubr.bf16.mxu0 %v4588_v44 }
 0x1c6   :  { %5380 = vmatmul.mubr.bf16.gmra.mrb[60].mxu1 %v5789_v46 }
 0x1c7   :  { %5399 = vmatprep.mubr.bf16.mxu1 %v5792_v40 }
 0x1c9   :  { %3051 = vmatmul.mubr.bf16.gmra.mrb[108].mxu0 %v4587_v45 }
 0x1ca   :  { %3460 = vmatprep.mubr.bf16.mxu0 %v4615_v50 }
 0x1ce   :  { %5400 = vmatmul.mubr.bf16.vlgmr.msra.gmra.mrb[48].mxu1 %v5796_v56 }
 0x1cf   :  { %5403 = vmatprep.mubr.bf16.mxu1 %v5798_v11  ;;  %5176 = vmatpush3.bf16.msra.mxu1 %v5799_v52 }
 0x1d0   :  { %5177 = vmatprep.subr.bf16.mxu1 %v5800_v7 }
 0x1d1   :  { %3461 = vmatmul.mubr.bf16.vlgmr.msra.gmra.mrb[112].mxu0 %v4614_v49 }
 0x1d2   :  { %3468 = vmatprep.mubr.bf16.mxu0 %v4618_v9 }
 0x1d3   :  { %5178 = vmatpush3.bf16.msra.mxu1 %v5801_v1 }
 0x1d4   :  { %5179 = vmatprep.subr.bf16.mxu1 %v5803_v15 }
 0x1d6   :  { %5404 = vmatmul.mubr.bf16.gmra.mrb[52].mxu1 %v5802_v17 }
 0x1d7   :  { %5407 = vmatprep.mubr.bf16.mxu1 %v5804_v30  ;;  %5180 = vmatpush3.bf16.msra.mxu1 %v5805_v12 }
 0x1d8   :  { %5181 = vmatprep.subr.bf16.mxu1 %v5806_v51 }
 0x1d9   :  { %3469 = vmatmul.mubr.bf16.gmra.mrb[116].mxu0 %v7062_v57 }
 0x1da   :  { %3476 = vmatprep.mubr.bf16.mxu0 %v7066_v37 }
 0x1db   :  { %5182 = vmatpush3.bf16.msra.mxu1 %v5807_v18 }
 0x1dc   :  { %5183 = vmatprep.subr.bf16.mxu1 %v5809_v5 }
 0x1de   :  { %5408 = vmatmul.mubr.bf16.gmra.mrb[56].mxu1 %v5808_v60 }
 0x1df   :  { %5411 = vmatprep.mubr.bf16.mxu1 %v5810_v8  ;;  %5184 = vmatpush3.bf16.msra.mxu1 %v5811_v55 }
 0x1e0   :  { %5185 = vmatprep.subr.bf16.mxu1 %v5812_v4 }
 0x1e1   :  { %3477 = vmatmul.mubr.bf16.gmra.mrb[120].mxu0 %v7077_v39 }
 0x1e2   :  { %3484 = vmatprep.mubr.bf16.mxu0 %v4624_v29 }
 0x1e3   :  { %5186 = vmatpush3.bf16.msra.mxu1 %v5813_v24 }
 0x1e4   :  { %5187 = vmatprep.subr.bf16.mxu1 %v5815_v41 }
 0x1e6   :  { %5412 = vmatmul.mubr.bf16.gmra.mrb[60].mxu1 %v5814_v21 }
 0x1e7   :  { %4008 = vmatprep.mubr.bf16.mxu1 %v4618_v9  ;;  %5188 = vmatpush3.bf16.msra.mxu1 %v5816_v54 }
 0x1e8   :  { %5189 = vmatprep.subr.bf16.mxu1 %v5817_v38 }
 0x1e9   :  { %3485 = vmatmul.mubr.bf16.gmra.mrb[124].mxu0 %v7081_v25 }
 0x1ea   :  { %3492 = vmatprep.mubr.bf16.mxu0 %v4627_v61 }
 0x1eb   :  { %5190 = vmatpush3.bf16.msra.mxu1 %v5818_v62 }
 0x1ec   :  { %5415 = vmatprep.subr.bf16.mxu1 %v5820_v3 }
 0x1ee   :  { %4009 = vmatmul.mubr.bf16.vlgmr.msra.gmra.mrb[64].mxu1 %v7062_v57  ;;  %v5829_v57 = vld [vmem:[%s7400_s3 + $0x220] sm:$0xff]  }
 0x1ef   :  { %4016 = vmatprep.mubr.bf16.mxu1 %v7066_v37  ;;  %5416 = vmatpush3.bf16.msra.mxu1 %v5820_v3  ;;  %v4636_v37 = vcombine.high %v7105_v20, %v7115_v2  ;;  %v5840_v20 = vld [vmem:[#allocation3 + $0xe0] ss:$12 sps:$4 sm:$0xff]  }
 0x1f0   :  { %5417 = vmatprep.subr.bf16.mxu1 %v5823_v28 }
 0x1f1   :  { %3493 = vmatmul.mubr.bf16.gmra.mrb[128].mxu0 %v4626_v0 }
 0x1f2   :  { %3500 = vmatprep.mubr.bf16.mxu0 %v7089_v33 }
 0x1f3   :  { %5418 = vmatpush3.bf16.msra.mxu1 %v5823_v28 }
 0x1f4   :  { %5419 = vmatprep.subr.bf16.mxu1 %v5826_v63 }
 0x1f6   :  { %4017 = vmatmul.mubr.bf16.gmra.mrb[68].mxu1 %v7077_v39  ;;  %v5830_v39 = vld [vmem:[%s7400_s3 + $0x228] sm:$0xff]  }
 0x1f7   :  { %4024 = vmatprep.mubr.bf16.mxu1 %v4624_v29  ;;  %5420 = vmatpush3.bf16.msra.mxu1 %v5826_v63 }
 0x1f8   :  { %5421 = vmatprep.subr.bf16.mxu1 %v5828_v35 }
 0x1f9   :  { %3501 = vmatmul.mubr.bf16.gmra.mrb[132].mxu0 %v7092_v47 }
 0x1fa   :  { %3508 = vmatprep.mubr.bf16.mxu0 %v4633_v42 }
 0x1fb   :  { %5422 = vmatpush3.bf16.msra.mxu1 %v5828_v35 }
 0x1fc   :  { %5423 = vmatprep.subr.bf16.mxu1 %v5829_v57 }
 0x1fe   :  { %4025 = vmatmul.mubr.bf16.gmra.mrb[72].mxu1 %v7081_v25  ;;  %v4731_v25 = vcombine.low %v7121_v19, %v7127_v13 }
 0x1ff   :  { %4032 = vmatprep.mubr.bf16.mxu1 %v4720_v53  ;;  %5424 = vmatpush3.bf16.msra.mxu1 %v5829_v57 }
 0x200   :  { %5425 = vmatprep.subr.bf16.mxu1 %v5830_v39 }
 0x201   :  { %3509 = vmatmul.mubr.bf16.gmra.mrb[136].mxu0 %v7101_v32 }
 0x202   :  { %3516 = vmatprep.mubr.bf16.mxu0 %v4636_v37 }
 0x203   :  { %5426 = vmatpush3.bf16.msra.mxu1 %v5830_v39 }
 0x204   :  { %5427 = vmatprep.subr.bf16.mxu1 %v5831_v27 }
 0x206   :  { %4033 = vmatmul.mubr.bf16.gmra.mrb[76].mxu1 %v4719_v31 }
 0x207   :  { %4040 = vmatprep.mubr.bf16.mxu1 %v7089_v33  ;;  %5428 = vmatpush3.bf16.msra.mxu1 %v5831_v27  ;;  %v5834_v33 = vld [vmem:[#allocation3 + $0x38] ss:$12 sps:$4 sm:$0xff]  }
 0x208   :  { %5429 = vmatprep.subr.bf16.mxu1 %v5832_v14 }
 0x209   :  { %3517 = vmatmul.mubr.bf16.gmra.mrb[140].mxu0 %v7119_v26 }
 0x20b   :  { %5430 = vmatpush3.bf16.msra.mxu1 %v5832_v14 }
 0x20e   :  { %4041 = vmatmul.mubr.bf16.gmra.mrb[80].mxu1 %v7092_v47  ;;  %v5836_v47 = vld [vmem:[#allocation3 + $0x68] ss:$12 sps:$4 sm:$0xff]  }
 0x20f   :  { %4048 = vmatprep.mubr.bf16.mxu1 %v4633_v42 }
 0x216   :  { %4049 = vmatmul.mubr.bf16.gmra.mrb[84].mxu1 %v7101_v32  ;;  %v5838_v32 = vld [vmem:[#allocation3 + $0xb0] ss:$12 sps:$4 sm:$0xff]  }
 0x217   :  { %4056 = vmatprep.mubr.bf16.mxu1 %v4636_v37 }
 0x21e   :  { %4057 = vmatmul.mubr.bf16.gmra.mrb[88].mxu1 %v7119_v26 }
 0x21f   :  { %4064 = vmatprep.mubr.bf16.mxu1 %v4732_v34 }
 0x226   :  { %4065 = vmatmul.mubr.bf16.gmra.mrb[92].mxu1 %v4731_v25 }
 0x227   :  { %5431 = vmatprep.mubr.bf16.mxu1 %v5833_v10 }
 0x22e   :  { %5432 = vmatmul.mubr.bf16.vlgmr.msra.gmra.mrb[48].mxu1 %v5834_v33 }
 0x22f   :  { %5435 = vmatprep.mubr.bf16.mxu1 %v5835_v23 }
 0x236   :  { %5436 = vmatmul.mubr.bf16.gmra.mrb[52].mxu1 %v5836_v47 }
 0x237   :  { %5439 = vmatprep.mubr.bf16.mxu1 %v5837_v59 }
 0x23e   :  { %5440 = vmatmul.mubr.bf16.gmra.mrb[56].mxu1 %v5838_v32 }
 0x23f   :  { %5443 = vmatprep.mubr.bf16.mxu1 %v5839_v6 }
 0x246   :  { %5444 = vmatmul.mubr.bf16.gmra.mrb[60].mxu1 %v5840_v20 }
 0x25d   :  { %v5031_v22 = vpop.f32.mrb[80].mxu0 }
 0x25e   :  { %v5032_v48 = vpop.f32.mrb[81].mxu0 }
 0x25f   :  { %v5033_v16 = vadd.f32 %v5032_v48, %v5031_v22  ;;  %v5034_v36 = vpop.f32.mrb[82].mxu0 }
 0x260   :  { %v5035_v58 = vpop.f32.mrb[83].mxu0 }
 0x261   :  { %v5036_v43 = vadd.f32 %v5035_v58, %v5034_v36 }
 0x268   :  { %v5037_v2 = vpop.f32.mrb[84].mxu0 }
 0x269   :  { %v5038_v26 = vpop.f32.mrb[85].mxu0 }
 0x26a   :  { %v5039_v19 = vadd.f32 %v5038_v26, %v5037_v2  ;;  %v5040_v44 = vpop.f32.mrb[86].mxu0 }
 0x26b   :  { %v5041_v45 = vpop.f32.mrb[87].mxu0 }
 0x26c   :  { %v5042_v46 = vadd.f32 %v5041_v45, %v5040_v44 }
 0x271   :  { %v5043_v40 = vpop.f32.mrb[88].mxu0 }
 0x272   :  { %v5044_v13 = vpop.f32.mrb[89].mxu0 }
 0x273   :  { %v5045_v50 = vadd.f32 %v5044_v13, %v5043_v40  ;;  %v5046_v56 = vpop.f32.mrb[90].mxu0 }
 0x274   :  { %v5047_v52 = vpop.f32.mrb[91].mxu0 }
 0x275   :  { %v5048_v49 = vadd.f32 %v5047_v52, %v5046_v56 }
 0x27c   :  { %v5049_v11 = vpop.f32.mrb[92].mxu0 }
 0x27d   :  { %v5050_v7 = vpop.f32.mrb[93].mxu0 }
 0x27e   :  { %v5051_v9 = vadd.f32 %v5050_v7, %v5049_v11  ;;  %v5052_v1 = vpop.f32.mrb[94].mxu0 }
 0x27f   :  { %v5053_v15 = vpop.f32.mrb[95].mxu0 }
 0x280   :  { %v5054_v17 = vadd.f32 %v5053_v15, %v5052_v1 }
 0x284   :  { %v5055_v12 = vpop.f32.mrb[96].mxu0 }
 0x285   :  { %v5056_v30 = vpop.f32.mrb[97].mxu0 }
 0x286   :  { %v7238_v51 = vadd.f32 %v5056_v30, %v5055_v12  ;;  %v5058_v18 = vpop.f32.mrb[98].mxu0 }
 0x287   :  { %v5059_v5 = vpop.f32.mrb[99].mxu0 }
 0x288   :  { %v7240_v60 = vadd.f32 %v5059_v5, %v5058_v18 }
 0x28c   :  { %v5061_v55 = vpop.f32.mrb[100].mxu0 }
 0x28d   :  { %v5062_v8 = vpop.f32.mrb[101].mxu0 }
 0x28e   :  { %v7242_v4 = vadd.f32 %v5062_v8, %v5061_v55  ;;  %v5064_v29 = vpop.f32.mrb[102].mxu0 }
 0x28f   :  { %v5065_v24 = vpop.f32.mrb[103].mxu0 }
 0x290   :  { %v7244_v41 = vadd.f32 %v5065_v24, %v5064_v29 }
 0x294   :  { %v5067_v21 = vpop.f32.mrb[104].mxu0 }
 0x295   :  { %v5068_v54 = vpop.f32.mrb[105].mxu0 }
 0x296   :  { %v7246_v38 = vadd.f32 %v5068_v54, %v5067_v21  ;;  %v5070_v61 = vpop.f32.mrb[106].mxu0 }
 0x297   :  { %v5071_v62 = vpop.f32.mrb[107].mxu0 }
 0x298   :  { %v7248_v3 = vadd.f32 %v5071_v62, %v5070_v61 }
 0x29c   :  { %v5073_v0 = vpop.f32.mrb[108].mxu0 }
 0x29d   :  { %v5074_v28 = vpop.f32.mrb[109].mxu0 }
 0x29e   :  { %v7250_v63 = vadd.f32 %v5074_v28, %v5073_v0  ;;  %v5076_v42 = vpop.f32.mrb[110].mxu0 }
 0x29f   :  { %v5077_v35 = vpop.f32.mrb[111].mxu0 }
 0x2a0   :  { %v7252_v57 = vadd.f32 %v5077_v35, %v5076_v42 }
 0x2a4   :  { %v5111_v37 = vpop.f32.mrb[112].mxu0 }
 0x2a5   :  { %v5112_v53 = vpop.f32.mrb[113].mxu0 }
 0x2a6   :  { %v5113_v39 = vadd.f32 %v5112_v53, %v5111_v37  ;;  %v5114_v27 = vpop.f32.mrb[114].mxu0 }
 0x2a7   :  { %v5115_v31 = vpop.f32.mrb[115].mxu0 }
 0x2a8   :  { %v5514_v14 = vadd.f32 %v5113_v39, %v5033_v16  ;;  %v5116_v34 = vadd.f32 %v5115_v31, %v5114_v27 }
 0x2aa   :  { %v5520_v25 = vadd.f32 %v5116_v34, %v5036_v43 }
 0x2ac   :  { %v5117_v10 = vpop.f32.mrb[116].mxu0 }
 0x2ad   :  { %v5118_v33 = vpop.f32.mrb[117].mxu0 }
 0x2ae   :  { %v5119_v23 = vadd.f32 %v5118_v33, %v5117_v10  ;;  %v5120_v47 = vpop.f32.mrb[118].mxu0 }
 0x2af   :  { %v5121_v59 = vpop.f32.mrb[119].mxu0 }
 0x2b0   :  { %v5511_v32 = vadd.f32 %v5119_v23, %v5039_v19  ;;  %v5122_v6 = vadd.f32 %v5121_v59, %v5120_v47 }
 0x2b2   :  { %v5517_v20 = vadd.f32 %v5122_v6, %v5042_v46 }
 0x2b4   :  { %v5123_v22 = vpop.f32.mrb[120].mxu0 }
 0x2b5   :  { %v5124_v48 = vpop.f32.mrb[121].mxu0 }
 0x2b6   :  { %v5125_v36 = vadd.f32 %v5124_v48, %v5123_v22  ;;  %v5126_v58 = vpop.f32.mrb[122].mxu0 }
 0x2b7   :  { %v5127_v2 = vpop.f32.mrb[123].mxu0 }
 0x2b8   :  { %v5526_v26 = vadd.f32 %v5125_v36, %v5045_v50  ;;  %v5128_v44 = vadd.f32 %v5127_v2, %v5126_v58 }
 0x2ba   :  { %v5532_v45 = vadd.f32 %v5128_v44, %v5048_v49 }
 0x2bc   :  { %v5129_v40 = vpop.f32.mrb[124].mxu0 }
 0x2bd   :  { %v5130_v16 = vpop.f32.mrb[125].mxu0 }
 0x2be   :  { %v5131_v13 = vadd.f32 %v5130_v16, %v5129_v40  ;;  %v5132_v43 = vpop.f32.mrb[126].mxu0 }
 0x2bf   :  { %v5133_v56 = vpop.f32.mrb[127].mxu0 }
 0x2c0   :  { %v7254_v52 = vadd.f32 %v5131_v13, %v5051_v9  ;;  %v5134_v11 = vadd.f32 %v5133_v56, %v5132_v43 }
 0x2c1   :  { %v5191_v46 = vpop.f32.mrb[64].mxu1 }
 0x2c2   :  { %v7256_v7 = vadd.f32 %v5134_v11, %v5054_v17  ;;  %v5192_v15 = vpop.f32.mrb[65].mxu1 }
 0x2c3   :  { %v5193_v18 = vadd.f32 %v5192_v15, %v5191_v46  ;;  %v5194_v50 = vpop.f32.mrb[66].mxu1 }
 0x2c4   :  { %v5135_v19 = vpop.f32.mrb[128].mxu0  ;;  %v5195_v49 = vpop.f32.mrb[67].mxu1 }
 0x2c5   :  { %v5136_v1 = vpop.f32.mrb[129].mxu0  ;;  %v5196_v29 = vadd.f32 %v5195_v49, %v5194_v50  ;;  %v7259_v24 = vadd.f32 %v5514_v14, %v5193_v18 }
 0x2c6   :  { %v5137_v12 = vadd.f32 %v5136_v1, %v5135_v19  ;;  %v5138_v30 = vpop.f32.mrb[130].mxu0 }
 0x2c7   :  { %v5139_v5 = vpop.f32.mrb[131].mxu0  ;;  %v7262_v17 = vadd.f32 %v5520_v25, %v5196_v29 }
 0x2c8   :  { %v5538_v55 = vadd.f32 %v5137_v12, %v7238_v51  ;;  %v5140_v8 = vadd.f32 %v5139_v5, %v5138_v30 }
 0x2c9   :  { %v5197_v54 = vpop.f32.mrb[68].mxu1 }
 0x2ca   :  { %v5544_v9 = vadd.f32 %v5140_v8, %v7240_v60  ;;  %v5198_v62 = vpop.f32.mrb[69].mxu1 }
 0x2cb   :  { %v5199_v42 = vadd.f32 %v5198_v62, %v5197_v54  ;;  %v5200_v35 = vpop.f32.mrb[70].mxu1 }
 0x2cc   :  { %v5141_v21 = vpop.f32.mrb[132].mxu0  ;;  %v5201_v53 = vpop.f32.mrb[71].mxu1 }
 0x2cd   :  { %v5142_v61 = vpop.f32.mrb[133].mxu0  ;;  %v5202_v27 = vadd.f32 %v5201_v53, %v5200_v35  ;;  %v7265_v31 = vadd.f32 %v5511_v32, %v5199_v42 }
 0x2ce   :  { %v5143_v0 = vadd.f32 %v5142_v61, %v5141_v21  ;;  %v5144_v28 = vpop.f32.mrb[134].mxu0 }
 0x2cf   :  { %v5145_v37 = vpop.f32.mrb[135].mxu0  ;;  %v7268_v14 = vadd.f32 %v5517_v20, %v5202_v27 }
 0x2d0   :  { %v5535_v51 = vadd.f32 %v5143_v0, %v7242_v4  ;;  %v5146_v39 = vadd.f32 %v5145_v37, %v5144_v28 }
 0x2d1   :  { %v5203_v25 = vpop.f32.mrb[72].mxu1 }
 0x2d2   :  { %v5541_v60 = vadd.f32 %v5146_v39, %v7244_v41  ;;  %v5204_v33 = vpop.f32.mrb[73].mxu1 }
 0x2d3   :  { %v5205_v59 = vadd.f32 %v5204_v33, %v5203_v25  ;;  %v5206_v6 = vpop.f32.mrb[74].mxu1 }
 0x2d4   :  { %v5147_v34 = vpop.f32.mrb[136].mxu0  ;;  %v5207_v48 = vpop.f32.mrb[75].mxu1 }
 0x2d5   :  { %v5148_v10 = vpop.f32.mrb[137].mxu0  ;;  %v5208_v58 = vadd.f32 %v5207_v48, %v5206_v6  ;;  %v7271_v32 = vadd.f32 %v5526_v26, %v5205_v59 }
 0x2d6   :  { %v5149_v23 = vadd.f32 %v5148_v10, %v5147_v34  ;;  %v5150_v47 = vpop.f32.mrb[138].mxu0 }
 0x2d7   :  { %v5151_v22 = vpop.f32.mrb[139].mxu0  ;;  %v7274_v20 = vadd.f32 %v5532_v45, %v5208_v58 }
 0x2d8   :  { %v5550_v4 = vadd.f32 %v5149_v23, %v7246_v38  ;;  %v5152_v36 = vadd.f32 %v5151_v22, %v5150_v47  ;;  %v7301_v47 = vld [vmem:[%s7402_s4] ss:$0 sm:$0xff] }
 0x2d9   :  { %v5209_v44 = vpop.f32.mrb[76].mxu1 }
 0x2da   :  { %v5556_v41 = vadd.f32 %v5152_v36, %v7248_v3  ;;  %v5210_v16 = vpop.f32.mrb[77].mxu1 }
 0x2db   :  { %v5211_v56 = vadd.f32 %v5210_v16, %v5209_v44  ;;  %v5212_v11 = vpop.f32.mrb[78].mxu1 }
 0x2dc   :  { %v5153_v2 = vpop.f32.mrb[140].mxu0  ;;  %v5213_v46 = vpop.f32.mrb[79].mxu1 }
 0x2dd   :  { %v5154_v40 = vpop.f32.mrb[141].mxu0  ;;  %v5214_v15 = vadd.f32 %v5213_v46, %v5212_v11  ;;  %v5524_v26 = vadd.f32 %v7254_v52, %v5211_v56 }
 0x2de   :  { %v5155_v13 = vadd.f32 %v5154_v40, %v5153_v2  ;;  %v5156_v43 = vpop.f32.mrb[142].mxu0 }
 0x2df   :  { %v5157_v19 = vpop.f32.mrb[143].mxu0  ;;  %v7280_v45 = vadd.f32 %v7256_v7, %v5214_v15 }
 0x2e0   :  { %v5547_v38 = vadd.f32 %v5155_v13, %v7250_v63  ;;  %v5158_v1 = vadd.f32 %v5157_v19, %v5156_v43 }
 0x2e1   :  { %v5215_v12 = vpop.f32.mrb[80].mxu1 }
 0x2e2   :  { %v5553_v3 = vadd.f32 %v5158_v1, %v7252_v57  ;;  %v5216_v30 = vpop.f32.mrb[81].mxu1 }
 0x2e3   :  { %v5217_v18 = vadd.f32 %v5216_v30, %v5215_v12  ;;  %v5218_v50 = vpop.f32.mrb[82].mxu1 }
 0x2e4   :  { %v5219_v5 = vpop.f32.mrb[83].mxu1 }
 0x2e5   :  { %v5220_v49 = vadd.f32 %v5219_v5, %v5218_v50  ;;  %v7282_v8 = vadd.f32 %v5538_v55, %v5217_v18 }
 0x2e7   :  { %v7284_v29 = vadd.f32 %v5544_v9, %v5220_v49 }
 0x2e9   :  { %v5221_v63 = vpop.f32.mrb[84].mxu1 }
 0x2ea   :  { %v5222_v21 = vpop.f32.mrb[85].mxu1 }
 0x2eb   :  { %v5223_v54 = vadd.f32 %v5222_v21, %v5221_v63  ;;  %v5224_v61 = vpop.f32.mrb[86].mxu1 }
 0x2ec   :  { %v5225_v52 = vpop.f32.mrb[87].mxu1 }
 0x2ed   :  { %v5226_v62 = vadd.f32 %v5225_v52, %v5224_v61  ;;  %v7286_v57 = vadd.f32 %v5535_v51, %v5223_v54 }
 0x2ef   :  { %v7288_v7 = vadd.f32 %v5541_v60, %v5226_v62 }
 0x2f1   :  { %v5227_v0 = vpop.f32.mrb[88].mxu1 }
 0x2f2   :  { %v5228_v28 = vpop.f32.mrb[89].mxu1 }
 0x2f3   :  { %v5229_v42 = vadd.f32 %v5228_v28, %v5227_v0  ;;  %v5230_v35 = vpop.f32.mrb[90].mxu1 }
 0x2f4   :  { %v5231_v37 = vpop.f32.mrb[91].mxu1 }
 0x2f5   :  { %v5232_v53 = vadd.f32 %v5231_v37, %v5230_v35  ;;  %v7290_v55 = vadd.f32 %v5550_v4, %v5229_v42 }
 0x2f7   :  { %v7292_v9 = vadd.f32 %v5556_v41, %v5232_v53 }
 0x2f9   :  { %v5233_v39 = vpop.f32.mrb[92].mxu1 }
 0x2fa   :  { %v5234_v27 = vpop.f32.mrb[93].mxu1 }
 0x2fb   :  { %v5235_v34 = vadd.f32 %v5234_v27, %v5233_v39  ;;  %v5236_v25 = vpop.f32.mrb[94].mxu1 }
 0x2fc   :  { %v5237_v10 = vpop.f32.mrb[95].mxu1 }
 0x2fd   :  { %v5238_v33 = vadd.f32 %v5237_v10, %v5236_v25  ;;  %v7294_v51 = vadd.f32 %v5547_v38, %v5235_v34 }
 0x2ff   :  { %v7296_v60 = vadd.f32 %v5553_v3, %v5238_v33 }
 0x301   :  { %v5433_v23 = vpop.f32.mrb[48].mxu1 }
 0x302   :  { %v5513_v59 = vadd.f32 %v7265_v31, %v5433_v23  ;;  %v4107_v6 = vpop.f32.mrb[49].mxu1 }
 0x303   :  { %v5516_v22 = vadd.f32 %v7259_v24, %v4107_v6  ;;  %v5434_v48 = vpop.f32.mrb[50].mxu1 }
 0x304   :  { %v4195_v4 = vadd.f32 %v5513_v59, %v7301_v47  ;;  %v5519_v36 = vadd.f32 %v7268_v14, %v5434_v48  ;;  %v4110_v58 = vpop.f32.mrb[51].mxu1 }
 0x305   :  { %v4193_v41 = vadd.f32 %v5516_v22, %v7301_v47  ;;  %v5522_v2 = vadd.f32 %v7262_v17, %v4110_v58 }
 0x306   :  { %v4211_v44 = vmax.f32 %v4195_v4, 0.0  ;;  %v4196_v40 = vadd.f32 %v5519_v36, %v7301_v47 }
 0x307   :  { %v4209_v16 = vmax.f32 %v4193_v41, 0.0  ;;  %v4194_v13 = vadd.f32 %v5522_v2, %v7301_v47 }
 0x308   :  { %v4227_v31 = vpack.c.bf16 %v4211_v44, %v4211_v44  ;;  %v4212_v43 = vmax.f32 %v4196_v40, 0.0 }
 0x309   :  { %v4225_v56 = vpack.c.bf16 %v4209_v16, %v4209_v16  ;;  %v4210_v24 = vmax.f32 %v4194_v13, 0.0  ;;  %v5437_v11 = vpop.f32.mrb[52].mxu1 }
 0x30a   :  { %4243 = vst.msk [vmem:[%s7403_s5 + $0x8] sm:$0xf] %vm2333_vm5, %v4227_v31  ;;  %v4228_v14 = vpack.c.bf16 %v4212_v43, %v4212_v43  ;;  %v5525_v19 = vadd.f32 %v5524_v26, %v5437_v11  ;;  %v4123_v46 = vpop.f32.mrb[53].mxu1 }
 0x30b   :  { %4241 = vst.msk [vmem:[%s7403_s5] sm:$0xf] %vm2333_vm5, %v4225_v56  ;;  %v4226_v17 = vpack.c.bf16 %v4210_v24, %v4210_v24  ;;  %v5528_v38 = vadd.f32 %v7271_v32, %v4123_v46  ;;  %v5438_v1 = vpop.f32.mrb[54].mxu1 }
 0x30c   :  { %4244 = vst.msk [vmem:[%s7403_s5 + $0xc] sm:$0xf] %vm2333_vm5, %v4228_v14  ;;  %v4199_v15 = vadd.f32 %v5525_v19, %v7301_v47  ;;  %v5531_v3 = vadd.f32 %v7280_v45, %v5438_v1  ;;  %v4126_v26 = vpop.f32.mrb[55].mxu1 }
 0x30d   :  { %4242 = vst.msk [vmem:[%s7403_s5 + $0x4] sm:$0xf] %vm2333_vm5, %v4226_v17  ;;  %v4197_v12 = vadd.f32 %v5528_v38, %v7301_v47  ;;  %v5534_v32 = vadd.f32 %v7274_v20, %v4126_v26 }
 0x30e   :  { %v4215_v30 = vmax.f32 %v4199_v15, 0.0  ;;  %v4200_v18 = vadd.f32 %v5531_v3, %v7301_v47 }
 0x30f   :  { %v4213_v50 = vmax.f32 %v4197_v12, 0.0  ;;  %v4198_v5 = vadd.f32 %v5534_v32, %v7301_v47 }
 0x310   :  { %v4231_v49 = vpack.c.bf16 %v4215_v30, %v4215_v30  ;;  %v4216_v63 = vmax.f32 %v4200_v18, 0.0 }
 0x311   :  { %v4229_v21 = vpack.c.bf16 %v4213_v50, %v4213_v50  ;;  %v4214_v45 = vmax.f32 %v4198_v5, 0.0  ;;  %v5441_v54 = vpop.f32.mrb[56].mxu1 }
 0x312   :  { %4247 = vst.msk [vmem:[%s7403_s5 + $0x18] sm:$0xf] %vm2333_vm5, %v4231_v49  ;;  %v4232_v61 = vpack.c.bf16 %v4216_v63, %v4216_v63  ;;  %v5537_v52 = vadd.f32 %v7286_v57, %v5441_v54  ;;  %v4139_v20 = vpop.f32.mrb[57].mxu1 }
 0x313   :  { %4245 = vst.msk [vmem:[%s7403_s5 + $0x10] sm:$0xf] %vm2333_vm5, %v4229_v21  ;;  %v4230_v62 = vpack.c.bf16 %v4214_v45, %v4214_v45  ;;  %v5540_v0 = vadd.f32 %v7282_v8, %v4139_v20  ;;  %v5442_v28 = vpop.f32.mrb[58].mxu1 }
 0x314   :  { %4248 = vst.msk [vmem:[%s7403_s5 + $0x1c] sm:$0xf] %vm2333_vm5, %v4232_v61  ;;  %v4203_v42 = vadd.f32 %v5537_v52, %v7301_v47  ;;  %v5543_v35 = vadd.f32 %v7288_v7, %v5442_v28  ;;  %v4142_v57 = vpop.f32.mrb[59].mxu1 }
 0x315   :  { %4246 = vst.msk [vmem:[%s7403_s5 + $0x14] sm:$0xf] %vm2333_vm5, %v4230_v62  ;;  %v4201_v37 = vadd.f32 %v5540_v0, %v7301_v47  ;;  %v5546_v8 = vadd.f32 %v7284_v29, %v4142_v57 }
 0x316   :  { %v4219_v53 = vmax.f32 %v4203_v42, 0.0  ;;  %v4204_v39 = vadd.f32 %v5543_v35, %v7301_v47 }
 0x317   :  { %v4217_v27 = vmax.f32 %v4201_v37, 0.0  ;;  %v4202_v34 = vadd.f32 %v5546_v8, %v7301_v47 }
 0x318   :  { %v4235_v25 = vpack.c.bf16 %v4219_v53, %v4219_v53  ;;  %v4220_v10 = vmax.f32 %v4204_v39, 0.0 }
 0x319   :  { %v4233_v33 = vpack.c.bf16 %v4217_v27, %v4217_v27  ;;  %v4218_v7 = vmax.f32 %v4202_v34, 0.0  ;;  %v5445_v23 = vpop.f32.mrb[60].mxu1 }
 0x31a   :  { %4251 = vst.msk [vmem:[%s7403_s5 + $0x28] sm:$0xf] %vm2333_vm5, %v4235_v25  ;;  %v4236_v59 = vpack.c.bf16 %v4220_v10, %v4220_v10  ;;  %v5549_v6 = vadd.f32 %v7294_v51, %v5445_v23  ;;  %v4155_v29 = vpop.f32.mrb[61].mxu1 }
 0x31b   :  { %4249 = vst.msk [vmem:[%s7403_s5 + $0x20] sm:$0xf] %vm2333_vm5, %v4233_v33  ;;  %v4234_v22 = vpack.c.bf16 %v4218_v7, %v4218_v7  ;;  %v5552_v48 = vadd.f32 %v7290_v55, %v4155_v29  ;;  %v5446_v4 = vpop.f32.mrb[62].mxu1 }
 0x31c   :  { %4252 = vst.msk [vmem:[%s7403_s5 + $0x2c] sm:$0xf] %vm2333_vm5, %v4236_v59  ;;  %v4207_v36 = vadd.f32 %v5549_v6, %v7301_v47  ;;  %v5555_v58 = vadd.f32 %v7296_v60, %v5446_v4  ;;  %v4158_v51 = vpop.f32.mrb[63].mxu1 }
 0x31d   :  { %4250 = vst.msk [vmem:[%s7403_s5 + $0x24] sm:$0xf] %vm2333_vm5, %v4234_v22  ;;  %v4205_v41 = vadd.f32 %v5552_v48, %v7301_v47  ;;  %v5558_v55 = vadd.f32 %v7292_v9, %v4158_v51 }
 0x31e   :  { %v4223_v2 = vmax.f32 %v4207_v36, 0.0  ;;  %v4208_v44 = vadd.f32 %v5555_v58, %v7301_v47 }
 0x31f   :  { %v4221_v40 = vmax.f32 %v4205_v41, 0.0  ;;  %v4206_v16 = vadd.f32 %v5558_v55, %v7301_v47 }
 0x320   :  { %v4239_v13 = vpack.c.bf16 %v4223_v2, %v4223_v2  ;;  %v4224_v31 = vmax.f32 %v4208_v44, 0.0 }
 0x321   :  { %v4237_v43 = vpack.c.bf16 %v4221_v40, %v4221_v40  ;;  %v4222_v60 = vmax.f32 %v4206_v16, 0.0 }
 0x322   :  { %4255 = vst.msk [vmem:[%s7403_s5 + $0x38] sm:$0xf] %vm2333_vm5, %v4239_v13  ;;  %v4240_v56 = vpack.c.bf16 %v4224_v31, %v4224_v31 }
 0x323   :  { %4253 = vst.msk [vmem:[%s7403_s5 + $0x30] sm:$0xf] %vm2333_vm5, %v4237_v43  ;;  %v4238_v9 = vpack.c.bf16 %v4222_v60, %v4222_v60 }
 0x324   :  { %4256 = vst.msk [vmem:[%s7403_s5 + $0x3c] sm:$0xf] %vm2333_vm5, %v4240_v56 }
 0x325   :  { %4254 = vst.msk [vmem:[%s7403_s5 + $0x34] sm:$0xf] %vm2333_vm5, %v4238_v9 }

// kernel: inception_a_forward.4
= control target key start
LH: loop header
LB: loop body
LE: loop exit
PB: predicated region body
PF: predicated region fallthrough
CT: control target
= control target key end

     0   :  { %v7152_v1 = vmov 0   ;;  %vm152_vm0 = vcmask 388097   ;;  %vm297_vm1 = vcmask 388096   ;;  %vm298_vm2 = vsmask.f32 7938  ;;  %s8993_s1 = inlined_call_operand.vmem [shape: bf16[5,640,64], index: 1, kind: input, shape index: {}]   ;;  %s8994_s0 = inlined_call_operand.vmem [shape: bf16[2,8,8,48], index: 0, kind: input, shape index: {}]   ;;  %s8995_s2 = inlined_call_operand.vmem [shape: f32[1,64], index: 2, kind: input, shape index: {}]   ;;  %s8996_s3 = inlined_call_operand.vmem [shape: bf16[2,8,8,64], index: 3, kind: output, shape index: {}]  }
   0x1   :  { %v6820_v0 = vld [vmem:[%s8993_s1 + $0x180] sm:$0xff]   ;;  %34 = vst [vmem:[#allocation2 + $0x14] sm:$0xff] %v7152_v1  ;;  %37 = vst [vmem:[#allocation2 + $0x28] sm:$0xff] %v7152_v1  ;;  %v6824_v5 = vld [vmem:[%s8993_s1 + $0x188] sm:$0xff]   ;;  %vm543_vm3 = vcmask 387072   ;;  %vm5005_vm7 = vcmask 519168  }
   0x2   :  { %33 = vst [vmem:[#allocation2 + $0x10] sm:$0xf] %v7152_v1  ;;  %36 = vst [vmem:[#allocation2 + $0x24] sm:$0xf] %v7152_v1  ;;  %v6821_v2 = vld [vmem:[%s8993_s1 + $0x200] sm:$0xff]   ;;  %5763 = vmatprep.subr.bf16.mxu0 %v6820_v0  ;;  %v6825_v6 = vld [vmem:[%s8993_s1 + $0x208] sm:$0xff]  }
   0x3   :  { %38 = vst [vmem:[#allocation2 + $0x30] sm:$0xff] %v7152_v1  ;;  %39 = vst [vmem:[#allocation2 + $0x38] sm:$0xf] %v7152_v1  ;;  %v6822_v3 = vld [vmem:[%s8993_s1 + $0x140] sm:$0xff]   ;;  %5827 = vmatprep.subr.bf16.mxu1 %v6821_v2  ;;  %v6826_v7 = vld [vmem:[%s8993_s1 + $0x148] sm:$0xff]  }
   0x4   :  { %40 = vst [vmem:[#allocation2 + $0x3c] sm:$0xff] %v7152_v1  ;;  %41 = vst [vmem:[#allocation2 + $0x44] sm:$0xff] %v7152_v1  ;;  %v6823_v4 = vld [vmem:[%s8993_s1 + $0x1c0] sm:$0xff]   ;;  %5764 = vmatpush3.bf16.msra.mxu0 %v6822_v3  ;;  %v6827_v8 = vld [vmem:[%s8993_s1 + $0x1c8] sm:$0xff]   ;;  %vm445_vm4 = vsmask.f32 3328 }
   0x5   :  { %42 = vst [vmem:[#allocation2 + $0x4c] sm:$0xf] %v7152_v1  ;;  %43 = vst [vmem:[#allocation2 + $0x50] sm:$0xff] %v7152_v1  ;;  %5828 = vmatpush3.bf16.msra.mxu1 %v6823_v4  ;;  %5765 = vmatprep.subr.bf16.mxu0 %v6824_v5  ;;  %v6828_v9 = vld [vmem:[%s8993_s1 + $0x190] sm:$0xff]   ;;  %v6832_v13 = vld [vmem:[%s8993_s1 + $0x198] sm:$0xff]  }
   0x6   :  { %44 = vst [vmem:[#allocation2 + $0x58] sm:$0xff] %v7152_v1  ;;  %45 = vst [vmem:[#allocation2 + $0x60] sm:$0xf] %v7152_v1  ;;  %5829 = vmatprep.subr.bf16.mxu1 %v6825_v6  ;;  %v6829_v10 = vld [vmem:[%s8993_s1 + $0x210] sm:$0xff]   ;;  %v6833_v14 = vld [vmem:[%s8993_s1 + $0x218] sm:$0xff]  }
   0x7   :  { %46 = vst [vmem:[#allocation2 + $0x64] sm:$0xff] %v7152_v1  ;;  %47 = vst [vmem:[#allocation2 + $0x6c] sm:$0xff] %v7152_v1  ;;  %v6830_v11 = vld [vmem:[%s8993_s1 + $0x150] sm:$0xff]   ;;  %v6834_v15 = vld [vmem:[%s8993_s1 + $0x158] sm:$0xff]  }
   0x8   :  { %48 = vst [vmem:[#allocation2 + $0x74] sm:$0xf] %v7152_v1  ;;  %49 = vst [vmem:[#allocation2 + $0x78] sm:$0xff] %v7152_v1  ;;  %5766 = vmatpush3.bf16.msra.mxu0 %v6826_v7  ;;  %v6831_v12 = vld [vmem:[%s8993_s1 + $0x1d0] sm:$0xff]   ;;  %v6835_v16 = vld [vmem:[%s8993_s1 + $0x1d8] sm:$0xff]  }
   0x9   :  { %50 = vst [vmem:[#allocation2 + $0x80] sm:$0xff] %v7152_v1  ;;  %51 = vst [vmem:[#allocation2 + $0x88] sm:$0xf] %v7152_v1  ;;  %5830 = vmatpush3.bf16.msra.mxu1 %v6827_v8  ;;  %5767 = vmatprep.subr.bf16.mxu0 %v6828_v9  ;;  %v6836_v17 = vld [vmem:[%s8993_s1 + $0x1a0] sm:$0xff]   ;;  %v6840_v21 = vld [vmem:[%s8993_s1 + $0x1a8] sm:$0xff]  }
   0xa   :  { %52 = vst [vmem:[#allocation2 + $0x8c] sm:$0xff] %v7152_v1  ;;  %53 = vst [vmem:[#allocation2 + $0x94] sm:$0xff] %v7152_v1  ;;  %5831 = vmatprep.subr.bf16.mxu1 %v6829_v10  ;;  %v6837_v18 = vld [vmem:[%s8993_s1 + $0x220] sm:$0xff]   ;;  %v6841_v22 = vld [vmem:[%s8993_s1 + $0x228] sm:$0xff]  }
   0xb   :  { %54 = vst [vmem:[#allocation2 + $0x9c] sm:$0xf] %v7152_v1  ;;  %55 = vst [vmem:[#allocation2 + $0xa0] sm:$0xff] %v7152_v1  ;;  %v6838_v19 = vld [vmem:[%s8993_s1 + $0x160] sm:$0xff]   ;;  %v6842_v23 = vld [vmem:[%s8993_s1 + $0x168] sm:$0xff]  }
   0xc   :  { %56 = vst [vmem:[#allocation2 + $0xa8] sm:$0xff] %v7152_v1  ;;  %57 = vst [vmem:[#allocation2 + $0xb0] sm:$0xf] %v7152_v1  ;;  %5768 = vmatpush3.bf16.msra.mxu0 %v6830_v11  ;;  %v6839_v20 = vld [vmem:[%s8993_s1 + $0x1e0] sm:$0xff]   ;;  %v6843_v24 = vld [vmem:[%s8993_s1 + $0x1e8] sm:$0xff]  }
   0xd   :  { %58 = vst [vmem:[#allocation2 + $0xb4] sm:$0xff] %v7152_v1  ;;  %59 = vst [vmem:[#allocation2 + $0xbc] sm:$0xff] %v7152_v1  ;;  %5832 = vmatpush3.bf16.msra.mxu1 %v6831_v12  ;;  %5769 = vmatprep.subr.bf16.mxu0 %v6832_v13  ;;  %v6844_v25 = vld [vmem:[%s8993_s1 + $0x1b0] sm:$0xff]   ;;  %v6848_v29 = vld [vmem:[%s8993_s1 + $0x1b8] sm:$0xff]  }
   0xe   :  { %60 = vst [vmem:[#allocation2 + $0xc4] sm:$0xf] %v7152_v1  ;;  %63 = vst [vmem:[#allocation2 + $0xd8] sm:$0xf] %v7152_v1  ;;  %5833 = vmatprep.subr.bf16.mxu1 %v6833_v14  ;;  %v6845_v26 = vld [vmem:[%s8993_s1 + $0x230] sm:$0xff]   ;;  %v6849_v30 = vld [vmem:[%s8993_s1 + $0x238] sm:$0xff]  }
   0xf   :  { %66 = vst [vmem:[#allocation2 + $0xec] sm:$0xf] %v7152_v1  ;;  %69 = vst [vmem:[#allocation2 + $0x100] sm:$0xf] %v7152_v1  ;;  %v6846_v27 = vld [vmem:[%s8993_s1 + $0x170] sm:$0xff]   ;;  %v6850_v31 = vld [vmem:[%s8993_s1 + $0x178] sm:$0xff]  }
  0x10   :  { %72 = vst [vmem:[#allocation2 + $0x114] sm:$0xf] %v7152_v1  ;;  %73 = vst [vmem:[#allocation2 + $0x118] sm:$0xff] %v7152_v1  ;;  %5770 = vmatpush3.bf16.msra.mxu0 %v6834_v15  ;;  %v6847_v28 = vld [vmem:[%s8993_s1 + $0x1f0] sm:$0xff]   ;;  %v6851_v32 = vld [vmem:[%s8993_s1 + $0x1f8] sm:$0xff]  }
  0x11   :  { %74 = vst [vmem:[#allocation2 + $0x120] sm:$0xff] %v7152_v1  ;;  %75 = vst [vmem:[#allocation2 + $0x128] sm:$0xf] %v7152_v1  ;;  %5834 = vmatpush3.bf16.msra.mxu1 %v6835_v16  ;;  %5771 = vmatprep.subr.bf16.mxu0 %v6836_v17  ;;  %v15_v33 = vld [vmem:[%s8994_s0] sm:$0xf] }
  0x12   :  { %76 = vst [vmem:[#allocation2 + $0x12c] sm:$0xff] %v7152_v1  ;;  %77 = vst [vmem:[#allocation2 + $0x134] sm:$0xff] %v7152_v1  ;;  %5835 = vmatprep.subr.bf16.mxu1 %v6837_v18  ;;  %v119_v34 = vrot.slane %v15_v33, 7  ;;  %v170_v35 = vshrl.u32 %v15_v33, 16  ;;  %v173_v36 = vshll.u32 %v15_v33, 16  ;;  %v7333_v37 = vld [vmem:[%s8993_s1 + $0x240] sm:$0xff]  }
  0x13   :  { %78 = vst [vmem:[#allocation2 + $0x13c] sm:$0xf] %v7152_v1  ;;  %79 = vst [vmem:[#allocation2 + $0x140] sm:$0xff] %v7152_v1  ;;  %v300_v38 = vld [vmem:[#allocation2 + $0x2c] sm:$0xf]  ;;  %v6853_v42 = vld [vmem:[%s8993_s1 + $0x40] sm:$0xff]  }
  0x14   :  { %80 = vst [vmem:[#allocation2 + $0x148] sm:$0xff] %v7152_v1  ;;  %81 = vst [vmem:[#allocation2 + $0x150] sm:$0xf] %v7152_v1  ;;  %5772 = vmatpush3.bf16.msra.mxu0 %v6838_v19  ;;  %v172_v39 = vrot.slane %v170_v35, 7  ;;  %v365_v40 = vrot.slane %v170_v35, 4  ;;  %v366_v41 = vrot.slane %v173_v36, 5 }
  0x15   :  { %82 = vst [vmem:[#allocation2 + $0x154] sm:$0xff] %v7152_v1  ;;  %83 = vst [vmem:[#allocation2 + $0x15c] sm:$0xff] %v7152_v1  ;;  %5836 = vmatpush3.bf16.msra.mxu1 %v6839_v20  ;;  %5773 = vmatprep.subr.bf16.mxu0 %v6840_v21  ;;  %v5026_v44 = vrot.slane %v15_v33, 9  ;;  %v7349_v47 = vld [vmem:[%s8994_s0 + $0x4] sm:$0xf] }
  0x16   :  { %84 = vst [vmem:[#allocation2 + $0x164] sm:$0xf] %v7152_v1  ;;  %85 = vst [vmem:[#allocation2 + $0x168] sm:$0xff] %v7152_v1  ;;  %5837 = vmatprep.subr.bf16.mxu1 %v6841_v22  ;;  %v175_v45 = vor.u32 %v173_v36, %v172_v39  ;;  %v367_v46 = vor.u32 %v366_v41, %v365_v40  ;;  %v7354_v48 = vld [vmem:[%s8994_s0 + $0x8] sm:$0xf]  ;;  %v120_v51 = vrot.slane %v7349_v47, 7 }
  0x17   :  { %86 = vst [vmem:[#allocation2 + $0x170] sm:$0xff] %v7152_v1  ;;  %87 = vst [vmem:[#allocation2 + $0x178] sm:$0xf] %v7152_v1  ;;  %v447_v50 = vld [vmem:[#allocation2 + $0x34] sm:$0xf]  ;;  %v121_v52 = vrot.slane %v7354_v48, 7 }
  0x18   :  { %88 = vst [vmem:[#allocation2 + $0x17c] sm:$0xff] %v7152_v1  ;;  %89 = vst [vmem:[#allocation2 + $0x184] sm:$0xff] %v7152_v1  ;;  %5774 = vmatpush3.bf16.msra.mxu0 %v6842_v23  ;;  %v177_v53 = vshrl.u32 %v7349_v47, 16  ;;  %v180_v54 = vshll.u32 %v7349_v47, 16  ;;  %v368_v56 = vrot.slane %v367_v46, 4  ;;  %v184_v57 = vshrl.u32 %v7354_v48, 16 }
  0x19   :  { %90 = vst [vmem:[#allocation2 + $0x18c] sm:$0xf] %v7152_v1  ;;  %91 = vst [vmem:[#allocation2 + $0x190] sm:$0xff] %v7152_v1  ;;  %5838 = vmatpush3.bf16.msra.mxu1 %v6843_v24  ;;  %5775 = vmatprep.subr.bf16.mxu0 %v6844_v25  ;;  %v187_v58 = vshll.u32 %v7354_v48, 16  ;;  %v303_v59 = vld [vmem:[#allocation2 + $0x40] sm:$0xf] }
  0x1a   :  { %92 = vst [vmem:[#allocation2 + $0x198] sm:$0xff] %v7152_v1  ;;  %93 = vst [vmem:[#allocation2 + $0x1a0] sm:$0xf] %v7152_v1  ;;  %5839 = vmatprep.subr.bf16.mxu1 %v6845_v26  ;;  %v179_v60 = vrot.slane %v177_v53, 7  ;;  %v306_v61 = vld [vmem:[#allocation2 + $0x54] sm:$0xf] }
  0x1b   :  { %94 = vst [vmem:[#allocation2 + $0x1a4] sm:$0xff] %v7152_v1  ;;  %95 = vst [vmem:[#allocation2 + $0x1ac] sm:$0xff] %v7152_v1  ;;  %v369_v62 = vrot.slane %v177_v53, 4  ;;  %v370_v63 = vrot.slane %v180_v54, 5  ;;  %v186_v2 = vrot.slane %v184_v57, 7  ;;  %v373_v3 = vrot.slane %v184_v57, 4 }
  0x1c   :  { %96 = vst [vmem:[#allocation2 + $0x1b4] sm:$0xf] %v7152_v1  ;;  %99 = vst [vmem:[#allocation2 + $0x1c8] sm:$0xf] %v7152_v1  ;;  %5776 = vmatpush3.bf16.msra.mxu0 %v6846_v27  ;;  %v374_v4 = vrot.slane %v187_v58, 5  ;;  %v182_v6 = vor.u32 %v180_v54, %v179_v60  ;;  %v6859_v39 = vld [vmem:[%s8993_s1 + $0x248] sm:$0xff]  }
  0x1d   :  { %102 = vst [vmem:[#allocation2 + $0x1dc] sm:$0xf] %v7152_v1  ;;  %5840 = vmatpush3.bf16.msra.mxu1 %v6847_v28  ;;  %5777 = vmatprep.subr.bf16.mxu0 %v6848_v29  ;;  %349 = vst.msk [vmem:[#allocation2 + $0x30] sm:$0xf] %vm297_vm1, %v15_v33  ;;  %v450_v5 = vld [vmem:[#allocation2 + $0x48] sm:$0xf]  ;;  %v371_v7 = vor.u32 %v370_v63, %v369_v62  ;;  %v189_v9 = vor.u32 %v187_v58, %v186_v2 }
  0x1e   :  { %5841 = vmatprep.subr.bf16.mxu1 %v6849_v30  ;;  %153 = vst.msk [vmem:[#allocation2 + $0x28] sm:$0xe] %vm152_vm0, %v119_v34  ;;  %vm7342_vm5 = vmand %vm297_vm1, %vm298_vm2  ;;  %v453_v8 = vld [vmem:[#allocation2 + $0x5c] sm:$0xf]  ;;  %v375_v10 = vor.u32 %v374_v4, %v373_v3  ;;  %v7382_v11 = vld [vmem:[%s8994_s0 + $0xc] sm:$0xf] }
  0x1f   :  { %vm7358_vm6 = vmand %vm297_vm1, %vm445_vm4  ;;  %350 = vst.msk [vmem:[#allocation2 + $0x44] sm:$0xf] %vm297_vm1, %v7349_v47  ;;  %v301_v55 = vsel %vm7342_vm5, %v175_v45, %v300_v38  ;;  %v304_v12 = vsel %vm7342_vm5, %v182_v6, %v303_v59  ;;  %v372_v13 = vrot.slane %v371_v7, 4  ;;  %v7389_v14 = vld [vmem:[%s8994_s0 + $0x10] sm:$0xf]  ;;  %v122_v15 = vrot.slane %v7382_v11, 7 }
  0x20   :  { %5778 = vmatpush3.bf16.msra.mxu0 %v6850_v31  ;;  %351 = vst.msk [vmem:[#allocation2 + $0x58] sm:$0xf] %vm297_vm1, %v7354_v48  ;;  %302 = vst [vmem:[#allocation2 + $0x2c] sm:$0xf] %v301_v55  ;;  %v448_v0 = vsel %vm7358_vm6, %v368_v56, %v447_v50  ;;  %v191_v16 = vshrl.u32 %v7382_v11, 16  ;;  %v307_v17 = vsel %vm7342_vm5, %v189_v9, %v306_v61  ;;  %v376_v18 = vrot.slane %v375_v10, 4 }
  0x21   :  { %5842 = vmatpush3.bf16.msra.mxu1 %v6851_v32  ;;  %6483 = vmatprep.subr.bf16.mxu0 %v7333_v37  ;;  %544 = vst.msk [vmem:[#allocation2 + $0x38] sm:$0x7] %vm543_vm3, %v5026_v44  ;;  %449 = vst [vmem:[#allocation2 + $0x34] sm:$0xf] %v448_v0  ;;  %v123_v19 = vrot.slane %v7389_v14, 7  ;;  %v194_v20 = vshll.u32 %v7382_v11, 16  ;;  %v451_v21 = vsel %vm7358_vm6, %v372_v13, %v450_v5 }
  0x22   :  { %5907 = vmatprep.subr.bf16.mxu1 %v6853_v42  ;;  %154 = vst.msk [vmem:[#allocation2 + $0x3c] sm:$0xe] %vm152_vm0, %v120_v51  ;;  %155 = vst.msk [vmem:[#allocation2 + $0x50] sm:$0xe] %vm152_vm0, %v121_v52  ;;  %v193_v22 = vrot.slane %v191_v16, 7  ;;  %v198_v23 = vshrl.u32 %v7389_v14, 16  ;;  %v454_v27 = vsel %vm7358_vm6, %v376_v18, %v453_v8 }
  0x23   :  { %352 = vst.msk [vmem:[#allocation2 + $0x6c] sm:$0xf] %vm297_vm1, %v7382_v11  ;;  %305 = vst [vmem:[#allocation2 + $0x40] sm:$0xf] %v304_v12  ;;  %v201_v24 = vshll.u32 %v7389_v14, 16  ;;  %v377_v29 = vrot.slane %v191_v16, 4 }
  0x24   :  { %353 = vst.msk [vmem:[#allocation2 + $0x80] sm:$0xf] %vm297_vm1, %v7389_v14  ;;  %308 = vst [vmem:[#allocation2 + $0x54] sm:$0xf] %v307_v17  ;;  %v309_v25 = vld [vmem:[#allocation2 + $0x68] sm:$0xf]  ;;  %v196_v34 = vor.u32 %v194_v20, %v193_v22 }
  0x25   :  { %156 = vst.msk [vmem:[#allocation2 + $0x64] sm:$0xe] %vm152_vm0, %v122_v15  ;;  %452 = vst [vmem:[#allocation2 + $0x48] sm:$0xf] %v451_v21  ;;  %v312_v28 = vld [vmem:[#allocation2 + $0x7c] sm:$0xf] }
  0x26   :  { %157 = vst.msk [vmem:[#allocation2 + $0x78] sm:$0xe] %vm152_vm0, %v123_v19  ;;  %v378_v30 = vrot.slane %v194_v20, 5  ;;  %v6854_v33 = vld [vmem:[%s8993_s1] sm:$0xff]   ;;  %455 = vst [vmem:[#allocation2 + $0x5c] sm:$0xf] %v454_v27  ;;  %v310_v50 = vsel %vm7342_vm5, %v196_v34, %v309_v25 }
  0x27   :  { %v692_v26 = vld [vmem:[#allocation2 + $0x28] sm:$0xff]  ;;  %v200_v35 = vrot.slane %v198_v23, 7  ;;  %v456_v36 = vld [vmem:[#allocation2 + $0x70] sm:$0xf]  ;;  %v381_v41 = vrot.slane %v198_v23, 4  ;;  %v382_v42 = vrot.slane %v201_v24, 5 }
  0x28   :  { %v5122_v31 = vcombine.low %v7152_v1, %v692_v26  ;;  %v5123_v32 = vcombine.high %v7152_v1, %v692_v26  ;;  %v693_v38 = vld [vmem:[#allocation2 + $0x30] sm:$0xff]  ;;  %v379_v40 = vor.u32 %v378_v30, %v377_v29  ;;  %v459_v51 = vld [vmem:[#allocation2 + $0x84] sm:$0xf]  ;;  %v6860_v52 = vld [vmem:[%s8993_s1 + $0x48] sm:$0xff]   ;;  %311 = vst [vmem:[#allocation2 + $0x68] sm:$0xf] %v310_v50 }
  0x29   :  { %v5124_v44 = vcombine.low %v7152_v1, %v693_v38  ;;  %v5125_v45 = vcombine.high %v7152_v1, %v693_v38  ;;  %v203_v46 = vor.u32 %v201_v24, %v200_v35  ;;  %v383_v54 = vor.u32 %v382_v42, %v381_v41  ;;  %v7427_v55 = vld [vmem:[%s8994_s0 + $0x14] sm:$0xf]  ;;  %v7437_v57 = vld [vmem:[%s8994_s0 + $0x18] sm:$0xf]  ;;  %v6861_v61 = vld [vmem:[%s8993_s1 + $0x8] sm:$0xff]  }
  0x2a   :  { %1298 = vmatprep.mubr.bf16.mxu0 %v5123_v32  ;;  %v380_v53 = vrot.slane %v379_v40, 4  ;;  %v7430_v1 = vld [vmem:[#allocation2 + $0x3c] sm:$0xff]  ;;  %v124_v58 = vrot.slane %v7427_v55, 7  ;;  %v205_v59 = vshrl.u32 %v7427_v55, 16  ;;  %v208_v60 = vshll.u32 %v7427_v55, 16  ;;  %v6866_v0 = vld [vmem:[%s8993_s1 + $0x250] sm:$0xff]  }
  0x2b   :  { %1299 = vmatmul.mubr.bf16.vlgmr.msra.gmra.mrb[0].mxu0 %v5122_v31  ;;  %1395 = vmatprep.mubr.bf16.mxu1 %v5125_v45  ;;  %v313_v56 = vsel %vm7342_vm5, %v203_v46, %v312_v28  ;;  %354 = vst.msk [vmem:[#allocation2 + $0x94] sm:$0xf] %vm297_vm1, %v7427_v55  ;;  %v384_v62 = vrot.slane %v383_v54, 4  ;;  %v125_v2 = vrot.slane %v7437_v57, 7  ;;  %v212_v3 = vshrl.u32 %v7437_v57, 16  ;;  %v6867_v5 = vld [vmem:[%s8993_s1 + $0x50] sm:$0xff]  }
  0x2c   :  { %6484 = vmatpush3.bf16.msra.mxu0 %v7333_v37  ;;  %1396 = vmatmul.mubr.bf16.vlgmr.msra.gmra.mrb[0].mxu1 %v5124_v44  ;;  %v7444_v37 = vld [vmem:[#allocation2 + $0x50] sm:$0xff]  ;;  %314 = vst [vmem:[#allocation2 + $0x7c] sm:$0xf] %v313_v56  ;;  %v457_v63 = vsel %vm7358_vm6, %v380_v53, %v456_v36  ;;  %355 = vst.msk [vmem:[#allocation2 + $0xa8] sm:$0xf] %vm297_vm1, %v7437_v57  ;;  %v207_v6 = vrot.slane %v205_v59, 7 }
  0x2d   :  { %6485 = vmatprep.subr.bf16.mxu0 %v6859_v39  ;;  %5908 = vmatpush3.bf16.msra.mxu1 %v6854_v33  ;;  %v5128_v4 = vcombine.high %v7430_v1, %v7444_v37  ;;  %458 = vst [vmem:[#allocation2 + $0x70] sm:$0xf] %v457_v63  ;;  %158 = vst.msk [vmem:[#allocation2 + $0x8c] sm:$0xe] %vm152_vm0, %v124_v58  ;;  %v215_v7 = vshll.u32 %v7437_v57, 16  ;;  %v5127_v10 = vcombine.low %v7430_v1, %v7444_v37  ;;  %v6868_v17 = vld [vmem:[%s8993_s1 + $0x10] sm:$0xff]  }
  0x2e   :  { %v315_v8 = vld [vmem:[#allocation2 + $0x90] sm:$0xf]  ;;  %v6856_v9 = vld [vmem:[#allocation2 + $0x48] ss:$20 sps:$4 sm:$0xff]   ;;  %5909 = vmatprep.subr.bf16.mxu1 %v6860_v52  ;;  %v460_v12 = vsel %vm7358_vm6, %v384_v62, %v459_v51  ;;  %159 = vst.msk [vmem:[#allocation2 + $0xa0] sm:$0xe] %vm152_vm0, %v125_v2  ;;  %v210_v18 = vor.u32 %v208_v60, %v207_v6 }
  0x2f   :  { %v214_v13 = vrot.slane %v212_v3, 7  ;;  %v318_v15 = vld [vmem:[#allocation2 + $0xa4] sm:$0xf]  ;;  %1306 = vmatprep.mubr.bf16.mxu0 %v5128_v4  ;;  %461 = vst [vmem:[#allocation2 + $0x84] sm:$0xf] %v460_v12  ;;  %v385_v19 = vrot.slane %v205_v59, 4  ;;  %1403 = vmatprep.mubr.bf16.mxu1 %v6856_v9 }
  0x30   :  { %v6858_v16 = vld [vmem:[#allocation2 + $0x44] ss:$20 sps:$4 sm:$0xff]   ;;  %6486 = vmatpush3.bf16.msra.mxu0 %v6859_v39  ;;  %v386_v20 = vrot.slane %v208_v60, 5  ;;  %v389_v21 = vrot.slane %v212_v3, 4  ;;  %v390_v24 = vrot.slane %v215_v7, 5  ;;  %v316_v28 = vsel %vm7342_vm5, %v210_v18, %v315_v8  ;;  %v6881_v63 = vld [vmem:[%s8993_s1 + $0x268] sm:$0xff]  }
  0x31   :  { %v6872_v22 = vld [vmem:[%s8993_s1 + $0x258] sm:$0xff]   ;;  %6487 = vmatprep.subr.bf16.mxu0 %v6866_v0  ;;  %v217_v23 = vor.u32 %v215_v7, %v214_v13  ;;  %5910 = vmatpush3.bf16.msra.mxu1 %v6861_v61  ;;  %v7479_v27 = vld [vmem:[#allocation2 + $0x64] sm:$0xff]  ;;  %v5027_v30 = vrot.slane %v7349_v47, 9  ;;  %317 = vst [vmem:[#allocation2 + $0x90] sm:$0xf] %v316_v28  ;;  %v5028_v58 = vrot.slane %v7354_v48, 9 }
  0x32   :  { %v462_v25 = vld [vmem:[#allocation2 + $0x98] sm:$0xf]  ;;  %v387_v29 = vor.u32 %v386_v20, %v385_v19  ;;  %5911 = vmatprep.subr.bf16.mxu1 %v6867_v5  ;;  %v391_v32 = vor.u32 %v390_v24, %v389_v21  ;;  %v465_v35 = vld [vmem:[#allocation2 + $0xac] sm:$0xf]  ;;  %v7494_v47 = vld [vmem:[%s8994_s0 + $0x20] sm:$0xf]  ;;  %v5212_v38 = vcombine.low %v7444_v37, %v7479_v27 }
  0x33   :  { %v6873_v26 = vld [vmem:[%s8993_s1 + $0x58] sm:$0xff]   ;;  %1307 = vmatmul.mubr.bf16.gmra.mrb[4].mxu0 %v5127_v10  ;;  %v319_v31 = vsel %vm7342_vm5, %v217_v23, %v318_v15  ;;  %545 = vst.msk [vmem:[#allocation2 + $0x4c] sm:$0x7] %vm543_vm3, %v5027_v30  ;;  %v127_v41 = vrot.slane %v7494_v47, 7  ;;  %v6875_v42 = vld [vmem:[%s8993_s1 + $0x260] sm:$0xff]   ;;  %v226_v46 = vshrl.u32 %v7494_v47, 16 }
  0x34   :  { %v7486_v33 = vld [vmem:[#allocation2 + $0x78] sm:$0xff]  ;;  %6488 = vmatpush3.bf16.msra.mxu0 %v6866_v0  ;;  %320 = vst [vmem:[#allocation2 + $0xa4] sm:$0xf] %v319_v31  ;;  %v388_v34 = vrot.slane %v387_v29, 4  ;;  %1404 = vmatmul.mubr.bf16.gmra.mrb[4].mxu1 %v6858_v16  ;;  %v392_v40 = vrot.slane %v391_v32, 4  ;;  %v6876_v44 = vld [vmem:[%s8993_s1 + $0x60] sm:$0xff]  }
  0x35   :  { %v6874_v36 = vld [vmem:[%s8993_s1 + $0x18] sm:$0xff]   ;;  %v5133_v39 = vcombine.high %v7479_v27, %v7486_v33  ;;  %6489 = vmatprep.subr.bf16.mxu0 %v6872_v22  ;;  %357 = vst.msk [vmem:[#allocation2 + $0x120] sm:$0xf] %vm297_vm1, %v7494_v47  ;;  %5912 = vmatpush3.bf16.msra.mxu1 %v6868_v17  ;;  %v229_v50 = vshll.u32 %v7494_v47, 16  ;;  %v5132_v52 = vcombine.low %v7479_v27, %v7486_v33  ;;  %v6865_v53 = vld [vmem:[#allocation2 + $0x6c] ss:$20 sps:$4 sm:$0xff]  }
  0x36   :  { %v463_v45 = vsel %vm7358_vm6, %v388_v34, %v462_v25  ;;  %v6863_v51 = vld [vmem:[#allocation2 + $0x70] ss:$20 sps:$4 sm:$0xff]   ;;  %v466_v54 = vsel %vm7358_vm6, %v392_v40, %v465_v35  ;;  %5913 = vmatprep.subr.bf16.mxu1 %v6873_v26  ;;  %161 = vst.msk [vmem:[#allocation2 + $0x118] sm:$0xe] %vm152_vm0, %v127_v41  ;;  %v324_v56 = vld [vmem:[#allocation2 + $0x11c] sm:$0xf] }
  0x37   :  { %1314 = vmatprep.mubr.bf16.mxu0 %v5133_v39  ;;  %464 = vst [vmem:[#allocation2 + $0x98] sm:$0xf] %v463_v45  ;;  %467 = vst [vmem:[#allocation2 + $0xac] sm:$0xf] %v466_v54  ;;  %v228_v59 = vrot.slane %v226_v46, 7  ;;  %v397_v60 = vrot.slane %v226_v46, 4  ;;  %1411 = vmatprep.mubr.bf16.mxu1 %v6863_v51 }
  0x38   :  { %6490 = vmatpush3.bf16.msra.mxu0 %v6872_v22  ;;  %v398_v61 = vrot.slane %v229_v50, 5  ;;  %v6877_v62 = vld [vmem:[%s8993_s1 + $0x20] sm:$0xff]   ;;  %546 = vst.msk [vmem:[#allocation2 + $0x60] sm:$0x7] %vm543_vm3, %v5028_v58  ;;  %v7527_v2 = vld [vmem:[#allocation2 + $0x8c] sm:$0xff]  ;;  %v5029_v6 = vrot.slane %v7382_v11, 9 }
  0x39   :  { %v471_v0 = vld [vmem:[#allocation2 + $0x124] sm:$0xf]  ;;  %6491 = vmatprep.subr.bf16.mxu0 %v6875_v42  ;;  %5914 = vmatpush3.bf16.msra.mxu1 %v6874_v36  ;;  %v231_v48 = vor.u32 %v229_v50, %v228_v59  ;;  %v7537_v5 = vld [vmem:[%s8994_s0 + $0x28] sm:$0xf]  ;;  %v7565_v19 = vld [vmem:[%s8993_s1 + $0x270] sm:$0xff]   ;;  %v5218_v31 = vcombine.high %v7486_v33, %v7527_v2  ;;  %v5217_v32 = vcombine.low %v7486_v33, %v7527_v2 }
  0x3a   :  { %v399_v3 = vor.u32 %v398_v61, %v397_v60  ;;  %v7532_v4 = vld [vmem:[%s8994_s0 + $0x24] sm:$0xf]  ;;  %5915 = vmatprep.subr.bf16.mxu1 %v6876_v44  ;;  %v129_v9 = vrot.slane %v7537_v5, 7  ;;  %359 = vst.msk [vmem:[#allocation2 + $0x148] sm:$0xf] %vm297_vm1, %v7537_v5  ;;  %v6882_v11 = vld [vmem:[%s8993_s1 + $0x68] sm:$0xff]  }
  0x3b   :  { %1315 = vmatmul.mubr.bf16.gmra.mrb[8].mxu0 %v5132_v52  ;;  %v7540_v7 = vld [vmem:[#allocation2 + $0xa0] sm:$0xff]  ;;  %v128_v8 = vrot.slane %v7532_v4, 7  ;;  %v233_v10 = vshrl.u32 %v7532_v4, 16  ;;  %v236_v12 = vshll.u32 %v7532_v4, 16  ;;  %358 = vst.msk [vmem:[#allocation2 + $0x134] sm:$0xf] %vm297_vm1, %v7532_v4  ;;  %v325_v16 = vsel %vm7342_vm5, %v231_v48, %v324_v56 }
  0x3c   :  { %v5138_v13 = vcombine.high %v7527_v2, %v7540_v7  ;;  %v5137_v15 = vcombine.low %v7527_v2, %v7540_v7  ;;  %v400_v17 = vrot.slane %v399_v3, 4  ;;  %6492 = vmatpush3.bf16.msra.mxu0 %v6875_v42  ;;  %v6883_v18 = vld [vmem:[%s8993_s1 + $0x28] sm:$0xff]   ;;  %547 = vst.msk [vmem:[#allocation2 + $0x74] sm:$0x7] %vm543_vm3, %v5029_v6  ;;  %1412 = vmatmul.mubr.bf16.gmra.mrb[8].mxu1 %v6865_v53  ;;  %326 = vst [vmem:[#allocation2 + $0x11c] sm:$0xf] %v325_v16 }
  0x3d   :  { %162 = vst.msk [vmem:[#allocation2 + $0x12c] sm:$0xe] %vm152_vm0, %v128_v8  ;;  %163 = vst.msk [vmem:[#allocation2 + $0x140] sm:$0xe] %vm152_vm0, %v129_v9  ;;  %v235_v20 = vrot.slane %v233_v10, 7  ;;  %v240_v21 = vshrl.u32 %v7537_v5, 16  ;;  %6493 = vmatprep.subr.bf16.mxu0 %v6881_v63  ;;  %5916 = vmatpush3.bf16.msra.mxu1 %v6877_v62 }
  0x3e   :  { %v243_v22 = vshll.u32 %v7537_v5, 16  ;;  %v327_v23 = vld [vmem:[#allocation2 + $0x130] sm:$0xf]  ;;  %v401_v24 = vrot.slane %v233_v10, 4  ;;  %1322 = vmatprep.mubr.bf16.mxu0 %v5138_v13  ;;  %v7572_v25 = vld [vmem:[#allocation2 + $0x94] sm:$0xff]  ;;  %v472_v26 = vsel %vm7358_vm6, %v400_v17, %v471_v0  ;;  %v402_v29 = vrot.slane %v236_v12, 5  ;;  %5917 = vmatprep.subr.bf16.mxu1 %v6882_v11 }
  0x3f   :  { %v330_v28 = vld [vmem:[#allocation2 + $0x144] sm:$0xf]  ;;  %v6888_v30 = vld [vmem:[%s8993_s1 + $0x70] sm:$0xff]   ;;  %v711_v34 = vld [vmem:[#allocation2 + $0xa8] sm:$0xff]  ;;  %473 = vst [vmem:[#allocation2 + $0x124] sm:$0xf] %v472_v26  ;;  %v238_v35 = vor.u32 %v236_v12, %v235_v20 }
  0x40   :  { %v242_v36 = vrot.slane %v240_v21, 7  ;;  %v405_v39 = vrot.slane %v240_v21, 4  ;;  %v406_v40 = vrot.slane %v243_v22, 5  ;;  %v474_v41 = vld [vmem:[#allocation2 + $0x138] sm:$0xf]  ;;  %v5140_v42 = vcombine.high %v7572_v25, %v711_v34  ;;  %6494 = vmatpush3.bf16.msra.mxu0 %v6881_v63  ;;  %v6889_v48 = vld [vmem:[%s8993_s1 + $0x30] sm:$0xff]  }
  0x41   :  { %v403_v44 = vor.u32 %v402_v29, %v401_v24  ;;  %v5139_v45 = vcombine.low %v7572_v25, %v711_v34  ;;  %v328_v50 = vsel %vm7342_vm5, %v238_v35, %v327_v23  ;;  %v7590_v52 = vld [vmem:[%s8994_s0 + $0x2c] sm:$0xf]  ;;  %v7595_v53 = vld [vmem:[%s8994_s0 + $0x30] sm:$0xf]  ;;  %6495 = vmatprep.subr.bf16.mxu0 %v7565_v19  ;;  %5918 = vmatpush3.bf16.msra.mxu1 %v6883_v18  ;;  %v333_v9 = vld [vmem:[#allocation2 + $0x158] sm:$0xf] }
  0x42   :  { %v245_v46 = vor.u32 %v243_v22, %v242_v36  ;;  %v407_v51 = vor.u32 %v406_v40, %v405_v39  ;;  %1419 = vmatprep.mubr.bf16.mxu1 %v5140_v42  ;;  %329 = vst [vmem:[#allocation2 + $0x130] sm:$0xf] %v328_v50  ;;  %v477_v56 = vld [vmem:[#allocation2 + $0x14c] sm:$0xf]  ;;  %v130_v58 = vrot.slane %v7590_v52, 7  ;;  %v131_v59 = vrot.slane %v7595_v53, 7  ;;  %5919 = vmatprep.subr.bf16.mxu1 %v6888_v30 }
  0x43   :  { %v404_v54 = vrot.slane %v403_v44, 4  ;;  %v247_v60 = vshrl.u32 %v7590_v52, 16  ;;  %360 = vst.msk [vmem:[#allocation2 + $0x15c] sm:$0xf] %vm297_vm1, %v7590_v52  ;;  %361 = vst.msk [vmem:[#allocation2 + $0x170] sm:$0xf] %vm297_vm1, %v7595_v53  ;;  %1323 = vmatmul.mubr.bf16.gmra.mrb[12].mxu0 %v5137_v15 }
  0x44   :  { %v331_v61 = vsel %vm7342_vm5, %v245_v46, %v330_v28  ;;  %v408_v62 = vrot.slane %v407_v51, 4  ;;  %v250_v63 = vshll.u32 %v7590_v52, 16  ;;  %v254_v0 = vshrl.u32 %v7595_v53, 16  ;;  %v7612_v3 = vld [vmem:[#allocation2 + $0x118] sm:$0xff]  ;;  %164 = vst.msk [vmem:[#allocation2 + $0x154] sm:$0xe] %vm152_vm0, %v130_v58  ;;  %6496 = vmatpush3.bf16.msra.mxu0 %v7565_v19  ;;  %1420 = vmatmul.mubr.bf16.gmra.mrb[12].mxu1 %v5139_v45 }
  0x45   :  { %332 = vst [vmem:[#allocation2 + $0x144] sm:$0xf] %v331_v61  ;;  %v475_v6 = vsel %vm7358_vm6, %v404_v54, %v474_v41  ;;  %165 = vst.msk [vmem:[#allocation2 + $0x168] sm:$0xe] %vm152_vm0, %v131_v59  ;;  %v249_v7 = vrot.slane %v247_v60, 7  ;;  %v257_v8 = vshll.u32 %v7595_v53, 16  ;;  %5920 = vmatpush3.bf16.msra.mxu1 %v6889_v48 }
  0x46   :  { %v409_v10 = vrot.slane %v247_v60, 4  ;;  %v7620_v12 = vld [vmem:[#allocation2 + $0x14] sm:$0xff]  ;;  %476 = vst [vmem:[#allocation2 + $0x138] sm:$0xf] %v475_v6  ;;  %v478_v13 = vsel %vm7358_vm6, %v408_v62, %v477_v56  ;;  %v256_v15 = vrot.slane %v254_v0, 7  ;;  %v7629_v18 = vld [vmem:[#allocation2 + $0x120] sm:$0xff] }
  0x47   :  { %v5143_v11 = vcombine.high %v7620_v12, %v7612_v3  ;;  %v336_v16 = vld [vmem:[#allocation2 + $0x16c] sm:$0xf]  ;;  %v6893_v17 = vld [vmem:[%s8993_s1 + $0x278] sm:$0xff]   ;;  %479 = vst [vmem:[#allocation2 + $0x14c] sm:$0xf] %v478_v13  ;;  %v252_v19 = vor.u32 %v250_v63, %v249_v7  ;;  %v410_v20 = vrot.slane %v250_v63, 5  ;;  %v5145_v23 = vcombine.high %v7620_v12, %v7629_v18 }
  0x48   :  { %v413_v21 = vrot.slane %v254_v0, 4  ;;  %v414_v22 = vrot.slane %v257_v8, 5  ;;  %v5142_v24 = vcombine.low %v7620_v12, %v7612_v3  ;;  %v259_v26 = vor.u32 %v257_v8, %v256_v15  ;;  %v480_v28 = vld [vmem:[#allocation2 + $0x160] sm:$0xf]  ;;  %6497 = vmatprep.subr.bf16.mxu0 %v6893_v17  ;;  %v7642_v36 = vld [vmem:[%s8994_s0 + $0x34] sm:$0xf] }
  0x49   :  { %1330 = vmatprep.mubr.bf16.mxu0 %v5143_v11  ;;  %v5144_v29 = vcombine.low %v7620_v12, %v7629_v18  ;;  %v334_v30 = vsel %vm7342_vm5, %v252_v19, %v333_v9  ;;  %v411_v34 = vor.u32 %v410_v20, %v409_v10  ;;  %v7647_v39 = vld [vmem:[%s8994_s0 + $0x38] sm:$0xf]  ;;  %6498 = vmatpush3.bf16.msra.mxu0 %v6893_v17  ;;  %v7649_v40 = vld [vmem:[#allocation2 + $0x12c] sm:$0xff]  ;;  %v483_v42 = vld [vmem:[#allocation2 + $0x174] sm:$0xf]  ;;  %v132_v44 = vrot.slane %v7642_v36, 7 }
  0x4a   :  { %v415_v35 = vor.u32 %v414_v22, %v413_v21  ;;  %1427 = vmatprep.mubr.bf16.mxu1 %v5145_v23  ;;  %335 = vst [vmem:[#allocation2 + $0x158] sm:$0xf] %v334_v30  ;;  %v337_v41 = vsel %vm7342_vm5, %v259_v26, %v336_v16  ;;  %v133_v45 = vrot.slane %v7647_v39, 7  ;;  %v261_v46 = vshrl.u32 %v7642_v36, 16  ;;  %362 = vst.msk [vmem:[#allocation2 + $0x184] sm:$0xf] %vm297_vm1, %v7642_v36 }
  0x4b   :  { %363 = vst.msk [vmem:[#allocation2 + $0x198] sm:$0xf] %vm297_vm1, %v7647_v39  ;;  %338 = vst [vmem:[#allocation2 + $0x16c] sm:$0xf] %v337_v41  ;;  %v412_v50 = vrot.slane %v411_v34, 4  ;;  %v264_v54 = vshll.u32 %v7642_v36, 16  ;;  %1331 = vmatmul.mubr.bf16.gmra.mrb[16].mxu0 %v5142_v24  ;;  %v5228_v63 = vcombine.high %v7612_v3, %v7649_v40  ;;  %v5227_v23 = vcombine.low %v7612_v3, %v7649_v40 }
  0x4c   :  { %v416_v51 = vrot.slane %v415_v35, 4  ;;  %v268_v56 = vshrl.u32 %v7647_v39, 16  ;;  %v7662_v58 = vld [vmem:[#allocation2 + $0x140] sm:$0xff]  ;;  %166 = vst.msk [vmem:[#allocation2 + $0x17c] sm:$0xe] %vm152_vm0, %v132_v44  ;;  %v263_v59 = vrot.slane %v261_v46, 7  ;;  %1428 = vmatmul.mubr.bf16.gmra.mrb[16].mxu1 %v5144_v29 }
  0x4d   :  { %167 = vst.msk [vmem:[#allocation2 + $0x190] sm:$0xe] %vm152_vm0, %v133_v45  ;;  %v271_v60 = vshll.u32 %v7647_v39, 16  ;;  %v339_v61 = vld [vmem:[#allocation2 + $0x180] sm:$0xf]  ;;  %v417_v62 = vrot.slane %v261_v46, 4  ;;  %v5148_v0 = vcombine.high %v7649_v40, %v7662_v58  ;;  %v5147_v6 = vcombine.low %v7649_v40, %v7662_v58 }
  0x4e   :  { %v7671_v48 = vld [vmem:[#allocation2 + $0x134] sm:$0xff]  ;;  %v481_v7 = vsel %vm7358_vm6, %v412_v50, %v480_v28  ;;  %v484_v8 = vsel %vm7358_vm6, %v416_v51, %v483_v42  ;;  %v7679_v10 = vld [vmem:[#allocation2 + $0x148] sm:$0xff]  ;;  %v266_v11 = vor.u32 %v264_v54, %v263_v59  ;;  %v270_v13 = vrot.slane %v268_v56, 7  ;;  %v489_v50 = vld [vmem:[#allocation2 + $0x19c] sm:$0xf] }
  0x4f   :  { %v342_v9 = vld [vmem:[#allocation2 + $0x194] sm:$0xf]  ;;  %482 = vst [vmem:[#allocation2 + $0x160] sm:$0xf] %v481_v7  ;;  %485 = vst [vmem:[#allocation2 + $0x174] sm:$0xf] %v484_v8  ;;  %1338 = vmatprep.mubr.bf16.mxu0 %v5148_v0  ;;  %v5150_v17 = vcombine.high %v7671_v48, %v7679_v10  ;;  %v5149_v19 = vcombine.low %v7671_v48, %v7679_v10  ;;  %v5230_v42 = vcombine.high %v7629_v18, %v7671_v48 }
  0x50   :  { %v418_v15 = vrot.slane %v264_v54, 5  ;;  %v421_v16 = vrot.slane %v268_v56, 4  ;;  %v422_v20 = vrot.slane %v271_v60, 5  ;;  %v486_v21 = vld [vmem:[#allocation2 + $0x188] sm:$0xf]  ;;  %v6894_v22 = vld [vmem:[%s8993_s1 + $0x78] sm:$0xff]   ;;  %v273_v24 = vor.u32 %v271_v60, %v270_v13 }
  0x51   :  { %v340_v26 = vsel %vm7342_vm5, %v266_v11, %v339_v61  ;;  %v6895_v29 = vld [vmem:[%s8993_s1 + $0x38] sm:$0xff]   ;;  %v5030_v30 = vrot.slane %v7389_v14, 9  ;;  %1435 = vmatprep.mubr.bf16.mxu1 %v5150_v17  ;;  %5921 = vmatprep.subr.bf16.mxu1 %v6894_v22  ;;  %v5031_v41 = vrot.slane %v7427_v55, 9  ;;  %v5229_v44 = vcombine.low %v7629_v18, %v7671_v48  ;;  %v6898_v59 = vld [vmem:[%s8993_s1 + $0xc0] sm:$0xff]   ;;  %v7896_v33 = vld [vmem:[#allocation2 + $0x34] ss:$20 sps:$4 sm:$0xff]  }
  0x52   :  { %v419_v28 = vor.u32 %v418_v15, %v417_v62  ;;  %v7696_v34 = vld [vmem:[#allocation2 + $0x154] sm:$0xff]  ;;  %341 = vst [vmem:[#allocation2 + $0x180] sm:$0xf] %v340_v26  ;;  %v423_v35 = vor.u32 %v422_v20, %v421_v16  ;;  %v7703_v45 = vld [vmem:[#allocation2 + $0x168] sm:$0xff]  ;;  %v343_v46 = vsel %vm7342_vm5, %v273_v24, %v342_v9  ;;  %5922 = vmatpush3.bf16.msra.mxu1 %v6895_v29  ;;  %v5032_v7 = vrot.slane %v7437_v57, 9  ;;  %v6899_v9 = vld [vmem:[%s8993_s1 + $0x2c0] sm:$0xff]  }
  0x53   :  { %548 = vst.msk [vmem:[#allocation2 + $0x88] sm:$0x7] %vm543_vm3, %v5030_v30  ;;  %v5233_v51 = vcombine.high %v7662_v58, %v7696_v34  ;;  %v5232_v55 = vcombine.low %v7662_v58, %v7696_v34  ;;  %v5153_v54 = vcombine.high %v7696_v34, %v7703_v45  ;;  %344 = vst [vmem:[#allocation2 + $0x194] sm:$0xf] %v343_v46  ;;  %1339 = vmatmul.mubr.bf16.gmra.mrb[20].mxu0 %v5147_v6  ;;  %v6896_v30 = vld [vmem:[#allocation2 + $0x24] ss:$20 sps:$4 sm:$0xff]  }
  0x54   :  { %v420_v14 = vrot.slane %v419_v28, 4  ;;  %v424_v56 = vrot.slane %v423_v35, 4  ;;  %549 = vst.msk [vmem:[#allocation2 + $0x9c] sm:$0x7] %vm543_vm3, %v5031_v41  ;;  %5971 = vmatprep.subr.bf16.mxu0 %v6898_v59  ;;  %v5034_v8 = vrot.slane %v7494_v47, 9  ;;  %1436 = vmatmul.mubr.bf16.gmra.mrb[20].mxu1 %v5149_v19  ;;  %v5035_v11 = vrot.slane %v7532_v4, 9 }
  0x55   :  { %1346 = vmatprep.mubr.bf16.mxu0 %v5153_v54  ;;  %550 = vst.msk [vmem:[#allocation2 + $0xb0] sm:$0x7] %vm543_vm3, %v5032_v7  ;;  %v5036_v57 = vrot.slane %v7537_v5, 9  ;;  %v5152_v15 = vcombine.low %v7696_v34, %v7703_v45  ;;  %6051 = vmatprep.subr.bf16.mxu1 %v6899_v9  ;;  %v5037_v4 = vrot.slane %v7590_v52, 9  ;;  %v5038_v17 = vrot.slane %v7595_v53, 9  ;;  %v6902_v59 = vld [vmem:[%s8993_s1 + $0xc8] sm:$0xff]  }
  0x56   :  { %v487_v60 = vsel %vm7358_vm6, %v420_v14, %v486_v21  ;;  %v7720_v61 = vld [vmem:[#allocation2 + $0x15c] sm:$0xff]  ;;  %v7722_v62 = vld [vmem:[#allocation2 + $0x170] sm:$0xff]  ;;  %v490_v0 = vsel %vm7358_vm6, %v424_v56, %v489_v50  ;;  %552 = vst.msk [vmem:[#allocation2 + $0x128] sm:$0x7] %vm543_vm3, %v5034_v8  ;;  %553 = vst.msk [vmem:[#allocation2 + $0x13c] sm:$0x7] %vm543_vm3, %v5035_v11  ;;  %v7773_v41 = vcombine.high %v7620_v12, %v7620_v12 }
  0x57   :  { %488 = vst [vmem:[#allocation2 + $0x188] sm:$0xf] %v487_v60  ;;  %v5155_v6 = vcombine.high %v7720_v61, %v7722_v62  ;;  %491 = vst [vmem:[#allocation2 + $0x19c] sm:$0xf] %v490_v0  ;;  %v5235_v13 = vcombine.high %v7679_v10, %v7720_v61  ;;  %v5234_v47 = vcombine.low %v7679_v10, %v7720_v61  ;;  %v5039_v5 = vrot.slane %v7642_v36, 9  ;;  %v6900_v14 = vld [vmem:[%s8993_s1 + $0x80] sm:$0xff]  }
  0x58   :  { %554 = vst.msk [vmem:[#allocation2 + $0x150] sm:$0x7] %vm543_vm3, %v5036_v57  ;;  %v5154_v21 = vcombine.low %v7720_v61, %v7722_v62  ;;  %555 = vst.msk [vmem:[#allocation2 + $0x164] sm:$0x7] %vm543_vm3, %v5037_v4  ;;  %v5040_v52 = vrot.slane %v7647_v39, 9  ;;  %v7779_v50 = vld [vmem:[#allocation2 + $0x28] sm:$0xff]  ;;  %v7783_v56 = vcombine.low %v7620_v12, %v7620_v12 }
  0x59   :  { %1443 = vmatprep.mubr.bf16.mxu1 %v5155_v6  ;;  %v7743_v16 = vld [vmem:[#allocation2 + $0x17c] sm:$0xff]  ;;  %556 = vst.msk [vmem:[#allocation2 + $0x178] sm:$0x7] %vm543_vm3, %v5038_v17  ;;  %557 = vst.msk [vmem:[#allocation2 + $0x18c] sm:$0x7] %vm543_vm3, %v5039_v5  ;;  %v5208_v0 = vcombine.high %v7779_v50, %v7430_v1  ;;  %v6907_v7 = vld [vmem:[%s8993_s1 + $0x2c8] sm:$0xff]   ;;  %v5207_v4 = vcombine.low %v7779_v50, %v7430_v1  ;;  %v5213_v5 = vcombine.high %v7444_v37, %v7479_v27 }
  0x5a   :  { %v5238_v19 = vcombine.high %v7703_v45, %v7743_v16  ;;  %v5237_v20 = vcombine.low %v7703_v45, %v7743_v16  ;;  %v734_v22 = vld [vmem:[#allocation2 + $0x190] sm:$0xff]  ;;  %558 = vst.msk [vmem:[#allocation2 + $0x1a0] sm:$0x7] %vm543_vm3, %v5040_v52  ;;  %v6897_v46 = vld [vmem:[#allocation2 + $0x4c] ss:$20 sps:$4 sm:$0xff]   ;;  %v6910_v17 = vld [vmem:[%s8993_s1 + $0xd8] sm:$0xff]  }
  0x5b   :  { %v5158_v53 = vcombine.high %v7743_v16, %v734_v22  ;;  %1347 = vmatmul.mubr.bf16.gmra.mrb[24].mxu0 %v5152_v15  ;;  %v5157_v29 = vcombine.low %v7743_v16, %v734_v22  ;;  %v6904_v54 = vld [vmem:[#allocation2 + $0x74] ss:$20 sps:$4 sm:$0xff]   ;;  %v6901_v60 = vld [vmem:[%s8993_s1 + $0x280] sm:$0xff]   ;;  %v6923_v22 = vld [vmem:[%s8993_s1 + $0x2d8] sm:$0xff]  }
  0x5c   :  { %1444 = vmatmul.mubr.bf16.gmra.mrb[24].mxu1 %v5154_v21  ;;  %v6903_v12 = vld [vmem:[%s8993_s1 + $0x88] sm:$0xff]   ;;  %v6905_v8 = vld [vmem:[#allocation2 + $0x9c] ss:$20 sps:$4 sm:$0xff]   ;;  %v6948_v45 = vld [vmem:[%s8993_s1 + $0x3c0] sm:$0xff]  }
  0x5d   :  { %1354 = vmatprep.mubr.bf16.mxu0 %v5158_v53  ;;  %v6906_v6 = vld [vmem:[%s8993_s1 + $0xd0] sm:$0xff]   ;;  %v6909_v11 = vld [vmem:[%s8993_s1 + $0x288] sm:$0xff]   ;;  %v6911_v1 = vld [vmem:[%s8993_s1 + $0x98] sm:$0xff]  }
  0x5e   :  { %v7761_v36 = vld [vmem:[#allocation2 + $0x184] sm:$0xff]  ;;  %v735_v24 = vld [vmem:[#allocation2 + $0x198] sm:$0xff]  ;;  %v6908_v9 = vld [vmem:[%s8993_s1 + $0x90] sm:$0xff]  }
  0x5f   :  { %v5240_v26 = vcombine.high %v7722_v62, %v7761_v36  ;;  %v5239_v28 = vcombine.low %v7722_v62, %v7761_v36  ;;  %v5160_v39 = vcombine.high %v7761_v36, %v735_v24  ;;  %v5159_v35 = vcombine.low %v7761_v36, %v735_v24  ;;  %v6915_v57 = vld [vmem:[%s8993_s1 + $0x2d0] sm:$0xff]   ;;  %v6914_v53 = vld [vmem:[%s8993_s1 + $0xe0] sm:$0xff]   ;;  %v6934_v2 = vld [vmem:[%s8993_s1 + $0x108] sm:$0xff]  }
  0x60   :  { %v6912_v15 = vld [vmem:[#allocation2 + $0x114] ss:$20 sps:$4 sm:$0xff]   ;;  %v6913_v52 = vld [vmem:[#allocation2 + $0x13c] ss:$20 sps:$4 sm:$0xff]   ;;  %v6916_v24 = vld [vmem:[%s8993_s1 + $0xa0] sm:$0xff]  }
  0x61   :  { %1451 = vmatprep.mubr.bf16.mxu1 %v5160_v39  ;;  %v6917_v21 = vld [vmem:[%s8993_s1 + $0x290] sm:$0xff]   ;;  %v6925_v39 = vld [vmem:[%s8993_s1 + $0x298] sm:$0xff]   ;;  %v6950_v3 = vld [vmem:[%s8993_s1 + $0x128] sm:$0xff]  }
  0x62   :  { %v6941_v37 = vld [vmem:[%s8993_s1 + $0x2f0] sm:$0xff]   ;;  %v6960_v58 = vld [vmem:[%s8993_s1 + $0x138] sm:$0xff]   ;;  %v6968_v43 = vld [vmem:[%s8993_s1 + $0x420] sm:$0xff]  }
  0x63   :  { %1355 = vmatmul.mubr.bf16.gmra.mrb[28].mxu0 %v5157_v29  ;;  %v6929_v29 = vld [vmem:[%s8993_s1 + $0x2e0] sm:$0xff]   ;;  %v6924_v27 = vld [vmem:[%s8993_s1 + $0xb0] sm:$0xff]   ;;  %v6962_v18 = vld [vmem:[%s8993_s1 + $0x3d8] sm:$0xff]  }
  0x64   :  { %6499 = vmatprep.mubr.bf16.mxu0 %v6896_v30  ;;  %1452 = vmatmul.mubr.bf16.gmra.mrb[28].mxu1 %v5159_v35  ;;  %v6920_v30 = vld [vmem:[#allocation2 + $0x164] ss:$20 sps:$4 sm:$0xff]   ;;  %v6918_v35 = vld [vmem:[%s8993_s1 + $0xe8] sm:$0xff]   ;;  %v6955_v40 = vld [vmem:[%s8993_s1 + $0x130] sm:$0xff]  }
  0x65   :  { %2037 = vmatprep.mubr.bf16.mxu1 %v7773_v41  ;;  %v6980_v10 = vld [vmem:[%s8993_s1 + $0x3e8] sm:$0xff]   ;;  %v8076_v61 = vld [vmem:[#allocation2 + $0x94] sm:$0xff] }
  0x66   :  { %v6999_v62 = vld [vmem:[%s8993_s1 + $0x3f8] sm:$0xff]   ;;  %v8148_v49 = vld [vmem:[#allocation2 + $0x170] sm:$0xff] }
  0x6b   :  { %6500 = vmatmul.mubr.bf16.vlgmr.msra.gmra.mrb[32].mxu0 %v6897_v46  ;;  %v6930_v46 = vld [vmem:[%s8993_s1 + $0x2a0] sm:$0xff]  }
  0x6c   :  { %5972 = vmatpush3.bf16.msra.mxu0 %v6900_v14  ;;  %6503 = vmatprep.mubr.bf16.mxu0 %v6904_v54  ;;  %v6935_v14 = vld [vmem:[%s8993_s1 + $0x2e8] sm:$0xff]  }
  0x6d   :  { %2038 = vmatmul.mubr.bf16.vlgmr.msra.gmra.mrb[32].mxu1 %v7783_v56  ;;  %5973 = vmatprep.subr.bf16.mxu0 %v6902_v59  ;;  %v6919_v54 = vld [vmem:[%s8993_s1 + $0xa8] sm:$0xff]   ;;  %v6922_v59 = vld [vmem:[%s8993_s1 + $0xf0] sm:$0xff]  }
  0x6e   :  { %6052 = vmatpush3.bf16.msra.mxu1 %v6901_v60  ;;  %2045 = vmatprep.mubr.bf16.mxu1 %v5208_v0  ;;  %v6921_v60 = vld [vmem:[#allocation2 + $0x18c] ss:$20 sps:$4 sm:$0xff]  }
  0x6f   :  { %6053 = vmatprep.subr.bf16.mxu1 %v6907_v7  ;;  %v6936_v0 = vld [vmem:[%s8993_s1 + $0x2a8] sm:$0xff]   ;;  %v6944_v7 = vld [vmem:[%s8993_s1 + $0x2f8] sm:$0xff]  }
  0x70   :  { %5974 = vmatpush3.bf16.msra.mxu0 %v6903_v12  ;;  %v6927_v12 = vld [vmem:[%s8993_s1 + $0xb8] sm:$0xff]  }
  0x71   :  { %5975 = vmatprep.subr.bf16.mxu0 %v6906_v6  ;;  %v6945_v6 = vld [vmem:[%s8993_s1 + $0x2b8] sm:$0xff]  }
  0x72   :  { %6054 = vmatpush3.bf16.msra.mxu1 %v6909_v11  ;;  %v7909_v11 = vld [vmem:[#allocation2 + $0x30] ss:$20 sps:$4 sm:$0xff]  }
  0x73   :  { %6504 = vmatmul.mubr.bf16.gmra.mrb[36].mxu0 %v6905_v8  ;;  %6055 = vmatprep.subr.bf16.mxu1 %v6915_v57  ;;  %v6928_v8 = vld [vmem:[%s8993_s1 + $0x100] sm:$0xff]   ;;  %v6940_v57 = vld [vmem:[%s8993_s1 + $0x110] sm:$0xff]  }
  0x74   :  { %5976 = vmatpush3.bf16.msra.mxu0 %v6908_v9  ;;  %6507 = vmatprep.mubr.bf16.mxu0 %v6912_v15  ;;  %v6947_v9 = vld [vmem:[%s8993_s1 + $0x400] sm:$0xff]  }
  0x75   :  { %2046 = vmatmul.mubr.bf16.gmra.mrb[36].mxu1 %v5207_v4  ;;  %5977 = vmatprep.subr.bf16.mxu0 %v6910_v17 }
  0x76   :  { %2053 = vmatprep.mubr.bf16.mxu1 %v5213_v5  ;;  %6056 = vmatpush3.bf16.msra.mxu1 %v6917_v21  ;;  %v7922_v5 = vld [vmem:[#allocation2 + $0x5c] ss:$20 sps:$4 sm:$0xff]  }
  0x77   :  { %6057 = vmatprep.subr.bf16.mxu1 %v6923_v22  ;;  %v321_v22 = vld [vmem:[#allocation2 + $0xb8] sm:$0xf] }
  0x78   :  { %5978 = vmatpush3.bf16.msra.mxu0 %v6911_v1  ;;  %v6943_v1 = vld [vmem:[%s8993_s1 + $0x118] sm:$0xff]  }
  0x79   :  { %5979 = vmatprep.subr.bf16.mxu0 %v6914_v53  ;;  %v7936_v53 = vld [vmem:[#allocation2 + $0x80] sm:$0xff] }
  0x7a   :  { %6058 = vmatpush3.bf16.msra.mxu1 %v6925_v39  ;;  %v7947_v39 = vld [vmem:[#allocation2 + $0x58] ss:$20 sps:$4 sm:$0xff]  }
  0x7b   :  { %6508 = vmatmul.mubr.bf16.gmra.mrb[40].mxu0 %v6913_v52  ;;  %6059 = vmatprep.subr.bf16.mxu1 %v6929_v29  ;;  %v5220_v29 = vcombine.high %v7936_v53, %v7572_v25 }
  0x7c   :  { %5980 = vmatpush3.bf16.msra.mxu0 %v6916_v24  ;;  %6511 = vmatprep.mubr.bf16.mxu0 %v6920_v30  ;;  %v6946_v24 = vld [vmem:[%s8993_s1 + $0x120] sm:$0xff]  }
  0x7d   :  { %2054 = vmatmul.mubr.bf16.gmra.mrb[40].mxu1 %v5212_v38  ;;  %5981 = vmatprep.subr.bf16.mxu0 %v6918_v35  ;;  %v6926_v38 = vld [vmem:[%s8993_s1 + $0xf8] sm:$0xff]  }
  0x7e   :  { %2061 = vmatprep.mubr.bf16.mxu1 %v5218_v31  ;;  %6060 = vmatpush3.bf16.msra.mxu1 %v6930_v46  ;;  %v6942_v31 = vld [vmem:[%s8993_s1 + $0x2b0] sm:$0xff]   ;;  %v8005_v35 = vld [vmem:[%s8994_s0 + $0x3c] sm:$0xf] }
  0x7f   :  { %6061 = vmatprep.subr.bf16.mxu1 %v6935_v14  ;;  %v134_v46 = vrot.slane %v8005_v35, 7  ;;  %v275_v14 = vshrl.u32 %v8005_v35, 16  ;;  %364 = vst.msk [vmem:[#allocation2 + $0x1ac] sm:$0xf] %vm297_vm1, %v8005_v35 }
  0x80   :  { %5982 = vmatpush3.bf16.msra.mxu0 %v6919_v54  ;;  %v8015_v54 = vld [vmem:[#allocation2 + $0x8c] sm:$0xff] }
  0x81   :  { %5983 = vmatprep.subr.bf16.mxu0 %v6922_v59  ;;  %v6957_v59 = vld [vmem:[%s8993_s1 + $0x410] sm:$0xff]   ;;  %168 = vst.msk [vmem:[#allocation2 + $0x1a4] sm:$0xe] %vm152_vm0, %v134_v46  ;;  %v8120_v46 = vld [vmem:[#allocation2 + $0x148] sm:$0xff] }
  0x82   :  { %6062 = vmatpush3.bf16.msra.mxu1 %v6936_v0  ;;  %v345_v0 = vld [vmem:[#allocation2 + $0x1a8] sm:$0xf] }
  0x83   :  { %6512 = vmatmul.mubr.bf16.gmra.mrb[44].mxu0 %v6921_v60  ;;  %6063 = vmatprep.subr.bf16.mxu1 %v6941_v37  ;;  %v277_v60 = vrot.slane %v275_v14, 7 }
  0x84   :  { %5984 = vmatpush3.bf16.msra.mxu0 %v6924_v27  ;;  %2134 = vmatprep.mubr.bf16.mxu0 %v7773_v41  ;;  %v6958_v27 = vld [vmem:[%s8993_s1 + $0x3d0] sm:$0xff]  }
  0x85   :  { %2062 = vmatmul.mubr.bf16.gmra.mrb[44].mxu1 %v5217_v32  ;;  %5985 = vmatprep.subr.bf16.mxu0 %v6926_v38  ;;  %v7906_v32 = vld [vmem:[%s8994_s0 + $0x1c] sm:$0xf] }
  0x86   :  { %2069 = vmatprep.mubr.bf16.mxu1 %v7773_v41  ;;  %6064 = vmatpush3.bf16.msra.mxu1 %v6942_v31  ;;  %v126_v15 = vrot.slane %v7906_v32, 7  ;;  %v219_v4 = vshrl.u32 %v7906_v32, 16  ;;  %v222_v17 = vshll.u32 %v7906_v32, 16  ;;  %356 = vst.msk [vmem:[#allocation2 + $0xbc] sm:$0xf] %vm297_vm1, %v7906_v32 }
  0x87   :  { %6065 = vmatprep.subr.bf16.mxu1 %v6944_v7  ;;  %v6961_v7 = vld [vmem:[%s8993_s1 + $0x418] sm:$0xff]  }
  0x88   :  { %5986 = vmatpush3.bf16.msra.mxu0 %v6927_v12  ;;  %160 = vst.msk [vmem:[#allocation2 + $0xb4] sm:$0xe] %vm152_vm0, %v126_v15  ;;  %v221_v21 = vrot.slane %v219_v4, 7  ;;  %v6978_v15 = vld [vmem:[%s8993_s1 + $0x428] sm:$0xff]  }
  0x89   :  { %6515 = vmatprep.subr.bf16.mxu0 %v6928_v8 }
  0x8a   :  { %6066 = vmatpush3.bf16.msra.mxu1 %v6945_v6  ;;  %v224_v52 = vor.u32 %v222_v17, %v221_v21  ;;  %v394_v6 = vrot.slane %v222_v17, 5  ;;  %v2320_v17 = vld [vmem:[#allocation2 + $0x118] sm:$0xff]  ;;  %v8071_v21 = vld [vmem:[#allocation2 + $0x12c] sm:$0xff] }
  0x8b   :  { %2135 = vmatmul.mubr.bf16.vlgmr.msra.gmra.mrb[48].mxu0 %v7783_v56  ;;  %6195 = vmatprep.subr.bf16.mxu1 %v6947_v9  ;;  %v8043_v9 = vld [vmem:[#allocation2 + $0xa0] sm:$0xff] }
  0x8c   :  { %6516 = vmatpush3.bf16.msra.mxu0 %v6928_v8  ;;  %2142 = vmatprep.mubr.bf16.mxu0 %v7896_v33  ;;  %v393_v8 = vrot.slane %v219_v4, 4 }
  0x8d   :  { %2070 = vmatmul.mubr.bf16.gmra.mrb[48].mxu1 %v7783_v56  ;;  %6517 = vmatprep.subr.bf16.mxu0 %v6934_v2 }
  0x8e   :  { %2077 = vmatprep.mubr.bf16.mxu1 %v5228_v63  ;;  %v322_v63 = vsel %vm7342_vm5, %v224_v52, %v321_v22  ;;  %v8078_v22 = vld [vmem:[#allocation2 + $0xa8] sm:$0xff] }
  0x8f   :  { %323 = vst [vmem:[#allocation2 + $0xb8] sm:$0xf] %v322_v63  ;;  %v5534_v52 = vcombine.low %v8076_v61, %v8078_v22  ;;  %v6963_v63 = vld [vmem:[#allocation2 + $0x10] ss:$20 sps:$4 sm:$0xff]  }
  0x90   :  { %6518 = vmatpush3.bf16.msra.mxu0 %v6934_v2 }
  0x91   :  { %6519 = vmatprep.subr.bf16.mxu0 %v6940_v57 }
  0x93   :  { %2143 = vmatmul.mubr.bf16.gmra.mrb[52].mxu0 %v7909_v11 }
  0x94   :  { %2150 = vmatprep.mubr.bf16.mxu0 %v7922_v5  ;;  %6520 = vmatpush3.bf16.msra.mxu0 %v6940_v57  ;;  %v5041_v57 = vrot.slane %v8005_v35, 9 }
  0x95   :  { %2078 = vmatmul.mubr.bf16.gmra.mrb[52].mxu1 %v5227_v23  ;;  %6521 = vmatprep.subr.bf16.mxu0 %v6943_v1  ;;  %v5219_v23 = vcombine.low %v7936_v53, %v7572_v25  ;;  %v6967_v25 = vld [vmem:[%s8993_s1 + $0x340] sm:$0xff]  }
  0x96   :  { %2085 = vmatprep.mubr.bf16.mxu1 %v5233_v51  ;;  %v7966_v51 = vld [vmem:[#allocation2 + $0x3c] sm:$0xff]  ;;  %v8051_v48 = vld [vmem:[#allocation2 + $0xb4] sm:$0xff]  ;;  %559 = vst.msk [vmem:[#allocation2 + $0x1b4] sm:$0x7] %vm543_vm3, %v5041_v57 }
  0x97   :  { %v5363_v34 = vcombine.high %v7779_v50, %v7966_v51  ;;  %v5362_v30 = vcombine.low %v7779_v50, %v7966_v51  ;;  %v6953_v50 = vld [vmem:[%s8993_s1 + $0x3c8] sm:$0xff]   ;;  %v5378_v2 = vcombine.high %v8043_v9, %v8051_v48  ;;  %v6989_v57 = vld [vmem:[%s8993_s1 + $0x320] sm:$0xff]  }
  0x98   :  { %6522 = vmatpush3.bf16.msra.mxu0 %v6943_v1 }
  0x99   :  { %6523 = vmatprep.subr.bf16.mxu0 %v6946_v24 }
  0x9b   :  { %2151 = vmatmul.mubr.bf16.gmra.mrb[56].mxu0 %v7947_v39 }
  0x9c   :  { %2158 = vmatprep.mubr.bf16.mxu0 %v5220_v29  ;;  %6524 = vmatpush3.bf16.msra.mxu0 %v6946_v24  ;;  %v5377_v24 = vcombine.low %v8043_v9, %v8051_v48  ;;  %v5383_v29 = vcombine.high %v2320_v17, %v8071_v21 }
  0x9d   :  { %2086 = vmatmul.mubr.bf16.gmra.mrb[56].mxu1 %v5232_v55  ;;  %6525 = vmatprep.subr.bf16.mxu0 %v6950_v3  ;;  %v7980_v55 = vld [vmem:[#allocation2 + $0x50] sm:$0xff] }
  0x9e   :  { %2093 = vmatprep.mubr.bf16.mxu1 %v5238_v19  ;;  %v7982_v19 = vld [vmem:[#allocation2 + $0x64] sm:$0xff] }
  0x9f   :  { %v5368_v16 = vcombine.high %v7980_v55, %v7982_v19  ;;  %v5367_v37 = vcombine.low %v7980_v55, %v7982_v19 }
  0xa0   :  { %6526 = vmatpush3.bf16.msra.mxu0 %v6950_v3  ;;  %v6990_v3 = vld [vmem:[%s8993_s1 + $0x3f0] sm:$0xff]  }
  0xa1   :  { %6527 = vmatprep.subr.bf16.mxu0 %v6955_v40 }
  0xa3   :  { %2159 = vmatmul.mubr.bf16.gmra.mrb[60].mxu0 %v5219_v23 }
  0xa4   :  { %2166 = vmatprep.mubr.bf16.mxu0 %v7773_v41  ;;  %6528 = vmatpush3.bf16.msra.mxu0 %v6955_v40  ;;  %v6952_v41 = vld [vmem:[%s8993_s1 + $0x408] sm:$0xff]   ;;  %v425_v40 = vrot.slane %v275_v14, 4 }
  0xa5   :  { %2094 = vmatmul.mubr.bf16.gmra.mrb[60].mxu1 %v5237_v20  ;;  %6529 = vmatprep.subr.bf16.mxu0 %v6960_v58  ;;  %v5033_v20 = vrot.slane %v7906_v32, 9  ;;  %v6970_v32 = vld [vmem:[%s8993_s1 + $0x3e0] sm:$0xff]  }
  0xa6   :  { %2905 = vmatprep.mubr.bf16.mxu1 %v5363_v34  ;;  %v6965_v34 = vld [vmem:[#allocation2 + $0x38] ss:$20 sps:$4 sm:$0xff]  }
  0xa7   :  { %551 = vst.msk [vmem:[#allocation2 + $0xc4] sm:$0x7] %vm543_vm3, %v5033_v20  ;;  %v5382_v20 = vcombine.low %v2320_v17, %v8071_v21  ;;  %v6993_v17 = vld [vmem:[#allocation2 + $0x150] ss:$20 sps:$4 sm:$0xff]  }
  0xa8   :  { %6530 = vmatpush3.bf16.msra.mxu0 %v6960_v58  ;;  %v6997_v58 = vld [vmem:[%s8993_s1 + $0x438] sm:$0xff]  }
  0xa9   :  { %6115 = vmatprep.subr.bf16.mxu0 %v6967_v25  ;;  %v8099_v25 = vld [vmem:[#allocation2 + $0x140] sm:$0xff] }
  0xab   :  { %2167 = vmatmul.mubr.bf16.gmra.mrb[64].mxu0 %v7783_v56  ;;  %v8008_v56 = vld [vmem:[#allocation2 + $0x78] sm:$0xff] }
  0xac   :  { %2174 = vmatprep.mubr.bf16.mxu0 %v5230_v42  ;;  %v278_v42 = vshll.u32 %v8005_v35, 16  ;;  %v5373_v31 = vcombine.high %v8008_v56, %v8015_v54 }
  0xad   :  { %2906 = vmatmul.mubr.bf16.vlgmr.msra.gmra.mrb[64].mxu1 %v5362_v30  ;;  %v6969_v30 = vld [vmem:[%s8993_s1 + $0x300] sm:$0xff]  }
  0xae   :  { %6196 = vmatpush3.bf16.msra.mxu1 %v6948_v45  ;;  %2913 = vmatprep.mubr.bf16.mxu1 %v5368_v16  ;;  %v280_v38 = vor.u32 %v278_v42, %v277_v60  ;;  %v426_v23 = vrot.slane %v278_v42, 5  ;;  %v7003_v45 = vld [vmem:[%s8993_s1 + $0x480] sm:$0xff]   ;;  %v6975_v60 = vld [vmem:[#allocation2 + $0x88] ss:$20 sps:$4 sm:$0xff]  }
  0xaf   :  { %6197 = vmatprep.subr.bf16.mxu1 %v6952_v41  ;;  %v6973_v16 = vld [vmem:[#allocation2 + $0x60] ss:$20 sps:$4 sm:$0xff]   ;;  %v6971_v41 = vld [vmem:[%s8993_s1 + $0x348] sm:$0xff]  }
  0xb0   :  { %v346_v12 = vsel %vm7342_vm5, %v280_v38, %v345_v0  ;;  %v427_v36 = vor.u32 %v426_v23, %v425_v40  ;;  %v6977_v0 = vld [vmem:[%s8993_s1 + $0x350] sm:$0xff]   ;;  %v8133_v38 = vld [vmem:[#allocation2 + $0x168] sm:$0xff] }
  0xb1   :  { %347 = vst [vmem:[#allocation2 + $0x1a8] sm:$0xf] %v346_v12  ;;  %v6983_v12 = vld [vmem:[#allocation2 + $0x100] ss:$20 sps:$4 sm:$0xff]   ;;  %v6995_v40 = vld [vmem:[#allocation2 + $0x178] ss:$20 sps:$4 sm:$0xff]  }
  0xb2   :  { %6198 = vmatpush3.bf16.msra.mxu1 %v6953_v50  ;;  %v8116_v50 = vld [vmem:[#allocation2 + $0x134] sm:$0xff]  ;;  %v428_v14 = vrot.slane %v427_v36, 4  ;;  %v7002_v36 = vld [vmem:[%s8993_s1 + $0x380] sm:$0xff]  }
  0xb3   :  { %2175 = vmatmul.mubr.bf16.gmra.mrb[68].mxu0 %v5229_v44  ;;  %6199 = vmatprep.subr.bf16.mxu1 %v6957_v59  ;;  %v395_v44 = vor.u32 %v394_v6, %v393_v8  ;;  %v5544_v42 = vcombine.low %v8116_v50, %v8120_v46  ;;  %v6972_v59 = vld [vmem:[%s8993_s1 + $0x308] sm:$0xff]   ;;  %v6981_v6 = vld [vmem:[%s8993_s1 + $0x358] sm:$0xff]   ;;  %v6998_v23 = vld [vmem:[%s8993_s1 + $0x330] sm:$0xff]  }
  0xb4   :  { %2182 = vmatprep.mubr.bf16.mxu0 %v5235_v13  ;;  %v5372_v13 = vcombine.low %v8008_v56, %v8015_v54 }
  0xb5   :  { %2914 = vmatmul.mubr.bf16.gmra.mrb[68].mxu1 %v5367_v37  ;;  %v396_v4 = vrot.slane %v395_v44, 4  ;;  %v492_v37 = vld [vmem:[#allocation2 + $0x1b0] sm:$0xf] }
  0xb6   :  { %2921 = vmatprep.mubr.bf16.mxu1 %v5373_v31  ;;  %6200 = vmatpush3.bf16.msra.mxu1 %v6958_v27  ;;  %v6979_v27 = vld [vmem:[%s8993_s1 + $0x310] sm:$0xff]   ;;  %v493_v31 = vsel %vm7358_vm6, %v428_v14, %v492_v37  ;;  %v7013_v14 = vld [vmem:[%s8993_s1 + $0x398] sm:$0xff]   ;;  %v5374_v37 = vcombine.low %v7936_v53, %v8076_v61 }
  0xb7   :  { %6201 = vmatprep.subr.bf16.mxu1 %v6961_v7  ;;  %v8137_v7 = vld [vmem:[#allocation2 + $0x17c] sm:$0xff]  ;;  %494 = vst [vmem:[#allocation2 + $0x1b0] sm:$0xf] %v493_v31 }
  0xba   :  { %6202 = vmatpush3.bf16.msra.mxu1 %v6962_v18  ;;  %v5393_v18 = vcombine.high %v8133_v38, %v8137_v7 }
  0xbb   :  { %2183 = vmatmul.mubr.bf16.gmra.mrb[72].mxu0 %v5234_v47  ;;  %6203 = vmatprep.subr.bf16.mxu1 %v6968_v43  ;;  %v468_v47 = vld [vmem:[#allocation2 + $0xc0] sm:$0xf] }
  0xbc   :  { %2190 = vmatprep.mubr.bf16.mxu0 %v5240_v26  ;;  %v6988_v26 = vld [vmem:[%s8993_s1 + $0x430] sm:$0xff]   ;;  %v469_v1 = vsel %vm7358_vm6, %v396_v4, %v468_v47  ;;  %v8146_v43 = vld [vmem:[#allocation2 + $0x15c] sm:$0xff]  ;;  %v8163_v4 = vld [vmem:[#allocation2 + $0x1a4] sm:$0xff] }
  0xbd   :  { %2922 = vmatmul.mubr.bf16.gmra.mrb[72].mxu1 %v5372_v13  ;;  %470 = vst [vmem:[#allocation2 + $0xc0] sm:$0xf] %v469_v1  ;;  %v5549_v44 = vcombine.low %v8146_v43, %v8148_v49  ;;  %v6982_v13 = vld [vmem:[%s8993_s1 + $0x318] sm:$0xff]   ;;  %v6991_v47 = vld [vmem:[%s8993_s1 + $0x368] sm:$0xff]  }
  0xbe   :  { %2929 = vmatprep.mubr.bf16.mxu1 %v5378_v2  ;;  %6204 = vmatpush3.bf16.msra.mxu1 %v6970_v32  ;;  %v6985_v2 = vld [vmem:[#allocation2 + $0x128] ss:$20 sps:$4 sm:$0xff]   ;;  %v6987_v32 = vld [vmem:[%s8993_s1 + $0x360] sm:$0xff]  }
  0xbf   :  { %6205 = vmatprep.subr.bf16.mxu1 %v6978_v15  ;;  %v8161_v15 = vld [vmem:[#allocation2 + $0x190] sm:$0xff] }
  0xc0   :  { %v5398_v1 = vcombine.high %v8161_v15, %v8163_v4 }
  0xc2   :  { %6206 = vmatpush3.bf16.msra.mxu1 %v6980_v10  ;;  %v5392_v10 = vcombine.low %v8133_v38, %v8137_v7 }
  0xc3   :  { %2191 = vmatmul.mubr.bf16.gmra.mrb[76].mxu0 %v5239_v28  ;;  %6207 = vmatprep.subr.bf16.mxu1 %v6988_v26  ;;  %v8107_v28 = vld [vmem:[#allocation2 + $0x154] sm:$0xff]  ;;  %v8170_v26 = vld [vmem:[#allocation2 + $0x184] sm:$0xff] }
  0xc4   :  { %6531 = vmatprep.mubr.bf16.mxu0 %v6963_v63  ;;  %v5388_v35 = vcombine.high %v8099_v25, %v8107_v28  ;;  %v5387_v8 = vcombine.low %v8099_v25, %v8107_v28  ;;  %v8174_v63 = vld [vmem:[#allocation2 + $0x198] sm:$0xff] }
  0xc5   :  { %2930 = vmatmul.mubr.bf16.gmra.mrb[76].mxu1 %v5377_v24  ;;  %v5554_v24 = vcombine.low %v8170_v26, %v8174_v63 }
  0xc6   :  { %2937 = vmatprep.mubr.bf16.mxu1 %v5383_v29  ;;  %6208 = vmatpush3.bf16.msra.mxu1 %v6990_v3  ;;  %v6992_v29 = vld [vmem:[%s8993_s1 + $0x328] sm:$0xff]   ;;  %v6996_v3 = vld [vmem:[%s8993_s1 + $0x370] sm:$0xff]  }
  0xc7   :  { %6209 = vmatprep.subr.bf16.mxu1 %v6997_v58  ;;  %v5397_v58 = vcombine.low %v8161_v15, %v8163_v4 }
  0xca   :  { %6210 = vmatpush3.bf16.msra.mxu1 %v6999_v62  ;;  %v7001_v62 = vld [vmem:[%s8993_s1 + $0x338] sm:$0xff]  }
  0xcb   :  { %6532 = vmatmul.mubr.bf16.vlgmr.msra.gmra.mrb[32].mxu0 %v6965_v34  ;;  %6259 = vmatprep.subr.bf16.mxu1 %v7003_v45  ;;  %v7000_v34 = vld [vmem:[%s8993_s1 + $0x378] sm:$0xff]   ;;  %v5522_v45 = vcombine.low %v7966_v51, %v7980_v55 }
  0xcc   :  { %6116 = vmatpush3.bf16.msra.mxu0 %v6969_v30  ;;  %6535 = vmatprep.mubr.bf16.mxu0 %v6973_v16  ;;  %v5523_v30 = vcombine.high %v7966_v51, %v7980_v55  ;;  %v7005_v16 = vld [vmem:[%s8993_s1 + $0x388] sm:$0xff]   ;;  %v7008_v51 = vld [vmem:[%s8993_s1 + $0x390] sm:$0xff]  }
  0xcd   :  { %2938 = vmatmul.mubr.bf16.gmra.mrb[80].mxu1 %v5382_v20  ;;  %6117 = vmatprep.subr.bf16.mxu0 %v6971_v41  ;;  %v5528_v20 = vcombine.high %v7982_v19, %v8008_v56  ;;  %v7006_v41 = vld [vmem:[%s8993_s1 + $0x488] sm:$0xff]  }
  0xce   :  { %2945 = vmatprep.mubr.bf16.mxu1 %v5388_v35  ;;  %v7007_v55 = vld [vmem:[%s8993_s1 + $0x448] sm:$0xff]   ;;  %v5527_v35 = vcombine.low %v7982_v19, %v8008_v56  ;;  %v7014_v19 = vld [vmem:[%s8993_s1 + $0x498] sm:$0xff]   ;;  %v7018_v56 = vld [vmem:[%s8993_s1 + $0x3a0] sm:$0xff]  }
  0xd0   :  { %6118 = vmatpush3.bf16.msra.mxu0 %v6972_v59  ;;  %v5533_v59 = vcombine.high %v8015_v54, %v8043_v9 }
  0xd1   :  { %6119 = vmatprep.subr.bf16.mxu0 %v6977_v0  ;;  %v8244_v0 = vld [vmem:[#allocation2 + $0xbc] sm:$0xff] }
  0xd2   :  { %v5380_v31 = vcombine.high %v8078_v22, %v8244_v0 }
  0xd3   :  { %6536 = vmatmul.mubr.bf16.gmra.mrb[36].mxu0 %v6975_v60  ;;  %v7010_v60 = vld [vmem:[%s8993_s1 + $0x450] sm:$0xff]  }
  0xd4   :  { %6120 = vmatpush3.bf16.msra.mxu0 %v6979_v27  ;;  %6539 = vmatprep.mubr.bf16.mxu0 %v6983_v12  ;;  %v7019_v27 = vld [vmem:[%s8993_s1 + $0x4a0] sm:$0xff]   ;;  %v5532_v12 = vcombine.low %v8015_v54, %v8043_v9  ;;  %v7024_v54 = vld [vmem:[%s8993_s1 + $0x4a8] sm:$0xff]  }
  0xd5   :  { %2946 = vmatmul.mubr.bf16.gmra.mrb[84].mxu1 %v5387_v8  ;;  %6121 = vmatprep.subr.bf16.mxu0 %v6981_v6  ;;  %v7023_v8 = vld [vmem:[%s8993_s1 + $0x3a8] sm:$0xff]   ;;  %v8261_v6 = vld [vmem:[#allocation2 + $0x14] sm:$0xff]  ;;  %v8271_v9 = vld [vmem:[#allocation2 + $0x120] sm:$0xff] }
  0xd6   :  { %2953 = vmatprep.mubr.bf16.mxu1 %v5393_v18  ;;  %v7020_v18 = vld [vmem:[%s8993_s1 + $0x460] sm:$0xff]  }
  0xd8   :  { %6122 = vmatpush3.bf16.msra.mxu0 %v6982_v13  ;;  %v7028_v13 = vld [vmem:[%s8993_s1 + $0x3b0] sm:$0xff]  }
  0xd9   :  { %6123 = vmatprep.subr.bf16.mxu0 %v6987_v32  ;;  %v7025_v32 = vld [vmem:[%s8993_s1 + $0x468] sm:$0xff]  }
  0xdb   :  { %6540 = vmatmul.mubr.bf16.gmra.mrb[40].mxu0 %v6985_v2 }
  0xdc   :  { %6124 = vmatpush3.bf16.msra.mxu0 %v6989_v57  ;;  %6543 = vmatprep.mubr.bf16.mxu0 %v6993_v17  ;;  %v5379_v17 = vcombine.low %v8078_v22, %v8244_v0 }
  0xdd   :  { %2954 = vmatmul.mubr.bf16.gmra.mrb[88].mxu1 %v5392_v10  ;;  %6125 = vmatprep.subr.bf16.mxu0 %v6991_v47  ;;  %v7029_v10 = vld [vmem:[%s8993_s1 + $0x4b0] sm:$0xff]  }
  0xde   :  { %2961 = vmatprep.mubr.bf16.mxu1 %v5398_v1 }
  0xe0   :  { %6126 = vmatpush3.bf16.msra.mxu0 %v6992_v29 }
  0xe1   :  { %6127 = vmatprep.subr.bf16.mxu0 %v6996_v3  ;;  %v5385_v3 = vcombine.high %v8271_v9, %v8116_v50 }
  0xe3   :  { %6544 = vmatmul.mubr.bf16.gmra.mrb[44].mxu0 %v6995_v40  ;;  %v7033_v40 = vld [vmem:[%s8993_s1 + $0x3b8] sm:$0xff]  }
  0xe4   :  { %6128 = vmatpush3.bf16.msra.mxu0 %v6998_v23  ;;  %3002 = vmatprep.mubr.bf16.mxu0 %v7896_v33  ;;  %v7004_v33 = vld [vmem:[%s8993_s1 + $0x440] sm:$0xff]  }
  0xe5   :  { %2962 = vmatmul.mubr.bf16.gmra.mrb[92].mxu1 %v5397_v58  ;;  %6129 = vmatprep.subr.bf16.mxu0 %v7000_v34  ;;  %v5537_v34 = vcombine.low %v8051_v48, %v8261_v6 }
  0xe6   :  { %3790 = vmatprep.mubr.bf16.mxu1 %v5523_v30 }
  0xe8   :  { %6130 = vmatpush3.bf16.msra.mxu0 %v7001_v62 }
  0xe9   :  { %6547 = vmatprep.subr.bf16.mxu0 %v7002_v36 }
  0xeb   :  { %3003 = vmatmul.mubr.bf16.vlgmr.msra.gmra.mrb[80].mxu0 %v7909_v11  ;;  %v7009_v11 = vld [vmem:[%s8993_s1 + $0x490] sm:$0xff]  }
  0xec   :  { %6548 = vmatpush3.bf16.msra.mxu0 %v7002_v36  ;;  %3010 = vmatprep.mubr.bf16.mxu0 %v7922_v5  ;;  %v5375_v5 = vcombine.high %v7936_v53, %v8076_v61  ;;  %v5538_v53 = vcombine.high %v8051_v48, %v8261_v6  ;;  %v7082_v61 = vld [vmem:[%s8993_s1 + $0x5f0] sm:$0xff]  }
  0xed   :  { %3791 = vmatmul.mubr.bf16.vlgmr.msra.gmra.mrb[96].mxu1 %v5522_v45  ;;  %6549 = vmatprep.subr.bf16.mxu0 %v7005_v16  ;;  %v5543_v45 = vcombine.high %v8071_v21, %v8099_v25 }
  0xee   :  { %6260 = vmatpush3.bf16.msra.mxu1 %v7004_v33  ;;  %3798 = vmatprep.mubr.bf16.mxu1 %v5528_v20  ;;  %v7034_v20 = vld [vmem:[%s8993_s1 + $0x4b8] sm:$0xff]  }
  0xef   :  { %6261 = vmatprep.subr.bf16.mxu1 %v7006_v41 }
  0xf0   :  { %6550 = vmatpush3.bf16.msra.mxu0 %v7005_v16  ;;  %v7030_v16 = vld [vmem:[%s8993_s1 + $0x470] sm:$0xff]  }
  0xf1   :  { %6551 = vmatprep.subr.bf16.mxu0 %v7008_v51 }
  0xf2   :  { %6262 = vmatpush3.bf16.msra.mxu1 %v7007_v55 }
  0xf3   :  { %3011 = vmatmul.mubr.bf16.gmra.mrb[84].mxu0 %v7947_v39  ;;  %6263 = vmatprep.subr.bf16.mxu1 %v7009_v11  ;;  %v7015_v39 = vld [vmem:[%s8993_s1 + $0x458] sm:$0xff]  }
  0xf4   :  { %3018 = vmatprep.mubr.bf16.mxu0 %v5375_v5  ;;  %6552 = vmatpush3.bf16.msra.mxu0 %v7008_v51  ;;  %v8304_v51 = vld [vmem:[%s8993_s1 + $0x4c0] sm:$0xff]   ;;  %v7035_v5 = vld [vmem:[%s8993_s1 + $0x478] sm:$0xff]  }
  0xf5   :  { %3799 = vmatmul.mubr.bf16.gmra.mrb[100].mxu1 %v5527_v35  ;;  %6553 = vmatprep.subr.bf16.mxu0 %v7013_v14 }
  0xf6   :  { %3806 = vmatprep.mubr.bf16.mxu1 %v5533_v59  ;;  %6264 = vmatpush3.bf16.msra.mxu1 %v7010_v60  ;;  %v7041_v59 = vld [vmem:[%s8993_s1 + $0x5c0] sm:$0xff]  }
  0xf7   :  { %6265 = vmatprep.subr.bf16.mxu1 %v7014_v19 }
  0xf8   :  { %6554 = vmatpush3.bf16.msra.mxu0 %v7013_v14  ;;  %v5384_v14 = vcombine.low %v8271_v9, %v8116_v50  ;;  %v7077_v50 = vld [vmem:[%s8993_s1 + $0x558] sm:$0xff]  }
  0xf9   :  { %6555 = vmatprep.subr.bf16.mxu0 %v7018_v56 }
  0xfa   :  { %6266 = vmatpush3.bf16.msra.mxu1 %v7015_v39  ;;  %v5390_v39 = vcombine.high %v8120_v46, %v8146_v43 }
  0xfb   :  { %3019 = vmatmul.mubr.bf16.gmra.mrb[88].mxu0 %v5374_v37  ;;  %6267 = vmatprep.subr.bf16.mxu1 %v7019_v27 }
  0xfc   :  { %3026 = vmatprep.mubr.bf16.mxu0 %v5380_v31  ;;  %6556 = vmatpush3.bf16.msra.mxu0 %v7018_v56  ;;  %v5542_v31 = vcombine.low %v8071_v21, %v8099_v25 }
  0xfd   :  { %3807 = vmatmul.mubr.bf16.gmra.mrb[104].mxu1 %v5532_v12  ;;  %6557 = vmatprep.subr.bf16.mxu0 %v7023_v8 }
  0xfe   :  { %v5779_v2 = vpop.f32.mrb[0].mxu0  ;;  %3814 = vmatprep.mubr.bf16.mxu1 %v5538_v53  ;;  %6268 = vmatpush3.bf16.msra.mxu1 %v7020_v18  ;;  %v5548_v18 = vcombine.high %v8107_v28, %v8133_v38 }
  0xff   :  { %v5780_v57 = vpop.f32.mrb[1].mxu0  ;;  %6269 = vmatprep.subr.bf16.mxu1 %v7024_v54  ;;  %v5843_v47 = vpop.f32.mrb[0].mxu1 }
 0x100   :  { %v5781_v1 = vadd.f32 %v5780_v57, %v5779_v2  ;;  %v5782_v29 = vpop.f32.mrb[2].mxu0  ;;  %6558 = vmatpush3.bf16.msra.mxu0 %v7023_v8  ;;  %v5844_v23 = vpop.f32.mrb[1].mxu1 }
 0x101   :  { %v5783_v58 = vpop.f32.mrb[3].mxu0  ;;  %6559 = vmatprep.subr.bf16.mxu0 %v7028_v13  ;;  %v5845_v30 = vadd.f32 %v5844_v23, %v5843_v47  ;;  %v5846_v62 = vpop.f32.mrb[2].mxu1  ;;  %v5395_v47 = vcombine.high %v8148_v49, %v8170_v26 }
 0x102   :  { %v5784_v36 = vadd.f32 %v5783_v58, %v5782_v29  ;;  %6270 = vmatpush3.bf16.msra.mxu1 %v7025_v32  ;;  %v5847_v33 = vpop.f32.mrb[3].mxu1  ;;  %v5389_v32 = vcombine.low %v8120_v46, %v8146_v43  ;;  %v7085_v43 = vld [vmem:[%s8993_s1 + $0x568] sm:$0xff]  }
 0x103   :  { %3027 = vmatmul.mubr.bf16.gmra.mrb[92].mxu0 %v5379_v17  ;;  %6271 = vmatprep.subr.bf16.mxu1 %v7029_v10  ;;  %v8299_v48 = vadd.f32 %v5845_v30, %v5781_v1  ;;  %v5848_v41 = vadd.f32 %v5847_v33, %v5846_v62 }
 0x104   :  { %3034 = vmatprep.mubr.bf16.mxu0 %v5385_v3  ;;  %6560 = vmatpush3.bf16.msra.mxu0 %v7028_v13  ;;  %v5547_v3 = vcombine.low %v8107_v28, %v8133_v38  ;;  %v5394_v38 = vcombine.low %v8148_v49, %v8170_v26  ;;  %v7091_v26 = vld [vmem:[%s8993_s1 + $0x530] sm:$0xff]  }
 0x105   :  { %3815 = vmatmul.mubr.bf16.gmra.mrb[108].mxu1 %v5537_v34  ;;  %6561 = vmatprep.subr.bf16.mxu0 %v7033_v40  ;;  %v8306_v55 = vadd.f32 %v5848_v41, %v5784_v36  ;;  %v5553_v34 = vcombine.high %v8137_v7, %v8161_v15 }
 0x106   :  { %v5785_v11 = vpop.f32.mrb[4].mxu0  ;;  %3822 = vmatprep.mubr.bf16.mxu1 %v5543_v45  ;;  %6272 = vmatpush3.bf16.msra.mxu1 %v7030_v16  ;;  %v8337_v45 = vld [vmem:[#allocation2 + $0x1ac] sm:$0xff] }
 0x107   :  { %v5786_v35 = vpop.f32.mrb[5].mxu0  ;;  %6273 = vmatprep.subr.bf16.mxu1 %v7034_v20  ;;  %v5849_v60 = vpop.f32.mrb[4].mxu1 }
 0x108   :  { %v5787_v19 = vadd.f32 %v5786_v35, %v5785_v11  ;;  %v5788_v56 = vpop.f32.mrb[6].mxu0  ;;  %6562 = vmatpush3.bf16.msra.mxu0 %v7033_v40  ;;  %v5850_v37 = vpop.f32.mrb[5].mxu1 }
 0x109   :  { %v5789_v27 = vpop.f32.mrb[7].mxu0  ;;  %6579 = vmatprep.subr.bf16.mxu0 %v8304_v51  ;;  %v5851_v12 = vadd.f32 %v5850_v37, %v5849_v60  ;;  %v5852_v8 = vpop.f32.mrb[6].mxu1 }
 0x10a   :  { %v5790_v53 = vadd.f32 %v5789_v27, %v5788_v56  ;;  %6274 = vmatpush3.bf16.msra.mxu1 %v7035_v5  ;;  %v5853_v54 = vpop.f32.mrb[7].mxu1  ;;  %v5400_v5 = vcombine.high %v8174_v63, %v8337_v45 }
 0x10b   :  { %3035 = vmatmul.mubr.bf16.gmra.mrb[96].mxu0 %v5384_v14  ;;  %6403 = vmatprep.subr.bf16.mxu1 %v7041_v59  ;;  %v8323_v9 = vadd.f32 %v5851_v12, %v5787_v19  ;;  %v5854_v13 = vadd.f32 %v5853_v54, %v5852_v8  ;;  %v5552_v59 = vcombine.low %v8137_v7, %v8161_v15  ;;  %v3182_v15 = vld [vmem:[#allocation2 + $0x44] sm:$0xff]  ;;  %v8355_v54 = vld [vmem:[#allocation2 + $0x58] sm:$0xff] }
 0x10c   :  { %3042 = vmatprep.mubr.bf16.mxu0 %v5390_v39  ;;  %v5558_v39 = vcombine.high %v8163_v4, %v8261_v6  ;;  %v5399_v7 = vcombine.low %v8174_v63, %v8337_v45  ;;  %v7097_v63 = vld [vmem:[#allocation2 + $0x54] ss:$20 sps:$4 sm:$0xff]  }
 0x10d   :  { %3823 = vmatmul.mubr.bf16.gmra.mrb[112].mxu1 %v5542_v31  ;;  %v8325_v2 = vadd.f32 %v5854_v13, %v5790_v53  ;;  %v7036_v53 = vld [vmem:[#allocation2 + $0x38] ss:$20 sps:$4 sm:$0xff]  }
 0x10e   :  { %v5791_v21 = vpop.f32.mrb[8].mxu0  ;;  %3830 = vmatprep.mubr.bf16.mxu1 %v5548_v18 }
 0x10f   :  { %v5792_v25 = vpop.f32.mrb[9].mxu0  ;;  %v5855_v57 = vpop.f32.mrb[8].mxu1 }
 0x110   :  { %v5793_v17 = vadd.f32 %v5792_v25, %v5791_v21  ;;  %v5794_v10 = vpop.f32.mrb[10].mxu0  ;;  %v5856_v1 = vpop.f32.mrb[9].mxu1 }
 0x111   :  { %v5795_v29 = vpop.f32.mrb[11].mxu0  ;;  %v5857_v40 = vadd.f32 %v5856_v1, %v5855_v57  ;;  %v5858_v23 = vpop.f32.mrb[10].mxu1 }
 0x112   :  { %v5796_v58 = vadd.f32 %v5795_v29, %v5794_v10  ;;  %v5859_v30 = vpop.f32.mrb[11].mxu1  ;;  %v5525_v29 = vcombine.high %v3182_v15, %v8355_v54 }
 0x113   :  { %3043 = vmatmul.mubr.bf16.gmra.mrb[100].mxu0 %v5389_v32  ;;  %v8335_v62 = vadd.f32 %v5857_v40, %v5793_v17  ;;  %v5860_v36 = vadd.f32 %v5859_v30, %v5858_v23  ;;  %v5557_v17 = vcombine.low %v8163_v4, %v8261_v6 }
 0x114   :  { %3050 = vmatprep.mubr.bf16.mxu0 %v5395_v47 }
 0x115   :  { %3831 = vmatmul.mubr.bf16.gmra.mrb[116].mxu1 %v5547_v3  ;;  %v8339_v16 = vadd.f32 %v5860_v36, %v5796_v58  ;;  %v7039_v58 = vld [vmem:[#allocation2 + $0x60] ss:$20 sps:$4 sm:$0xff]   ;;  %v7044_v36 = vld [vmem:[#allocation2 + $0x88] ss:$20 sps:$4 sm:$0xff]  }
 0x116   :  { %v5797_v33 = vpop.f32.mrb[12].mxu0  ;;  %3838 = vmatprep.mubr.bf16.mxu1 %v5553_v34 }
 0x117   :  { %v5798_v28 = vpop.f32.mrb[13].mxu0  ;;  %v5861_v20 = vpop.f32.mrb[12].mxu1 }
 0x118   :  { %v5799_v41 = vadd.f32 %v5798_v28, %v5797_v33  ;;  %v5800_v11 = vpop.f32.mrb[14].mxu0  ;;  %v5862_v35 = vpop.f32.mrb[13].mxu1  ;;  %v8364_v33 = vld [vmem:[#allocation2 + $0x6c] sm:$0xff]  ;;  %v8366_v28 = vld [vmem:[#allocation2 + $0x80] sm:$0xff] }
 0x119   :  { %v5801_v14 = vpop.f32.mrb[15].mxu0  ;;  %v5863_v60 = vadd.f32 %v5862_v35, %v5861_v20  ;;  %v5864_v19 = vpop.f32.mrb[14].mxu1  ;;  %v5524_v35 = vcombine.low %v3182_v15, %v8355_v54 }
 0x11a   :  { %v5802_v56 = vadd.f32 %v5801_v14, %v5800_v11  ;;  %v5865_v37 = vpop.f32.mrb[15].mxu1  ;;  %v7043_v14 = vld [vmem:[%s8993_s1 + $0x4c8] sm:$0xff]  }
 0x11b   :  { %3051 = vmatmul.mubr.bf16.gmra.mrb[104].mxu0 %v5394_v38  ;;  %v8349_v27 = vadd.f32 %v5863_v60, %v5799_v41  ;;  %v5866_v31 = vadd.f32 %v5865_v37, %v5864_v19 }
 0x11c   :  { %3058 = vmatprep.mubr.bf16.mxu0 %v5400_v5 }
 0x11d   :  { %3839 = vmatmul.mubr.bf16.gmra.mrb[120].mxu1 %v5552_v59  ;;  %v8351_v12 = vadd.f32 %v5866_v31, %v5802_v56  ;;  %v7042_v56 = vld [vmem:[%s8993_s1 + $0x580] sm:$0xff]   ;;  %v7048_v31 = vld [vmem:[%s8993_s1 + $0x5c8] sm:$0xff]  }
 0x11e   :  { %v5803_v8 = vpop.f32.mrb[16].mxu0  ;;  %3846 = vmatprep.mubr.bf16.mxu1 %v5558_v39  ;;  %v5530_v39 = vcombine.high %v8364_v33, %v8366_v28 }
 0x11f   :  { %v5804_v18 = vpop.f32.mrb[17].mxu0  ;;  %v5867_v13 = vpop.f32.mrb[16].mxu1 }
 0x120   :  { %v5805_v21 = vadd.f32 %v5804_v18, %v5803_v8  ;;  %v5806_v25 = vpop.f32.mrb[18].mxu0  ;;  %v5868_v32 = vpop.f32.mrb[17].mxu1  ;;  %v7047_v18 = vld [vmem:[%s8993_s1 + $0x4d0] sm:$0xff]  }
 0x121   :  { %v5807_v57 = vpop.f32.mrb[19].mxu0  ;;  %v5869_v10 = vadd.f32 %v5868_v32, %v5867_v13  ;;  %v5870_v47 = vpop.f32.mrb[18].mxu1  ;;  %v7049_v13 = vld [vmem:[%s8993_s1 + $0x588] sm:$0xff]  }
 0x122   :  { %v5808_v1 = vadd.f32 %v5807_v57, %v5806_v25  ;;  %v5871_v3 = vpop.f32.mrb[19].mxu1  ;;  %v7046_v25 = vld [vmem:[#allocation2 + $0xb0] ss:$20 sps:$4 sm:$0xff]  }
 0x123   :  { %3059 = vmatmul.mubr.bf16.gmra.mrb[108].mxu0 %v5399_v7  ;;  %v8360_v40 = vadd.f32 %v5869_v10, %v5805_v21  ;;  %v5872_v23 = vadd.f32 %v5871_v3, %v5870_v47  ;;  %v7051_v10 = vld [vmem:[#allocation2 + $0x128] ss:$20 sps:$4 sm:$0xff]  }
 0x124   :  { %6563 = vmatprep.mubr.bf16.mxu0 %v7036_v53  ;;  %v7050_v3 = vld [vmem:[%s8993_s1 + $0x4d8] sm:$0xff]  }
 0x125   :  { %3847 = vmatmul.mubr.bf16.gmra.mrb[124].mxu1 %v5557_v17  ;;  %v8362_v34 = vadd.f32 %v5872_v23, %v5808_v1 }
 0x126   :  { %v5809_v30 = vpop.f32.mrb[20].mxu0  ;;  %3887 = vmatprep.mubr.bf16.mxu1 %v5525_v29  ;;  %v5529_v29 = vcombine.low %v8364_v33, %v8366_v28 }
 0x127   :  { %v5810_v4 = vpop.f32.mrb[21].mxu0  ;;  %v5873_v38 = vpop.f32.mrb[20].mxu1 }
 0x128   :  { %v5811_v20 = vadd.f32 %v5810_v4, %v5809_v30  ;;  %v5812_v41 = vpop.f32.mrb[22].mxu0  ;;  %v5874_v11 = vpop.f32.mrb[21].mxu1  ;;  %v7144_v4 = vld [vmem:[#allocation2 + $0xa8] sm:$0xff] }
 0x129   :  { %v5813_v5 = vpop.f32.mrb[23].mxu0  ;;  %v5875_v59 = vadd.f32 %v5874_v11, %v5873_v38  ;;  %v5876_v60 = vpop.f32.mrb[22].mxu1  ;;  %v7060_v11 = vld [vmem:[%s8993_s1 + $0x5d8] sm:$0xff]  }
 0x12a   :  { %v5814_v19 = vadd.f32 %v5813_v5, %v5812_v41  ;;  %v5877_v37 = vpop.f32.mrb[23].mxu1 }
 0x12b   :  { %6564 = vmatmul.mubr.bf16.vlgmr.msra.gmra.mrb[32].mxu0 %v7039_v58  ;;  %v8380_v8 = vadd.f32 %v5875_v59, %v5811_v20  ;;  %v5878_v53 = vadd.f32 %v5877_v37, %v5876_v60  ;;  %v7055_v20 = vld [vmem:[%s8993_s1 + $0x590] sm:$0xff]   ;;  %v7066_v37 = vld [vmem:[%s8993_s1 + $0x5e0] sm:$0xff]  }
 0x12c   :  { %6580 = vmatpush3.bf16.msra.mxu0 %v8304_v51  ;;  %6567 = vmatprep.mubr.bf16.mxu0 %v7044_v36  ;;  %v7054_v51 = vld [vmem:[%s8993_s1 + $0x5d0] sm:$0xff]  }
 0x12d   :  { %3888 = vmatmul.mubr.bf16.vlgmr.msra.gmra.mrb[128].mxu1 %v5524_v35  ;;  %6581 = vmatprep.subr.bf16.mxu0 %v7043_v14  ;;  %v8386_v7 = vadd.f32 %v5878_v53, %v5814_v19  ;;  %v7143_v36 = vld [vmem:[#allocation2 + $0x94] sm:$0xff] }
 0x12e   :  { %6404 = vmatpush3.bf16.msra.mxu1 %v7042_v56  ;;  %v5815_v15 = vpop.f32.mrb[24].mxu0  ;;  %3895 = vmatprep.mubr.bf16.mxu1 %v5530_v39  ;;  %v5535_v38 = vcombine.high %v7143_v36, %v7144_v4  ;;  %v7061_v19 = vld [vmem:[%s8993_s1 + $0x598] sm:$0xff]   ;;  %v7052_v39 = vld [vmem:[#allocation2 + $0x150] ss:$20 sps:$4 sm:$0xff]   ;;  %v7058_v36 = vld [vmem:[#allocation2 + $0x1a0] ss:$20 sps:$4 sm:$0xff]  }
 0x12f   :  { %v5816_v21 = vpop.f32.mrb[25].mxu0  ;;  %6405 = vmatprep.subr.bf16.mxu1 %v7048_v31  ;;  %v5879_v32 = vpop.f32.mrb[24].mxu1 }
 0x130   :  { %v5817_v57 = vadd.f32 %v5816_v21, %v5815_v15  ;;  %v5818_v17 = vpop.f32.mrb[26].mxu0  ;;  %6582 = vmatpush3.bf16.msra.mxu0 %v7043_v14  ;;  %v5880_v47 = vpop.f32.mrb[25].mxu1  ;;  %v7053_v14 = vld [vmem:[%s8993_s1 + $0x4e0] sm:$0xff]   ;;  %v7057_v15 = vld [vmem:[#allocation2 + $0x178] ss:$20 sps:$4 sm:$0xff]  }
 0x131   :  { %v5819_v1 = vpop.f32.mrb[27].mxu0  ;;  %6583 = vmatprep.subr.bf16.mxu0 %v7047_v18  ;;  %v5881_v23 = vadd.f32 %v5880_v47, %v5879_v32  ;;  %v5882_v58 = vpop.f32.mrb[26].mxu1 }
 0x132   :  { %v5820_v30 = vadd.f32 %v5819_v1, %v5818_v17  ;;  %6406 = vmatpush3.bf16.msra.mxu1 %v7049_v13  ;;  %v5883_v41 = vpop.f32.mrb[27].mxu1  ;;  %v5540_v17 = vcombine.high %v8244_v0, %v8261_v6  ;;  %v7074_v1 = vld [vmem:[%s8993_s1 + $0x5e8] sm:$0xff]  }
 0x133   :  { %6568 = vmatmul.mubr.bf16.gmra.mrb[36].mxu0 %v7046_v25  ;;  %6407 = vmatprep.subr.bf16.mxu1 %v7054_v51  ;;  %v8405_v5 = vadd.f32 %v5881_v23, %v5817_v57  ;;  %v5884_v35 = vadd.f32 %v5883_v41, %v5882_v58  ;;  %v7056_v25 = vld [vmem:[%s8993_s1 + $0x4e8] sm:$0xff]   ;;  %v7059_v23 = vld [vmem:[%s8993_s1 + $0x4f0] sm:$0xff]  }
 0x134   :  { %6584 = vmatpush3.bf16.msra.mxu0 %v7047_v18  ;;  %6571 = vmatprep.mubr.bf16.mxu0 %v7051_v10  ;;  %v7068_v10 = vld [vmem:[%s8993_s1 + $0x5a0] sm:$0xff]  }
 0x135   :  { %3896 = vmatmul.mubr.bf16.gmra.mrb[132].mxu1 %v5529_v29  ;;  %6585 = vmatprep.subr.bf16.mxu0 %v7050_v3  ;;  %v8410_v59 = vadd.f32 %v5884_v35, %v5820_v30  ;;  %v7076_v30 = vld [vmem:[%s8993_s1 + $0x5a8] sm:$0xff]   ;;  %v7145_v35 = vld [vmem:[#allocation2 + $0x134] sm:$0xff] }
 0x136   :  { %v5821_v60 = vpop.f32.mrb[28].mxu0  ;;  %3903 = vmatprep.mubr.bf16.mxu1 %v5535_v38  ;;  %6408 = vmatpush3.bf16.msra.mxu1 %v7055_v20  ;;  %v5539_v38 = vcombine.low %v8244_v0, %v8261_v6  ;;  %v7062_v20 = vld [vmem:[%s8993_s1 + $0x4f8] sm:$0xff]  }
 0x137   :  { %v5822_v56 = vpop.f32.mrb[29].mxu0  ;;  %6409 = vmatprep.subr.bf16.mxu1 %v7060_v11  ;;  %v5885_v31 = vpop.f32.mrb[28].mxu1  ;;  %v7090_v0 = vld [vmem:[%s8993_s1 + $0x5f8] sm:$0xff]  }
 0x138   :  { %v5823_v53 = vadd.f32 %v5822_v56, %v5821_v60  ;;  %v5824_v18 = vpop.f32.mrb[30].mxu0  ;;  %6586 = vmatpush3.bf16.msra.mxu0 %v7050_v3  ;;  %v5886_v13 = vpop.f32.mrb[29].mxu1 }
 0x139   :  { %v5825_v21 = vpop.f32.mrb[31].mxu0  ;;  %6587 = vmatprep.subr.bf16.mxu0 %v7053_v14  ;;  %v5887_v51 = vadd.f32 %v5886_v13, %v5885_v31  ;;  %v5888_v32 = vpop.f32.mrb[30].mxu1  ;;  %v7065_v31 = vld [vmem:[%s8993_s1 + $0x540] sm:$0xff]  }
 0x13a   :  { %v5826_v57 = vadd.f32 %v5825_v21, %v5824_v18  ;;  %6410 = vmatpush3.bf16.msra.mxu1 %v7061_v19  ;;  %v5889_v47 = vpop.f32.mrb[31].mxu1  ;;  %v7084_v19 = vld [vmem:[%s8993_s1 + $0x5b0] sm:$0xff]   ;;  %v7092_v18 = vld [vmem:[%s8993_s1 + $0x5b8] sm:$0xff]  }
 0x13b   :  { %6572 = vmatmul.mubr.bf16.gmra.mrb[40].mxu0 %v7052_v39  ;;  %6411 = vmatprep.subr.bf16.mxu1 %v7066_v37  ;;  %v8429_v29 = vadd.f32 %v5887_v51, %v5823_v53  ;;  %v5890_v3 = vadd.f32 %v5889_v47, %v5888_v32  ;;  %v7071_v21 = vld [vmem:[#allocation2 + $0x9c] ss:$20 sps:$4 sm:$0xff]   ;;  %v7069_v51 = vld [vmem:[%s8993_s1 + $0x548] sm:$0xff]  }
 0x13c   :  { %6588 = vmatpush3.bf16.msra.mxu0 %v7053_v14  ;;  %6575 = vmatprep.mubr.bf16.mxu0 %v7057_v15  ;;  %v7146_v14 = vld [vmem:[#allocation2 + $0x148] sm:$0xff]  ;;  %v8471_v15 = vld [vmem:[%s8993_s1 + $0x600] sm:$0xff]  }
 0x13d   :  { %3904 = vmatmul.mubr.bf16.gmra.mrb[136].mxu1 %v5534_v52  ;;  %6589 = vmatprep.subr.bf16.mxu0 %v7056_v25  ;;  %v8437_v58 = vadd.f32 %v5890_v3, %v5826_v57  ;;  %v7063_v52 = vld [vmem:[#allocation2 + $0x4c] ss:$20 sps:$4 sm:$0xff]   ;;  %v5545_v60 = vcombine.high %v7145_v35, %v7146_v14 }
 0x13e   :  { %3911 = vmatprep.mubr.bf16.mxu1 %v5540_v17  ;;  %6412 = vmatpush3.bf16.msra.mxu1 %v7068_v10  ;;  %v7147_v17 = vld [vmem:[#allocation2 + $0x15c] sm:$0xff]  ;;  %v7148_v10 = vld [vmem:[#allocation2 + $0x170] sm:$0xff] }
 0x13f   :  { %6413 = vmatprep.subr.bf16.mxu1 %v7074_v1  ;;  %v5550_v47 = vcombine.high %v7147_v17, %v7148_v10 }
 0x140   :  { %v5923_v22 = vpop.f32.mrb[32].mxu1  ;;  %6590 = vmatpush3.bf16.msra.mxu0 %v7056_v25 }
 0x141   :  { %v5924_v4 = vpop.f32.mrb[33].mxu1  ;;  %6591 = vmatprep.subr.bf16.mxu0 %v7059_v23 }
 0x142   :  { %v5925_v41 = vadd.f32 %v5924_v4, %v5923_v22  ;;  %v5926_v11 = vpop.f32.mrb[34].mxu1  ;;  %6414 = vmatpush3.bf16.msra.mxu1 %v7076_v30  ;;  %v7070_v30 = vld [vmem:[%s8993_s1 + $0x508] sm:$0xff]   ;;  %v7079_v4 = vld [vmem:[#allocation2 + $0x13c] ss:$20 sps:$4 sm:$0xff]  }
 0x143   :  { %v5927_v56 = vpop.f32.mrb[35].mxu1  ;;  %6576 = vmatmul.mubr.bf16.gmra.mrb[44].mxu0 %v7058_v36  ;;  %6415 = vmatprep.subr.bf16.mxu1 %v7082_v61  ;;  %v7073_v36 = vld [vmem:[%s8993_s1 + $0x550] sm:$0xff]  }
 0x144   :  { %v8457_v39 = vadd.f32 %v5925_v41, %v8299_v48  ;;  %v5928_v37 = vadd.f32 %v5927_v56, %v5926_v11  ;;  %6592 = vmatpush3.bf16.msra.mxu0 %v7059_v23  ;;  %6595 = vmatprep.mubr.bf16.mxu0 %v7063_v52  ;;  %v7064_v48 = vld [vmem:[#allocation2 + $0x74] ss:$20 sps:$4 sm:$0xff]  }
 0x145   :  { %3912 = vmatmul.mubr.bf16.gmra.mrb[140].mxu1 %v5539_v38  ;;  %6593 = vmatprep.subr.bf16.mxu0 %v7062_v20  ;;  %v7075_v52 = vld [vmem:[%s8993_s1 + $0x510] sm:$0xff]  }
 0x146   :  { %v8463_v53 = vadd.f32 %v5928_v37, %v8306_v55  ;;  %3919 = vmatprep.mubr.bf16.mxu1 %v5545_v60  ;;  %6416 = vmatpush3.bf16.msra.mxu1 %v7084_v19  ;;  %v7067_v55 = vld [vmem:[%s8993_s1 + $0x500] sm:$0xff]   ;;  %v7078_v60 = vld [vmem:[%s8993_s1 + $0x518] sm:$0xff]  }
 0x147   :  { %6417 = vmatprep.subr.bf16.mxu1 %v7090_v0  ;;  %v7081_v19 = vld [vmem:[%s8993_s1 + $0x560] sm:$0xff]  }
 0x148   :  { %v5929_v13 = vpop.f32.mrb[36].mxu1  ;;  %6594 = vmatpush3.bf16.msra.mxu0 %v7062_v20  ;;  %v7149_v20 = vld [vmem:[#allocation2 + $0x184] sm:$0xff] }
 0x149   :  { %v5930_v25 = vpop.f32.mrb[37].mxu1  ;;  %6339 = vmatprep.subr.bf16.mxu0 %v7065_v31  ;;  %v7083_v37 = vld [vmem:[%s8993_s1 + $0x520] sm:$0xff]  }
 0x14a   :  { %v5931_v32 = vadd.f32 %v5930_v25, %v5929_v13  ;;  %v5932_v57 = vpop.f32.mrb[38].mxu1  ;;  %6418 = vmatpush3.bf16.msra.mxu1 %v7092_v18  ;;  %v7087_v31 = vld [vmem:[#allocation2 + $0x18c] ss:$20 sps:$4 sm:$0xff]   ;;  %v7089_v25 = vld [vmem:[%s8993_s1 + $0x570] sm:$0xff]  }
 0x14b   :  { %v5933_v1 = vpop.f32.mrb[39].mxu1  ;;  %6596 = vmatmul.mubr.bf16.vlgmr.msra.gmra.mrb[32].mxu0 %v7064_v48  ;;  %6643 = vmatprep.subr.bf16.mxu1 %v8471_v15 }
 0x14c   :  { %v8481_v3 = vadd.f32 %v5931_v32, %v8323_v9  ;;  %v5934_v23 = vadd.f32 %v5933_v1, %v5932_v57  ;;  %6340 = vmatpush3.bf16.msra.mxu0 %v7067_v55  ;;  %6599 = vmatprep.mubr.bf16.mxu0 %v7071_v21  ;;  %v7072_v9 = vld [vmem:[#allocation2 + $0xc4] ss:$20 sps:$4 sm:$0xff]   ;;  %v7086_v21 = vld [vmem:[%s8993_s1 + $0x528] sm:$0xff]  }
 0x14d   :  { %3920 = vmatmul.mubr.bf16.gmra.mrb[144].mxu1 %v5544_v42  ;;  %6341 = vmatprep.subr.bf16.mxu0 %v7069_v51  ;;  %v7088_v57 = vld [vmem:[#allocation2 + $0x1b4] ss:$20 sps:$4 sm:$0xff]  }
 0x14e   :  { %v8493_v61 = vadd.f32 %v5934_v23, %v8325_v2  ;;  %3927 = vmatprep.mubr.bf16.mxu1 %v5550_v47  ;;  %v7150_v2 = vld [vmem:[#allocation2 + $0x198] sm:$0xff]  ;;  %v5559_v23 = vcombine.low %v8337_v45, %v8261_v6 }
 0x14f   :  { %v5555_v41 = vcombine.high %v7149_v20, %v7150_v2  ;;  %v4076_v20 = vld [vmem:[#allocation2 + $0x94] sm:$0xff] }
 0x150   :  { %v5935_v22 = vpop.f32.mrb[40].mxu1  ;;  %6342 = vmatpush3.bf16.msra.mxu0 %v7070_v30 }
 0x151   :  { %v5936_v38 = vpop.f32.mrb[41].mxu1  ;;  %6343 = vmatprep.subr.bf16.mxu0 %v7073_v36 }
 0x152   :  { %v5937_v46 = vadd.f32 %v5936_v38, %v5935_v22  ;;  %v5938_v42 = vpop.f32.mrb[42].mxu1 }
 0x153   :  { %v5939_v11 = vpop.f32.mrb[43].mxu1  ;;  %6600 = vmatmul.mubr.bf16.gmra.mrb[36].mxu0 %v7072_v9 }
 0x154   :  { %v8502_v35 = vadd.f32 %v5937_v46, %v8335_v62  ;;  %v5940_v14 = vadd.f32 %v5939_v11, %v5938_v42  ;;  %6344 = vmatpush3.bf16.msra.mxu0 %v7075_v52  ;;  %6603 = vmatprep.mubr.bf16.mxu0 %v7079_v4  ;;  %v7080_v62 = vld [vmem:[#allocation2 + $0x164] ss:$20 sps:$4 sm:$0xff]   ;;  %v5685_v52 = vcombine.high %v8355_v54, %v8364_v33  ;;  %v7099_v11 = vld [vmem:[#allocation2 + $0x7c] ss:$20 sps:$4 sm:$0xff]  }
 0x155   :  { %3928 = vmatmul.mubr.bf16.gmra.mrb[148].mxu1 %v5549_v44  ;;  %6345 = vmatprep.subr.bf16.mxu0 %v7077_v50 }
 0x156   :  { %v8514_v56 = vadd.f32 %v5940_v14, %v8339_v16  ;;  %3935 = vmatprep.mubr.bf16.mxu1 %v5555_v41  ;;  %v5560_v16 = vcombine.high %v8337_v45, %v8261_v6 }
 0x158   :  { %v5941_v0 = vpop.f32.mrb[44].mxu1  ;;  %6346 = vmatpush3.bf16.msra.mxu0 %v7078_v60 }
 0x159   :  { %v5942_v18 = vpop.f32.mrb[45].mxu1  ;;  %6347 = vmatprep.subr.bf16.mxu0 %v7081_v19  ;;  %v5684_v19 = vcombine.low %v8355_v54, %v8364_v33 }
 0x15a   :  { %v5943_v49 = vadd.f32 %v5942_v18, %v5941_v0  ;;  %v5944_v44 = vpop.f32.mrb[46].mxu1  ;;  %v5690_v18 = vcombine.high %v8366_v28, %v4076_v20 }
 0x15b   :  { %v5945_v48 = vpop.f32.mrb[47].mxu1  ;;  %6604 = vmatmul.mubr.bf16.gmra.mrb[40].mxu0 %v7080_v62 }
 0x15c   :  { %v8525_v13 = vadd.f32 %v5943_v49, %v8349_v27  ;;  %v5946_v55 = vadd.f32 %v5945_v48, %v5944_v44  ;;  %6348 = vmatpush3.bf16.msra.mxu0 %v7083_v37  ;;  %6607 = vmatprep.mubr.bf16.mxu0 %v7087_v31  ;;  %v7101_v48 = vld [vmem:[#allocation2 + $0x78] ss:$20 sps:$4 sm:$0xff]  }
 0x15d   :  { %3936 = vmatmul.mubr.bf16.gmra.mrb[152].mxu1 %v5554_v24  ;;  %6349 = vmatprep.subr.bf16.mxu0 %v7085_v43 }
 0x15e   :  { %v8537_v51 = vadd.f32 %v5946_v55, %v8351_v12  ;;  %v5987_v27 = vpop.f32.mrb[48].mxu0  ;;  %3943 = vmatprep.mubr.bf16.mxu1 %v5560_v16  ;;  %v7093_v12 = vld [vmem:[%s8993_s1 + $0x578] sm:$0xff]  }
 0x15f   :  { %v5988_v32 = vpop.f32.mrb[49].mxu0 }
 0x160   :  { %v5947_v17 = vpop.f32.mrb[48].mxu1  ;;  %v5989_v10 = vadd.f32 %v5988_v32, %v5987_v27  ;;  %v5990_v47 = vpop.f32.mrb[50].mxu0  ;;  %6350 = vmatpush3.bf16.msra.mxu0 %v7086_v21 }
 0x161   :  { %v5948_v24 = vpop.f32.mrb[49].mxu1  ;;  %v5991_v1 = vpop.f32.mrb[51].mxu0  ;;  %6351 = vmatprep.subr.bf16.mxu0 %v7089_v25  ;;  %v7103_v25 = vld [vmem:[#allocation2 + $0xa4] ss:$20 sps:$4 sm:$0xff]  }
 0x162   :  { %v5949_v30 = vadd.f32 %v5948_v24, %v5947_v17  ;;  %v8548_v36 = vadd.f32 %v8457_v39, %v5989_v10  ;;  %v5950_v9 = vpop.f32.mrb[50].mxu1  ;;  %v5992_v22 = vadd.f32 %v5991_v1, %v5990_v47  ;;  %v7094_v39 = vld [vmem:[%s8993_s1 + $0x538] sm:$0xff]  }
 0x163   :  { %v5951_v4 = vpop.f32.mrb[51].mxu1  ;;  %6608 = vmatmul.mubr.bf16.gmra.mrb[44].mxu0 %v7088_v57  ;;  %v5689_v57 = vcombine.low %v8366_v28, %v4076_v20 }
 0x164   :  { %v8553_v38 = vadd.f32 %v5949_v30, %v8360_v40  ;;  %v5952_v6 = vadd.f32 %v5951_v4, %v5950_v9  ;;  %v8556_v45 = vadd.f32 %v8463_v53, %v5992_v22  ;;  %6352 = vmatpush3.bf16.msra.mxu0 %v7091_v26  ;;  %4675 = vmatprep.mubr.bf16.mxu0 %v7097_v63  ;;  %v7095_v40 = vld [vmem:[#allocation2 + $0x50] ss:$20 sps:$4 sm:$0xff]   ;;  %v7105_v26 = vld [vmem:[#allocation2 + $0xac] ss:$20 sps:$4 sm:$0xff]  }
 0x165   :  { %3944 = vmatmul.mubr.bf16.gmra.mrb[156].mxu1 %v5559_v23  ;;  %6353 = vmatprep.subr.bf16.mxu0 %v7093_v12  ;;  %v7107_v30 = vld [vmem:[#allocation2 + $0xa0] ss:$20 sps:$4 sm:$0xff]  }
 0x166   :  { %v8562_v50 = vadd.f32 %v5952_v6, %v8362_v34  ;;  %v5993_v46 = vpop.f32.mrb[52].mxu0  ;;  %4772 = vmatprep.mubr.bf16.mxu1 %v5685_v52  ;;  %v7102_v34 = vld [vmem:[%s8993_s1 + $0x608] sm:$0xff]   ;;  %v7151_v52 = vld [vmem:[#allocation2 + $0x14] sm:$0xff] }
 0x167   :  { %v5994_v42 = vpop.f32.mrb[53].mxu0  ;;  %v8607_v4 = vcombine.high %v7151_v52, %v7151_v52 }
 0x168   :  { %v5953_v2 = vpop.f32.mrb[52].mxu1  ;;  %v5995_v41 = vadd.f32 %v5994_v42, %v5993_v46  ;;  %v5996_v53 = vpop.f32.mrb[54].mxu0  ;;  %6354 = vmatpush3.bf16.msra.mxu0 %v7094_v39  ;;  %v7108_v46 = vld [vmem:[#allocation2 + $0xa8] ss:$20 sps:$4 sm:$0xff]  }
 0x169   :  { %v5954_v14 = vpop.f32.mrb[53].mxu1  ;;  %v5997_v60 = vpop.f32.mrb[55].mxu0  ;;  %6611 = vmatprep.subr.bf16.mxu0 %v8471_v15 }
 0x16a   :  { %v5955_v62 = vadd.f32 %v5954_v14, %v5953_v2  ;;  %v8571_v0 = vadd.f32 %v8481_v3, %v5995_v41  ;;  %v5956_v37 = vpop.f32.mrb[54].mxu1  ;;  %v5998_v31 = vadd.f32 %v5997_v60, %v5996_v53  ;;  %v7109_v3 = vld [vmem:[%s8993_s1 + $0x610] sm:$0xff]  }
 0x16b   :  { %v5957_v43 = vpop.f32.mrb[55].mxu1  ;;  %4676 = vmatmul.mubr.bf16.vlgmr.msra.gmra.mrb[112].mxu0 %v7095_v40 }
 0x16c   :  { %v8575_v49 = vadd.f32 %v5955_v62, %v8380_v8  ;;  %v5958_v54 = vadd.f32 %v5957_v43, %v5956_v37  ;;  %v8578_v33 = vadd.f32 %v8493_v61, %v5998_v31  ;;  %6612 = vmatpush3.bf16.msra.mxu0 %v8471_v15  ;;  %4683 = vmatprep.mubr.bf16.mxu0 %v7099_v11  ;;  %v7111_v31 = vld [vmem:[#allocation2 + $0x144] ss:$20 sps:$4 sm:$0xff]  }
 0x16d   :  { %4773 = vmatmul.mubr.bf16.vlgmr.msra.gmra.mrb[160].mxu1 %v5684_v19  ;;  %6613 = vmatprep.subr.bf16.mxu0 %v7102_v34 }
 0x16e   :  { %v8585_v44 = vadd.f32 %v5958_v54, %v8386_v7  ;;  %6651 = vmatpush3.bf16.msra.mxu1 %v8471_v15  ;;  %v5999_v8 = vpop.f32.mrb[56].mxu0  ;;  %4780 = vmatprep.mubr.bf16.mxu1 %v5690_v18  ;;  %v7110_v7 = vld [vmem:[%s8993_s1 + $0x618] sm:$0xff]  }
 0x16f   :  { %v6000_v16 = vpop.f32.mrb[57].mxu0  ;;  %6644 = vmatprep.subr.bf16.mxu1 %v7102_v34 }
 0x170   :  { %v5959_v61 = vpop.f32.mrb[56].mxu1  ;;  %v6001_v55 = vadd.f32 %v6000_v16, %v5999_v8  ;;  %v6002_v21 = vpop.f32.mrb[58].mxu0  ;;  %6614 = vmatpush3.bf16.msra.mxu0 %v7102_v34 }
 0x171   :  { %v5960_v27 = vpop.f32.mrb[57].mxu1  ;;  %v6003_v32 = vpop.f32.mrb[59].mxu0  ;;  %6615 = vmatprep.subr.bf16.mxu0 %v7109_v3 }
 0x172   :  { %v5961_v15 = vadd.f32 %v5960_v27, %v5959_v61  ;;  %v8593_v17 = vadd.f32 %v8502_v35, %v6001_v55  ;;  %v5962_v10 = vpop.f32.mrb[58].mxu1  ;;  %v6004_v47 = vadd.f32 %v6003_v32, %v6002_v21  ;;  %6652 = vmatpush3.bf16.msra.mxu1 %v7102_v34  ;;  %v7117_v35 = vld [vmem:[%s8993_s1 + $0x620] sm:$0xff]   ;;  %v8629_v34 = vcombine.low %v7151_v52, %v7151_v52 }
 0x173   :  { %v5963_v63 = vpop.f32.mrb[59].mxu1  ;;  %4684 = vmatmul.mubr.bf16.gmra.mrb[116].mxu0 %v7101_v48  ;;  %6645 = vmatprep.subr.bf16.mxu1 %v7109_v3  ;;  %v7113_v48 = vld [vmem:[#allocation2 + $0x14c] ss:$20 sps:$4 sm:$0xff]  }
 0x174   :  { %v8596_v24 = vadd.f32 %v5961_v15, %v8405_v5  ;;  %v5964_v28 = vadd.f32 %v5963_v63, %v5962_v10  ;;  %v8599_v1 = vadd.f32 %v8514_v56, %v6004_v47  ;;  %4691 = vmatprep.mubr.bf16.mxu0 %v7103_v25  ;;  %6616 = vmatpush3.bf16.msra.mxu0 %v7109_v3  ;;  %v7115_v27 = vld [vmem:[#allocation2 + $0x140] ss:$20 sps:$4 sm:$0xff]   ;;  %v7116_v47 = vld [vmem:[#allocation2 + $0x148] ss:$20 sps:$4 sm:$0xff]  }
 0x175   :  { %4781 = vmatmul.mubr.bf16.gmra.mrb[164].mxu1 %v5689_v57  ;;  %6617 = vmatprep.subr.bf16.mxu0 %v7110_v7  ;;  %v7118_v15 = vld [vmem:[#allocation2 + $0x16c] ss:$20 sps:$4 sm:$0xff]  }
 0x176   :  { %v8605_v23 = vadd.f32 %v5964_v28, %v8410_v59  ;;  %v6005_v12 = vpop.f32.mrb[60].mxu0  ;;  %4788 = vmatprep.mubr.bf16.mxu1 %v7105_v26  ;;  %6653 = vmatpush3.bf16.msra.mxu1 %v7109_v3  ;;  %v7124_v59 = vld [vmem:[%s8993_s1 + $0x628] sm:$0xff]  }
 0x177   :  { %v6006_v5 = vpop.f32.mrb[61].mxu0  ;;  %6646 = vmatprep.subr.bf16.mxu1 %v7110_v7 }
 0x178   :  { %v5965_v9 = vpop.f32.mrb[60].mxu1  ;;  %v6007_v56 = vadd.f32 %v6006_v5, %v6005_v12  ;;  %v6008_v22 = vpop.f32.mrb[62].mxu0  ;;  %6618 = vmatpush3.bf16.msra.mxu0 %v7110_v7  ;;  %v7120_v12 = vld [vmem:[#allocation2 + $0x174] ss:$20 sps:$4 sm:$0xff]  }
 0x179   :  { %v5966_v6 = vpop.f32.mrb[61].mxu1  ;;  %v6009_v39 = vpop.f32.mrb[63].mxu0  ;;  %6619 = vmatprep.subr.bf16.mxu0 %v7117_v35 }
 0x17a   :  { %v5967_v42 = vadd.f32 %v5966_v6, %v5965_v9  ;;  %v8613_v40 = vadd.f32 %v8525_v13, %v6007_v56  ;;  %v5968_v20 = vpop.f32.mrb[62].mxu1  ;;  %v6010_v2 = vadd.f32 %v6009_v39, %v6008_v22  ;;  %6654 = vmatpush3.bf16.msra.mxu1 %v7110_v7  ;;  %v7131_v13 = vld [vmem:[%s8993_s1 + $0x630] sm:$0xff]  }
 0x17b   :  { %v5969_v41 = vpop.f32.mrb[63].mxu1  ;;  %4692 = vmatmul.mubr.bf16.gmra.mrb[120].mxu0 %v7107_v30  ;;  %6647 = vmatprep.subr.bf16.mxu1 %v7117_v35 }
 0x17c   :  { %v8616_v53 = vadd.f32 %v5967_v42, %v8429_v29  ;;  %v5970_v11 = vadd.f32 %v5969_v41, %v5968_v20  ;;  %v8619_v14 = vadd.f32 %v8537_v51, %v6010_v2  ;;  %4699 = vmatprep.mubr.bf16.mxu0 %v8607_v4  ;;  %6620 = vmatpush3.bf16.msra.mxu0 %v7117_v35  ;;  %v7123_v20 = vld [vmem:[#allocation2 + $0x170] ss:$20 sps:$4 sm:$0xff]  }
 0x17d   :  { %4789 = vmatmul.mubr.bf16.gmra.mrb[168].mxu1 %v7108_v46  ;;  %6621 = vmatprep.subr.bf16.mxu0 %v7124_v59  ;;  %v7125_v46 = vld [vmem:[#allocation2 + $0x194] ss:$20 sps:$4 sm:$0xff]  }
 0x17e   :  { %v8626_v60 = vadd.f32 %v5970_v11, %v8437_v58  ;;  %v6011_v19 = vpop.f32.mrb[64].mxu0  ;;  %4796 = vmatprep.mubr.bf16.mxu1 %v8607_v4  ;;  %6655 = vmatpush3.bf16.msra.mxu1 %v7117_v35  ;;  %v7132_v58 = vld [vmem:[%s8993_s1 + $0x638] sm:$0xff]  }
 0x17f   :  { %v6012_v29 = vpop.f32.mrb[65].mxu0  ;;  %6648 = vmatprep.subr.bf16.mxu1 %v7124_v59 }
 0x180   :  { %v6067_v51 = vpop.f32.mrb[64].mxu1  ;;  %v6013_v62 = vadd.f32 %v6012_v29, %v6011_v19  ;;  %v6014_v37 = vpop.f32.mrb[66].mxu0  ;;  %6622 = vmatpush3.bf16.msra.mxu0 %v7124_v59 }
 0x181   :  { %v6068_v18 = vpop.f32.mrb[65].mxu1  ;;  %v6015_v43 = vpop.f32.mrb[67].mxu0  ;;  %6623 = vmatprep.subr.bf16.mxu0 %v7131_v13 }
 0x182   :  { %v8635_v54 = vadd.f32 %v8553_v38, %v6013_v62  ;;  %v8637_v3 = vadd.f32 %v6068_v18, %v6067_v51  ;;  %v6070_v8 = vpop.f32.mrb[66].mxu1  ;;  %v6016_v16 = vadd.f32 %v6015_v43, %v6014_v37  ;;  %6656 = vmatpush3.bf16.msra.mxu1 %v7124_v59 }
 0x183   :  { %v6071_v61 = vpop.f32.mrb[67].mxu1  ;;  %4700 = vmatmul.mubr.bf16.gmra.mrb[124].mxu0 %v8629_v34  ;;  %6649 = vmatprep.subr.bf16.mxu1 %v7131_v13 }
 0x184   :  { %v8641_v55 = vadd.f32 %v8562_v50, %v6016_v16  ;;  %v8643_v21 = vadd.f32 %v6071_v61, %v6070_v8  ;;  %4707 = vmatprep.mubr.bf16.mxu0 %v7111_v31  ;;  %6624 = vmatpush3.bf16.msra.mxu0 %v7131_v13  ;;  %v7129_v31 = vld [vmem:[#allocation2 + $0x190] ss:$20 sps:$4 sm:$0xff]   ;;  %v7130_v16 = vld [vmem:[#allocation2 + $0x198] ss:$20 sps:$4 sm:$0xff]  }
 0x185   :  { %4797 = vmatmul.mubr.bf16.gmra.mrb[172].mxu1 %v8629_v34  ;;  %6625 = vmatprep.subr.bf16.mxu0 %v7132_v58 }
 0x186   :  { %v6017_v38 = vpop.f32.mrb[68].mxu0  ;;  %4804 = vmatprep.mubr.bf16.mxu1 %v7113_v48  ;;  %6657 = vmatpush3.bf16.msra.mxu1 %v7131_v13  ;;  %v7127_v13 = vld [vmem:[#allocation2 + $0x19c] ss:$20 sps:$4 sm:$0xff]  }
 0x187   :  { %v6018_v25 = vpop.f32.mrb[69].mxu0  ;;  %6650 = vmatprep.subr.bf16.mxu1 %v7132_v58 }
 0x188   :  { %v6073_v32 = vpop.f32.mrb[68].mxu1  ;;  %v6019_v57 = vadd.f32 %v6018_v25, %v6017_v38  ;;  %v6020_v7 = vpop.f32.mrb[70].mxu0  ;;  %6626 = vmatpush3.bf16.msra.mxu0 %v7132_v58 }
 0x189   :  { %v6074_v50 = vpop.f32.mrb[69].mxu1  ;;  %v6021_v10 = vpop.f32.mrb[71].mxu0 }
 0x18a   :  { %v8647_v26 = vadd.f32 %v8575_v49, %v6019_v57  ;;  %v8649_v63 = vadd.f32 %v6074_v50, %v6073_v32  ;;  %v6076_v28 = vpop.f32.mrb[70].mxu1  ;;  %v6022_v35 = vadd.f32 %v6021_v10, %v6020_v7  ;;  %6658 = vmatpush3.bf16.msra.mxu1 %v7132_v58  ;;  %v7122_v49 = vld [vmem:[#allocation2 + $0x168] ss:$20 sps:$4 sm:$0xff]   ;;  %v7133_v7 = vld [vmem:[#allocation2 + $0x60] ss:$20 sps:$4 sm:$0xff]  }
 0x18b   :  { %v6077_v5 = vpop.f32.mrb[71].mxu1  ;;  %4708 = vmatmul.mubr.bf16.gmra.mrb[128].mxu0 %v7115_v27  ;;  %v7134_v10 = vld [vmem:[#allocation2 + $0x150] ss:$20 sps:$4 sm:$0xff]  }
 0x18c   :  { %v8652_v30 = vadd.f32 %v8585_v44, %v6022_v35  ;;  %v8654_v9 = vadd.f32 %v6077_v5, %v6076_v28  ;;  %4715 = vmatprep.mubr.bf16.mxu0 %v7118_v15  ;;  %v7136_v5 = vld [vmem:[#allocation2 + $0x178] ss:$20 sps:$4 sm:$0xff]  }
 0x18d   :  { %4805 = vmatmul.mubr.bf16.gmra.mrb[176].mxu1 %v7116_v47 }
 0x18e   :  { %v6023_v56 = vpop.f32.mrb[72].mxu0  ;;  %4812 = vmatprep.mubr.bf16.mxu1 %v7120_v12  ;;  %v7137_v12 = vld [vmem:[#allocation2 + $0xb0] ss:$20 sps:$4 sm:$0xff]  }
 0x18f   :  { %v6024_v22 = vpop.f32.mrb[73].mxu0 }
 0x190   :  { %v6079_v52 = vpop.f32.mrb[72].mxu1  ;;  %v6025_v6 = vadd.f32 %v6024_v22, %v6023_v56  ;;  %v6026_v39 = vpop.f32.mrb[74].mxu0 }
 0x191   :  { %v6080_v59 = vpop.f32.mrb[73].mxu1  ;;  %v6027_v42 = vpop.f32.mrb[75].mxu0 }
 0x192   :  { %v8657_v2 = vadd.f32 %v8596_v24, %v6025_v6  ;;  %v8659_v44 = vadd.f32 %v6080_v59, %v6079_v52  ;;  %v6082_v41 = vpop.f32.mrb[74].mxu1  ;;  %v6028_v11 = vadd.f32 %v6027_v42, %v6026_v39  ;;  %v7139_v39 = vld [vmem:[#allocation2 + $0xd8] ss:$20 sps:$4 sm:$0xff]   ;;  %v7140_v59 = vld [vmem:[#allocation2 + $0x1c8] ss:$20 sps:$4 sm:$0xff]  }
 0x193   :  { %v6083_v19 = vpop.f32.mrb[75].mxu1  ;;  %4716 = vmatmul.mubr.bf16.gmra.mrb[132].mxu0 %v7122_v49  ;;  %v7138_v49 = vld [vmem:[#allocation2 + $0x1a0] ss:$20 sps:$4 sm:$0xff]  }
 0x194   :  { %v8662_v29 = vadd.f32 %v8605_v23, %v6028_v11  ;;  %v8664_v51 = vadd.f32 %v6083_v19, %v6082_v41  ;;  %4723 = vmatprep.mubr.bf16.mxu0 %v7125_v46 }
 0x195   :  { %4813 = vmatmul.mubr.bf16.gmra.mrb[180].mxu1 %v7123_v20 }
 0x196   :  { %v6029_v62 = vpop.f32.mrb[76].mxu0  ;;  %4820 = vmatprep.mubr.bf16.mxu1 %v7127_v13 }
 0x197   :  { %v6030_v37 = vpop.f32.mrb[77].mxu0 }
 0x198   :  { %v6085_v24 = vpop.f32.mrb[76].mxu1  ;;  %v6031_v18 = vadd.f32 %v6030_v37, %v6029_v62  ;;  %v6032_v43 = vpop.f32.mrb[78].mxu0 }
 0x199   :  { %v6086_v58 = vpop.f32.mrb[77].mxu1  ;;  %v6033_v8 = vpop.f32.mrb[79].mxu0 }
 0x19a   :  { %v8667_v48 = vadd.f32 %v8616_v53, %v6031_v18  ;;  %v8669_v61 = vadd.f32 %v6086_v58, %v6085_v24  ;;  %v6088_v23 = vpop.f32.mrb[78].mxu1  ;;  %v6034_v38 = vadd.f32 %v6033_v8, %v6032_v43 }
 0x19b   :  { %v6089_v25 = vpop.f32.mrb[79].mxu1  ;;  %4724 = vmatmul.mubr.bf16.gmra.mrb[136].mxu0 %v7129_v31 }
 0x19c   :  { %v8672_v27 = vadd.f32 %v8626_v60, %v6034_v38  ;;  %v8674_v32 = vadd.f32 %v6089_v25, %v6088_v23  ;;  %4731 = vmatprep.mubr.bf16.mxu0 %v8607_v4  ;;  %v7135_v60 = vld [vmem:[#allocation2 + $0x88] ss:$20 sps:$4 sm:$0xff]  }
 0x19d   :  { %4821 = vmatmul.mubr.bf16.gmra.mrb[184].mxu1 %v7130_v16 }
 0x19e   :  { %4828 = vmatprep.mubr.bf16.mxu1 %v8607_v4 }
 0x1a0   :  { %v6091_v57 = vpop.f32.mrb[80].mxu1 }
 0x1a1   :  { %v6092_v53 = vpop.f32.mrb[81].mxu1 }
 0x1a2   :  { %v8678_v15 = vadd.f32 %v6092_v53, %v6091_v57  ;;  %v6094_v50 = vpop.f32.mrb[82].mxu1 }
 0x1a3   :  { %v6095_v47 = vpop.f32.mrb[83].mxu1  ;;  %4732 = vmatmul.mubr.bf16.gmra.mrb[140].mxu0 %v8629_v34 }
 0x1a4   :  { %v8681_v28 = vadd.f32 %v6095_v47, %v6094_v50  ;;  %6627 = vmatprep.mubr.bf16.mxu0 %v7133_v7 }
 0x1a5   :  { %4829 = vmatmul.mubr.bf16.gmra.mrb[188].mxu1 %v8629_v34 }
 0x1a6   :  { %6635 = vmatprep.mubr.bf16.mxu1 %v7134_v10 }
 0x1a8   :  { %v6097_v35 = vpop.f32.mrb[84].mxu1 }
 0x1a9   :  { %v6098_v4 = vpop.f32.mrb[85].mxu1 }
 0x1aa   :  { %v8684_v56 = vadd.f32 %v6098_v4, %v6097_v35  ;;  %v6100_v22 = vpop.f32.mrb[86].mxu1 }
 0x1ab   :  { %v6101_v52 = vpop.f32.mrb[87].mxu1  ;;  %6628 = vmatmul.mubr.bf16.vlgmr.msra.gmra.mrb[32].mxu0 %v7135_v60 }
 0x1ac   :  { %v8686_v6 = vadd.f32 %v6101_v52, %v6100_v22  ;;  %6631 = vmatprep.mubr.bf16.mxu0 %v7137_v12 }
 0x1ad   :  { %6636 = vmatmul.mubr.bf16.vlgmr.msra.gmra.mrb[192].mxu1 %v7136_v5 }
 0x1ae   :  { %6639 = vmatprep.mubr.bf16.mxu1 %v7138_v49 }
 0x1b0   :  { %v6103_v46 = vpop.f32.mrb[88].mxu1 }
 0x1b1   :  { %v6104_v34 = vpop.f32.mrb[89].mxu1 }
 0x1b2   :  { %v8688_v42 = vadd.f32 %v6104_v34, %v6103_v46  ;;  %v6106_v20 = vpop.f32.mrb[90].mxu1 }
 0x1b3   :  { %v6107_v41 = vpop.f32.mrb[91].mxu1  ;;  %6632 = vmatmul.mubr.bf16.gmra.mrb[36].mxu0 %v7139_v39 }
 0x1b4   :  { %v8690_v11 = vadd.f32 %v6107_v41, %v6106_v20 }
 0x1b5   :  { %6640 = vmatmul.mubr.bf16.gmra.mrb[196].mxu1 %v7140_v59 }
 0x1b8   :  { %v6109_v13 = vpop.f32.mrb[92].mxu1 }
 0x1b9   :  { %v6110_v19 = vpop.f32.mrb[93].mxu1 }
 0x1ba   :  { %v8692_v62 = vadd.f32 %v6110_v19, %v6109_v13  ;;  %v6112_v37 = vpop.f32.mrb[94].mxu1 }
 0x1bb   :  { %v6113_v31 = vpop.f32.mrb[95].mxu1 }
 0x1bc   :  { %v8694_v24 = vadd.f32 %v6113_v31, %v6112_v37 }
 0x1be   :  { %v6131_v18 = vpop.f32.mrb[80].mxu0 }
 0x1bf   :  { %v6132_v43 = vpop.f32.mrb[81].mxu0 }
 0x1c0   :  { %v6211_v58 = vpop.f32.mrb[96].mxu1  ;;  %v6133_v8 = vadd.f32 %v6132_v43, %v6131_v18  ;;  %v6134_v16 = vpop.f32.mrb[82].mxu0 }
 0x1c1   :  { %v6212_v23 = vpop.f32.mrb[97].mxu1  ;;  %v6135_v38 = vpop.f32.mrb[83].mxu0 }
 0x1c2   :  { %v3005_v25 = vadd.f32 %v6133_v8, %v8637_v3  ;;  %v8697_v57 = vadd.f32 %v6212_v23, %v6211_v58  ;;  %v6214_v7 = vpop.f32.mrb[98].mxu1  ;;  %v6136_v53 = vadd.f32 %v6135_v38, %v6134_v16 }
 0x1c3   :  { %v6215_v50 = vpop.f32.mrb[99].mxu1 }
 0x1c4   :  { %v8700_v10 = vadd.f32 %v8548_v36, %v3005_v25  ;;  %v3008_v47 = vadd.f32 %v6136_v53, %v8643_v21  ;;  %v8703_v60 = vadd.f32 %v6215_v50, %v6214_v7 }
 0x1c6   :  { %v8706_v35 = vadd.f32 %v8556_v45, %v3008_v47  ;;  %v6137_v12 = vpop.f32.mrb[84].mxu0 }
 0x1c7   :  { %v6138_v4 = vpop.f32.mrb[85].mxu0 }
 0x1c8   :  { %v6217_v5 = vpop.f32.mrb[100].mxu1  ;;  %v6139_v22 = vadd.f32 %v6138_v4, %v6137_v12  ;;  %v6140_v3 = vpop.f32.mrb[86].mxu0 }
 0x1c9   :  { %v6218_v49 = vpop.f32.mrb[101].mxu1  ;;  %v6141_v52 = vpop.f32.mrb[87].mxu0 }
 0x1ca   :  { %v3013_v39 = vadd.f32 %v6139_v22, %v8649_v63  ;;  %v8709_v46 = vadd.f32 %v6218_v49, %v6217_v5  ;;  %v6220_v36 = vpop.f32.mrb[102].mxu1  ;;  %v6142_v34 = vadd.f32 %v6141_v52, %v6140_v3 }
 0x1cb   :  { %v6221_v59 = vpop.f32.mrb[103].mxu1 }
 0x1cc   :  { %v8712_v21 = vadd.f32 %v8571_v0, %v3013_v39  ;;  %v3016_v45 = vadd.f32 %v6142_v34, %v8654_v9  ;;  %v8715_v20 = vadd.f32 %v6221_v59, %v6220_v36 }
 0x1ce   :  { %v8718_v41 = vadd.f32 %v8578_v33, %v3016_v45  ;;  %v6143_v13 = vpop.f32.mrb[88].mxu0 }
 0x1cf   :  { %v6144_v19 = vpop.f32.mrb[89].mxu0 }
 0x1d0   :  { %v6223_v37 = vpop.f32.mrb[104].mxu1  ;;  %v6145_v31 = vadd.f32 %v6144_v19, %v6143_v13  ;;  %v6146_v63 = vpop.f32.mrb[90].mxu0 }
 0x1d1   :  { %v6224_v18 = vpop.f32.mrb[105].mxu1  ;;  %v6147_v43 = vpop.f32.mrb[91].mxu0 }
 0x1d2   :  { %v3021_v58 = vadd.f32 %v6145_v31, %v8659_v44  ;;  %v8721_v8 = vadd.f32 %v6224_v18, %v6223_v37  ;;  %v6226_v0 = vpop.f32.mrb[106].mxu1  ;;  %v6148_v16 = vadd.f32 %v6147_v43, %v6146_v63 }
 0x1d3   :  { %v6227_v23 = vpop.f32.mrb[107].mxu1 }
 0x1d4   :  { %v8724_v9 = vadd.f32 %v8593_v17, %v3021_v58  ;;  %v3024_v33 = vadd.f32 %v6148_v16, %v8664_v51  ;;  %v8727_v38 = vadd.f32 %v6227_v23, %v6226_v0 }
 0x1d6   :  { %v8730_v25 = vadd.f32 %v8599_v1, %v3024_v33  ;;  %v6149_v7 = vpop.f32.mrb[92].mxu0 }
 0x1d7   :  { %v6150_v53 = vpop.f32.mrb[93].mxu0 }
 0x1d8   :  { %v6229_v50 = vpop.f32.mrb[108].mxu1  ;;  %v6151_v47 = vadd.f32 %v6150_v53, %v6149_v7  ;;  %v6152_v44 = vpop.f32.mrb[94].mxu0 }
 0x1d9   :  { %v6230_v12 = vpop.f32.mrb[109].mxu1  ;;  %v6153_v4 = vpop.f32.mrb[95].mxu0 }
 0x1da   :  { %v3029_v5 = vadd.f32 %v6151_v47, %v8669_v61  ;;  %v8733_v22 = vadd.f32 %v6230_v12, %v6229_v50  ;;  %v6232_v17 = vpop.f32.mrb[110].mxu1  ;;  %v6154_v3 = vadd.f32 %v6153_v4, %v6152_v44 }
 0x1db   :  { %v6233_v49 = vpop.f32.mrb[111].mxu1 }
 0x1dc   :  { %v8736_v51 = vadd.f32 %v8613_v40, %v3029_v5  ;;  %v3032_v1 = vadd.f32 %v6154_v3, %v8674_v32  ;;  %v8739_v52 = vadd.f32 %v6233_v49, %v6232_v17 }
 0x1de   :  { %v8742_v39 = vadd.f32 %v8619_v14, %v3032_v1  ;;  %v6155_v36 = vpop.f32.mrb[96].mxu0 }
 0x1df   :  { %v6156_v34 = vpop.f32.mrb[97].mxu0 }
 0x1e0   :  { %v6235_v59 = vpop.f32.mrb[112].mxu1  ;;  %v6157_v45 = vadd.f32 %v6156_v34, %v6155_v36  ;;  %v6158_v61 = vpop.f32.mrb[98].mxu0 }
 0x1e1   :  { %v6236_v13 = vpop.f32.mrb[113].mxu1  ;;  %v6159_v19 = vpop.f32.mrb[99].mxu0 }
 0x1e2   :  { %v3037_v37 = vadd.f32 %v6157_v45, %v8678_v15  ;;  %v8745_v31 = vadd.f32 %v6236_v13, %v6235_v59  ;;  %v6238_v40 = vpop.f32.mrb[114].mxu1  ;;  %v6160_v63 = vadd.f32 %v6159_v19, %v6158_v61 }
 0x1e3   :  { %v6239_v18 = vpop.f32.mrb[115].mxu1 }
 0x1e4   :  { %v3040_v32 = vadd.f32 %v6160_v63, %v8681_v28  ;;  %v8748_v43 = vadd.f32 %v6239_v18, %v6238_v40  ;;  %v8751_v14 = vadd.f32 %v8635_v54, %v3037_v37 }
 0x1e6   :  { %v6161_v58 = vpop.f32.mrb[100].mxu0  ;;  %v8754_v0 = vadd.f32 %v8641_v55, %v3040_v32 }
 0x1e7   :  { %v6162_v16 = vpop.f32.mrb[101].mxu0 }
 0x1e8   :  { %v6241_v23 = vpop.f32.mrb[116].mxu1  ;;  %v6163_v33 = vadd.f32 %v6162_v16, %v6161_v58  ;;  %v6164_v15 = vpop.f32.mrb[102].mxu0 }
 0x1e9   :  { %v6242_v7 = vpop.f32.mrb[117].mxu1  ;;  %v6165_v53 = vpop.f32.mrb[103].mxu0 }
 0x1ea   :  { %v3045_v50 = vadd.f32 %v6163_v33, %v8684_v56  ;;  %v8757_v47 = vadd.f32 %v6242_v7, %v6241_v23  ;;  %v6244_v28 = vpop.f32.mrb[118].mxu1  ;;  %v6166_v44 = vadd.f32 %v6165_v53, %v6164_v15 }
 0x1eb   :  { %v6245_v12 = vpop.f32.mrb[119].mxu1 }
 0x1ec   :  { %v3048_v54 = vadd.f32 %v6166_v44, %v8686_v6  ;;  %v8760_v4 = vadd.f32 %v6245_v12, %v6244_v28  ;;  %v8763_v55 = vadd.f32 %v8647_v26, %v3045_v50 }
 0x1ee   :  { %v6167_v5 = vpop.f32.mrb[104].mxu0  ;;  %v8766_v17 = vadd.f32 %v8652_v30, %v3048_v54 }
 0x1ef   :  { %v6168_v3 = vpop.f32.mrb[105].mxu0 }
 0x1f0   :  { %v6247_v49 = vpop.f32.mrb[120].mxu1  ;;  %v6169_v1 = vadd.f32 %v6168_v3, %v6167_v5  ;;  %v6170_v56 = vpop.f32.mrb[106].mxu0 }
 0x1f1   :  { %v6248_v36 = vpop.f32.mrb[121].mxu1  ;;  %v6171_v34 = vpop.f32.mrb[107].mxu0 }
 0x1f2   :  { %v3053_v59 = vadd.f32 %v6169_v1, %v8688_v42  ;;  %v8769_v45 = vadd.f32 %v6248_v36, %v6247_v49  ;;  %v6250_v6 = vpop.f32.mrb[122].mxu1  ;;  %v6172_v61 = vadd.f32 %v6171_v34, %v6170_v56 }
 0x1f3   :  { %v6251_v13 = vpop.f32.mrb[123].mxu1 }
 0x1f4   :  { %v3056_v26 = vadd.f32 %v6172_v61, %v8690_v11  ;;  %v8772_v19 = vadd.f32 %v6251_v13, %v6250_v6  ;;  %v8775_v30 = vadd.f32 %v8657_v2, %v3053_v59 }
 0x1f6   :  { %v6173_v37 = vpop.f32.mrb[108].mxu0  ;;  %v8778_v40 = vadd.f32 %v8662_v29, %v3056_v26 }
 0x1f7   :  { %v6174_v63 = vpop.f32.mrb[109].mxu0 }
 0x1f8   :  { %v6253_v18 = vpop.f32.mrb[124].mxu1  ;;  %v6175_v32 = vadd.f32 %v6174_v63, %v6173_v37  ;;  %v6176_v42 = vpop.f32.mrb[110].mxu0 }
 0x1f9   :  { %v6254_v58 = vpop.f32.mrb[125].mxu1  ;;  %v6177_v16 = vpop.f32.mrb[111].mxu0 }
 0x1fa   :  { %v3061_v23 = vadd.f32 %v6175_v32, %v8692_v62  ;;  %v8781_v33 = vadd.f32 %v6254_v58, %v6253_v18  ;;  %v6256_v11 = vpop.f32.mrb[126].mxu1  ;;  %v6178_v15 = vadd.f32 %v6177_v16, %v6176_v42 }
 0x1fb   :  { %v6257_v7 = vpop.f32.mrb[127].mxu1 }
 0x1fc   :  { %v8784_v2 = vadd.f32 %v8667_v48, %v3061_v23  ;;  %v3064_v53 = vadd.f32 %v6178_v15, %v8694_v24  ;;  %v8787_v29 = vadd.f32 %v6257_v7, %v6256_v11 }
 0x1fe   :  { %v8790_v50 = vadd.f32 %v8672_v27, %v3064_v53 }
 0x200   :  { %v6275_v28 = vpop.f32.mrb[128].mxu1 }
 0x201   :  { %v6276_v44 = vpop.f32.mrb[129].mxu1 }
 0x202   :  { %v6277_v12 = vadd.f32 %v6276_v44, %v6275_v28  ;;  %v6278_v54 = vpop.f32.mrb[130].mxu1 }
 0x203   :  { %v6279_v62 = vpop.f32.mrb[131].mxu1 }
 0x204   :  { %v3890_v5 = vadd.f32 %v6277_v12, %v8697_v57  ;;  %v6280_v3 = vadd.f32 %v6279_v62, %v6278_v54 }
 0x206   :  { %v3893_v49 = vadd.f32 %v6280_v3, %v8703_v60  ;;  %v8795_v48 = vadd.f32 %v8700_v10, %v3890_v5 }
 0x208   :  { %v6281_v1 = vpop.f32.mrb[132].mxu1  ;;  %v8798_v24 = vadd.f32 %v8706_v35, %v3893_v49 }
 0x209   :  { %v6282_v56 = vpop.f32.mrb[133].mxu1 }
 0x20a   :  { %v6283_v27 = vadd.f32 %v6282_v56, %v6281_v1  ;;  %v6284_v36 = vpop.f32.mrb[134].mxu1 }
 0x20b   :  { %v6285_v34 = vpop.f32.mrb[135].mxu1 }
 0x20c   :  { %v3898_v59 = vadd.f32 %v6283_v27, %v8709_v46  ;;  %v6286_v6 = vadd.f32 %v6285_v34, %v6284_v36 }
 0x20e   :  { %v3901_v61 = vadd.f32 %v6286_v6, %v8715_v20  ;;  %v8803_v57 = vadd.f32 %v8712_v21, %v3898_v59 }
 0x210   :  { %v6287_v60 = vpop.f32.mrb[136].mxu1  ;;  %v8806_v10 = vadd.f32 %v8718_v41, %v3901_v61 }
 0x211   :  { %v6288_v13 = vpop.f32.mrb[137].mxu1 }
 0x212   :  { %v6289_v26 = vadd.f32 %v6288_v13, %v6287_v60  ;;  %v6290_v35 = vpop.f32.mrb[138].mxu1 }
 0x213   :  { %v6291_v37 = vpop.f32.mrb[139].mxu1 }
 0x214   :  { %v3906_v63 = vadd.f32 %v6289_v26, %v8721_v8  ;;  %v6292_v18 = vadd.f32 %v6291_v37, %v6290_v35 }
 0x216   :  { %v3909_v32 = vadd.f32 %v6292_v18, %v8727_v38  ;;  %v8811_v46 = vadd.f32 %v8724_v9, %v3906_v63 }
 0x218   :  { %v6293_v20 = vpop.f32.mrb[140].mxu1  ;;  %v8814_v21 = vadd.f32 %v8730_v25, %v3909_v32 }
 0x219   :  { %v6294_v42 = vpop.f32.mrb[141].mxu1 }
 0x21a   :  { %v6295_v58 = vadd.f32 %v6294_v42, %v6293_v20  ;;  %v6296_v41 = vpop.f32.mrb[142].mxu1 }
 0x21b   :  { %v6297_v16 = vpop.f32.mrb[143].mxu1 }
 0x21c   :  { %v3914_v23 = vadd.f32 %v6295_v58, %v8733_v22  ;;  %v6298_v11 = vadd.f32 %v6297_v16, %v6296_v41 }
 0x21e   :  { %v3917_v15 = vadd.f32 %v6298_v11, %v8739_v52  ;;  %v8819_v8 = vadd.f32 %v8736_v51, %v3914_v23 }
 0x220   :  { %v6299_v38 = vpop.f32.mrb[144].mxu1  ;;  %v8822_v9 = vadd.f32 %v8742_v39, %v3917_v15 }
 0x221   :  { %v6300_v7 = vpop.f32.mrb[145].mxu1 }
 0x222   :  { %v6301_v53 = vadd.f32 %v6300_v7, %v6299_v38  ;;  %v6302_v25 = vpop.f32.mrb[146].mxu1 }
 0x223   :  { %v6303_v28 = vpop.f32.mrb[147].mxu1 }
 0x224   :  { %v3922_v44 = vadd.f32 %v6301_v53, %v8745_v31  ;;  %v6304_v12 = vadd.f32 %v6303_v28, %v6302_v25 }
 0x226   :  { %v3925_v54 = vadd.f32 %v6304_v12, %v8748_v43  ;;  %v6717_v22 = vadd.f32 %v8751_v14, %v3922_v44 }
 0x228   :  { %v6305_v62 = vpop.f32.mrb[148].mxu1  ;;  %v6731_v52 = vadd.f32 %v8754_v0, %v3925_v54 }
 0x229   :  { %v6306_v51 = vpop.f32.mrb[149].mxu1 }
 0x22a   :  { %v6307_v5 = vadd.f32 %v6306_v51, %v6305_v62  ;;  %v6308_v3 = vpop.f32.mrb[150].mxu1 }
 0x22b   :  { %v6309_v49 = vpop.f32.mrb[151].mxu1 }
 0x22c   :  { %v3930_v39 = vadd.f32 %v6307_v5, %v8757_v47  ;;  %v6310_v1 = vadd.f32 %v6309_v49, %v6308_v3 }
 0x22e   :  { %v3933_v56 = vadd.f32 %v6310_v1, %v8760_v4  ;;  %v6605_v27 = vpop.f32.mrb[40].mxu0  ;;  %v6710_v31 = vadd.f32 %v8763_v55, %v3930_v39 }
 0x22f   :  { %v4018_v36 = vpop.f32.mrb[41].mxu0 }
 0x230   :  { %v6311_v34 = vpop.f32.mrb[152].mxu1  ;;  %v8831_v43 = vadd.f32 %v6710_v31, %v6605_v27  ;;  %v8833_v14 = vadd.f32 %v6717_v22, %v4018_v36  ;;  %v6606_v59 = vpop.f32.mrb[42].mxu0  ;;  %v6724_v0 = vadd.f32 %v8766_v17, %v3933_v56 }
 0x231   :  { %v6312_v6 = vpop.f32.mrb[153].mxu1  ;;  %v4021_v61 = vpop.f32.mrb[43].mxu0 }
 0x232   :  { %v6313_v60 = vadd.f32 %v6312_v6, %v6311_v34  ;;  %v6314_v13 = vpop.f32.mrb[154].mxu1  ;;  %v8836_v47 = vadd.f32 %v6724_v0, %v6606_v59  ;;  %v8838_v26 = vadd.f32 %v6731_v52, %v4021_v61 }
 0x233   :  { %v6315_v4 = vpop.f32.mrb[155].mxu1 }
 0x234   :  { %v3938_v55 = vadd.f32 %v6313_v60, %v8769_v45  ;;  %v6316_v35 = vadd.f32 %v6315_v4, %v6314_v13 }
 0x236   :  { %v3941_v37 = vadd.f32 %v6316_v35, %v8772_v19  ;;  %v6609_v63 = vpop.f32.mrb[44].mxu0  ;;  %v6745_v18 = vadd.f32 %v8775_v30, %v3938_v55 }
 0x237   :  { %v4034_v32 = vpop.f32.mrb[45].mxu0 }
 0x238   :  { %v6317_v20 = vpop.f32.mrb[156].mxu1  ;;  %v8843_v17 = vadd.f32 %v6745_v18, %v4034_v32  ;;  %v6610_v42 = vpop.f32.mrb[46].mxu0  ;;  %v6759_v58 = vadd.f32 %v8778_v40, %v3941_v37 }
 0x239   :  { %v6318_v41 = vpop.f32.mrb[157].mxu1  ;;  %v4037_v16 = vpop.f32.mrb[47].mxu0 }
 0x23a   :  { %v6319_v23 = vadd.f32 %v6318_v41, %v6317_v20  ;;  %v6320_v11 = vpop.f32.mrb[158].mxu1  ;;  %v8846_v15 = vadd.f32 %v6759_v58, %v4037_v16 }
 0x23b   :  { %v6321_v45 = vpop.f32.mrb[159].mxu1 }
 0x23c   :  { %v3946_v38 = vadd.f32 %v6319_v23, %v8781_v33  ;;  %v6322_v19 = vadd.f32 %v6321_v45, %v6320_v11 }
 0x23e   :  { %v6738_v7 = vadd.f32 %v8784_v2, %v3946_v38  ;;  %v3949_v30 = vadd.f32 %v6322_v19, %v8787_v29  ;;  %v6355_v53 = vpop.f32.mrb[112].mxu0 }
 0x23f   :  { %v6356_v25 = vpop.f32.mrb[113].mxu0 }
 0x240   :  { %v6752_v28 = vadd.f32 %v8790_v50, %v3949_v30  ;;  %v6419_v44 = vpop.f32.mrb[160].mxu1  ;;  %v6357_v40 = vadd.f32 %v6356_v25, %v6355_v53  ;;  %v6358_v12 = vpop.f32.mrb[114].mxu0  ;;  %v8852_v54 = vadd.f32 %v6738_v7, %v6609_v63 }
 0x241   :  { %v6420_v22 = vpop.f32.mrb[161].mxu1  ;;  %v6359_v62 = vpop.f32.mrb[115].mxu0 }
 0x242   :  { %v6421_v52 = vadd.f32 %v6420_v22, %v6419_v44  ;;  %v6422_v51 = vpop.f32.mrb[162].mxu1  ;;  %v6360_v5 = vadd.f32 %v6359_v62, %v6358_v12  ;;  %v8854_v33 = vadd.f32 %v6752_v28, %v6610_v42 }
 0x243   :  { %v6423_v3 = vpop.f32.mrb[163].mxu1 }
 0x244   :  { %v4775_v2 = vadd.f32 %v6421_v52, %v6357_v40  ;;  %v6424_v49 = vadd.f32 %v6423_v3, %v6422_v51 }
 0x246   :  { %v4778_v29 = vadd.f32 %v6424_v49, %v6360_v5  ;;  %v6361_v39 = vpop.f32.mrb[116].mxu0  ;;  %v8857_v1 = vadd.f32 %v8795_v48, %v4775_v2 }
 0x247   :  { %v6362_v50 = vpop.f32.mrb[117].mxu0 }
 0x248   :  { %v6425_v56 = vpop.f32.mrb[164].mxu1  ;;  %v6363_v27 = vadd.f32 %v6362_v50, %v6361_v39  ;;  %v6364_v31 = vpop.f32.mrb[118].mxu0  ;;  %v8860_v36 = vadd.f32 %v8798_v24, %v4778_v29 }
 0x249   :  { %v6426_v34 = vpop.f32.mrb[165].mxu1  ;;  %v6365_v59 = vpop.f32.mrb[119].mxu0 }
 0x24a   :  { %v6427_v0 = vadd.f32 %v6426_v34, %v6425_v56  ;;  %v6428_v6 = vpop.f32.mrb[166].mxu1  ;;  %v6366_v61 = vadd.f32 %v6365_v59, %v6364_v31 }
 0x24b   :  { %v6429_v60 = vpop.f32.mrb[167].mxu1 }
 0x24c   :  { %v4783_v13 = vadd.f32 %v6427_v0, %v6363_v27  ;;  %v6430_v4 = vadd.f32 %v6429_v60, %v6428_v6 }
 0x24e   :  { %v4786_v55 = vadd.f32 %v6430_v4, %v6366_v61  ;;  %v6367_v35 = vpop.f32.mrb[120].mxu0  ;;  %v8863_v48 = vadd.f32 %v8803_v57, %v4783_v13 }
 0x24f   :  { %v6368_v37 = vpop.f32.mrb[121].mxu0 }
 0x250   :  { %v6431_v63 = vpop.f32.mrb[168].mxu1  ;;  %v6369_v18 = vadd.f32 %v6368_v37, %v6367_v35  ;;  %v6370_v32 = vpop.f32.mrb[122].mxu0  ;;  %v8866_v24 = vadd.f32 %v8806_v10, %v4786_v55 }
 0x251   :  { %v6432_v20 = vpop.f32.mrb[169].mxu1  ;;  %v6371_v42 = vpop.f32.mrb[123].mxu0 }
 0x252   :  { %v6433_v58 = vadd.f32 %v6432_v20, %v6431_v63  ;;  %v6434_v41 = vpop.f32.mrb[170].mxu1  ;;  %v6372_v16 = vadd.f32 %v6371_v42, %v6370_v32 }
 0x253   :  { %v6435_v23 = vpop.f32.mrb[171].mxu1 }
 0x254   :  { %v4791_v11 = vadd.f32 %v6433_v58, %v6369_v18  ;;  %v6436_v45 = vadd.f32 %v6435_v23, %v6434_v41 }
 0x256   :  { %v4794_v38 = vadd.f32 %v6436_v45, %v6372_v16  ;;  %v6373_v19 = vpop.f32.mrb[124].mxu0  ;;  %v8869_v57 = vadd.f32 %v8811_v46, %v4791_v11 }
 0x257   :  { %v6374_v7 = vpop.f32.mrb[125].mxu0 }
 0x258   :  { %v6437_v30 = vpop.f32.mrb[172].mxu1  ;;  %v6375_v53 = vadd.f32 %v6374_v7, %v6373_v19  ;;  %v6376_v25 = vpop.f32.mrb[126].mxu0  ;;  %v8872_v10 = vadd.f32 %v8814_v21, %v4794_v38 }
 0x259   :  { %v6438_v28 = vpop.f32.mrb[173].mxu1  ;;  %v6377_v44 = vpop.f32.mrb[127].mxu0 }
 0x25a   :  { %v6439_v40 = vadd.f32 %v6438_v28, %v6437_v30  ;;  %v6440_v12 = vpop.f32.mrb[174].mxu1  ;;  %v6378_v22 = vadd.f32 %v6377_v44, %v6376_v25 }
 0x25b   :  { %v6441_v62 = vpop.f32.mrb[175].mxu1 }
 0x25c   :  { %v4799_v52 = vadd.f32 %v6439_v40, %v6375_v53  ;;  %v6442_v51 = vadd.f32 %v6441_v62, %v6440_v12 }
 0x25e   :  { %v4802_v5 = vadd.f32 %v6442_v51, %v6378_v22  ;;  %v6379_v3 = vpop.f32.mrb[128].mxu0  ;;  %v8875_v46 = vadd.f32 %v8819_v8, %v4799_v52 }
 0x25f   :  { %v6380_v2 = vpop.f32.mrb[129].mxu0 }
 0x260   :  { %v6443_v49 = vpop.f32.mrb[176].mxu1  ;;  %v6381_v29 = vadd.f32 %v6380_v2, %v6379_v3  ;;  %v6382_v39 = vpop.f32.mrb[130].mxu0  ;;  %v8878_v21 = vadd.f32 %v8822_v9, %v4802_v5 }
 0x261   :  { %v6444_v50 = vpop.f32.mrb[177].mxu1  ;;  %v6383_v56 = vpop.f32.mrb[131].mxu0 }
 0x262   :  { %v6445_v27 = vadd.f32 %v6444_v50, %v6443_v49  ;;  %v6446_v31 = vpop.f32.mrb[178].mxu1  ;;  %v6384_v34 = vadd.f32 %v6383_v56, %v6382_v39 }
 0x263   :  { %v6447_v59 = vpop.f32.mrb[179].mxu1 }
 0x264   :  { %v4807_v0 = vadd.f32 %v6445_v27, %v6381_v29  ;;  %v6448_v6 = vadd.f32 %v6447_v59, %v6446_v31 }
 0x266   :  { %v4810_v61 = vadd.f32 %v6448_v6, %v6384_v34  ;;  %v6385_v60 = vpop.f32.mrb[132].mxu0  ;;  %v8881_v8 = vadd.f32 %v8833_v14, %v4807_v0 }
 0x267   :  { %v6386_v13 = vpop.f32.mrb[133].mxu0 }
 0x268   :  { %v6449_v4 = vpop.f32.mrb[180].mxu1  ;;  %v6387_v55 = vadd.f32 %v6386_v13, %v6385_v60  ;;  %v6388_v35 = vpop.f32.mrb[134].mxu0  ;;  %v8884_v9 = vadd.f32 %v8838_v26, %v4810_v61 }
 0x269   :  { %v6450_v37 = vpop.f32.mrb[181].mxu1  ;;  %v6389_v63 = vpop.f32.mrb[135].mxu0 }
 0x26a   :  { %v6451_v18 = vadd.f32 %v6450_v37, %v6449_v4  ;;  %v6452_v32 = vpop.f32.mrb[182].mxu1  ;;  %v6390_v20 = vadd.f32 %v6389_v63, %v6388_v35 }
 0x26b   :  { %v6453_v42 = vpop.f32.mrb[183].mxu1 }
 0x26c   :  { %v4815_v58 = vadd.f32 %v6451_v18, %v6387_v55  ;;  %v6454_v41 = vadd.f32 %v6453_v42, %v6452_v32 }
 0x26e   :  { %v4818_v16 = vadd.f32 %v6454_v41, %v6390_v20  ;;  %v6391_v23 = vpop.f32.mrb[136].mxu0  ;;  %v6712_v14 = vadd.f32 %v8831_v43, %v4815_v58 }
 0x26f   :  { %v6392_v11 = vpop.f32.mrb[137].mxu0 }
 0x270   :  { %v6455_v45 = vpop.f32.mrb[184].mxu1  ;;  %v6393_v38 = vadd.f32 %v6392_v11, %v6391_v23  ;;  %v6394_v19 = vpop.f32.mrb[138].mxu0  ;;  %v6726_v7 = vadd.f32 %v8836_v47, %v4818_v16 }
 0x271   :  { %v6456_v26 = vpop.f32.mrb[185].mxu1  ;;  %v6395_v30 = vpop.f32.mrb[139].mxu0 }
 0x272   :  { %v6457_v53 = vadd.f32 %v6456_v26, %v6455_v45  ;;  %v6458_v25 = vpop.f32.mrb[186].mxu1  ;;  %v6396_v28 = vadd.f32 %v6395_v30, %v6394_v19 }
 0x273   :  { %v6459_v44 = vpop.f32.mrb[187].mxu1 }
 0x274   :  { %v4823_v40 = vadd.f32 %v6457_v53, %v6393_v38  ;;  %v6460_v12 = vadd.f32 %v6459_v44, %v6458_v25 }
 0x276   :  { %v4826_v22 = vadd.f32 %v6460_v12, %v6396_v28  ;;  %v6397_v62 = vpop.f32.mrb[140].mxu0  ;;  %v8889_v52 = vadd.f32 %v8843_v17, %v4823_v40  ;;  %v8897_v17 = vld [vmem:[%s8995_s2] ss:$0 sm:$0xff] }
 0x277   :  { %v6398_v43 = vpop.f32.mrb[141].mxu0 }
 0x278   :  { %v6461_v51 = vpop.f32.mrb[188].mxu1  ;;  %v6399_v5 = vadd.f32 %v6398_v43, %v6397_v62  ;;  %v6400_v3 = vpop.f32.mrb[142].mxu0  ;;  %v8892_v2 = vadd.f32 %v8846_v15, %v4826_v22 }
 0x279   :  { %v6462_v47 = vpop.f32.mrb[189].mxu1  ;;  %v6401_v49 = vpop.f32.mrb[143].mxu0 }
 0x27a   :  { %v6463_v29 = vadd.f32 %v6462_v47, %v6461_v51  ;;  %v6464_v39 = vpop.f32.mrb[190].mxu1  ;;  %v6402_v50 = vadd.f32 %v6401_v49, %v6400_v3 }
 0x27b   :  { %v6465_v56 = vpop.f32.mrb[191].mxu1 }
 0x27c   :  { %v4831_v27 = vadd.f32 %v6463_v29, %v6399_v5  ;;  %v6466_v31 = vadd.f32 %v6465_v56, %v6464_v39 }
 0x27e   :  { %v4834_v34 = vadd.f32 %v6466_v31, %v6402_v50  ;;  %v6629_v59 = vpop.f32.mrb[32].mxu0  ;;  %v6740_v0 = vadd.f32 %v8852_v54, %v4831_v27 }
 0x27f   :  { %v6664_v15 = vadd.f32 %v8863_v48, %v6629_v59  ;;  %v4871_v6 = vpop.f32.mrb[33].mxu0 }
 0x280   :  { %v6637_v61 = vpop.f32.mrb[192].mxu1  ;;  %v6670_v60 = vadd.f32 %v8857_v1, %v4871_v6  ;;  %v6630_v13 = vpop.f32.mrb[34].mxu0  ;;  %v6754_v4 = vadd.f32 %v8854_v33, %v4834_v34 }
 0x281   :  { %v4959_v55 = vadd.f32 %v6664_v15, %v8897_v17  ;;  %v6713_v35 = vadd.f32 %v6712_v14, %v6637_v61  ;;  %v4903_v37 = vpop.f32.mrb[193].mxu1  ;;  %v6676_v63 = vadd.f32 %v8866_v24, %v6630_v13  ;;  %v4874_v18 = vpop.f32.mrb[35].mxu0 }
 0x282   :  { %v4957_v32 = vadd.f32 %v6670_v60, %v8897_v17  ;;  %v6720_v54 = vadd.f32 %v8881_v8, %v4903_v37  ;;  %v6638_v48 = vpop.f32.mrb[194].mxu1  ;;  %v6682_v20 = vadd.f32 %v8860_v36, %v4874_v18 }
 0x283   :  { %v4975_v42 = vmax.f32 %v4959_v55, 0.0  ;;  %v4967_v1 = vadd.f32 %v6713_v35, %v8897_v17  ;;  %v4960_v33 = vadd.f32 %v6676_v63, %v8897_v17  ;;  %v6727_v58 = vadd.f32 %v6726_v7, %v6638_v48  ;;  %v4906_v41 = vpop.f32.mrb[195].mxu1 }
 0x284   :  { %v4973_v16 = vmax.f32 %v4957_v32, 0.0  ;;  %v4965_v23 = vadd.f32 %v6720_v54, %v8897_v17  ;;  %v4958_v24 = vadd.f32 %v6682_v20, %v8897_v17  ;;  %v6734_v14 = vadd.f32 %v8884_v9, %v4906_v41 }
 0x285   :  { %v4991_v11 = vpack.c.bf16 %v4975_v42, %v4975_v42  ;;  %v4983_v45 = vmax.f32 %v4967_v1, 0.0  ;;  %v4976_v8 = vmax.f32 %v4960_v33, 0.0  ;;  %v4968_v38 = vadd.f32 %v6727_v58, %v8897_v17 }
 0x286   :  { %v4989_v36 = vpack.c.bf16 %v4973_v16, %v4973_v16  ;;  %v4981_v19 = vmax.f32 %v4965_v23, 0.0  ;;  %v4974_v26 = vmax.f32 %v4958_v24, 0.0  ;;  %v4966_v30 = vadd.f32 %v6734_v14, %v8897_v17  ;;  %v6633_v53 = vpop.f32.mrb[36].mxu0 }
 0x287   :  { %5008 = vst.msk [vmem:[%s8996_s3 + $0x8] sm:$0xf] %vm5005_vm7, %v4991_v11  ;;  %v4999_v7 = vpack.c.bf16 %v4983_v45, %v4983_v45  ;;  %v4992_v25 = vpack.c.bf16 %v4976_v8, %v4976_v8  ;;  %v4984_v28 = vmax.f32 %v4968_v38, 0.0  ;;  %v6688_v9 = vadd.f32 %v8875_v46, %v6633_v53  ;;  %v4887_v44 = vpop.f32.mrb[37].mxu0 }
 0x288   :  { %5006 = vst.msk [vmem:[%s8996_s3] sm:$0xf] %vm5005_vm7, %v4989_v36  ;;  %v4997_v40 = vpack.c.bf16 %v4981_v19, %v4981_v19  ;;  %v4990_v12 = vpack.c.bf16 %v4974_v26, %v4974_v26  ;;  %v4982_v22 = vmax.f32 %v4966_v30, 0.0  ;;  %v6641_v62 = vpop.f32.mrb[196].mxu1  ;;  %v6694_v43 = vadd.f32 %v8869_v57, %v4887_v44  ;;  %v6634_v51 = vpop.f32.mrb[38].mxu0 }
 0x289   :  { %5016 = vst.msk [vmem:[%s8996_s3 + $0x28] sm:$0xf] %vm5005_vm7, %v4999_v7  ;;  %5009 = vst.msk [vmem:[%s8996_s3 + $0xc] sm:$0xf] %vm5005_vm7, %v4992_v25  ;;  %v5000_v46 = vpack.c.bf16 %v4984_v28, %v4984_v28  ;;  %v4963_v5 = vadd.f32 %v6688_v9, %v8897_v17  ;;  %v6741_v3 = vadd.f32 %v6740_v0, %v6641_v62  ;;  %v4919_v47 = vpop.f32.mrb[197].mxu1  ;;  %v4890_v29 = vpop.f32.mrb[39].mxu0 }
 0x28a   :  { %v6700_v49 = vadd.f32 %v8878_v21, %v6634_v51  ;;  %5014 = vst.msk [vmem:[%s8996_s3 + $0x20] sm:$0xf] %vm5005_vm7, %v4997_v40  ;;  %5007 = vst.msk [vmem:[%s8996_s3 + $0x4] sm:$0xf] %vm5005_vm7, %v4990_v12  ;;  %v4998_v57 = vpack.c.bf16 %v4982_v22, %v4982_v22  ;;  %v4961_v39 = vadd.f32 %v6694_v43, %v8897_v17  ;;  %v6642_v56 = vpop.f32.mrb[198].mxu1 }
 0x28b   :  { %v6748_v50 = vadd.f32 %v8889_v52, %v4919_v47  ;;  %v6706_v27 = vadd.f32 %v8872_v10, %v4890_v29  ;;  %5017 = vst.msk [vmem:[%s8996_s3 + $0x2c] sm:$0xf] %vm5005_vm7, %v5000_v46  ;;  %v4979_v21 = vmax.f32 %v4963_v5, 0.0  ;;  %v4971_v31 = vadd.f32 %v6741_v3, %v8897_v17  ;;  %v4922_v0 = vpop.f32.mrb[199].mxu1 }
 0x28c   :  { %v4964_v34 = vadd.f32 %v6700_v49, %v8897_v17  ;;  %v6755_v59 = vadd.f32 %v6754_v4, %v6642_v56  ;;  %5015 = vst.msk [vmem:[%s8996_s3 + $0x24] sm:$0xf] %vm5005_vm7, %v4998_v57  ;;  %v4977_v52 = vmax.f32 %v4961_v39, 0.0  ;;  %v6762_v6 = vadd.f32 %v8892_v2, %v4922_v0 }
 0x28d   :  { %v4969_v10 = vadd.f32 %v6748_v50, %v8897_v17  ;;  %v4962_v15 = vadd.f32 %v6706_v27, %v8897_v17  ;;  %v4995_v61 = vpack.c.bf16 %v4979_v21, %v4979_v21  ;;  %v4987_v60 = vmax.f32 %v4971_v31, 0.0 }
 0x28e   :  { %v4980_v13 = vmax.f32 %v4964_v34, 0.0  ;;  %v4972_v55 = vadd.f32 %v6755_v59, %v8897_v17  ;;  %v4993_v35 = vpack.c.bf16 %v4977_v52, %v4977_v52  ;;  %v4970_v63 = vadd.f32 %v6762_v6, %v8897_v17 }
 0x28f   :  { %v4985_v4 = vmax.f32 %v4969_v10, 0.0  ;;  %v4978_v37 = vmax.f32 %v4962_v15, 0.0  ;;  %5012 = vst.msk [vmem:[%s8996_s3 + $0x18] sm:$0xf] %vm5005_vm7, %v4995_v61  ;;  %v5003_v18 = vpack.c.bf16 %v4987_v60, %v4987_v60 }
 0x290   :  { %v4996_v32 = vpack.c.bf16 %v4980_v13, %v4980_v13  ;;  %v4988_v54 = vmax.f32 %v4972_v55, 0.0  ;;  %5010 = vst.msk [vmem:[%s8996_s3 + $0x10] sm:$0xf] %vm5005_vm7, %v4993_v35  ;;  %v4986_v20 = vmax.f32 %v4970_v63, 0.0 }
 0x291   :  { %v5001_v2 = vpack.c.bf16 %v4985_v4, %v4985_v4  ;;  %v4994_v48 = vpack.c.bf16 %v4978_v37, %v4978_v37  ;;  %5020 = vst.msk [vmem:[%s8996_s3 + $0x38] sm:$0xf] %vm5005_vm7, %v5003_v18 }
 0x292   :  { %5013 = vst.msk [vmem:[%s8996_s3 + $0x1c] sm:$0xf] %vm5005_vm7, %v4996_v32  ;;  %v5004_v17 = vpack.c.bf16 %v4988_v54, %v4988_v54  ;;  %v5002_v42 = vpack.c.bf16 %v4986_v20, %v4986_v20 }
 0x293   :  { %5018 = vst.msk [vmem:[%s8996_s3 + $0x30] sm:$0xf] %vm5005_vm7, %v5001_v2  ;;  %5011 = vst.msk [vmem:[%s8996_s3 + $0x14] sm:$0xf] %vm5005_vm7, %v4994_v48 }
 0x294   :  { %5021 = vst.msk [vmem:[%s8996_s3 + $0x3c] sm:$0xf] %vm5005_vm7, %v5004_v17  ;;  %5019 = vst.msk [vmem:[%s8996_s3 + $0x34] sm:$0xf] %vm5005_vm7, %v5002_v42 }

</bundles_post_ra>
